<compile_context>
chip_gen: v6e
topology: v6e:2x2x1
jax: 0.10.0
libtpu: 0.0.40
codegen_flags: <defaults>
</compile_context>

<pallas_src>
import jax
import jax.numpy as jnp
from jax.experimental import pallas as pl
from jax.experimental.pallas import tpu as pltpu


def _make_pmp_kernel(act_dtype):
    """Builds the 5-layer MLP kernel with elementwise math in `act_dtype`."""

    def kernel(xT_ref,
               w1_ref, b1_ref,
               w2_ref, b2_ref,
               w3_ref, b3_ref,
               w4_ref, b4_ref,
               w5_ref, b5_ref,
               outT_ref):
        # xT_ref:   (6, TILE_N)   bfloat16
        # wK_ref:   (out_K, in_K) bfloat16   (MXU-native operands)
        # bK_ref:   (out_K, 1)    act_dtype  (f32 for the final layer)
        # outT_ref: (3, TILE_N)   float32    (lane-dense store)
        h = xT_ref[...]                                     # (6, TILE_N) bf16

        def dense_silu(h_bf16, w_ref, b_ref):
            # bf16 operands, f32 MXU accumulation.
            z = jnp.dot(w_ref[...], h_bf16,
                        preferred_element_type=jnp.float32)
            # Bias add + activation in act_dtype; the (out,1) bias is a cheap
            # lane-broadcast against (out, TILE_N).
            za = z.astype(act_dtype) + b_ref[...]
            # Single-transcendental SiLU: z*sigmoid(z) = 0.5*z*(1 + tanh(z/2)).
            s = 0.5 * za * (1.0 + jnp.tanh(0.5 * za))
            return s.astype(jnp.bfloat16)                   # next MXU operand

        h = dense_silu(h, w1_ref, b1_ref)                   # (128, TILE_N)
        h = dense_silu(h, w2_ref, b2_ref)
        h = dense_silu(h, w3_ref, b3_ref)
        h = dense_silu(h, w4_ref, b4_ref)
        out = jnp.dot(w5_ref[...], h,
                      preferred_element_type=jnp.float32) + b5_ref[...]
        outT_ref[...] = out.astype(outT_ref.dtype)          # (3, TILE_N)

    return kernel


def _default_act_dtype():
    """bf16 elementwise on chips with bf16 VPU/EUP (v6e/v7x); f32 otherwise."""
    try:
        kind = jax.devices()[0].device_kind.lower()
    except Exception:
        return jnp.float32
    for old in ("v2", "v3", "v4", "v5"):
        if old in kind:
            return jnp.float32
    return jnp.bfloat16


def pmp_forward(x, params, *, tile_n=2048, act_dtype=None):
    """x: (N, 6) float32.  params: list of (w, b), w stored as (in, out)."""
    n, in_dim = x.shape
    out_dim = params[-1][0].shape[1]
    if act_dtype is None:
        act_dtype = _default_act_dtype()

    # Keep tiles large (amortize per-step overhead) but shrink for small
    # batches so padding stays bounded and there are >= 2 grid steps where the
    # batch allows it (both v7x TensorCores get work under "parallel").
    tile_n = int(min(tile_n, max(256, pl.next_power_of_2(pl.cdiv(n, 2)))))

    # Pad the batch up to a multiple of tile_n (padded rows sliced off below).
    n_pad = pl.cdiv(n, tile_n) * tile_n
    # Cast to bf16 BEFORE pad/transpose: the kernel consumes bf16 MXU operands
    # anyway, so this is numerically identical and halves x HBM traffic.
    x_bf16 = x.astype(jnp.bfloat16)
    if n_pad != n:
        x_bf16 = jnp.pad(x_bf16, ((0, n_pad - n), (0, 0)))
    xT = x_bf16.T                                           # (6, n_pad)
    # TODO(synk): the wrapper-side transposes of x / out could be folded into
    # the first/last dots (lax.dot_general contracting the 6-dim of a
    # (tile_n, 6) block); kept in the wrapper for lowering robustness since
    # they are cheap single bf16 passes.

    # Flat arg list (w1.T, b1, ..., w5.T, b5); weights bf16 (out, in), hidden
    # biases in act_dtype, final bias f32, all as whole-array VMEM blocks.
    # TODO(synk): constant-index weight blocks could use
    # pipeline_mode=pl.Buffered(1) to skip pointless double-buffering.
    weight_args, weight_specs = [], []
    n_layers = len(params)
    for li, (w, b) in enumerate(params):
        wT = w.T.astype(jnp.bfloat16)                       # (out, in)
        b_dt = jnp.float32 if li == n_layers - 1 else act_dtype
        b2d = b.reshape(-1, 1).astype(b_dt)                 # (out, 1)
        weight_args += [wT, b2d]
        weight_specs += [
            pl.BlockSpec(wT.shape, lambda i: (0, 0)),
            pl.BlockSpec(b2d.shape, lambda i: (0, 0)),
        ]

    grid = (n_pad // tile_n,)
    outT = pl.pallas_call(
        _make_pmp_kernel(act_dtype),
        out_shape=jax.ShapeDtypeStruct((out_dim, n_pad), jnp.float32),
        grid_spec=pltpu.PrefetchScalarGridSpec(
            num_scalar_prefetch=0,
            grid=grid,
            in_specs=[pl.BlockSpec((in_dim, tile_n), lambda i: (0, i))]
                     + weight_specs,
            out_specs=pl.BlockSpec((out_dim, tile_n), lambda i: (0, i)),
        ),
        compiler_params=pltpu.CompilerParams(
            dimension_semantics=("parallel",),
            vmem_limit_bytes=32 << 20),   # plenty; safe on v5e/v6e/v7x
    )(xT, *weight_args)

    return outT.T[:n]                                       # (N, 3)


def init_pmp_params(key,
                    units_layer1=128, units_layer2=128,
                    units_layer3=128, units_layer4=128):
    """Deterministic init matching nn.Linear shapes (w stored as (in, out))."""
    dims = [6, units_layer1, units_layer2, units_layer3, units_layer4, 3]
    params = []
    for i in range(len(dims) - 1):
        key, kw, kb = jax.random.split(key, 3)
        fan_in = dims[i]
        bound = 1.0 / jnp.sqrt(fan_in)
        w = jax.random.uniform(kw, (dims[i], dims[i + 1]),
                               minval=-bound, maxval=bound,
                               dtype=jnp.float32)
        b = jax.random.uniform(kb, (dims[i + 1],),
                               minval=-bound, maxval=bound,
                               dtype=jnp.float32)
        params.append((w, b))
    return params


def pmp_reference(x, params):
    """Pure-JAX f32 reference of the PyTorch forward."""
    h = x
    for (w, b) in params[:-1]:
        z = h @ w + b
        h = z * jax.nn.sigmoid(z)
    w, b = params[-1]
    return h @ w + b


if __name__ == "__main__":
    key = jax.random.PRNGKey(0)
    key, kx = jax.random.split(key)

    # Small synthetic batch of 6-dof joint-angle rows (stands in for the
    # 'IndhRobot_ur5.txt' data the original script would load).  N is not a
    # multiple of the tile to exercise padding; with the default tile it pads
    # to 4096 -> an even 2-step grid (both v7x TensorCores busy).
    N = 4000
    x = jax.random.normal(kx, (N, 6), dtype=jnp.float32)

    params = init_pmp_params(key)

    out = pmp_forward(x, params)
    out = jax.block_until_ready(out)

    ref = pmp_reference(x, params)
    assert out.shape == (N, 3), out.shape
    # bf16 MXU operands (+ bf16 elementwise on v6e/v7x) vs f32 reference.
    max_err = float(jnp.max(jnp.abs(out - ref)))
    assert jnp.allclose(out, ref, atol=5e-2, rtol=5e-2), max_err

    # TODO(synk): get_jacobian (autograd-based) is an analysis utility, not
    # part of the forward hot path; obtainable via jax.jacfwd on pmp_forward.
    print("KERNEL_OK")
</pallas_src>

<mosaic_0001>
module attributes {stable_mosaic.version = 11 : i64} {
  func.func @kernel(%arg0: i32, %arg1: memref<6x2048xbf16, #tpu.memory_space<vmem>>, %arg2: memref<128x6xbf16, #tpu.memory_space<vmem>>, %arg3: memref<128x1xbf16, #tpu.memory_space<vmem>>, %arg4: memref<128x128xbf16, #tpu.memory_space<vmem>>, %arg5: memref<128x1xbf16, #tpu.memory_space<vmem>>, %arg6: memref<128x128xbf16, #tpu.memory_space<vmem>>, %arg7: memref<128x1xbf16, #tpu.memory_space<vmem>>, %arg8: memref<128x128xbf16, #tpu.memory_space<vmem>>, %arg9: memref<128x1xbf16, #tpu.memory_space<vmem>>, %arg10: memref<3x128xbf16, #tpu.memory_space<vmem>>, %arg11: memref<3x1xf32, #tpu.memory_space<vmem>>, %arg12: memref<3x2048xf32, #tpu.memory_space<vmem>>) attributes {dimension_semantics = [#tpu.dimension_semantics<parallel>], iteration_bounds = array<i64: 2>, scalar_prefetch = 0 : i64, scratch_operands = 0 : i64, tpu.core_type = #tpu.core_type<tc>, window_params = [{transform_indices = @transform_0, window_bounds = array<i64: 6, 2048>}, {pipeline_mode = #tpu.pipeline_mode<synchronous>, transform_indices = @transform_1, window_bounds = array<i64: 128, 6>}, {pipeline_mode = #tpu.pipeline_mode<synchronous>, transform_indices = @transform_2, window_bounds = array<i64: 128, 1>}, {pipeline_mode = #tpu.pipeline_mode<synchronous>, transform_indices = @transform_3, window_bounds = array<i64: 128, 128>}, {pipeline_mode = #tpu.pipeline_mode<synchronous>, transform_indices = @transform_4, window_bounds = array<i64: 128, 1>}, {pipeline_mode = #tpu.pipeline_mode<synchronous>, transform_indices = @transform_5, window_bounds = array<i64: 128, 128>}, {pipeline_mode = #tpu.pipeline_mode<synchronous>, transform_indices = @transform_6, window_bounds = array<i64: 128, 1>}, {pipeline_mode = #tpu.pipeline_mode<synchronous>, transform_indices = @transform_7, window_bounds = array<i64: 128, 128>}, {pipeline_mode = #tpu.pipeline_mode<synchronous>, transform_indices = @transform_8, window_bounds = array<i64: 128, 1>}, {pipeline_mode = #tpu.pipeline_mode<synchronous>, transform_indices = @transform_9, window_bounds = array<i64: 3, 128>}, {pipeline_mode = #tpu.pipeline_mode<synchronous>, transform_indices = @transform_10, window_bounds = array<i64: 3, 1>}, {transform_indices = @transform_11, window_bounds = array<i64: 3, 2048>}]} {
    %c0 = arith.constant 0 : index
    %c0_0 = arith.constant 0 : index
    %0 = vector.load %arg1[%c0, %c0_0] : memref<6x2048xbf16, #tpu.memory_space<vmem>>, vector<6x2048xbf16>
    %c0_1 = arith.constant 0 : index
    %c0_2 = arith.constant 0 : index
    %1 = vector.load %arg2[%c0_1, %c0_2] : memref<128x6xbf16, #tpu.memory_space<vmem>>, vector<128x6xbf16>
    %cst = arith.constant dense<0.000000e+00> : vector<128x2048xf32>
    %2 = tpu.matmul %1, %0, %cst {dimension_numbers = #tpu.dot_dimension_numbers<[1], [0], [0], [1], [0, 0, 1, 1], [], []>} : vector<128x6xbf16>, vector<6x2048xbf16>, vector<128x2048xf32> -> vector<128x2048xf32>
    %3 = arith.truncf %2 : vector<128x2048xf32> to vector<128x2048xbf16>
    %c0_3 = arith.constant 0 : index
    %c0_4 = arith.constant 0 : index
    %4 = vector.load %arg3[%c0_3, %c0_4] : memref<128x1xbf16, #tpu.memory_space<vmem>>, vector<128x1xbf16>
    %5 = vector.broadcast %4 : vector<128x1xbf16> to vector<128x2048xbf16>
    %6 = arith.addf %3, %5 : vector<128x2048xbf16>
    %cst_5 = arith.constant 5.000000e-01 : bf16
    %7 = vector.broadcast %cst_5 : bf16 to vector<128x2048xbf16>
    %8 = arith.mulf %7, %6 : vector<128x2048xbf16>
    %cst_6 = arith.constant 5.000000e-01 : bf16
    %9 = vector.broadcast %cst_6 : bf16 to vector<128x2048xbf16>
    %10 = arith.mulf %9, %6 : vector<128x2048xbf16>
    %11 = math.tanh %10 : vector<128x2048xbf16>
    %cst_7 = arith.constant 1.000000e+00 : bf16
    %12 = vector.broadcast %cst_7 : bf16 to vector<128x2048xbf16>
    %13 = arith.addf %12, %11 : vector<128x2048xbf16>
    %14 = arith.mulf %8, %13 : vector<128x2048xbf16>
    %c0_8 = arith.constant 0 : index
    %c0_9 = arith.constant 0 : index
    %15 = vector.load %arg4[%c0_8, %c0_9] : memref<128x128xbf16, #tpu.memory_space<vmem>>, vector<128x128xbf16>
    %cst_10 = arith.constant dense<0.000000e+00> : vector<128x2048xf32>
    %16 = tpu.matmul %15, %14, %cst_10 {dimension_numbers = #tpu.dot_dimension_numbers<[1], [0], [0], [1], [0, 0, 1, 1], [], []>} : vector<128x128xbf16>, vector<128x2048xbf16>, vector<128x2048xf32> -> vector<128x2048xf32>
    %17 = arith.truncf %16 : vector<128x2048xf32> to vector<128x2048xbf16>
    %c0_11 = arith.constant 0 : index
    %c0_12 = arith.constant 0 : index
    %18 = vector.load %arg5[%c0_11, %c0_12] : memref<128x1xbf16, #tpu.memory_space<vmem>>, vector<128x1xbf16>
    %19 = vector.broadcast %18 : vector<128x1xbf16> to vector<128x2048xbf16>
    %20 = arith.addf %17, %19 : vector<128x2048xbf16>
    %cst_13 = arith.constant 5.000000e-01 : bf16
    %21 = vector.broadcast %cst_13 : bf16 to vector<128x2048xbf16>
    %22 = arith.mulf %21, %20 : vector<128x2048xbf16>
    %cst_14 = arith.constant 5.000000e-01 : bf16
    %23 = vector.broadcast %cst_14 : bf16 to vector<128x2048xbf16>
    %24 = arith.mulf %23, %20 : vector<128x2048xbf16>
    %25 = math.tanh %24 : vector<128x2048xbf16>
    %cst_15 = arith.constant 1.000000e+00 : bf16
    %26 = vector.broadcast %cst_15 : bf16 to vector<128x2048xbf16>
    %27 = arith.addf %26, %25 : vector<128x2048xbf16>
    %28 = arith.mulf %22, %27 : vector<128x2048xbf16>
    %c0_16 = arith.constant 0 : index
    %c0_17 = arith.constant 0 : index
    %29 = vector.load %arg6[%c0_16, %c0_17] : memref<128x128xbf16, #tpu.memory_space<vmem>>, vector<128x128xbf16>
    %cst_18 = arith.constant dense<0.000000e+00> : vector<128x2048xf32>
    %30 = tpu.matmul %29, %28, %cst_18 {dimension_numbers = #tpu.dot_dimension_numbers<[1], [0], [0], [1], [0, 0, 1, 1], [], []>} : vector<128x128xbf16>, vector<128x2048xbf16>, vector<128x2048xf32> -> vector<128x2048xf32>
    %31 = arith.truncf %30 : vector<128x2048xf32> to vector<128x2048xbf16>
    %c0_19 = arith.constant 0 : index
    %c0_20 = arith.constant 0 : index
    %32 = vector.load %arg7[%c0_19, %c0_20] : memref<128x1xbf16, #tpu.memory_space<vmem>>, vector<128x1xbf16>
    %33 = vector.broadcast %32 : vector<128x1xbf16> to vector<128x2048xbf16>
    %34 = arith.addf %31, %33 : vector<128x2048xbf16>
    %cst_21 = arith.constant 5.000000e-01 : bf16
    %35 = vector.broadcast %cst_21 : bf16 to vector<128x2048xbf16>
    %36 = arith.mulf %35, %34 : vector<128x2048xbf16>
    %cst_22 = arith.constant 5.000000e-01 : bf16
    %37 = vector.broadcast %cst_22 : bf16 to vector<128x2048xbf16>
    %38 = arith.mulf %37, %34 : vector<128x2048xbf16>
    %39 = math.tanh %38 : vector<128x2048xbf16>
    %cst_23 = arith.constant 1.000000e+00 : bf16
    %40 = vector.broadcast %cst_23 : bf16 to vector<128x2048xbf16>
    %41 = arith.addf %40, %39 : vector<128x2048xbf16>
    %42 = arith.mulf %36, %41 : vector<128x2048xbf16>
    %c0_24 = arith.constant 0 : index
    %c0_25 = arith.constant 0 : index
    %43 = vector.load %arg8[%c0_24, %c0_25] : memref<128x128xbf16, #tpu.memory_space<vmem>>, vector<128x128xbf16>
    %cst_26 = arith.constant dense<0.000000e+00> : vector<128x2048xf32>
    %44 = tpu.matmul %43, %42, %cst_26 {dimension_numbers = #tpu.dot_dimension_numbers<[1], [0], [0], [1], [0, 0, 1, 1], [], []>} : vector<128x128xbf16>, vector<128x2048xbf16>, vector<128x2048xf32> -> vector<128x2048xf32>
    %45 = arith.truncf %44 : vector<128x2048xf32> to vector<128x2048xbf16>
    %c0_27 = arith.constant 0 : index
    %c0_28 = arith.constant 0 : index
    %46 = vector.load %arg9[%c0_27, %c0_28] : memref<128x1xbf16, #tpu.memory_space<vmem>>, vector<128x1xbf16>
    %47 = vector.broadcast %46 : vector<128x1xbf16> to vector<128x2048xbf16>
    %48 = arith.addf %45, %47 : vector<128x2048xbf16>
    %cst_29 = arith.constant 5.000000e-01 : bf16
    %49 = vector.broadcast %cst_29 : bf16 to vector<128x2048xbf16>
    %50 = arith.mulf %49, %48 : vector<128x2048xbf16>
    %cst_30 = arith.constant 5.000000e-01 : bf16
    %51 = vector.broadcast %cst_30 : bf16 to vector<128x2048xbf16>
    %52 = arith.mulf %51, %48 : vector<128x2048xbf16>
    %53 = math.tanh %52 : vector<128x2048xbf16>
    %cst_31 = arith.constant 1.000000e+00 : bf16
    %54 = vector.broadcast %cst_31 : bf16 to vector<128x2048xbf16>
    %55 = arith.addf %54, %53 : vector<128x2048xbf16>
    %56 = arith.mulf %50, %55 : vector<128x2048xbf16>
    %c0_32 = arith.constant 0 : index
    %c0_33 = arith.constant 0 : index
    %57 = vector.load %arg10[%c0_32, %c0_33] : memref<3x128xbf16, #tpu.memory_space<vmem>>, vector<3x128xbf16>
    %cst_34 = arith.constant dense<0.000000e+00> : vector<3x2048xf32>
    %58 = tpu.matmul %57, %56, %cst_34 {dimension_numbers = #tpu.dot_dimension_numbers<[1], [0], [0], [1], [0, 0, 1, 1], [], []>} : vector<3x128xbf16>, vector<128x2048xbf16>, vector<3x2048xf32> -> vector<3x2048xf32>
    %c0_35 = arith.constant 0 : index
    %c0_36 = arith.constant 0 : index
    %59 = vector.load %arg11[%c0_35, %c0_36] : memref<3x1xf32, #tpu.memory_space<vmem>>, vector<3x1xf32>
    %60 = vector.broadcast %59 : vector<3x1xf32> to vector<3x2048xf32>
    %61 = arith.addf %58, %60 : vector<3x2048xf32>
    %c0_37 = arith.constant 0 : index
    %c0_38 = arith.constant 0 : index
    %62 = vector.load %arg12[%c0_37, %c0_38] : memref<3x2048xf32, #tpu.memory_space<vmem>>, vector<3x2048xf32>
    tpu.vector_store %arg12[%c0_37, %c0_38], %61 {strides = array<i32>} : memref<3x2048xf32, #tpu.memory_space<vmem>>, vector<3x2048xf32>,
    return
  }
  func.func @transform_0(%arg0: i32) -> (i32, i32) {
    %c0_i32 = arith.constant 0 : i32
    %c0_i32_0 = arith.constant 0 : i32
    return %c0_i32, %arg0 : i32, i32
  }
  func.func @transform_1(%arg0: i32) -> (i32, i32) {
    %c0_i32 = arith.constant 0 : i32
    %c0_i32_0 = arith.constant 0 : i32
    %c0_i32_1 = arith.constant 0 : i32
    return %c0_i32, %c0_i32_0 : i32, i32
  }
  func.func @transform_2(%arg0: i32) -> (i32, i32) {
    %c0_i32 = arith.constant 0 : i32
    %c0_i32_0 = arith.constant 0 : i32
    %c0_i32_1 = arith.constant 0 : i32
    return %c0_i32, %c0_i32_0 : i32, i32
  }
  func.func @transform_3(%arg0: i32) -> (i32, i32) {
    %c0_i32 = arith.constant 0 : i32
    %c0_i32_0 = arith.constant 0 : i32
    %c0_i32_1 = arith.constant 0 : i32
    return %c0_i32, %c0_i32_0 : i32, i32
  }
  func.func @transform_4(%arg0: i32) -> (i32, i32) {
    %c0_i32 = arith.constant 0 : i32
    %c0_i32_0 = arith.constant 0 : i32
    %c0_i32_1 = arith.constant 0 : i32
    return %c0_i32, %c0_i32_0 : i32, i32
  }
  func.func @transform_5(%arg0: i32) -> (i32, i32) {
    %c0_i32 = arith.constant 0 : i32
    %c0_i32_0 = arith.constant 0 : i32
    %c0_i32_1 = arith.constant 0 : i32
    return %c0_i32, %c0_i32_0 : i32, i32
  }
  func.func @transform_6(%arg0: i32) -> (i32, i32) {
    %c0_i32 = arith.constant 0 : i32
    %c0_i32_0 = arith.constant 0 : i32
    %c0_i32_1 = arith.constant 0 : i32
    return %c0_i32, %c0_i32_0 : i32, i32
  }
  func.func @transform_7(%arg0: i32) -> (i32, i32) {
    %c0_i32 = arith.constant 0 : i32
    %c0_i32_0 = arith.constant 0 : i32
    %c0_i32_1 = arith.constant 0 : i32
    return %c0_i32, %c0_i32_0 : i32, i32
  }
  func.func @transform_8(%arg0: i32) -> (i32, i32) {
    %c0_i32 = arith.constant 0 : i32
    %c0_i32_0 = arith.constant 0 : i32
    %c0_i32_1 = arith.constant 0 : i32
    return %c0_i32, %c0_i32_0 : i32, i32
  }
  func.func @transform_9(%arg0: i32) -> (i32, i32) {
    %c0_i32 = arith.constant 0 : i32
    %c0_i32_0 = arith.constant 0 : i32
    %c0_i32_1 = arith.constant 0 : i32
    return %c0_i32, %c0_i32_0 : i32, i32
  }
  func.func @transform_10(%arg0: i32) -> (i32, i32) {
    %c0_i32 = arith.constant 0 : i32
    %c0_i32_0 = arith.constant 0 : i32
    %c0_i32_1 = arith.constant 0 : i32
    return %c0_i32, %c0_i32_0 : i32, i32
  }
  func.func @transform_11(%arg0: i32) -> (i32, i32) {
    %c0_i32 = arith.constant 0 : i32
    %c0_i32_0 = arith.constant 0 : i32
    return %c0_i32, %arg0 : i32, i32
  }
}

</mosaic_0001>

<bundles_post_ra>
// kernel: tpu_custom_call.1
= control target key start
LH: loop header
LB: loop body
LE: loop exit
PB: predicated region body
PF: predicated region fallthrough
CT: control target
= control target key end

     0   :  { %16 = vsyncpa [#allocation3], 0  ;;  %s18928_s0 = inlined_call_operand.vmem [shape: bf16[6,4096], index: 0, kind: input, shape index: {}]   ;;  %s18929_s1 = inlined_call_operand.vmem [shape: bf16[128,6], index: 1, kind: input, shape index: {}]   ;;  %s18930_s2 = inlined_call_operand.vmem [shape: bf16[128,1], index: 2, kind: input, shape index: {}]   ;;  %s18931_s3 = inlined_call_operand.vmem [shape: bf16[128,128], index: 3, kind: input, shape index: {}]   ;;  %s18932_s4 = inlined_call_operand.vmem [shape: bf16[128,1], index: 4, kind: input, shape index: {}]   ;;  %s18933_s5 = inlined_call_operand.vmem [shape: bf16[128,128], index: 5, kind: input, shape index: {}]   ;;  %s18934_s6 = inlined_call_operand.vmem [shape: bf16[128,1], index: 6, kind: input, shape index: {}]   ;;  %s18935_s7 = inlined_call_operand.vmem [shape: bf16[128,128], index: 7, kind: input, shape index: {}]   ;;  %s18936_s8 = inlined_call_operand.vmem [shape: bf16[128,1], index: 8, kind: input, shape index: {}]   ;;  %s18937_s9 = inlined_call_operand.vmem [shape: bf16[3,128], index: 9, kind: input, shape index: {}]   ;;  %s18938_s10 = inlined_call_operand.vmem [shape: f32[3,1], index: 10, kind: input, shape index: {}]   ;;  %s18939_s11 = inlined_call_operand.hbm [shape: f32[3,4096], index: 11, kind: output, shape index: {}]  }
   0x1   :  { %18 = vsyncpa [#allocation3 + $0x1], 0  ;;  %s10352_s17 = smov 0   ;;  %s10354_s18 = smov 0  }
   0x2   :  { %s10356_s19 = smov 0   ;;  %s10358_s20 = smov 0  }
   0x3 LB: > { %s10373_s21 = sadd.s32 4294967295, %s10287_s20   ;;  %s8922_s22 = sadd.s32 4294967294, %s10287_s20   ;;  %s10287_s20 = sphi %s10358_s20, %s21045_s20   ;;  %s10283_s19 = sphi %s10356_s19, %s21044_s19   ;;  %s10279_s18 = sphi %s10354_s18, %s21043_s18   ;;  %s10275_s17 = sphi %s10352_s17, %s21042_s17  }
   0x4   : > { %s10377_s23 = sadd.s32 1, %s10287_s20   ;;  %s267_s24 = sadd.s32 1, %s10283_s19 }
   0x5   : > { %s264_s25 = ssub.s32 %s10287_s20, %s10377_s23  ;;  %p277_p0 = scmp.ne.s32.totalorder %s10283_s19, %s10279_s18 }
   0x6   : > { %p265_p1 = scmp.eq.s32.totalorder %s264_s25, 0  ;;  %p278_p2 = scmp.eq.s32.totalorder %s10373_s21, 1 }
   0x7   : > { %p283_p3 = scmp.ne.s32.totalorder %s10279_s18, %s10275_s17  ;;  %p284_p4 = scmp.eq.s32.totalorder %s8922_s22, 1 }
   0x8   : > { %s10388_s26 = scalar_select %p265_p1, %s10283_s19, %s267_s24  }
   0x9   : > { %p10390_p5 = por %p278_p2, %p277_p0  ;;  %p10394_p6 = por %p284_p4, %p283_p3 }
   0xa   : > { %19565 = sst [smem:[#allocation5_spill]] %s10388_s26  ;;  %p8925_p7 = scmp.ge.s32.totalorder %s10287_s20, 1 }
   0xb   : > { %p341_p8 = scmp.lt.s32.totalorder %s10287_s20, 3 }
   0xd   : > { %p342_p9 = pnand %p8925_p7, %p341_p8 }
   0xf   : > { %345 = sbr.rel (%p342_p9) target bundleno = 1719 (0x6b7), region = 64 }
  0x14   : > { %s8927_s29 = sshll.u32 %s10373_s21, 4  ;;  %v1615_v0 = vld [vmem:[%s18930_s2 + $0x38] sm:$0xf]  ;;  %v18944_v1 = vmov 0   ;;  %v1613_v2 = vld [vmem:[%s18930_s2 + $0x30] sm:$0xf] }
  0x15   : > { %9128 = vset.pattern.permute.xlu0 %v18944_v1  ;;  %p382_p10 = scmp.lt.s32.totalorder %s8927_s29, 31  ;;  %601 = vmatprep.mubr.bf16.mxu0 %v18944_v1  ;;  %v1616_v3 = vld [vmem:[%s18930_s2 + $0x3c] sm:$0xf]  ;;  %v1614_v4 = vld [vmem:[%s18930_s2 + $0x34] sm:$0xf]  ;;  %vm520_vm0 = vcmask 1042432  }
  0x16   : > { %1787 = vperm.xlu0 %9128, %v1615_v0   ;;  %714 = vmatprep.mubr.bf16.mxu1 %v18944_v1  ;;  %v1611_v11 = vld [vmem:[%s18930_s2 + $0x28] sm:$0xf]  ;;  %v1612_v12 = vld [vmem:[%s18930_s2 + $0x2c] sm:$0xf]  ;;  %v10437_v15 = vld [vmem:[%s18929_s1] sm:$0xff]   ;;  %vm495_vm1 = vcmask 48128  }
  0x17   : > { %s21047_s29 = smov (!%p382_p10, %s8927_s29), 31  ;;  %9129 = vset.pattern.permute.xlu1 %v18944_v1  ;;  %v1609_v18 = vld [vmem:[%s18930_s2 + $0x20] sm:$0xf]  ;;  %v1610_v19 = vld [vmem:[%s18930_s2 + $0x24] sm:$0xf]  ;;  %v10466_v28 = vld [vmem:[%s18929_s1 + $0x8] sm:$0xff]  }
  0x18   : > { %1763 = vperm.xlu1 %9129, %v1613_v2   ;;  %s8928_s22 = sshll.u32 %s21047_s29, 2  ;;  %v1607_v26 = vld [vmem:[%s18930_s2 + $0x18] sm:$0xf]  ;;  %v1608_v27 = vld [vmem:[%s18930_s2 + $0x1c] sm:$0xf]  ;;  %v10489_v33 = vld [vmem:[%s18929_s1 + $0x10] sm:$0xff]  }
  0x19   : > { %s10420_s26 = scalar_lea.vmem %s18928_s0, %s8928_s22  ;;  %v1605_v29 = vld [vmem:[%s18930_s2 + $0x10] sm:$0xf]  ;;  %v1606_v30 = vld [vmem:[%s18930_s2 + $0x14] sm:$0xf]  ;;  %v1603_v31 = vld [vmem:[%s18930_s2 + $0x8] sm:$0xf] }
  0x1a   : > { %1799 = vperm.xlu0 %9128, %v1616_v3   ;;  %v391_v5 = vld [vmem:[%s10420_s26] sm:$0x77]  ;;  %v392_v6 = vld [vmem:[%s10420_s26 + $0x8] sm:$0x77]  ;;  %v393_v16 = vld [vmem:[%s10420_s26 + $0x10] sm:$0x77] }
  0x1b   : > { %v8938_v7 = vcombine.high %v391_v5, %v391_v5  ;;  %v8940_v8 = vcombine.high %v392_v6, %v392_v6  ;;  %v8937_v9 = vcombine.low %v391_v5, %v391_v5  ;;  %v8939_v10 = vcombine.low %v392_v6, %v392_v6  ;;  %v394_v17 = vld [vmem:[%s10420_s26 + $0x18] sm:$0x77]  ;;  %v1604_v32 = vld [vmem:[%s18930_s2 + $0xc] sm:$0xf]  ;;  %v10492_v34 = vld [vmem:[%s10420_s26 + $0x20] sm:$0x77] }
  0x1c   : > { %1775 = vperm.xlu1 %9129, %v1614_v4   ;;  %v8942_v20 = vcombine.high %v393_v16, %v393_v16  ;;  %v8944_v21 = vcombine.high %v394_v17, %v394_v17  ;;  %v8941_v22 = vcombine.low %v393_v16, %v393_v16  ;;  %v8943_v23 = vcombine.low %v394_v17, %v394_v17  ;;  %v10497_v36 = vld [vmem:[%s10420_s26 + $0x28] sm:$0x77]  ;;  %v1601_v37 = vld [vmem:[%s18930_s2] sm:$0xf]  ;;  %v1602_v38 = vld [vmem:[%s18930_s2 + $0x4] sm:$0xf] }
  0x1d   : > { %8953 = vmatprep.subr.msk.bf16.mxu0 %vm520_vm0, %v8938_v7  ;;  %8962 = vmatprep.subr.msk.bf16.mxu1 %vm520_vm0, %v8940_v8  ;;  %v522_v13 = vsel %vm520_vm0, %v8937_v9, 0  ;;  %v528_v14 = vsel %vm520_vm0, %v8939_v10, 0  ;;  %v8946_v35 = vcombine.high %v10492_v34, %v10492_v34  ;;  %v8948_v39 = vcombine.high %v10497_v36, %v10497_v36  ;;  %v10517_v40 = vld [vmem:[%s18929_s1 + $0x18] sm:$0xff]   ;;  %v3605_v43 = vld [vmem:[%s18932_s4 + $0x30] sm:$0xf]  ;;  %v10547_v47 = vld [vmem:[%s18929_s1 + $0x20] sm:$0xff]  }
  0x1e   : > { %584 = vmatpush1.bf16.msra.mxu0 %v522_v13  ;;  %697 = vmatpush1.bf16.msra.mxu1 %v528_v14  ;;  %v534_v24 = vsel %vm520_vm0, %v8941_v22, 0  ;;  %v540_v25 = vsel %vm520_vm0, %v8943_v23, 0  ;;  %v3607_v41 = vld [vmem:[%s18932_s4 + $0x38] sm:$0xf]  ;;  %v3608_v42 = vld [vmem:[%s18932_s4 + $0x3c] sm:$0xf]  ;;  %v8945_v4 = vcombine.low %v10492_v34, %v10492_v34  ;;  %v8947_v5 = vcombine.low %v10497_v36, %v10497_v36 }
  0x1f   : > { %1739 = vperm.xlu0 %9128, %v1611_v11   ;;  %8971 = vmatprep.subr.msk.bf16.mxu0 %vm520_vm0, %v8942_v20  ;;  %v3606_v44 = vld [vmem:[%s18932_s4 + $0x34] sm:$0xf]  ;;  %v3603_v45 = vld [vmem:[%s18932_s4 + $0x28] sm:$0xf]  ;;  %v3604_v46 = vld [vmem:[%s18932_s4 + $0x2c] sm:$0xf] }
  0x20   : > { %1751 = vperm.xlu1 %9129, %v1612_v12   ;;  %8980 = vmatprep.subr.msk.bf16.mxu1 %vm520_vm0, %v8944_v21  ;;  %v3601_v48 = vld [vmem:[%s18932_s4 + $0x20] sm:$0xf]  ;;  %v3602_v49 = vld [vmem:[%s18932_s4 + $0x24] sm:$0xf]  ;;  %v3599_v50 = vld [vmem:[%s18932_s4 + $0x18] sm:$0xf] }
  0x21   : > { %8954 = vmatmul.mubr.msk.bf16.vlgmr.msra.gmra.mxu0 %vm495_vm1, %v10437_v15  ;;  %8963 = vmatmul.mubr.msk.bf16.vlgmr.msra.gmra.mxu1 %vm495_vm1, %v10437_v15  ;;  %v3600_v51 = vld [vmem:[%s18932_s4 + $0x1c] sm:$0xf]  ;;  %v10570_v52 = vld [vmem:[%s18929_s1 + $0x28] sm:$0xff]   ;;  %v3597_v53 = vld [vmem:[%s18932_s4 + $0x10] sm:$0xf]  ;;  %v546_v10 = vsel %vm520_vm0, %v8945_v4, 0 }
  0x22   : > { %611 = vmatprep.mubr.bf16.mxu0 %v18944_v1  ;;  %724 = vmatprep.mubr.bf16.mxu1 %v18944_v1  ;;  %v3598_v54 = vld [vmem:[%s18932_s4 + $0x14] sm:$0xf]  ;;  %v3595_v55 = vld [vmem:[%s18932_s4 + $0x8] sm:$0xf]  ;;  %v3596_v56 = vld [vmem:[%s18932_s4 + $0xc] sm:$0xf] }
  0x23   : > { %1715 = vperm.xlu0 %9128, %v1609_v18   ;;  %810 = vmatpush1.bf16.msra.mxu0 %v534_v24  ;;  %v10593_v57 = vld [vmem:[%s18929_s1 + $0x30] sm:$0xff]   ;;  %v3593_v58 = vld [vmem:[%s18932_s4] sm:$0xf]  ;;  %v3594_v59 = vld [vmem:[%s18932_s4 + $0x4] sm:$0xf]  ;;  %v552_v11 = vsel %vm520_vm0, %v8947_v5, 0 }
  0x24   : > { %1727 = vperm.xlu1 %9129, %v1610_v19   ;;  %923 = vmatpush1.bf16.msra.mxu1 %v540_v25  ;;  %v5599_v60 = vld [vmem:[%s18934_s6 + $0x38] sm:$0xf]  ;;  %v5600_v61 = vld [vmem:[%s18934_s6 + $0x3c] sm:$0xf]  ;;  %v5597_v63 = vld [vmem:[%s18934_s6 + $0x30] sm:$0xf] }
  0x25   : > { %8989 = vmatprep.subr.msk.bf16.mxu0 %vm520_vm0, %v8946_v35  ;;  %8998 = vmatprep.subr.msk.bf16.mxu1 %vm520_vm0, %v8948_v39  ;;  %v10616_v62 = vld [vmem:[%s18929_s1 + $0x38] sm:$0xff]   ;;  %v5598_v0 = vld [vmem:[%s18934_s6 + $0x34] sm:$0xf]  ;;  %v5595_v2 = vld [vmem:[%s18934_s6 + $0x28] sm:$0xf]  ;;  %s378_s16 = sand.u32 1, %s10279_s18  }
  0x26   : > { %v5596_v3 = vld [vmem:[%s18934_s6 + $0x2c] sm:$0xf]  ;;  %v10641_v6 = vld [vmem:[%s10420_s26 + $0x30] sm:$0x77]  ;;  %v10644_v7 = vld [vmem:[%s10420_s26 + $0x38] sm:$0x77] }
  0x27   : > { %1691 = vperm.xlu0 %9128, %v1607_v26   ;;  %v5593_v8 = vld [vmem:[%s18934_s6 + $0x20] sm:$0xf]  ;;  %v5594_v9 = vld [vmem:[%s18934_s6 + $0x24] sm:$0xf]  ;;  %v8950_v12 = vcombine.high %v10641_v6, %v10641_v6  ;;  %v8952_v13 = vcombine.high %v10644_v7, %v10644_v7  ;;  %v5591_v14 = vld [vmem:[%s18934_s6 + $0x18] sm:$0xf] }
  0x28   : > { %1703 = vperm.xlu1 %9129, %v1608_v27   ;;  %v5592_v16 = vld [vmem:[%s18934_s6 + $0x1c] sm:$0xf]  ;;  %v5589_v17 = vld [vmem:[%s18934_s6 + $0x10] sm:$0xf]  ;;  %v5590_v18 = vld [vmem:[%s18934_s6 + $0x14] sm:$0xf] }
  0x29   : > { %8955 = vmatmul.mubr.msk.bf16.gmra.mxu0 %vm495_vm1, %v10466_v28  ;;  %8964 = vmatmul.mubr.msk.bf16.gmra.mxu1 %vm495_vm1, %v10466_v28  ;;  %v5587_v19 = vld [vmem:[%s18934_s6 + $0x8] sm:$0xf]  ;;  %v5588_v20 = vld [vmem:[%s18934_s6 + $0xc] sm:$0xf]  ;;  %v5585_v21 = vld [vmem:[%s18934_s6] sm:$0xf] }
  0x2a   : > { %621 = vmatprep.mubr.bf16.mxu0 %v18944_v1  ;;  %734 = vmatprep.mubr.bf16.mxu1 %v18944_v1  ;;  %v5586_v22 = vld [vmem:[%s18934_s6 + $0x4] sm:$0xf]  ;;  %v7591_v23 = vld [vmem:[%s18936_s8 + $0x38] sm:$0xf]  ;;  %v7592_v24 = vld [vmem:[%s18936_s8 + $0x3c] sm:$0xf] }
  0x2b   : > { %1667 = vperm.xlu0 %9128, %v1605_v29   ;;  %v7589_v25 = vld [vmem:[%s18936_s8 + $0x30] sm:$0xf]  ;;  %v7590_v26 = vld [vmem:[%s18936_s8 + $0x34] sm:$0xf]  ;;  %v7587_v27 = vld [vmem:[%s18936_s8 + $0x28] sm:$0xf] }
  0x2c   : > { %1679 = vperm.xlu1 %9129, %v1606_v30   ;;  %v7588_v29 = vld [vmem:[%s18936_s8 + $0x2c] sm:$0xf]  ;;  %v7585_v30 = vld [vmem:[%s18936_s8 + $0x20] sm:$0xf]  ;;  %v7584_v34 = vld [vmem:[%s18936_s8 + $0x1c] sm:$0xf] }
  0x2d   : > { %v7581_v35 = vld [vmem:[%s18936_s8 + $0x10] sm:$0xf]  ;;  %v7582_v36 = vld [vmem:[%s18936_s8 + $0x14] sm:$0xf]  ;;  %v7577_v39 = vld [vmem:[%s18936_s8] sm:$0xf] }
  0x2e   : > { %s8926_s22 = sshll.u32 %s378_s16, 6  ;;  %s9086_s25 = sshll.u32 %s10373_s21, 10 }
  0x2f   : > { %1643 = vperm.xlu0 %9128, %v1603_v31   ;;  %v7586_v31 = vld [vmem:[%s18936_s8 + $0x24] sm:$0xf]  ;;  %s18870_s24 = scalar_lea.vmem [#allocation2], %s8926_s22  ;;  %s18883_s29 = scalar_lea.hbm %s18939_s11, %s9086_s25 }
  0x30   : > { %1655 = vperm.xlu1 %9129, %v1604_v32   ;;  %v7583_v32 = vld [vmem:[%s18936_s8 + $0x18] sm:$0xf]  ;;  %s8863_s26 = sshll.u32 %s18870_s24, 4  ;;  %s8849_s21 = scalar_lea.sflag [#allocation3], %s378_s16  ;;  %s18885_s26 = int_to_ptr.vmem [resolvable:$true] %s8863_s26 }
  0x31   : > { %8956 = vmatmul.mubr.msk.bf16.gmra.mxu0 %vm495_vm1, %v10489_v33  ;;  %8965 = vmatmul.mubr.msk.bf16.gmra.mxu1 %vm495_vm1, %v10489_v33  ;;  %s10227_s13 = scalar_lea.vmem %s18885_s26, 1024  ;;  %s10291_s14 = smov [#allocation2]  }
  0x32   : > { %631 = vmatprep.mubr.bf16.mxu0 %v18944_v1  ;;  %744 = vmatprep.mubr.bf16.mxu1 %v18944_v1  ;;  %p10228_p11 = scmp.ne.s32.totalorder %s18885_s26, %s10227_s13  ;;  %s10231_s15 = sshll.u32 %s10291_s14, 4  ;;  %s10232_s15 = int_to_ptr.vmem [resolvable:$false] %s10231_s15 }
  0x33   : > { %1619 = vperm.xlu0 %9128, %v1601_v37   ;;  %v7579_v37 = vld [vmem:[%s18936_s8 + $0x8] sm:$0xf]  ;;  %s10233_s22 = scalar_lea.vmem %s10232_s15, 2048  ;;  %p10234_p0 = scmp.lt.s32.totalorder %s18885_s26, %s10232_s15 }
  0x34   : > { %1631 = vperm.xlu1 %9129, %v1602_v38   ;;  %v7580_v38 = vld [vmem:[%s18936_s8 + $0xc] sm:$0xf]  ;;  %p10229_p12 = pnand %p10228_p11, %p10390_p5  ;;  %p10235_p1 = scmp.lt.s32.totalorder %s10233_s22, %s10227_s13 }
  0x36   : > { %p10230_p13 = pneg %p10229_p12  ;;  %p10236_p2 = por %p10235_p1, %p10234_p0 }
  0x37   : > { %3779 = vperm.xlu0 %9128, %v3607_v41   ;;  %v7578_v41 = vld [vmem:[%s18936_s8 + $0x4] sm:$0xf] }
  0x38   : > { %3791 = vperm.xlu1 %9129, %v3608_v42   ;;  %v8474_v42 = vld [vmem:[%s18938_s10] sm:$0x7]  ;;  %p10237_p3 = pnand %p10236_p2, %p10230_p13 }
  0x39   : > { %8957 = vmatmul.mubr.msk.bf16.gmra.mxu0 %vm495_vm1, %v10517_v40  ;;  %8966 = vmatmul.mubr.msk.bf16.gmra.mxu1 %vm495_vm1, %v10517_v40 }
  0x3a   : > { %641 = vmatprep.mubr.bf16.mxu0 %v18944_v1  ;;  %754 = vmatprep.mubr.bf16.mxu1 %v18944_v1 }
  0x3b   : > { %3755 = vperm.xlu0 %9128, %v3605_v43   ;;  %v8949_v43 = vcombine.low %v10641_v6, %v10641_v6 }
  0x3c   : > { %3767 = vperm.xlu1 %9129, %v3606_v44   ;;  %v8951_v44 = vcombine.low %v10644_v7, %v10644_v7 }
  0x3f   : > { %3731 = vperm.xlu0 %9128, %v3603_v45   ;;  %v558_v45 = vsel %vm520_vm0, %v8949_v43, 0 }
  0x40   : > { %3743 = vperm.xlu1 %9129, %v3604_v46   ;;  %v564_v46 = vsel %vm520_vm0, %v8951_v44, 0 }
  0x41   : > { %8958 = vmatmul.mubr.msk.bf16.gmra.mxu0 %vm495_vm1, %v10547_v47  ;;  %8967 = vmatmul.mubr.msk.bf16.gmra.mxu1 %vm495_vm1, %v10547_v47 }
  0x42   : > { %651 = vmatprep.mubr.bf16.mxu0 %v18944_v1  ;;  %764 = vmatprep.mubr.bf16.mxu1 %v18944_v1 }
  0x43   : > { %3707 = vperm.xlu0 %9128, %v3601_v48  }
  0x44   : > { %3719 = vperm.xlu1 %9129, %v3602_v49  }
  0x47   : > { %3683 = vperm.xlu0 %9128, %v3599_v50  }
  0x48   : > { %3695 = vperm.xlu1 %9129, %v3600_v51  }
  0x49   : > { %8959 = vmatmul.mubr.msk.bf16.gmra.mxu0 %vm495_vm1, %v10570_v52  ;;  %8968 = vmatmul.mubr.msk.bf16.gmra.mxu1 %vm495_vm1, %v10570_v52 }
  0x4a   : > { %661 = vmatprep.mubr.bf16.mxu0 %v18944_v1  ;;  %774 = vmatprep.mubr.bf16.mxu1 %v18944_v1 }
  0x4b   : > { %3659 = vperm.xlu0 %9128, %v3597_v53  }
  0x4c   : > { %3671 = vperm.xlu1 %9129, %v3598_v54  }
  0x4f   : > { %3635 = vperm.xlu0 %9128, %v3595_v55  }
  0x50   : > { %3647 = vperm.xlu1 %9129, %v3596_v56  }
  0x51   : > { %8960 = vmatmul.mubr.msk.bf16.gmra.mxu0 %vm495_vm1, %v10593_v57  ;;  %8969 = vmatmul.mubr.msk.bf16.gmra.mxu1 %vm495_vm1, %v10593_v57 }
  0x52   : > { %671 = vmatprep.mubr.bf16.mxu0 %v18944_v1  ;;  %784 = vmatprep.mubr.bf16.mxu1 %v18944_v1 }
  0x53   : > { %3611 = vperm.xlu0 %9128, %v3593_v58  }
  0x54   : > { %3623 = vperm.xlu1 %9129, %v3594_v59  }
  0x57   : > { %5771 = vperm.xlu0 %9128, %v5599_v60  }
  0x58   : > { %5783 = vperm.xlu1 %9129, %v5600_v61  }
  0x59   : > { %8961 = vmatmul.mubr.msk.bf16.gmra.mxu0 %vm495_vm1, %v10616_v62  ;;  %8970 = vmatmul.mubr.msk.bf16.gmra.mxu1 %vm495_vm1, %v10616_v62 }
  0x5a   : > { %827 = vmatprep.mubr.bf16.mxu0 %v18944_v1  ;;  %940 = vmatprep.mubr.bf16.mxu1 %v18944_v1 }
  0x5b   : > { %5747 = vperm.xlu0 %9128, %v5597_v63  }
  0x5c   : > { %5759 = vperm.xlu1 %9129, %v5598_v0  }
  0x5f   : > { %5723 = vperm.xlu0 %9128, %v5595_v2  }
  0x60   : > { %5735 = vperm.xlu1 %9129, %v5596_v3  }
  0x61   : > { %8972 = vmatmul.mubr.msk.bf16.vlgmr.msra.gmra.mxu0 %vm495_vm1, %v10437_v15  ;;  %8981 = vmatmul.mubr.msk.bf16.vlgmr.msra.gmra.mxu1 %vm495_vm1, %v10437_v15 }
  0x62   : > { %837 = vmatprep.mubr.bf16.mxu0 %v18944_v1  ;;  %950 = vmatprep.mubr.bf16.mxu1 %v18944_v1 }
  0x63   : > { %5699 = vperm.xlu0 %9128, %v5593_v8   ;;  %1036 = vmatpush1.bf16.msra.mxu0 %v546_v10 }
  0x64   : > { %5711 = vperm.xlu1 %9129, %v5594_v9   ;;  %1149 = vmatpush1.bf16.msra.mxu1 %v552_v11 }
  0x65   : > { %9007 = vmatprep.subr.msk.bf16.mxu0 %vm520_vm0, %v8950_v12  ;;  %9016 = vmatprep.subr.msk.bf16.mxu1 %vm520_vm0, %v8952_v13 }
  0x67   : > { %5675 = vperm.xlu0 %9128, %v5591_v14  }
  0x68   : > { %5687 = vperm.xlu1 %9129, %v5592_v16  }
  0x69   : > { %8973 = vmatmul.mubr.msk.bf16.gmra.mxu0 %vm495_vm1, %v10466_v28  ;;  %8982 = vmatmul.mubr.msk.bf16.gmra.mxu1 %vm495_vm1, %v10466_v28 }
  0x6a   : > { %847 = vmatprep.mubr.bf16.mxu0 %v18944_v1  ;;  %960 = vmatprep.mubr.bf16.mxu1 %v18944_v1 }
  0x6b   : > { %5651 = vperm.xlu0 %9128, %v5589_v17  }
  0x6c   : > { %5663 = vperm.xlu1 %9129, %v5590_v18  }
  0x6f   : > { %5627 = vperm.xlu0 %9128, %v5587_v19  }
  0x70   : > { %5639 = vperm.xlu1 %9129, %v5588_v20  }
  0x71   : > { %8974 = vmatmul.mubr.msk.bf16.gmra.mxu0 %vm495_vm1, %v10489_v33  ;;  %8983 = vmatmul.mubr.msk.bf16.gmra.mxu1 %vm495_vm1, %v10489_v33 }
  0x72   : > { %857 = vmatprep.mubr.bf16.mxu0 %v18944_v1  ;;  %970 = vmatprep.mubr.bf16.mxu1 %v18944_v1 }
  0x73   : > { %5603 = vperm.xlu0 %9128, %v5585_v21  }
  0x74   : > { %5615 = vperm.xlu1 %9129, %v5586_v22  }
  0x77   : > { %7763 = vperm.xlu0 %9128, %v7591_v23  }
  0x78   : > { %7775 = vperm.xlu1 %9129, %v7592_v24  }
  0x79   : > { %8975 = vmatmul.mubr.msk.bf16.gmra.mxu0 %vm495_vm1, %v10517_v40  ;;  %8984 = vmatmul.mubr.msk.bf16.gmra.mxu1 %vm495_vm1, %v10517_v40 }
  0x7a   : > { %867 = vmatprep.mubr.bf16.mxu0 %v18944_v1  ;;  %980 = vmatprep.mubr.bf16.mxu1 %v18944_v1 }
  0x7b   : > { %7739 = vperm.xlu0 %9128, %v7589_v25  }
  0x7c   : > { %7751 = vperm.xlu1 %9129, %v7590_v26  }
  0x7f   : > { %7715 = vperm.xlu0 %9128, %v7587_v27  }
  0x80   : > { %7727 = vperm.xlu1 %9129, %v7588_v29  }
  0x81   : > { %8976 = vmatmul.mubr.msk.bf16.gmra.mxu0 %vm495_vm1, %v10547_v47  ;;  %8985 = vmatmul.mubr.msk.bf16.gmra.mxu1 %vm495_vm1, %v10547_v47 }
  0x82   : > { %877 = vmatprep.mubr.bf16.mxu0 %v18944_v1  ;;  %990 = vmatprep.mubr.bf16.mxu1 %v18944_v1 }
  0x83   : > { %7691 = vperm.xlu0 %9128, %v7585_v30  }
  0x84   : > { %7703 = vperm.xlu1 %9129, %v7586_v31  }
  0x87   : > { %7667 = vperm.xlu0 %9128, %v7583_v32  }
  0x88   : > { %7679 = vperm.xlu1 %9129, %v7584_v34  }
  0x89   : > { %8977 = vmatmul.mubr.msk.bf16.gmra.mxu0 %vm495_vm1, %v10570_v52  ;;  %8986 = vmatmul.mubr.msk.bf16.gmra.mxu1 %vm495_vm1, %v10570_v52 }
  0x8a   : > { %887 = vmatprep.mubr.bf16.mxu0 %v18944_v1  ;;  %1000 = vmatprep.mubr.bf16.mxu1 %v18944_v1 }
  0x8b   : > { %7643 = vperm.xlu0 %9128, %v7581_v35  }
  0x8c   : > { %7655 = vperm.xlu1 %9129, %v7582_v36  }
  0x8f   : > { %7619 = vperm.xlu0 %9128, %v7579_v37  }
  0x90   : > { %7631 = vperm.xlu1 %9129, %v7580_v38  }
  0x91   : > { %8978 = vmatmul.mubr.msk.bf16.gmra.mxu0 %vm495_vm1, %v10593_v57  ;;  %8987 = vmatmul.mubr.msk.bf16.gmra.mxu1 %vm495_vm1, %v10593_v57  ;;  %v10881_v3 = vpop.permute.xlu0 %1787 }
  0x92   : > { %897 = vmatprep.mubr.bf16.mxu0 %v18944_v1  ;;  %1010 = vmatprep.mubr.bf16.mxu1 %v18944_v1 }
  0x93   : > { %7595 = vperm.xlu0 %9128, %v7577_v39   ;;  %v10883_v4 = vpop.permute.xlu1 %1763 }
  0x94   : > { %7607 = vperm.xlu1 %9129, %v7578_v41  }
  0x95   : > { %v10909_v14 = vpop.permute.xlu0 %1799 }
  0x97   : > { %8477 = vperm.xlu0 %9128, %v8474_v42   ;;  %v10911_v16 = vpop.permute.xlu1 %1775 }
  0x99   : > { %8979 = vmatmul.mubr.msk.bf16.gmra.mxu0 %vm495_vm1, %v10616_v62  ;;  %8988 = vmatmul.mubr.msk.bf16.gmra.mxu1 %vm495_vm1, %v10616_v62 }
  0x9a   : > { %1053 = vmatprep.mubr.bf16.mxu0 %v18944_v1  ;;  %1166 = vmatprep.mubr.bf16.mxu1 %v18944_v1  ;;  %v10929_v23 = vpop.permute.xlu0 %1739 }
  0x9b   : > { %v10931_v24 = vpop.permute.xlu1 %1751 }
  0x9e   : > { %v10951_v32 = vpop.permute.xlu0 %1715 }
  0x9f   : > { %v10953_v34 = vpop.permute.xlu1 %1727 }
  0xa1   : > { %8990 = vmatmul.mubr.msk.bf16.vlgmr.msra.gmra.mxu0 %vm495_vm1, %v10437_v15  ;;  %8999 = vmatmul.mubr.msk.bf16.vlgmr.msra.gmra.mxu1 %vm495_vm1, %v10437_v15 }
  0xa2   : > { %1063 = vmatprep.mubr.bf16.mxu0 %v18944_v1  ;;  %1176 = vmatprep.mubr.bf16.mxu1 %v18944_v1  ;;  %v10973_v41 = vpop.permute.xlu0 %1691 }
  0xa3   : > { %1262 = vmatpush1.bf16.msra.mxu0 %v558_v45  ;;  %1375 = vmatpush1.bf16.msra.mxu1 %v564_v46  ;;  %v10975_v42 = vpop.permute.xlu1 %1703  ;;  %v10290_v45 = vmov 839922192  }
  0xa4   : > { %v1623_v46 = vunpack.c.l.s4 %v10290_v45 }
  0xa6   : > { %v1624_v56 = vunpack.c.0.s8 %v1623_v46  ;;  %v1668_v7 = vpop.permute.xlu0 %1667 }
  0xa7   : > { %v1680_v59 = vpop.permute.xlu1 %1679 }
  0xa9   : > { %8991 = vmatmul.mubr.msk.bf16.gmra.mxu0 %vm495_vm1, %v10466_v28  ;;  %9000 = vmatmul.mubr.msk.bf16.gmra.mxu1 %vm495_vm1, %v10466_v28 }
  0xaa   : > { %1073 = vmatprep.mubr.bf16.mxu0 %v18944_v1  ;;  %1186 = vmatprep.mubr.bf16.mxu1 %v18944_v1 }
  0xb1   : > { %8992 = vmatmul.mubr.msk.bf16.gmra.mxu0 %vm495_vm1, %v10489_v33  ;;  %9001 = vmatmul.mubr.msk.bf16.gmra.mxu1 %vm495_vm1, %v10489_v33 }
  0xb2   : > { %1083 = vmatprep.mubr.bf16.mxu0 %v18944_v1  ;;  %1196 = vmatprep.mubr.bf16.mxu1 %v18944_v1 }
  0xb9   : > { %8993 = vmatmul.mubr.msk.bf16.gmra.mxu0 %vm495_vm1, %v10517_v40  ;;  %9002 = vmatmul.mubr.msk.bf16.gmra.mxu1 %vm495_vm1, %v10517_v40 }
  0xba   : > { %1093 = vmatprep.mubr.bf16.mxu0 %v18944_v1  ;;  %1206 = vmatprep.mubr.bf16.mxu1 %v18944_v1 }
  0xc1   : > { %8994 = vmatmul.mubr.msk.bf16.gmra.mxu0 %vm495_vm1, %v10547_v47  ;;  %9003 = vmatmul.mubr.msk.bf16.gmra.mxu1 %vm495_vm1, %v10547_v47 }
  0xc2   : > { %1103 = vmatprep.mubr.bf16.mxu0 %v18944_v1  ;;  %1216 = vmatprep.mubr.bf16.mxu1 %v18944_v1 }
  0xc9   : > { %8995 = vmatmul.mubr.msk.bf16.gmra.mxu0 %vm495_vm1, %v10570_v52  ;;  %9004 = vmatmul.mubr.msk.bf16.gmra.mxu1 %vm495_vm1, %v10570_v52 }
  0xca   : > { %1113 = vmatprep.mubr.bf16.mxu0 %v18944_v1  ;;  %1226 = vmatprep.mubr.bf16.mxu1 %v18944_v1 }
  0xd1   : > { %8996 = vmatmul.mubr.msk.bf16.gmra.mxu0 %vm495_vm1, %v10593_v57  ;;  %9005 = vmatmul.mubr.msk.bf16.gmra.mxu1 %vm495_vm1, %v10593_v57 }
  0xd2   : > { %1123 = vmatprep.mubr.bf16.mxu0 %v18944_v1  ;;  %1236 = vmatprep.mubr.bf16.mxu1 %v18944_v1 }
  0xd9   : > { %8997 = vmatmul.mubr.msk.bf16.gmra.mxu0 %vm495_vm1, %v10616_v62  ;;  %9006 = vmatmul.mubr.msk.bf16.gmra.mxu1 %vm495_vm1, %v10616_v62 }
  0xda   : > { %1279 = vmatprep.mubr.bf16.mxu0 %v18944_v1  ;;  %1392 = vmatprep.mubr.bf16.mxu1 %v18944_v1 }
  0xe1   : > { %v10837_v48 = vpop.f32.mrf.mxu0  ;;  %v10839_v49 = vpop.f32.mrf.mxu1  ;;  %9008 = vmatmul.mubr.msk.bf16.vlgmr.msra.gmra.mxu0 %vm495_vm1, %v10437_v15  ;;  %9017 = vmatmul.mubr.msk.bf16.vlgmr.msra.gmra.mxu1 %vm495_vm1, %v10437_v15 }
  0xe2   : > { %19568 = vst [vmem:[#allocation6_spill] sm:$0xff] %v10837_v48  ;;  %19569 = vst [vmem:[#allocation7_spill] sm:$0xff] %v10839_v49  ;;  %1289 = vmatprep.mubr.bf16.mxu0 %v18944_v1  ;;  %1402 = vmatprep.mubr.bf16.mxu1 %v18944_v1 }
  0xe3   : > { %v10847_v50 = vpop.f32.mrf.mxu0  ;;  %v10849_v51 = vpop.f32.mrf.mxu1 }
  0xe4   : > { %19570 = vst [vmem:[#allocation8_spill] sm:$0xff] %v10847_v50  ;;  %19571 = vst [vmem:[#allocation9_spill] sm:$0xff] %v10849_v51  ;;  %v11015_v51 = vpop.permute.xlu1 %1655 }
  0xe5   : > { %v10851_v53 = vpop.f32.mrf.mxu0  ;;  %v10853_v54 = vpop.f32.mrf.mxu1 }
  0xe6   : > { %19572 = vst [vmem:[#allocation10_spill] sm:$0xff] %v10851_v53  ;;  %19573 = vst [vmem:[#allocation11_spill] sm:$0xff] %v10853_v54 }
  0xe7   : > { %v10859_v58 = vpop.f32.mrf.mxu0  ;;  %v10861_v15 = vpop.f32.mrf.mxu1 }
  0xe8   : > { %19574 = vst [vmem:[#allocation12_spill] sm:$0xff] %v10859_v58  ;;  %19575 = vst [vmem:[#allocation13_spill] sm:$0xff] %v10861_v15 }
  0xe9   : > { %v10867_v61 = vpop.f32.mrf.mxu0  ;;  %v10869_v63 = vpop.f32.mrf.mxu1  ;;  %9009 = vmatmul.mubr.msk.bf16.gmra.mxu0 %vm495_vm1, %v10466_v28  ;;  %9018 = vmatmul.mubr.msk.bf16.gmra.mxu1 %vm495_vm1, %v10466_v28  ;;  %v1625_v28 = vlaneseq }
  0xea   : > { %19576 = vst [vmem:[#allocation14_spill] sm:$0xff] %v10867_v61  ;;  %19577 = vst [vmem:[#allocation15_spill] sm:$0xff] %v10869_v63  ;;  %1299 = vmatprep.mubr.bf16.mxu0 %v18944_v1  ;;  %1412 = vmatprep.mubr.bf16.mxu1 %v18944_v1 }
  0xeb   : > { %v10877_v0 = vpop.f32.mrf.mxu0  ;;  %v10879_v2 = vpop.f32.mrf.mxu1  ;;  %v1626_v10 = vshrl.u32 %v1625_v28, 7 }
  0xec   : > { %19578 = vst [vmem:[#allocation16_spill] sm:$0xff] %v10877_v0  ;;  %19579 = vst [vmem:[#allocation17_spill] sm:$0xff] %v10879_v2 }
  0xed   : > { %v10885_v5 = vpop.f32.mrf.mxu0  ;;  %v10887_v6 = vpop.f32.mrf.mxu1  ;;  %v11003_v2 = vsub.s32 %v1624_v56, %v1626_v10  ;;  %v19589_v56 = vmov 0  }
  0xee   : > { %19580 = vst [vmem:[#allocation18_spill] sm:$0xff] %v10885_v5  ;;  %19581 = vst [vmem:[#allocation19_spill] sm:$0xff] %v10887_v6 }
  0xef   : > { %v10893_v8 = vpop.f32.mrf.mxu0  ;;  %v10895_v9 = vpop.f32.mrf.mxu1  ;;  %19588 = vst [vmem:[#allocation26_spill] sm:$0xff] %v11003_v2  ;;  %v1772_v28 = vrot.slane %v10883_v4, %v11003_v2  ;;  %v1784_v46 = vrot.slane %v10911_v16, %v11003_v2  ;;  %v1796_v4 = vrot.slane %v10881_v3, %v11003_v2  ;;  %v1808_v10 = vrot.slane %v10909_v14, %v11003_v2 }
  0xf0   : > { %19582 = vst [vmem:[#allocation20_spill] sm:$0xff] %v10893_v8  ;;  %19583 = vst [vmem:[#allocation21_spill] sm:$0xff] %v10895_v9  ;;  %v1748_v54 = vrot.slane %v10929_v23, %v11003_v2  ;;  %v1724_v0 = vrot.slane %v10951_v32, %v11003_v2  ;;  %v1736_v8 = vrot.slane %v10953_v34, %v11003_v2 }
  0xf1   : > { %v10901_v12 = vpop.f32.mrf.mxu0  ;;  %v10903_v13 = vpop.f32.mrf.mxu1  ;;  %9010 = vmatmul.mubr.msk.bf16.gmra.mxu0 %vm495_vm1, %v10489_v33  ;;  %9019 = vmatmul.mubr.msk.bf16.gmra.mxu1 %vm495_vm1, %v10489_v33  ;;  %v11029_v49 = vcombine.low %v1772_v28, %v1784_v46  ;;  %v1700_v3 = vrot.slane %v10973_v41, %v11003_v2  ;;  %v1712_v14 = vrot.slane %v10975_v42, %v11003_v2 }
  0xf2   : > { %19584 = vst [vmem:[#allocation22_spill] sm:$0xff] %v10901_v12  ;;  %19585 = vst [vmem:[#allocation23_spill] sm:$0xff] %v10903_v13  ;;  %1309 = vmatprep.mubr.bf16.mxu0 %v18944_v1  ;;  %1422 = vmatprep.mubr.bf16.mxu1 %v18944_v1  ;;  %v1676_v61 = vrot.slane %v1668_v7, %v11003_v2  ;;  %v1688_v23 = vrot.slane %v1680_v59, %v11003_v2 }
  0xf3   : > { %v10915_v17 = vpop.f32.mrf.mxu0  ;;  %v10917_v18 = vpop.f32.mrf.mxu1  ;;  %v11045_v58 = vcombine.low %v1796_v4, %v1808_v10  ;;  %v11054_v7 = vcombine.low %v1724_v0, %v1736_v8  ;;  %v11056_v59 = vcombine.low %v1700_v3, %v1712_v14 }
  0xf5   : > { %v10919_v19 = vpop.f32.mrf.mxu0  ;;  %v10921_v20 = vpop.f32.mrf.mxu1  ;;  %19590 = vst [vmem:[#allocation27_spill] sm:$0xff] %v11045_v58  ;;  %19592 = vst [vmem:[#allocation29_spill] sm:$0xff] %v11054_v7 }
  0xf6   : > { %19586 = vst [vmem:[#allocation24_spill] sm:$0xff] %v10919_v19  ;;  %19587 = vst [vmem:[#allocation25_spill] sm:$0xff] %v10921_v20 }
  0xf7   : > { %v10925_v33 = vpop.f32.mrf.mxu0  ;;  %v10927_v22 = vpop.f32.mrf.mxu1  ;;  %19593 = vst [vmem:[#allocation30_spill] sm:$0xff] %v11056_v59 }
  0xf9   : > { %v10933_v25 = vpop.f32.mrf.mxu0  ;;  %v10935_v26 = vpop.f32.mrf.mxu1  ;;  %9011 = vmatmul.mubr.msk.bf16.gmra.mxu0 %vm495_vm1, %v10517_v40  ;;  %9020 = vmatmul.mubr.msk.bf16.gmra.mxu1 %vm495_vm1, %v10517_v40 }
  0xfa   : > { %1319 = vmatprep.mubr.bf16.mxu0 %v18944_v1  ;;  %1432 = vmatprep.mubr.bf16.mxu1 %v18944_v1 }
  0xfb   : > { %v10943_v27 = vpop.f32.mrf.mxu0  ;;  %v10945_v29 = vpop.f32.mrf.mxu1 }
  0xfd   : > { %v10947_v30 = vpop.f32.mrf.mxu0  ;;  %v10949_v31 = vpop.f32.mrf.mxu1 }
  0xff   : > { %v10955_v35 = vpop.f32.mrf.mxu0  ;;  %v10957_v36 = vpop.f32.mrf.mxu1 }
 0x100   : > { %v1524_v3 = vpack.c.bf16 %v10957_v36, %v10945_v29 }
 0x101   : > { %v10959_v40 = vpop.f32.mrf.mxu0  ;;  %v10961_v37 = vpop.f32.mrf.mxu1  ;;  %9012 = vmatmul.mubr.msk.bf16.gmra.mxu0 %vm495_vm1, %v10547_v47  ;;  %9021 = vmatmul.mubr.msk.bf16.gmra.mxu1 %vm495_vm1, %v10547_v47 }
 0x102   : > { %1329 = vmatprep.mubr.bf16.mxu0 %v18944_v1  ;;  %1442 = vmatprep.mubr.bf16.mxu1 %v18944_v1 }
 0x103   : > { %v10969_v38 = vpop.f32.mrf.mxu0  ;;  %v10971_v39 = vpop.f32.mrf.mxu1 }
 0x105   : > { %v10977_v43 = vpop.f32.mrf.mxu0  ;;  %v10979_v44 = vpop.f32.mrf.mxu1 }
 0x107   : > { %v10981_v47 = vpop.f32.mrf.mxu0  ;;  %v10983_v11 = vpop.f32.mrf.mxu1 }
 0x109   : > { %v10985_v60 = vpop.f32.mrf.mxu0  ;;  %v10987_v21 = vpop.f32.mrf.mxu1  ;;  %9013 = vmatmul.mubr.msk.bf16.gmra.mxu0 %vm495_vm1, %v10570_v52  ;;  %9022 = vmatmul.mubr.msk.bf16.gmra.mxu1 %vm495_vm1, %v10570_v52 }
 0x10a   : > { %1339 = vmatprep.mubr.bf16.mxu0 %v18944_v1  ;;  %1452 = vmatprep.mubr.bf16.mxu1 %v18944_v1  ;;  %v11013_v1 = vpop.permute.xlu0 %1643 }
 0x10b   : > { %v10995_v45 = vpop.f32.mrf.mxu0  ;;  %v10997_v55 = vpop.f32.mrf.mxu1 }
 0x10d   : > { %v10999_v63 = vpop.f32.mrf.mxu0  ;;  %v11001_v6 = vpop.f32.mrf.mxu1 }
 0x10e   : > { %v1620_v5 = vpop.permute.xlu0 %1619 }
 0x10f   : > { %v11005_v9 = vpop.f32.mrf.mxu0  ;;  %v11007_v52 = vpop.f32.mrf.mxu1  ;;  %v1628_v32 = vrot.slane %v1620_v5, %v11003_v2  ;;  %v11062_v5 = vcombine.low %v1676_v61, %v1688_v23 }
 0x110   : > { %v1554_v0 = vpack.c.bf16 %v11005_v9, %v10995_v45  ;;  %v1537_v9 = vpack.c.bf16 %v10977_v43, %v10959_v40  ;;  %v1553_v40 = vpack.c.bf16 %v10999_v63, %v10985_v60  ;;  %v1555_v60 = vpack.c.bf16 %v11001_v6, %v10987_v21 }
 0x111   : > { %v663_v15 = vpop.f32.mrf.mxu0  ;;  %v11017_v13 = vpop.f32.mrf.mxu1  ;;  %9014 = vmatmul.mubr.msk.bf16.gmra.mxu0 %vm495_vm1, %v10593_v57  ;;  %9023 = vmatmul.mubr.msk.bf16.gmra.mxu1 %vm495_vm1, %v10593_v57  ;;  %v1760_v57 = vrot.slane %v10931_v24, %v11003_v2  ;;  %19594 = vst [vmem:[#allocation31_spill] sm:$0xff] %v11062_v5  ;;  %v1539_v21 = vpack.c.bf16 %v10979_v44, %v10961_v37 }
 0x112   : > { %1349 = vmatprep.mubr.bf16.mxu0 %v19589_v56  ;;  %1462 = vmatprep.mubr.bf16.mxu1 %v19589_v56  ;;  %v1632_v24 = vpop.permute.xlu1 %1631 }
 0x113   : > { %v665_v16 = vpop.f32.mrf.mxu0  ;;  %v778_v20 = vpop.f32.mrf.mxu1  ;;  %v1640_v41 = vrot.slane %v1632_v24, %v11003_v2  ;;  %v11052_v12 = vcombine.low %v1748_v54, %v1760_v57  ;;  %v1664_v54 = vrot.slane %v11015_v51, %v11003_v2  ;;  %v1522_v57 = vpack.c.bf16 %v10955_v35, %v10943_v27 }
 0x114   : > { %v1538_v24 = vpack.c.bf16 %v10981_v47, %v10969_v38  ;;  %v1540_v27 = vpack.c.bf16 %v10983_v11, %v10971_v39 }
 0x115   : > { %v667_v28 = vpop.f32.mrf.mxu0  ;;  %v780_v46 = vpop.f32.mrf.mxu1  ;;  %19591 = vst [vmem:[#allocation28_spill] sm:$0xff] %v11052_v12  ;;  %v11079_v10 = vcombine.low %v1628_v32, %v1640_v41  ;;  %v11100_v43 = vadd.bf16 %v11052_v12, %v1554_v0 }
 0x116   : > { %v1569_v50 = vpack.c.bf16 %v667_v28, %v663_v15  ;;  %v1571_v45 = vpack.c.bf16 %v780_v46, %v11017_v13  ;;  %v11136_v0 = vadd.bf16 %v11054_v7, %v1538_v24 }
 0x117   : > { %v669_v34 = vpop.f32.mrf.mxu0  ;;  %v782_v48 = vpop.f32.mrf.mxu1  ;;  %19595 = vst [vmem:[#allocation32_spill] sm:$0xff] %v11079_v10 }
 0x118   : > { %v11050_v53 = vadd.bf16 %v11029_v49, %v1569_v50  ;;  %v1570_v42 = vpack.c.bf16 %v669_v34, %v665_v16  ;;  %v1572_v19 = vpack.c.bf16 %v782_v48, %v778_v20  ;;  %v1652_v50 = vrot.slane %v11013_v1, %v11003_v2  ;;  %v19621_v2 = vld [vmem:[#allocation11_spill] sm:$0xff] }
 0x119   : > { %v673_v15 = vpop.f32.mrf.mxu0  ;;  %v786_v4 = vpop.f32.mrf.mxu1  ;;  %9015 = vmatmul.mubr.msk.bf16.gmra.mxu0 %vm495_vm1, %v10616_v62  ;;  %9024 = vmatmul.mubr.msk.bf16.gmra.mxu1 %vm495_vm1, %v10616_v62  ;;  %v1506_v16 = vpack.c.bf16 %v10925_v33, %v10915_v17  ;;  %v11117_v46 = vadd.bf16 %v11029_v49, %v1571_v45  ;;  %v18963_v45 = vmul.bf16 1056980736, %v11100_v43 }
 0x11a   : > { %v11067_v48 = vadd.bf16 %v11029_v49, %v1570_v42  ;;  %2593 = vmatprep.mubr.bf16.mxu0 %v19589_v56  ;;  %2706 = vmatprep.mubr.bf16.mxu1 %v19589_v56  ;;  %v18960_v62 = vmul.bf16 1056980736, %v11050_v53  ;;  %v11077_v61 = vadd.bf16 %v11029_v49, %v1572_v19  ;;  %v1556_v19 = vpack.c.bf16 %v11007_v52, %v10997_v55 }
 0x11b   : > { %v675_v8 = vpop.f32.mrf.mxu0  ;;  %v788_v20 = vpop.f32.mrf.mxu1  ;;  %v18962_v24 = vmul.bf16 1056980736, %v11117_v46 }
 0x11c   : > { %v18969_v14 = vmul.bf16 1056980736, %v11067_v48  ;;  %9178 = vtanh.bf16 %v18960_v62  ;;  %v18961_v55 = vmul.bf16 1056980736, %v11077_v61  ;;  %v11114_v63 = vadd.bf16 %v11052_v12, %v1556_v19 }
 0x11d   : > { %v677_v28 = vpop.f32.mrf.mxu0  ;;  %v790_v23 = vpop.f32.mrf.mxu1 }
 0x11e   : > { %v1585_v35 = vpack.c.bf16 %v677_v28, %v673_v15  ;;  %v1587_v32 = vpack.c.bf16 %v790_v23, %v786_v4  ;;  %9180 = vtanh.bf16 %v18969_v14  ;;  %v11153_v28 = vadd.bf16 %v11054_v7, %v1540_v27 }
 0x11f   : > { %v679_v13 = vpop.f32.mrf.mxu0  ;;  %v792_v52 = vpop.f32.mrf.mxu1  ;;  %9182 = vtanh.bf16 %v18961_v55  ;;  %v11156_v23 = vadd.bf16 %v11052_v12, %v1555_v60  ;;  %v1508_v27 = vpack.c.bf16 %v10927_v22, %v10917_v18 }
 0x120   : > { %v11106_v38 = vadd.bf16 %v11045_v58, %v1585_v35  ;;  %v11109_v11 = vadd.bf16 %v11045_v58, %v1587_v32  ;;  %v1586_v39 = vpack.c.bf16 %v679_v13, %v675_v8  ;;  %v1588_v47 = vpack.c.bf16 %v792_v52, %v788_v20 }
 0x121   : > { %v11121_v34 = vpop.f32.mrf.mxu0  ;;  %v11123_v41 = vpop.f32.mrf.mxu1  ;;  %v11139_v8 = vadd.bf16 %v11052_v12, %v1553_v40  ;;  %v18964_v40 = vmul.bf16 1056980736, %v11114_v63  ;;  %v1521_v52 = vpack.c.bf16 %v10947_v30, %v10933_v25  ;;  %v11187_v13 = vadd.bf16 %v11056_v59, %v1522_v57 }
 0x122   : > { %19596 = vst [vmem:[#allocation33_spill] sm:$0xff] %v11123_v41  ;;  %v18971_v42 = vmul.bf16 1056980736, %v11106_v38  ;;  %v18967_v15 = vmul.bf16 1056980736, %v11109_v11  ;;  %v11128_v4 = vadd.bf16 %v11045_v58, %v1586_v39  ;;  %v11131_v6 = vadd.bf16 %v11045_v58, %v1588_v47 }
 0x123   : > { %v11143_v20 = vpop.f32.mrf.mxu0  ;;  %v11145_v19 = vpop.f32.mrf.mxu1  ;;  %v11175_v39 = vadd.bf16 %v11054_v7, %v1537_v9  ;;  %v18965_v47 = vmul.bf16 1056980736, %v11139_v8  ;;  %v18966_v25 = vmul.bf16 1056980736, %v11136_v0  ;;  %v1523_v30 = vpack.c.bf16 %v10949_v31, %v10935_v26 }
 0x124   : > { %9184 = vtanh.bf16 %v18971_v42  ;;  %v18973_v37 = vmul.bf16 1056980736, %v11128_v4  ;;  %v18970_v44 = vmul.bf16 1056980736, %v11131_v6  ;;  %v11195_v9 = vadd.bf16 %v11054_v7, %v1539_v21  ;;  %v19601_v21 = vld [vmem:[#allocation22_spill] sm:$0xff] }
 0x125   : > { %9186 = vtanh.bf16 %v18967_v15  ;;  %v11161_v35 = vpop.f32.mrf.mxu0  ;;  %v11163_v32 = vpop.f32.mrf.mxu1  ;;  %v18968_v55 = vmul.bf16 1056980736, %v11156_v23  ;;  %v11210_v57 = vcombine.low %v1652_v50, %v1664_v54  ;;  %v11216_v26 = vadd.bf16 %v11056_v59, %v1524_v3  ;;  %v19605_v50 = vld [vmem:[#allocation10_spill] sm:$0xff]  ;;  %v19611_v15 = vld [vmem:[#allocation8_spill] sm:$0xff] }
 0x126   : > { %19597 = vst [vmem:[#allocation34_spill] sm:$0xff] %v11163_v32  ;;  %9188 = vtanh.bf16 %v18973_v37  ;;  %v18972_v31 = vmul.bf16 1056980736, %v11153_v28  ;;  %v11224_v51 = vadd.bf16 %v11056_v59, %v1521_v52  ;;  %v18974_v1 = vmul.bf16 1056980736, %v11175_v39  ;;  %v19606_v54 = vld [vmem:[#allocation6_spill] sm:$0xff] }
 0x127   : > { %9190 = vtanh.bf16 %v18970_v44  ;;  %v11180_v60 = vpop.f32.mrf.mxu0  ;;  %v11182_v62 = vpop.f32.mrf.mxu1  ;;  %19600 = vst [vmem:[#allocation37_spill] sm:$0xff] %v11210_v57  ;;  %v19607_v3 = vpack.c.bf16 %v19605_v50, %v19606_v54  ;;  %v18980_v52 = vmul.bf16 1056980736, %v11187_v13  ;;  %v11254_v50 = vadd.bf16 %v11056_v59, %v1523_v30  ;;  %v19615_v30 = vld [vmem:[#allocation18_spill] sm:$0xff] }
 0x128   : > { %9192 = vtanh.bf16 %v18963_v45  ;;  %v19616_v37 = vld [vmem:[#allocation14_spill] sm:$0xff] }
 0x129   : > { %9194 = vtanh.bf16 %v18962_v24  ;;  %v11200_v18 = vpop.f32.mrf.mxu0  ;;  %v11202_v22 = vpop.f32.mrf.mxu1  ;;  %v19602_v24 = vld [vmem:[#allocation24_spill] sm:$0xff] }
 0x12a   : > { %19598 = vst [vmem:[#allocation35_spill] sm:$0xff] %v11200_v18  ;;  %19599 = vst [vmem:[#allocation36_spill] sm:$0xff] %v11202_v22  ;;  %9196 = vtanh.bf16 %v18964_v40  ;;  %v1505_v45 = vpack.c.bf16 %v19602_v24, %v19601_v21  ;;  %v11237_v40 = vadd.bf16 %v11079_v10, %v19607_v3  ;;  %v11243_v24 = vadd.bf16 %v11062_v5, %v1506_v16  ;;  %v11248_v21 = vpop.eup %9178  ;;  %v19622_v22 = vld [vmem:[#allocation7_spill] sm:$0xff] }
 0x12b   : > { %9198 = vtanh.bf16 %v18965_v47  ;;  %v11229_v29 = vpop.f32.mrf.mxu0  ;;  %v11231_v36 = vpop.f32.mrf.mxu1  ;;  %v11251_v47 = vadd.bf16 %v11062_v5, %v1508_v27  ;;  %v19617_v16 = vpack.c.bf16 %v19615_v30, %v19616_v37  ;;  %v19625_v30 = vld [vmem:[#allocation23_spill] sm:$0xff] }
 0x12c   : > { %19603 = vst [vmem:[#allocation22_spill] sm:$0xff] %v11229_v29  ;;  %19604 = vst [vmem:[#allocation24_spill] sm:$0xff] %v11231_v36  ;;  %9200 = vtanh.bf16 %v18966_v25  ;;  %v11270_v3 = vpop.eup %9180  ;;  %v19610_v25 = vld [vmem:[#allocation12_spill] sm:$0xff]  ;;  %v11279_v44 = vadd.bf16 %v11062_v5, %v1505_v45  ;;  %v19637_v36 = vld [vmem:[#allocation19_spill] sm:$0xff] }
 0x12d   : > { %9202 = vtanh.bf16 %v18968_v55  ;;  %v11259_v17 = vpop.f32.mrf.mxu0  ;;  %v11261_v33 = vpop.f32.mrf.mxu1  ;;  %v19612_v55 = vpack.c.bf16 %v19610_v25, %v19611_v15  ;;  %v11292_v15 = vadd.bf16 %v11210_v57, %v19617_v16  ;;  %v19619_v25 = vld [vmem:[#allocation16_spill] sm:$0xff]  ;;  %v19624_v16 = vld [vmem:[#allocation25_spill] sm:$0xff]  ;;  %v2338_v59 = vadd.bf16 1065369472, %v11270_v3 }
 0x12e   : > { %19608 = vst [vmem:[#allocation10_spill] sm:$0xff] %v11259_v17  ;;  %19609 = vst [vmem:[#allocation6_spill] sm:$0xff] %v11261_v33  ;;  %9204 = vtanh.bf16 %v18972_v31  ;;  %v19623_v33 = vpack.c.bf16 %v19621_v2, %v19622_v22  ;;  %v19626_v41 = vpack.c.bf16 %v19624_v16, %v19625_v30  ;;  %v19630_v2 = vld [vmem:[#allocation13_spill] sm:$0xff]  ;;  %v19649_v3 = vmul.bf16 1056980736, %v11128_v4 }
 0x12f   : > { %v11276_v14 = vadd.bf16 %v11079_v10, %v19612_v55  ;;  %9206 = vtanh.bf16 %v18974_v1  ;;  %v11284_v27 = vpop.f32.mrf.mxu0  ;;  %v11286_v31 = vpop.f32.mrf.mxu1  ;;  %v19618_v55 = vld [vmem:[#allocation20_spill] sm:$0xff]  ;;  %v19631_v22 = vld [vmem:[#allocation9_spill] sm:$0xff] }
 0x130   : > { %19613 = vst [vmem:[#allocation12_spill] sm:$0xff] %v11284_v27  ;;  %19614 = vst [vmem:[#allocation8_spill] sm:$0xff] %v11286_v31  ;;  %v19620_v54 = vpack.c.bf16 %v19618_v55, %v19619_v25  ;;  %9208 = vtanh.bf16 %v18980_v52  ;;  %v11303_v1 = vpop.eup %9182  ;;  %v11309_v37 = vadd.bf16 %v11079_v10, %v19623_v33  ;;  %v11315_v55 = vadd.bf16 %v11062_v5, %v19626_v41  ;;  %v19633_v16 = vld [vmem:[#allocation21_spill] sm:$0xff] }
 0x131   : > { %v19627_v25 = vmul.bf16 1056980736, %v11195_v9  ;;  %v11320_v52 = vpop.f32.mrf.mxu0  ;;  %v11322_v42 = vpop.f32.mrf.mxu1  ;;  %v19632_v33 = vpack.c.bf16 %v19630_v2, %v19631_v22  ;;  %v19634_v30 = vld [vmem:[#allocation17_spill] sm:$0xff]  ;;  %v19642_v27 = vmul.bf16 1056980736, %v11243_v24 }
 0x132   : > { %v11298_v45 = vadd.bf16 %v11210_v57, %v19620_v54  ;;  %19628 = vst [vmem:[#allocation18_spill] sm:$0xff] %v11320_v52  ;;  %19629 = vst [vmem:[#allocation14_spill] sm:$0xff] %v11322_v42  ;;  %v9185_v32 = vpop.eup %9184  ;;  %v19635_v41 = vpack.c.bf16 %v19633_v16, %v19634_v30  ;;  %v19638_v52 = vld [vmem:[#allocation15_spill] sm:$0xff]  ;;  %v19640_v16 = vmul.bf16 1056980736, %v11224_v51 }
 0x133   : > { %9210 = vtanh.bf16 %v19627_v25  ;;  %v11328_v18 = vadd.bf16 %v11079_v10, %v19632_v33  ;;  %v19636_v25 = vmul.bf16 1056980736, %v11216_v26  ;;  %v9187_v5 = vpop.eup %9186  ;;  %v19639_v2 = vpack.c.bf16 %v19637_v36, %v19638_v52  ;;  %v11349_v30 = vpop.f32.mrf.mxu0 }
 0x134   : > { %v11334_v17 = vadd.bf16 %v11210_v57, %v19635_v41  ;;  %v11351_v41 = vpop.f32.mrf.mxu1  ;;  %v9189_v54 = vpop.eup %9188  ;;  %v2353_v36 = vadd.bf16 1065369472, %v9185_v32  ;;  %v19643_v33 = vmul.bf16 1056980736, %v11254_v50  ;;  %v2355_v32 = vadd.bf16 1065369472, %v9187_v5 }
 0x135   : > { %9212 = vtanh.bf16 %v19636_v25  ;;  %v11344_v22 = vadd.bf16 %v11210_v57, %v19639_v2  ;;  %19641 = vst [vmem:[#allocation20_spill] sm:$0xff] %v11351_v41  ;;  %v9191_v52 = vpop.eup %9190  ;;  %v2354_v29 = vadd.bf16 1065369472, %v9189_v54  ;;  %v19646_v41 = vmul.bf16 1056980736, %v11251_v47 }
 0x136   : > { %9214 = vtanh.bf16 %v19640_v16  ;;  %v11360_v16 = vpop.f32.mrf.mxu0  ;;  %v11362_v57 = vpop.f32.mrf.mxu1  ;;  %v2356_v58 = vadd.bf16 1065369472, %v9191_v52  ;;  %v2340_v31 = vadd.bf16 1065369472, %v11303_v1  ;;  %v19655_v1 = vmul.bf16 1056980736, %v11131_v6 }
 0x137   : > { %9216 = vtanh.bf16 %v19642_v27  ;;  %19644 = vst [vmem:[#allocation16_spill] sm:$0xff] %v11360_v16  ;;  %19645 = vst [vmem:[#allocation11_spill] sm:$0xff] %v11362_v57  ;;  %v9193_v25 = vpop.eup %9192  ;;  %v2482_v54 = vmul.bf16 %v2354_v29, %v19649_v3  ;;  %v2337_v27 = vadd.bf16 1065369472, %v11248_v21  ;;  %v19656_v3 = vmul.bf16 1056980736, %v11067_v48 }
 0x138   : > { %9218 = vtanh.bf16 %v19643_v33  ;;  %v9195_v2 = vpop.eup %9194  ;;  %v19647_v33 = vmul.bf16 1056980736, %v11279_v44  ;;  %v11372_v16 = vpop.f32.mrf.mxu0  ;;  %v2484_v52 = vmul.bf16 %v2356_v58, %v19655_v1  ;;  %v2322_v5 = vadd.bf16 1065369472, %v9193_v25 }
 0x139   : > { %9220 = vtanh.bf16 %v19646_v41  ;;  %v11374_v7 = vpop.f32.mrf.mxu1  ;;  %v9197_v12 = vpop.eup %9196  ;;  %v19650_v41 = vmul.bf16 1056980736, %v11298_v45  ;;  %2561 = vmatprep.subr.bf16.mxu0 %v2482_v54  ;;  %v18999_v54 = vmul.bf16 1056980736, %v11237_v40  ;;  %v19659_v58 = vmul.bf16 1056980736, %v11292_v15 }
 0x13a   : > { %9222 = vtanh.bf16 %v19647_v33  ;;  %19648 = vst [vmem:[#allocation7_spill] sm:$0xff] %v11374_v7  ;;  %v19651_v33 = vmul.bf16 1056980736, %v11106_v38  ;;  %v9199_v57 = vpop.eup %9198  ;;  %v19652_v7 = vmul.bf16 1056980736, %v11315_v55  ;;  %v11387_v4 = vpop.f32.mrf.mxu0  ;;  %2674 = vmatprep.subr.bf16.mxu1 %v2484_v52 }
 0x13b   : > { %9224 = vtanh.bf16 %v19650_v41  ;;  %19653 = vst [vmem:[#allocation25_spill] sm:$0xff] %v11387_v4  ;;  %v11389_v29 = vpop.f32.mrf.mxu1  ;;  %v2466_v41 = vmul.bf16 %v2338_v59, %v19656_v3  ;;  %v9201_v21 = vpop.eup %9200  ;;  %v1988_v38 = vmul.bf16 1056980736, %v11328_v18  ;;  %v19660_v6 = vmul.bf16 1056980736, %v11077_v61 }
 0x13c   : > { %v2481_v42 = vmul.bf16 %v2353_v36, %v19651_v33  ;;  %9226 = vtanh.bf16 %v19652_v7  ;;  %19654 = vst [vmem:[#allocation23_spill] sm:$0xff] %v11389_v29  ;;  %v19657_v36 = vmul.bf16 1056980736, %v11334_v17  ;;  %v2339_v33 = vadd.bf16 1065369472, %v9195_v2  ;;  %v9203_v29 = vpop.eup %9202  ;;  %v11403_v59 = vpop.f32.mrf.mxu0 }
 0x13d   : > { %v19658_v7 = vmul.bf16 1056980736, %v11109_v11  ;;  %v11405_v48 = vpop.f32.mrf.mxu1  ;;  %v2468_v25 = vmul.bf16 %v2340_v31, %v19660_v6  ;;  %v2324_v2 = vadd.bf16 1065369472, %v9197_v12  ;;  %v9205_v1 = vpop.eup %9204  ;;  %v19661_v11 = vmul.bf16 1056980736, %v11276_v14 }
 0x13e   : > { %9228 = vtanh.bf16 %v19657_v36  ;;  %2562 = vmatpush1.bf16.msra.mxu0 %v2481_v42  ;;  %v2321_v42 = vadd.bf16 1065369472, %v9199_v57  ;;  %v9207_v36 = vpop.eup %9206  ;;  %v18998_v52 = vmul.bf16 1056980736, %v11309_v37  ;;  %v19664_v12 = vmul.bf16 1056980736, %v11100_v43 }
 0x13f   : > { %v2483_v4 = vmul.bf16 %v2355_v32, %v19658_v7  ;;  %9230 = vtanh.bf16 %v19659_v58  ;;  %2563 = vmatprep.subr.bf16.mxu0 %v2466_v41  ;;  %v19662_v32 = vmul.bf16 1056980736, %v11050_v53  ;;  %v19663_v7 = vmul.bf16 1056980736, %v11344_v22  ;;  %v11416_v41 = vpop.f32.mrf.mxu0  ;;  %v11418_v61 = vpop.f32.mrf.mxu1 }
 0x140   : > { %9232 = vtanh.bf16 %v19661_v11  ;;  %v2450_v31 = vmul.bf16 %v2322_v5, %v19664_v12  ;;  %v2306_v58 = vadd.bf16 1065369472, %v9201_v21  ;;  %v9209_v57 = vpop.eup %9208  ;;  %v2323_v53 = vadd.bf16 1065369472, %v9203_v29 }
 0x141   : > { %v2465_v3 = vmul.bf16 %v2337_v27, %v19662_v32  ;;  %2675 = vmatpush1.bf16.msra.mxu1 %v2483_v4  ;;  %9234 = vtanh.bf16 %v19663_v7  ;;  %v19665_v27 = vmul.bf16 1056980736, %v11117_v46  ;;  %v9211_v6 = vpop.eup %9210  ;;  %v11430_v11 = vpop.f32.mrf.mxu1  ;;  %v19666_v43 = vmul.bf16 1056980736, %v11114_v63 }
 0x142   : > { %2676 = vmatprep.subr.bf16.mxu1 %v2468_v25  ;;  %9236 = vtanh.bf16 %v1988_v38  ;;  %v11428_v25 = vpop.f32.mrf.mxu0  ;;  %v2308_v21 = vadd.bf16 1065369472, %v9205_v1  ;;  %v2305_v7 = vadd.bf16 1065369472, %v9207_v36  ;;  %v19667_v29 = vmul.bf16 1056980736, %v11139_v8 }
 0x143   : > { %v2467_v4 = vmul.bf16 %v2339_v33, %v19665_v27  ;;  %2564 = vmatpush1.bf16.msra.mxu0 %v2465_v3  ;;  %9238 = vtanh.bf16 %v18999_v54  ;;  %v2452_v5 = vmul.bf16 %v2324_v2, %v19666_v43  ;;  %v9213_v32 = vpop.eup %9212  ;;  %v11440_v12 = vpop.f32.mrf.mxu1  ;;  %v2290_v2 = vadd.bf16 1065369472, %v9209_v57 }
 0x144   : > { %2565 = vmatprep.subr.bf16.mxu0 %v2450_v31  ;;  %v2449_v46 = vmul.bf16 %v2321_v42, %v19667_v29  ;;  %v9215_v33 = vpop.eup %9214  ;;  %9240 = vtanh.bf16 %v18998_v52  ;;  %v11438_v3 = vpop.f32.mrf.mxu0  ;;  %v19668_v31 = vmul.bf16 1056980736, %v11136_v0  ;;  %v2307_v27 = vadd.bf16 1065369472, %v9211_v6 }
 0x145   : > { %2677 = vmatpush1.bf16.msra.mxu1 %v2467_v4  ;;  %v9217_v1 = vpop.eup %9216  ;;  %v19669_v36 = vmul.bf16 1056980736, %v11156_v23  ;;  %v11448_v43 = vpop.f32.mrf.mxu1  ;;  %v2292_v52 = vadd.bf16 1065369472, %v9213_v32  ;;  %v2289_v0 = vadd.bf16 1065369472, %v9215_v33 }
 0x146   : > { %2678 = vmatprep.subr.bf16.mxu1 %v2452_v5  ;;  %v2434_v63 = vmul.bf16 %v2306_v58, %v19668_v31  ;;  %v9219_v42 = vpop.eup %9218  ;;  %v11446_v4 = vpop.f32.mrf.mxu0  ;;  %v19670_v5 = vmul.bf16 1056980736, %v11153_v28  ;;  %v19671_v58 = vmul.bf16 1056980736, %v11175_v39 }
 0x147   : > { %v2451_v8 = vmul.bf16 %v2323_v53, %v19669_v36  ;;  %2566 = vmatpush1.bf16.msra.mxu0 %v2449_v46  ;;  %v9221_v54 = vpop.eup %9220  ;;  %v11456_v53 = vpop.f32.mrf.mxu1  ;;  %v19672_v46 = vmul.bf16 1056980736, %v11187_v13  ;;  %v2291_v28 = vadd.bf16 1065369472, %v9219_v42 }
 0x148   : > { %2567 = vmatprep.subr.bf16.mxu0 %v2434_v63  ;;  %v2436_v29 = vmul.bf16 %v2308_v21, %v19670_v5  ;;  %v2433_v57 = vmul.bf16 %v2305_v7, %v19671_v58  ;;  %v9223_v6 = vpop.eup %9222  ;;  %v11454_v23 = vpop.f32.mrf.mxu0  ;;  %v2274_v63 = vadd.bf16 1065369472, %v9217_v1  ;;  %v19673_v21 = vmul.bf16 1056980736, %v11195_v9 }
 0x149   : > { %2679 = vmatpush1.bf16.msra.mxu1 %v2451_v8  ;;  %v2418_v31 = vmul.bf16 %v2290_v2, %v19672_v46  ;;  %v9225_v36 = vpop.eup %9224  ;;  %v11464_v7 = vpop.f32.mrf.mxu1  ;;  %v19674_v8 = vmul.bf16 1056980736, %v11216_v26  ;;  %v2273_v13 = vadd.bf16 1065369472, %v9223_v6  ;;  %v19675_v2 = vmul.bf16 1056980736, %v11224_v51 }
 0x14a   : > { %2680 = vmatprep.subr.bf16.mxu1 %v2436_v29  ;;  %v2435_v32 = vmul.bf16 %v2307_v27, %v19673_v21  ;;  %v9227_v33 = vpop.eup %9226  ;;  %v11462_v39 = vpop.f32.mrf.mxu0  ;;  %v2276_v29 = vadd.bf16 1065369472, %v9221_v54  ;;  %v19677_v54 = vmul.bf16 1056980736, %v11254_v50 }
 0x14b   : > { %2568 = vmatpush1.bf16.msra.mxu0 %v2433_v57  ;;  %v2420_v5 = vmul.bf16 %v2292_v52, %v19674_v8  ;;  %v2417_v1 = vmul.bf16 %v2289_v0, %v19675_v2  ;;  %v11472_v27 = vpop.f32.mrf.mxu1  ;;  %v19676_v57 = vmul.bf16 1056980736, %v11243_v24  ;;  %v2275_v26 = vadd.bf16 1065369472, %v9227_v33 }
 0x14c   : > { %2569 = vmatprep.subr.bf16.mxu0 %v2418_v31  ;;  %v9229_v58 = vpop.eup %9228  ;;  %v11470_v9 = vpop.f32.mrf.mxu0  ;;  %v2258_v31 = vadd.bf16 1065369472, %v9225_v36  ;;  %v2419_v52 = vmul.bf16 %v2291_v28, %v19677_v54 }
 0x14d   : > { %2681 = vmatpush1.bf16.msra.mxu1 %v2435_v32  ;;  %v9231_v42 = vpop.eup %9230  ;;  %v2402_v46 = vmul.bf16 %v2274_v63, %v19676_v57  ;;  %v11480_v0 = vpop.f32.mrf.mxu1  ;;  %v19678_v32 = vmul.bf16 1056980736, %v11251_v47  ;;  %v19679_v63 = vmul.bf16 1056980736, %v11279_v44  ;;  %v19681_v47 = vmul.bf16 1056980736, %v11315_v55 }
 0x14e   : > { %2682 = vmatprep.subr.bf16.mxu1 %v2420_v5  ;;  %v9233_v21 = vpop.eup %9232  ;;  %v11478_v51 = vpop.f32.mrf.mxu0  ;;  %v2260_v5 = vadd.bf16 1065369472, %v9229_v58  ;;  %v2257_v24 = vadd.bf16 1065369472, %v9231_v42 }
 0x14f   : > { %2570 = vmatpush1.bf16.msra.mxu0 %v2417_v1  ;;  %v9235_v6 = vpop.eup %9234  ;;  %v2404_v8 = vmul.bf16 %v2276_v29, %v19678_v32  ;;  %v2401_v36 = vmul.bf16 %v2273_v13, %v19679_v63  ;;  %v11488_v28 = vpop.f32.mrf.mxu1  ;;  %v19680_v1 = vmul.bf16 1056980736, %v11298_v45  ;;  %v2403_v29 = vmul.bf16 %v2275_v26, %v19681_v47 }
 0x150   : > { %2571 = vmatprep.subr.bf16.mxu0 %v2402_v46  ;;  %v9237_v2 = vpop.eup %9236  ;;  %v11486_v50 = vpop.f32.mrf.mxu0  ;;  %v2242_v46 = vadd.bf16 1065369472, %v9233_v21  ;;  %v2259_v54 = vadd.bf16 1065369472, %v9235_v6  ;;  %v19682_v13 = vmul.bf16 1056980736, %v11334_v17 }
 0x151   : > { %2683 = vmatpush1.bf16.msra.mxu1 %v2419_v52  ;;  %v9239_v33 = vpop.eup %9238  ;;  %v2386_v57 = vmul.bf16 %v2258_v31, %v19680_v1  ;;  %v11496_v44 = vpop.f32.mrf.mxu1  ;;  %v2244_v32 = vadd.bf16 1065369472, %v9237_v2  ;;  %v19683_v45 = vmul.bf16 1056980736, %v11292_v15  ;;  %v19684_v26 = vmul.bf16 1056980736, %v11276_v14 }
 0x152   : > { %2684 = vmatprep.subr.bf16.mxu1 %v2404_v8  ;;  %v9241_v58 = vpop.eup %9240  ;;  %v11494_v42 = vpop.f32.mrf.mxu0  ;;  %v2388_v52 = vmul.bf16 %v2260_v5, %v19682_v13  ;;  %v2241_v8 = vadd.bf16 1065369472, %v9239_v33  ;;  %v19686_v2 = vmul.bf16 1056980736, %v11237_v40  ;;  %v11515_v14 = vld [vmem:[%s18931_s3] sm:$0xff]  }
 0x153   : > { %2572 = vmatpush1.bf16.msra.mxu0 %v2401_v36  ;;  %v2385_v31 = vmul.bf16 %v2257_v24, %v19683_v45  ;;  %v11502_v55 = vpop.f32.mrf.mxu1  ;;  %v2370_v6 = vmul.bf16 %v2242_v46, %v19684_v26  ;;  %v2243_v63 = vadd.bf16 1065369472, %v9241_v58  ;;  %v19685_v36 = vmul.bf16 1056980736, %v11344_v22 }
 0x154   : > { %2573 = vmatprep.subr.bf16.mxu0 %v2386_v57  ;;  %v889_v21 = vpop.f32.mrf.mxu0  ;;  %v2372_v15 = vmul.bf16 %v2244_v32, %v1988_v38  ;;  %v2369_v24 = vmul.bf16 %v2241_v8, %v19686_v2  ;;  %v19687_v22 = vmul.bf16 1056980736, %v11309_v37  ;;  %v1558_v45 = vpack.c.bf16 %v11494_v42, %v11478_v51  ;;  %v11560_v2 = vld [vmem:[%s18931_s3 + $0x8] sm:$0xff]  }
 0x155   : > { %2685 = vmatpush1.bf16.msra.mxu1 %v2403_v29  ;;  %v2387_v1 = vmul.bf16 %v2259_v54, %v19685_v36  ;;  %v1004_v5 = vpop.f32.mrf.mxu1  ;;  %v1528_v51 = vpack.c.bf16 %v11430_v11, %v11405_v48  ;;  %v1541_v42 = vpack.c.bf16 %v11454_v23, %v11438_v3  ;;  %v1560_v36 = vpack.c.bf16 %v11496_v44, %v11480_v0  ;;  %v19690_v44 = vld [vmem:[#allocation28_spill] sm:$0xff] }
 0x156   : > { %2686 = vmatprep.subr.bf16.mxu1 %v2388_v52  ;;  %v891_v17 = vpop.f32.mrf.mxu0  ;;  %v2371_v46 = vmul.bf16 %v2243_v63, %v19687_v22  ;;  %v19688_v52 = vpack.c.bf16 %v11161_v35, %v11121_v34  ;;  %v1526_v63 = vpack.c.bf16 %v11428_v25, %v11403_v59  ;;  %19689 = vst [vmem:[#allocation13_spill] sm:$0xff] %v11560_v2 }
 0x157   : > { %2574 = vmatpush1.bf16.msra.mxu0 %v2385_v31  ;;  %v1006_v57 = vpop.f32.mrf.mxu1  ;;  %v1544_v3 = vpack.c.bf16 %v11464_v7, %v11448_v43  ;;  %v1557_v0 = vpack.c.bf16 %v11486_v50, %v11470_v9  ;;  %v1559_v9 = vpack.c.bf16 %v11488_v28, %v11472_v27  ;;  %v11583_v50 = vadd.bf16 %v19690_v44, %v1560_v36 }
 0x158   : > { %2575 = vmatprep.subr.bf16.mxu0 %v2370_v6  ;;  %v893_v33 = vpop.f32.mrf.mxu0  ;;  %v11527_v37 = vadd.bf16 %v11079_v10, %v19688_v52  ;;  %v1510_v6 = vpack.c.bf16 %v11372_v16, %v11349_v30  ;;  %v19693_v52 = vld [vmem:[#allocation29_spill] sm:$0xff]  ;;  %v19716_v30 = vpack.c.bf16 %v11180_v60, %v11143_v20 }
 0x159   : > { %2687 = vmatpush1.bf16.msra.mxu1 %v2387_v1  ;;  %v1573_v54 = vpack.c.bf16 %v893_v33, %v889_v21  ;;  %v1008_v18 = vpop.f32.mrf.mxu1  ;;  %v1575_v1 = vpack.c.bf16 %v1006_v57, %v11502_v55  ;;  %v11569_v55 = vadd.bf16 %v19690_v44, %v1558_v45 }
 0x15a   : > { %2688 = vmatprep.subr.bf16.mxu1 %v2372_v15  ;;  %v895_v47 = vpop.f32.mrf.mxu0  ;;  %v1576_v29 = vpack.c.bf16 %v1008_v18, %v1004_v5 }
 0x15b   : > { %2576 = vmatpush1.bf16.msra.mxu0 %v2369_v24  ;;  %v11520_v38 = vadd.bf16 %v11029_v49, %v1573_v54  ;;  %v1574_v40 = vpack.c.bf16 %v895_v47, %v891_v17  ;;  %v1012_v13 = vpop.f32.mrf.mxu1  ;;  %v1542_v24 = vpack.c.bf16 %v11462_v39, %v11446_v4  ;;  %v19691_v54 = vld [vmem:[#allocation27_spill] sm:$0xff]  ;;  %v11586_v47 = vadd.bf16 %v11029_v49, %v1575_v1 }
 0x15c   : > { %v899_v58 = vpop.f32.mrf.mxu0  ;;  %v11539_v21 = vadd.bf16 %v11029_v49, %v1576_v29  ;;  %v19008_v1 = vmul.bf16 1056980736, %v11569_v55 }
 0x15d   : > { %2689 = vmatpush1.bf16.msra.mxu1 %v2371_v46  ;;  %v11530_v32 = vadd.bf16 %v11029_v49, %v1574_v40  ;;  %v19000_v31 = vmul.bf16 1056980736, %v11520_v38  ;;  %v1014_v35 = vpop.f32.mrf.mxu1  ;;  %v11607_v45 = vadd.bf16 %v19693_v52, %v1542_v24  ;;  %v19007_v24 = vmul.bf16 1056980736, %v11586_v47 }
 0x15e   : > { %2594 = vmatmul.mubr.bf16.vlgmr.msra.gmra.mxu0 %v11515_v14  ;;  %v901_v34 = vpop.f32.mrf.mxu0  ;;  %v19001_v57 = vmul.bf16 1056980736, %v11539_v21 }
 0x15f   : > { %2603 = vmatprep.mubr.bf16.mxu0 %v19589_v56  ;;  %v19002_v17 = vmul.bf16 1056980736, %v11530_v32  ;;  %v1016_v15 = vpop.f32.mrf.mxu1  ;;  %9242 = vtanh.bf16 %v19000_v31 }
 0x160   : > { %2707 = vmatmul.mubr.bf16.vlgmr.msra.gmra.mxu1 %v11515_v14  ;;  %v903_v5 = vpop.f32.mrf.mxu0  ;;  %v1591_v33 = vpack.c.bf16 %v1016_v15, %v1012_v13  ;;  %v1543_v13 = vpack.c.bf16 %v11456_v53, %v11440_v12  ;;  %v11629_v15 = vadd.bf16 %v19690_v44, %v1559_v9  ;;  %v11653_v9 = vadd.bf16 %v19693_v52, %v1541_v42 }
 0x161   : > { %2716 = vmatprep.mubr.bf16.mxu1 %v19589_v56  ;;  %v1589_v23 = vpack.c.bf16 %v903_v5, %v899_v58  ;;  %v1018_v46 = vpop.f32.mrf.mxu1  ;;  %9244 = vtanh.bf16 %v19002_v17  ;;  %v11626_v5 = vadd.bf16 %v19693_v52, %v1544_v3  ;;  %v19009_v3 = vmul.bf16 1056980736, %v11583_v50 }
 0x162   : > { %v905_v22 = vpop.f32.mrf.mxu0  ;;  %v11578_v43 = vadd.bf16 %v19691_v54, %v1591_v33  ;;  %v1592_v7 = vpack.c.bf16 %v1018_v46, %v1014_v35  ;;  %9246 = vtanh.bf16 %v19001_v57  ;;  %v19700_v46 = vld [vmem:[#allocation30_spill] sm:$0xff]  ;;  %v19012_v42 = vmul.bf16 1056980736, %v11607_v45 }
 0x163   : > { %v11575_v4 = vadd.bf16 %v19691_v54, %v1589_v23  ;;  %v1590_v39 = vpack.c.bf16 %v905_v22, %v901_v34  ;;  %v11592_v40 = vpop.f32.mrf.mxu1  ;;  %v11610_v34 = vadd.bf16 %v19690_v44, %v1557_v0  ;;  %v11641_v0 = vld [vmem:[%s18931_s3 + $0x10] sm:$0xff]   ;;  %v19699_v22 = vld [vmem:[#allocation7_spill] sm:$0xff]  ;;  %v19011_v26 = vmul.bf16 1056980736, %v11629_v15 }
 0x164   : > { %v11590_v18 = vpop.f32.mrf.mxu0  ;;  %19692 = vst [vmem:[#allocation9_spill] sm:$0xff] %v11592_v40  ;;  %v19003_v58 = vmul.bf16 1056980736, %v11578_v43  ;;  %v11601_v28 = vadd.bf16 %v19691_v54, %v1592_v7  ;;  %19695 = vst [vmem:[#allocation17_spill] sm:$0xff] %v11641_v0 }
 0x165   : > { %v19004_v29 = vmul.bf16 1056980736, %v11575_v4  ;;  %v11598_v27 = vadd.bf16 %v19691_v54, %v1590_v39  ;;  %v11617_v36 = vpop.f32.mrf.mxu1  ;;  %v19696_v39 = vld [vmem:[#allocation25_spill] sm:$0xff]  ;;  %v19010_v31 = vmul.bf16 1056980736, %v11610_v34 }
 0x166   : > { %2604 = vmatmul.mubr.bf16.gmra.mxu0 %v11560_v2  ;;  %v11615_v35 = vpop.f32.mrf.mxu0  ;;  %v19005_v53 = vmul.bf16 1056980736, %v11601_v28  ;;  %v1525_v7 = vpack.c.bf16 %v11416_v41, %v19696_v39  ;;  %v11668_v41 = vadd.bf16 %v19700_v46, %v1526_v63  ;;  %v19701_v39 = vld [vmem:[#allocation23_spill] sm:$0xff]  ;;  %v19704_v63 = vld [vmem:[#allocation22_spill] sm:$0xff] }
 0x167   : > { %2613 = vmatprep.mubr.bf16.mxu0 %v19589_v56  ;;  %9248 = vtanh.bf16 %v19004_v29  ;;  %v19006_v12 = vmul.bf16 1056980736, %v11598_v27  ;;  %v11636_v33 = vpop.f32.mrf.mxu1 }
 0x168   : > { %2717 = vmatmul.mubr.bf16.gmra.mxu1 %v11560_v2  ;;  %9250 = vtanh.bf16 %v19003_v58  ;;  %v11634_v23 = vpop.f32.mrf.mxu0  ;;  %19694 = vst [vmem:[#allocation21_spill] sm:$0xff] %v11636_v33  ;;  %v19698_v58 = vld [vmem:[#allocation20_spill] sm:$0xff]  ;;  %v11701_v8 = vadd.bf16 %v19700_v46, %v1525_v7 }
 0x169   : > { %2726 = vmatprep.mubr.bf16.mxu1 %v19589_v56  ;;  %9252 = vtanh.bf16 %v19006_v12  ;;  %v11660_v17 = vpop.f32.mrf.mxu1  ;;  %v1512_v29 = vpack.c.bf16 %v19699_v22, %v19698_v58  ;;  %v11676_v12 = vadd.bf16 %v19693_v52, %v1543_v13  ;;  %v19705_v58 = vld [vmem:[#allocation12_spill] sm:$0xff]  ;;  %v19014_v13 = vmul.bf16 1056980736, %v11626_v5 }
 0x16a   : > { %9254 = vtanh.bf16 %v19005_v53  ;;  %v11658_v57 = vpop.f32.mrf.mxu0  ;;  %19697 = vst [vmem:[#allocation19_spill] sm:$0xff] %v11660_v17  ;;  %v1527_v53 = vpack.c.bf16 %v11418_v61, %v19701_v39  ;;  %v1494_v22 = vpack.c.bf16 %v19705_v58, %v19704_v63  ;;  %v11692_v61 = vadd.bf16 %v19700_v46, %v1528_v51  ;;  %v19706_v39 = vld [vmem:[#allocation18_spill] sm:$0xff]  ;;  %v19710_v51 = vld [vmem:[#allocation24_spill] sm:$0xff] }
 0x16b   : > { %9256 = vtanh.bf16 %v19008_v1  ;;  %v11683_v25 = vpop.f32.mrf.mxu1  ;;  %v19711_v58 = vld [vmem:[#allocation8_spill] sm:$0xff] }
 0x16c   : > { %9258 = vtanh.bf16 %v19007_v24  ;;  %v11681_v59 = vpop.f32.mrf.mxu0  ;;  %19703 = vst [vmem:[#allocation25_spill] sm:$0xff] %v11683_v25  ;;  %v19707_v24 = vld [vmem:[#allocation16_spill] sm:$0xff]  ;;  %v19721_v25 = vld [vmem:[#allocation35_spill] sm:$0xff] }
 0x16d   : > { %19702 = vst [vmem:[#allocation15_spill] sm:$0xff] %v11681_v59  ;;  %9260 = vtanh.bf16 %v19009_v3  ;;  %v1509_v1 = vpack.c.bf16 %v19707_v24, %v19706_v39  ;;  %v11709_v11 = vpop.f32.mrf.mxu1  ;;  %v1496_v3 = vpack.c.bf16 %v19711_v58, %v19710_v51  ;;  %v19712_v24 = vld [vmem:[#allocation31_spill] sm:$0xff]  ;;  %v11729_v51 = vadd.bf16 %v19700_v46, %v1527_v53  ;;  %v11741_v58 = vld [vmem:[%s18931_s3 + $0x18] sm:$0xff]  }
 0x16e   : > { %2614 = vmatmul.mubr.bf16.gmra.mxu0 %v11641_v0  ;;  %9262 = vtanh.bf16 %v19010_v31  ;;  %v11707_v48 = vpop.f32.mrf.mxu0  ;;  %19709 = vst [vmem:[#allocation7_spill] sm:$0xff] %v11709_v11  ;;  %v11717_v7 = vadd.bf16 %v19712_v24, %v1510_v6  ;;  %v11723_v31 = vpop.eup %9242  ;;  %v11726_v63 = vadd.bf16 %v19712_v24, %v1512_v29  ;;  %19715 = vst [vmem:[#allocation12_spill] sm:$0xff] %v11741_v58  ;;  %v19723_v59 = vld [vmem:[#allocation37_spill] sm:$0xff] }
 0x16f   : > { %2623 = vmatprep.mubr.bf16.mxu0 %v19589_v56  ;;  %19708 = vst [vmem:[#allocation20_spill] sm:$0xff] %v11707_v48  ;;  %9264 = vtanh.bf16 %v19012_v42  ;;  %v11736_v6 = vpop.f32.mrf.mxu1  ;;  %v11750_v42 = vpop.eup %9244  ;;  %v11756_v39 = vadd.bf16 %v11079_v10, %v19716_v30  ;;  %v11759_v40 = vadd.bf16 %v19712_v24, %v1509_v1  ;;  %v11775_v60 = vadd.bf16 %v19723_v59, %v1494_v22 }
 0x170   : > { %2727 = vmatmul.mubr.bf16.gmra.mxu1 %v11641_v0  ;;  %9266 = vtanh.bf16 %v19011_v26  ;;  %v11734_v16 = vpop.f32.mrf.mxu0  ;;  %19714 = vst [vmem:[#allocation22_spill] sm:$0xff] %v11736_v6  ;;  %v19720_v26 = vld [vmem:[#allocation10_spill] sm:$0xff]  ;;  %v19724_v30 = vmul.bf16 1056980736, %v11668_v41  ;;  %v11780_v29 = vpop.eup %9246  ;;  %v19728_v22 = vmul.bf16 1056980736, %v11676_v12 }
 0x171   : > { %2736 = vmatprep.mubr.bf16.mxu1 %v19589_v56  ;;  %19713 = vst [vmem:[#allocation23_spill] sm:$0xff] %v11734_v16  ;;  %9268 = vtanh.bf16 %v19014_v13  ;;  %v19717_v13 = vmul.bf16 1056980736, %v11653_v9  ;;  %v11766_v33 = vpop.f32.mrf.mxu1  ;;  %v19722_v6 = vpack.c.bf16 %v19720_v26, %v19721_v25  ;;  %v19725_v16 = vld [vmem:[#allocation11_spill] sm:$0xff]  ;;  %v19735_v25 = vmul.bf16 1056980736, %v11692_v61 }
 0x172   : > { %v11764_v53 = vpop.f32.mrf.mxu0  ;;  %19719 = vst [vmem:[#allocation16_spill] sm:$0xff] %v11766_v33  ;;  %v19726_v33 = vld [vmem:[#allocation14_spill] sm:$0xff]  ;;  %v19743_v46 = vmul.bf16 1056980736, %v11729_v51  ;;  %v19746_v2 = vmul.bf16 1056980736, %v11726_v63 }
 0x173   : > { %9270 = vtanh.bf16 %v19717_v13  ;;  %19718 = vst [vmem:[#allocation18_spill] sm:$0xff] %v11764_v53  ;;  %v11772_v20 = vadd.bf16 %v19723_v59, %v19722_v6  ;;  %v11783_v13 = vadd.bf16 %v19723_v59, %v1496_v3  ;;  %v19727_v11 = vpack.c.bf16 %v19725_v16, %v19726_v33  ;;  %v11796_v1 = vpop.f32.mrf.mxu1  ;;  %v19731_v3 = vld [vmem:[#allocation34_spill] sm:$0xff]  ;;  %v19732_v53 = vld [vmem:[#allocation33_spill] sm:$0xff] }
 0x174   : > { %9272 = vtanh.bf16 %v19724_v30  ;;  %v11794_v6 = vpop.f32.mrf.mxu0  ;;  %19730 = vst [vmem:[#allocation8_spill] sm:$0xff] %v11796_v1  ;;  %v19733_v48 = vpack.c.bf16 %v19731_v3, %v19732_v53  ;;  %v19736_v53 = vld [vmem:[#allocation6_spill] sm:$0xff]  ;;  %v19737_v3 = vld [vmem:[#allocation36_spill] sm:$0xff] }
 0x175   : > { %v11789_v26 = vadd.bf16 %v19712_v24, %v19727_v11  ;;  %9274 = vtanh.bf16 %v19728_v22  ;;  %19729 = vst [vmem:[#allocation24_spill] sm:$0xff] %v11794_v6  ;;  %v9249_v30 = vpop.eup %9248  ;;  %v19734_v11 = vpack.c.bf16 %v11182_v62, %v11145_v19  ;;  %v19739_v19 = vmul.bf16 1056980736, %v11701_v8  ;;  %v11833_v6 = vld [vmem:[%s18931_s3 + $0x20] sm:$0xff]  }
 0x176   : > { %2624 = vmatmul.mubr.bf16.gmra.mxu0 %v11741_v58  ;;  %v11803_v33 = vadd.bf16 %v11079_v10, %v19733_v48  ;;  %9276 = vtanh.bf16 %v19735_v25  ;;  %v9251_v24 = vpop.eup %9250  ;;  %v19738_v48 = vpack.c.bf16 %v19736_v53, %v19737_v3  ;;  %v11828_v25 = vpop.f32.mrf.mxu1  ;;  %v19742_v62 = vmul.bf16 1056980736, %v11717_v7 }
 0x177   : > { %v11809_v16 = vadd.bf16 %v11079_v10, %v19734_v11  ;;  %2633 = vmatprep.mubr.bf16.mxu0 %v19589_v56  ;;  %9278 = vtanh.bf16 %v19739_v19  ;;  %v11826_v11 = vpop.f32.mrf.mxu0  ;;  %19741 = vst [vmem:[#allocation35_spill] sm:$0xff] %v11828_v25  ;;  %v9253_v53 = vpop.eup %9252  ;;  %v2357_v19 = vadd.bf16 1065369472, %v9249_v30  ;;  %v2359_v30 = vadd.bf16 1065369472, %v9251_v24 }
 0x178   : > { %v11820_v0 = vadd.bf16 %v19723_v59, %v19738_v48  ;;  %2737 = vmatmul.mubr.bf16.gmra.mxu1 %v11741_v58  ;;  %19740 = vst [vmem:[#allocation10_spill] sm:$0xff] %v11826_v11  ;;  %9280 = vtanh.bf16 %v19742_v62  ;;  %v9255_v22 = vpop.eup %9254  ;;  %v11846_v52 = vpop.f32.mrf.mxu1  ;;  %v2358_v3 = vadd.bf16 1065369472, %v9253_v53  ;;  %v2342_v58 = vadd.bf16 1065369472, %v11750_v42 }
 0x179   : > { %2746 = vmatprep.mubr.bf16.mxu1 %v19589_v56  ;;  %9282 = vtanh.bf16 %v19743_v46  ;;  %v11844_v25 = vpop.f32.mrf.mxu0  ;;  %19745 = vst [vmem:[#allocation14_spill] sm:$0xff] %v11846_v52  ;;  %v9257_v48 = vpop.eup %9256  ;;  %v19747_v59 = vmul.bf16 1056980736, %v11759_v40  ;;  %v19749_v53 = vmul.bf16 1056980736, %v11598_v27 }
 0x17a   : > { %19744 = vst [vmem:[#allocation11_spill] sm:$0xff] %v11844_v25  ;;  %9284 = vtanh.bf16 %v19746_v2  ;;  %v9259_v54 = vpop.eup %9258  ;;  %v11857_v25 = vpop.f32.mrf.mxu1  ;;  %v2360_v11 = vadd.bf16 1065369472, %v9255_v22  ;;  %v2344_v2 = vadd.bf16 1065369472, %v11780_v29 }
 0x17b   : > { %9286 = vtanh.bf16 %v19747_v59  ;;  %v11855_v46 = vpop.f32.mrf.mxu0  ;;  %19748 = vst [vmem:[#allocation34_spill] sm:$0xff] %v11857_v25  ;;  %v2486_v44 = vmul.bf16 %v2358_v3, %v19749_v53  ;;  %v9261_v24 = vpop.eup %9260  ;;  %v19750_v62 = vmul.bf16 1056980736, %v11775_v60  ;;  %v2341_v42 = vadd.bf16 1065369472, %v11723_v31 }
 0x17c   : > { %v19751_v59 = vmul.bf16 1056980736, %v11575_v4  ;;  %v9263_v52 = vpop.eup %9262  ;;  %v19752_v27 = vmul.bf16 1056980736, %v11789_v26  ;;  %v11873_v29 = vpop.f32.mrf.mxu1  ;;  %v19754_v3 = vmul.bf16 1056980736, %v11601_v28 }
 0x17d   : > { %9288 = vtanh.bf16 %v19750_v62  ;;  %v11871_v22 = vpop.f32.mrf.mxu0  ;;  %19753 = vst [vmem:[#allocation33_spill] sm:$0xff] %v11873_v29  ;;  %2787 = vmatprep.subr.bf16.mxu0 %v2486_v44  ;;  %v2326_v31 = vadd.bf16 1065369472, %v9257_v48  ;;  %v9265_v53 = vpop.eup %9264  ;;  %v19755_v4 = vmul.bf16 1056980736, %v11783_v13 }
 0x17e   : > { %v2485_v1 = vmul.bf16 %v2357_v19, %v19751_v59  ;;  %9290 = vtanh.bf16 %v19752_v27  ;;  %2634 = vmatmul.mubr.bf16.gmra.mxu0 %v11833_v6  ;;  %v2488_v62 = vmul.bf16 %v2360_v11, %v19754_v3  ;;  %v2343_v19 = vadd.bf16 1065369472, %v9259_v54  ;;  %v9267_v29 = vpop.eup %9266  ;;  %v11891_v54 = vpop.f32.mrf.mxu1 }
 0x17f   : > { %9292 = vtanh.bf16 %v19755_v4  ;;  %v19756_v59 = vmul.bf16 1056980736, %v11578_v43  ;;  %v19757_v27 = vmul.bf16 1056980736, %v11530_v32  ;;  %2643 = vmatprep.mubr.bf16.mxu0 %v19589_v56  ;;  %v19037_v44 = vmul.bf16 1056980736, %v11527_v37  ;;  %v11889_v11 = vpop.f32.mrf.mxu0 }
 0x180   : > { %2788 = vmatpush1.bf16.msra.mxu0 %v2485_v1  ;;  %v19758_v28 = vmul.bf16 1056980736, %v11772_v20  ;;  %2747 = vmatmul.mubr.bf16.gmra.mxu1 %v11833_v6  ;;  %v19759_v43 = vmul.bf16 1056980736, %v11539_v21  ;;  %v2328_v32 = vadd.bf16 1065369472, %v9261_v24 }
 0x181   : > { %v2487_v17 = vmul.bf16 %v2359_v30, %v19756_v59  ;;  %v2470_v25 = vmul.bf16 %v2342_v58, %v19757_v27  ;;  %2900 = vmatprep.subr.bf16.mxu1 %v2488_v62  ;;  %v9269_v58 = vpop.eup %9268  ;;  %v19760_v48 = vmul.bf16 1056980736, %v11756_v39  ;;  %v2325_v30 = vadd.bf16 1065369472, %v9263_v52  ;;  %v11902_v21 = vpop.f32.mrf.mxu0  ;;  %2756 = vmatprep.mubr.bf16.mxu1 %v19589_v56 }
 0x182   : > { %9294 = vtanh.bf16 %v19758_v28  ;;  %v2472_v1 = vmul.bf16 %v2344_v2, %v19759_v43  ;;  %v19761_v3 = vmul.bf16 1056980736, %v11520_v38  ;;  %v9271_v59 = vpop.eup %9270  ;;  %v19036_v62 = vmul.bf16 1056980736, %v11803_v33  ;;  %v11904_v2 = vpop.f32.mrf.mxu1  ;;  %v11912_v38 = vld [vmem:[%s18931_s3 + $0x28] sm:$0xff]  }
 0x183   : > { %9296 = vtanh.bf16 %v19760_v48  ;;  %2901 = vmatpush1.bf16.msra.mxu1 %v2487_v17  ;;  %2789 = vmatprep.subr.bf16.mxu0 %v2470_v25  ;;  %v19762_v27 = vmul.bf16 1056980736, %v11820_v0  ;;  %v19763_v24 = vmul.bf16 1056980736, %v11569_v55  ;;  %19764 = vst [vmem:[#allocation6_spill] sm:$0xff] %v11912_v38  ;;  %v9273_v52 = vpop.eup %9272  ;;  %v11920_v55 = vpop.f32.mrf.mxu0 }
 0x184   : > { %v2469_v4 = vmul.bf16 %v2341_v42, %v19761_v3  ;;  %2902 = vmatprep.subr.bf16.mxu1 %v2472_v1  ;;  %v2310_v17 = vadd.bf16 1065369472, %v9265_v53  ;;  %v19765_v25 = vmul.bf16 1056980736, %v11809_v16  ;;  %v2327_v42 = vadd.bf16 1065369472, %v9267_v29  ;;  %v9275_v48 = vpop.eup %9274 }
 0x185   : > { %9298 = vtanh.bf16 %v19762_v27  ;;  %v2454_v28 = vmul.bf16 %v2326_v31, %v19763_v24  ;;  %v19766_v43 = vmul.bf16 1056980736, %v11586_v47  ;;  %v11922_v31 = vpop.f32.mrf.mxu1  ;;  %v19767_v53 = vmul.bf16 1056980736, %v11583_v50  ;;  %v9277_v24 = vpop.eup %9276 }
 0x186   : > { %9300 = vtanh.bf16 %v19765_v25  ;;  %2790 = vmatpush1.bf16.msra.mxu0 %v2469_v4  ;;  %v2312_v27 = vadd.bf16 1065369472, %v9269_v58  ;;  %v2309_v25 = vadd.bf16 1065369472, %v9271_v59  ;;  %v19768_v29 = vmul.bf16 1056980736, %v11610_v34  ;;  %v11930_v4 = vpop.f32.mrf.mxu0 }
 0x187   : > { %v2471_v1 = vmul.bf16 %v2343_v19, %v19766_v43  ;;  %9302 = vtanh.bf16 %v19037_v44  ;;  %2791 = vmatprep.subr.bf16.mxu0 %v2454_v28  ;;  %v2456_v3 = vmul.bf16 %v2328_v32, %v19767_v53  ;;  %v9279_v19 = vpop.eup %9278  ;;  %v11932_v43 = vpop.f32.mrf.mxu1  ;;  %2644 = vmatmul.mubr.bf16.gmra.mxu0 %v11912_v38  ;;  %v19769_v50 = vmul.bf16 1056980736, %v11607_v45 }
 0x188   : > { %v2453_v47 = vmul.bf16 %v2325_v30, %v19768_v29  ;;  %9304 = vtanh.bf16 %v19036_v62  ;;  %v2294_v58 = vadd.bf16 1065369472, %v9273_v52  ;;  %v9281_v59 = vpop.eup %9280  ;;  %v2311_v28 = vadd.bf16 1065369472, %v9275_v48  ;;  %2653 = vmatprep.mubr.bf16.mxu0 %v19589_v56  ;;  %2757 = vmatmul.mubr.bf16.gmra.mxu1 %v11912_v38  ;;  %v11941_v53 = vpop.f32.mrf.mxu0 }
 0x189   : > { %2903 = vmatpush1.bf16.msra.mxu1 %v2471_v1  ;;  %v2438_v32 = vmul.bf16 %v2310_v17, %v19769_v50  ;;  %v19770_v34 = vmul.bf16 1056980736, %v11629_v15  ;;  %v9283_v1 = vpop.eup %9282  ;;  %v19771_v45 = vmul.bf16 1056980736, %v11626_v5  ;;  %v2296_v52 = vadd.bf16 1065369472, %v9277_v24  ;;  %2766 = vmatprep.mubr.bf16.mxu1 %v19589_v56 }
 0x18a   : > { %2904 = vmatprep.subr.bf16.mxu1 %v2456_v3  ;;  %2792 = vmatpush1.bf16.msra.mxu0 %v2453_v47  ;;  %v11943_v3 = vpop.f32.mrf.mxu1  ;;  %v9285_v29 = vpop.eup %9284  ;;  %v2293_v48 = vadd.bf16 1065369472, %v9279_v19  ;;  %v19772_v15 = vmul.bf16 1056980736, %v11653_v9  ;;  %v11959_v5 = vld [vmem:[%s18931_s3 + $0x30] sm:$0xff]  }
 0x18b   : > { %v2455_v30 = vmul.bf16 %v2327_v42, %v19770_v34  ;;  %2793 = vmatprep.subr.bf16.mxu0 %v2438_v32  ;;  %v2440_v17 = vmul.bf16 %v2312_v27, %v19771_v45  ;;  %v9287_v47 = vpop.eup %9286  ;;  %v11950_v50 = vpop.f32.mrf.mxu0  ;;  %v19773_v32 = vmul.bf16 1056980736, %v11668_v41  ;;  %v2278_v27 = vadd.bf16 1065369472, %v9281_v59 }
 0x18c   : > { %v2437_v42 = vmul.bf16 %v2309_v25, %v19772_v15  ;;  %v11952_v34 = vpop.f32.mrf.mxu1  ;;  %v9289_v9 = vpop.eup %9288  ;;  %v2295_v24 = vadd.bf16 1065369472, %v9283_v1  ;;  %v19774_v25 = vmul.bf16 1056980736, %v11676_v12  ;;  %v19775_v41 = vmul.bf16 1056980736, %v11692_v61 }
 0x18d   : > { %2905 = vmatpush1.bf16.msra.mxu1 %v2455_v30  ;;  %v2422_v62 = vmul.bf16 %v2294_v58, %v19773_v32  ;;  %v9291_v30 = vpop.eup %9290  ;;  %v11963_v45 = vpop.f32.mrf.mxu0  ;;  %v2280_v15 = vadd.bf16 1065369472, %v9285_v29  ;;  %v2277_v44 = vadd.bf16 1065369472, %v9287_v47  ;;  %v19776_v59 = vmul.bf16 1056980736, %v11701_v8 }
 0x18e   : > { %2906 = vmatprep.subr.bf16.mxu1 %v2440_v17  ;;  %v2439_v19 = vmul.bf16 %v2311_v28, %v19774_v25  ;;  %2794 = vmatpush1.bf16.msra.mxu0 %v2437_v42  ;;  %v11965_v17 = vpop.f32.mrf.mxu1  ;;  %v2424_v58 = vmul.bf16 %v2296_v52, %v19775_v41  ;;  %v9293_v32 = vpop.eup %9292  ;;  %v2262_v61 = vadd.bf16 1065369472, %v9289_v9  ;;  %v2279_v29 = vadd.bf16 1065369472, %v9291_v30 }
 0x18f   : > { %2795 = vmatprep.subr.bf16.mxu0 %v2422_v62  ;;  %v2421_v38 = vmul.bf16 %v2293_v48, %v19776_v59  ;;  %v11971_v12 = vpop.f32.mrf.mxu0  ;;  %2654 = vmatmul.mubr.bf16.gmra.mxu0 %v11959_v5  ;;  %v19777_v62 = vmul.bf16 1056980736, %v11717_v7  ;;  %v19778_v47 = vmul.bf16 1056980736, %v11729_v51  ;;  %v19779_v7 = vmul.bf16 1056980736, %v11726_v63 }
 0x190   : > { %v9295_v1 = vpop.eup %9294  ;;  %v11973_v28 = vpop.f32.mrf.mxu1  ;;  %2663 = vmatprep.mubr.bf16.mxu0 %v19589_v56  ;;  %2767 = vmatmul.mubr.bf16.gmra.mxu1 %v11959_v5  ;;  %v2264_v9 = vadd.bf16 1065369472, %v9293_v32  ;;  %v19780_v51 = vmul.bf16 1056980736, %v11759_v40  ;;  %v12000_v63 = vld [vmem:[%s18931_s3 + $0x38] sm:$0xff]  }
 0x191   : > { %2907 = vmatpush1.bf16.msra.mxu1 %v2439_v19  ;;  %v2406_v42 = vmul.bf16 %v2278_v27, %v19777_v62  ;;  %v9297_v52 = vpop.eup %9296  ;;  %v2423_v25 = vmul.bf16 %v2295_v24, %v19778_v47  ;;  %v11982_v48 = vpop.f32.mrf.mxu0  ;;  %v2408_v27 = vmul.bf16 %v2280_v15, %v19779_v7  ;;  %v2261_v30 = vadd.bf16 1065369472, %v9295_v1  ;;  %2776 = vmatprep.mubr.bf16.mxu1 %v19589_v56 }
 0x192   : > { %2908 = vmatprep.subr.bf16.mxu1 %v2424_v58  ;;  %2796 = vmatpush1.bf16.msra.mxu0 %v2421_v38  ;;  %v11984_v19 = vpop.f32.mrf.mxu1  ;;  %v2405_v24 = vmul.bf16 %v2277_v44, %v19780_v51  ;;  %v19781_v62 = vmul.bf16 1056980736, %v11775_v60  ;;  %v2246_v15 = vadd.bf16 1065369472, %v9297_v52  ;;  %v19782_v44 = vmul.bf16 1056980736, %v11789_v26 }
 0x193   : > { %v9299_v8 = vpop.eup %9298  ;;  %2797 = vmatprep.subr.bf16.mxu0 %v2406_v42  ;;  %v11991_v58 = vpop.f32.mrf.mxu0  ;;  %v19783_v60 = vmul.bf16 1056980736, %v11783_v13  ;;  %v19784_v51 = vmul.bf16 1056980736, %v11772_v20 }
 0x194   : > { %v9301_v41 = vpop.eup %9300  ;;  %v11993_v59 = vpop.f32.mrf.mxu1  ;;  %v2390_v42 = vmul.bf16 %v2262_v61, %v19781_v62  ;;  %v2263_v40 = vadd.bf16 1065369472, %v9299_v8  ;;  %v2407_v32 = vmul.bf16 %v2279_v29, %v19782_v44  ;;  %v19785_v29 = vmul.bf16 1056980736, %v11756_v39 }
 0x195   : > { %2909 = vmatpush1.bf16.msra.mxu1 %v2423_v25  ;;  %v9303_v38 = vpop.eup %9302  ;;  %v12004_v47 = vpop.f32.mrf.mxu0  ;;  %v2392_v61 = vmul.bf16 %v2264_v9, %v19783_v60  ;;  %v2248_v7 = vadd.bf16 1065369472, %v9301_v41  ;;  %v2389_v62 = vmul.bf16 %v2261_v30, %v19784_v51  ;;  %v19787_v41 = vmul.bf16 1056980736, %v11809_v16 }
 0x196   : > { %2910 = vmatprep.subr.bf16.mxu1 %v2408_v27  ;;  %2798 = vmatpush1.bf16.msra.mxu0 %v2405_v24  ;;  %v9305_v1 = vpop.eup %9304  ;;  %v12006_v25 = vpop.f32.mrf.mxu1  ;;  %v2245_v27 = vadd.bf16 1065369472, %v9303_v38  ;;  %v2374_v8 = vmul.bf16 %v2246_v15, %v19785_v29  ;;  %v19788_v38 = vmul.bf16 1056980736, %v11527_v37  ;;  %v19789_v15 = vmul.bf16 1056980736, %v11803_v33 }
 0x197   : > { %2799 = vmatprep.subr.bf16.mxu0 %v2390_v42  ;;  %v1115_v52 = vpop.f32.mrf.mxu0  ;;  %2664 = vmatmul.mubr.bf16.gmra.mxu0 %v12000_v63  ;;  %v2247_v24 = vadd.bf16 1065369472, %v9305_v1  ;;  %v19786_v42 = vmul.bf16 1056980736, %v11820_v0  ;;  %v2376_v30 = vmul.bf16 %v2248_v7, %v19787_v41  ;;  %v19790_v51 = vpack.c.bf16 %v11634_v23, %v11590_v18 }
 0x198   : > { %v12012_v26 = vpop.f32.mrf.mxu1  ;;  %2819 = vmatprep.mubr.bf16.mxu0 %v19589_v56  ;;  %2777 = vmatmul.mubr.bf16.gmra.mxu1 %v12000_v63  ;;  %v2373_v44 = vmul.bf16 %v2245_v27, %v19788_v38  ;;  %v1562_v29 = vpack.c.bf16 %v12004_v47, %v11982_v48  ;;  %v1530_v41 = vpack.c.bf16 %v11920_v55, %v11889_v11 }
 0x199   : > { %2911 = vmatpush1.bf16.msra.mxu1 %v2407_v32  ;;  %v2391_v13 = vmul.bf16 %v2263_v40, %v19786_v42  ;;  %v1117_v20 = vpop.f32.mrf.mxu0  ;;  %2932 = vmatprep.mubr.bf16.mxu1 %v19589_v56  ;;  %v2375_v40 = vmul.bf16 %v2247_v24, %v19789_v15  ;;  %v12036_v33 = vadd.bf16 %v11079_v10, %v19790_v51  ;;  %v19791_v42 = vld [vmem:[#allocation19_spill] sm:$0xff] }
 0x19a   : > { %2912 = vmatprep.subr.bf16.mxu1 %v2392_v61  ;;  %2800 = vmatpush1.bf16.msra.mxu0 %v2389_v62  ;;  %v1230_v9 = vpop.f32.mrf.mxu1  ;;  %v1532_v48 = vpack.c.bf16 %v11922_v31, %v11891_v54  ;;  %v1545_v47 = vpack.c.bf16 %v11950_v50, %v11930_v4  ;;  %v1546_v15 = vpack.c.bf16 %v11963_v45, %v11941_v53  ;;  %v19793_v50 = vld [vmem:[#allocation28_spill] sm:$0xff] }
 0x19b   : > { %2801 = vmatprep.subr.bf16.mxu0 %v2374_v8  ;;  %v1119_v0 = vpop.f32.mrf.mxu0  ;;  %v1561_v4 = vpack.c.bf16 %v11991_v58, %v11971_v12  ;;  %v1563_v12 = vpack.c.bf16 %v11993_v59, %v11973_v28 }
 0x19c   : > { %v1232_v39 = vpop.f32.mrf.mxu1  ;;  %v1577_v32 = vpack.c.bf16 %v1119_v0, %v1115_v52 }
 0x19d   : > { %2913 = vmatpush1.bf16.msra.mxu1 %v2391_v13  ;;  %v1121_v1 = vpop.f32.mrf.mxu0 }
 0x19e   : > { %2914 = vmatprep.subr.bf16.mxu1 %v2376_v30  ;;  %2802 = vmatpush1.bf16.msra.mxu0 %v2373_v44  ;;  %v1234_v60 = vpop.f32.mrf.mxu1  ;;  %v12029_v61 = vadd.bf16 %v11029_v49, %v1577_v32  ;;  %v1578_v16 = vpack.c.bf16 %v1121_v1, %v1117_v20  ;;  %v19792_v20 = vld [vmem:[#allocation10_spill] sm:$0xff]  ;;  %v1579_v30 = vpack.c.bf16 %v1232_v39, %v12012_v26  ;;  %v19794_v39 = vld [vmem:[#allocation27_spill] sm:$0xff] }
 0x19f   : > { %v1580_v37 = vpack.c.bf16 %v1234_v60, %v1230_v9  ;;  %v1125_v7 = vpop.f32.mrf.mxu0  ;;  %v1514_v9 = vpack.c.bf16 %v11855_v46, %v19792_v20  ;;  %v12073_v60 = vadd.bf16 %v19793_v50, %v1562_v29 }
 0x1a0   : > { %v1238_v27 = vpop.f32.mrf.mxu1  ;;  %v12039_v62 = vadd.bf16 %v11029_v49, %v1578_v16  ;;  %v19040_v8 = vmul.bf16 1056980736, %v12029_v61  ;;  %v12090_v16 = vadd.bf16 %v11029_v49, %v1579_v30  ;;  %v12114_v30 = vadd.bf16 %v19793_v50, %v1561_v4 }
 0x1a1   : > { %2915 = vmatpush1.bf16.msra.mxu1 %v2375_v40  ;;  %2820 = vmatmul.mubr.bf16.vlgmr.msra.gmra.mxu0 %v11515_v14  ;;  %v12048_v24 = vadd.bf16 %v11029_v49, %v1580_v37  ;;  %v1127_v18 = vpop.f32.mrf.mxu0  ;;  %v1548_v40 = vpack.c.bf16 %v11965_v17, %v11943_v3 }
 0x1a2   : > { %2829 = vmatprep.mubr.bf16.mxu0 %v19589_v56  ;;  %v1240_v23 = vpop.f32.mrf.mxu1  ;;  %v19042_v38 = vmul.bf16 1056980736, %v12039_v62  ;;  %9306 = vtanh.bf16 %v19040_v8  ;;  %v19048_v4 = vmul.bf16 1056980736, %v12090_v16  ;;  %v19050_v8 = vmul.bf16 1056980736, %v12114_v30 }
 0x1a3   : > { %v1129_v44 = vpop.f32.mrf.mxu0 }
 0x1a4   : > { %2933 = vmatmul.mubr.bf16.vlgmr.msra.gmra.mxu1 %v11515_v14  ;;  %v1564_v14 = vpack.c.bf16 %v12006_v25, %v11984_v19  ;;  %v1242_v0 = vpop.f32.mrf.mxu1  ;;  %v1593_v32 = vpack.c.bf16 %v1129_v44, %v1125_v7  ;;  %v19041_v19 = vmul.bf16 1056980736, %v12048_v24  ;;  %9308 = vtanh.bf16 %v19042_v38 }
 0x1a5   : > { %2942 = vmatprep.mubr.bf16.mxu1 %v19589_v56  ;;  %v1595_v1 = vpack.c.bf16 %v1242_v0, %v1238_v27  ;;  %v1131_v25 = vpop.f32.mrf.mxu0  ;;  %v19797_v27 = vld [vmem:[#allocation13_spill] sm:$0xff] }
 0x1a6   : > { %v1244_v26 = vpop.f32.mrf.mxu1  ;;  %v12079_v53 = vadd.bf16 %v19794_v39, %v1593_v32  ;;  %v1594_v45 = vpack.c.bf16 %v1131_v25, %v1127_v18  ;;  %v12087_v58 = vadd.bf16 %v19793_v50, %v1564_v14  ;;  %v1547_v18 = vpack.c.bf16 %v11952_v34, %v11932_v43 }
 0x1a7   : > { %v12082_v3 = vadd.bf16 %v19794_v39, %v1595_v1  ;;  %v1596_v17 = vpack.c.bf16 %v1244_v26, %v1240_v23  ;;  %v12094_v37 = vpop.f32.mrf.mxu0  ;;  %v19798_v23 = vld [vmem:[#allocation29_spill] sm:$0xff]  ;;  %9310 = vtanh.bf16 %v19041_v19  ;;  %v19047_v32 = vmul.bf16 1056980736, %v12073_v60 }
 0x1a8   : > { %19795 = vst [vmem:[#allocation36_spill] sm:$0xff] %v12094_v37  ;;  %v12096_v7 = vpop.f32.mrf.mxu1  ;;  %v19044_v51 = vmul.bf16 1056980736, %v12079_v53  ;;  %v12102_v28 = vadd.bf16 %v19794_v39, %v1594_v45  ;;  %v12111_v14 = vadd.bf16 %v19798_v23, %v1546_v15  ;;  %v12130_v15 = vadd.bf16 %v19798_v23, %v1548_v40  ;;  %v19804_v40 = vld [vmem:[#allocation34_spill] sm:$0xff] }
 0x1a9   : > { %19796 = vst [vmem:[#allocation19_spill] sm:$0xff] %v12096_v7  ;;  %2830 = vmatmul.mubr.bf16.gmra.mxu0 %v19797_v27  ;;  %v19043_v29 = vmul.bf16 1056980736, %v12082_v3  ;;  %v12105_v59 = vadd.bf16 %v19794_v39, %v1596_v17  ;;  %v12119_v44 = vpop.f32.mrf.mxu0  ;;  %v12133_v1 = vadd.bf16 %v19793_v50, %v1563_v12  ;;  %v19049_v45 = vmul.bf16 1056980736, %v12087_v58  ;;  %v19805_v17 = vld [vmem:[#allocation30_spill] sm:$0xff] }
 0x1aa   : > { %2839 = vmatprep.mubr.bf16.mxu0 %v19589_v56  ;;  %v12121_v0 = vpop.f32.mrf.mxu1  ;;  %9312 = vtanh.bf16 %v19044_v51  ;;  %v19046_v43 = vmul.bf16 1056980736, %v12102_v28  ;;  %v1529_v12 = vpack.c.bf16 %v11902_v21, %v11871_v22  ;;  %v12167_v22 = vadd.bf16 %v19805_v17, %v1530_v41  ;;  %v19809_v41 = vld [vmem:[#allocation17_spill] sm:$0xff]  ;;  %v19831_v7 = vld [vmem:[#allocation14_spill] sm:$0xff] }
 0x1ab   : > { %19799 = vst [vmem:[#allocation10_spill] sm:$0xff] %v12121_v0  ;;  %v19045_v34 = vmul.bf16 1056980736, %v12105_v59  ;;  %9314 = vtanh.bf16 %v19043_v29  ;;  %v12138_v25 = vpop.f32.mrf.mxu0  ;;  %v19803_v29 = vld [vmem:[#allocation35_spill] sm:$0xff]  ;;  %v19051_v21 = vmul.bf16 1056980736, %v12111_v14 }
 0x1ac   : > { %2943 = vmatmul.mubr.bf16.gmra.mxu1 %v19797_v27  ;;  %19800 = vst [vmem:[#allocation28_spill] sm:$0xff] %v12138_v25  ;;  %v12140_v26 = vpop.f32.mrf.mxu1  ;;  %9316 = vtanh.bf16 %v19046_v43  ;;  %v12152_v27 = vadd.bf16 %v19798_v23, %v1545_v47  ;;  %v1516_v51 = vpack.c.bf16 %v19804_v40, %v19803_v29  ;;  %v19806_v47 = vld [vmem:[#allocation33_spill] sm:$0xff]  ;;  %v12175_v43 = vadd.bf16 %v19798_v23, %v1547_v18  ;;  %v19810_v29 = vld [vmem:[#allocation20_spill] sm:$0xff]  ;;  %v19811_v40 = vld [vmem:[#allocation18_spill] sm:$0xff] }
 0x1ad   : > { %2952 = vmatprep.mubr.bf16.mxu1 %v19589_v56  ;;  %19801 = vst [vmem:[#allocation27_spill] sm:$0xff] %v12140_v26  ;;  %9318 = vtanh.bf16 %v19045_v34  ;;  %v12157_v19 = vpop.f32.mrf.mxu0  ;;  %v1531_v34 = vpack.c.bf16 %v11904_v2, %v19806_v47  ;;  %v12191_v2 = vadd.bf16 %v19805_v17, %v1532_v48  ;;  %v19052_v18 = vmul.bf16 1056980736, %v12130_v15  ;;  %v19812_v47 = vld [vmem:[#allocation24_spill] sm:$0xff]  ;;  %v19816_v48 = vld [vmem:[#allocation7_spill] sm:$0xff] }
 0x1ae   : > { %v12159_v38 = vpop.f32.mrf.mxu1  ;;  %9320 = vtanh.bf16 %v19047_v32  ;;  %v1498_v32 = vpack.c.bf16 %v19811_v40, %v19810_v29  ;;  %v12200_v13 = vadd.bf16 %v19805_v17, %v1529_v12  ;;  %v19817_v40 = vld [vmem:[#allocation16_spill] sm:$0xff]  ;;  %v19819_v20 = vmul.bf16 1056980736, %v12133_v1 }
 0x1af   : > { %19802 = vst [vmem:[#allocation13_spill] sm:$0xff] %v12159_v38  ;;  %9322 = vtanh.bf16 %v19048_v4  ;;  %v12180_v11 = vpop.f32.mrf.mxu0  ;;  %v19813_v4 = vld [vmem:[#allocation11_spill] sm:$0xff]  ;;  %v19832_v26 = vld [vmem:[#allocation8_spill] sm:$0xff] }
 0x1b0   : > { %19807 = vst [vmem:[#allocation29_spill] sm:$0xff] %v12180_v11  ;;  %v12182_v55 = vpop.f32.mrf.mxu1  ;;  %9324 = vtanh.bf16 %v19049_v45  ;;  %v1513_v52 = vpack.c.bf16 %v19813_v4, %v19812_v47  ;;  %v1500_v45 = vpack.c.bf16 %v19817_v40, %v19816_v48  ;;  %v19818_v4 = vld [vmem:[#allocation31_spill] sm:$0xff]  ;;  %v12228_v48 = vadd.bf16 %v19805_v17, %v1531_v34 }
 0x1b1   : > { %19808 = vst [vmem:[#allocation35_spill] sm:$0xff] %v12182_v55  ;;  %2840 = vmatmul.mubr.bf16.gmra.mxu0 %v19809_v41  ;;  %9326 = vtanh.bf16 %v19050_v8  ;;  %v12206_v54 = vpop.f32.mrf.mxu0  ;;  %v12216_v12 = vadd.bf16 %v19818_v4, %v1514_v9  ;;  %v12225_v8 = vadd.bf16 %v19818_v4, %v1516_v51  ;;  %v19826_v34 = vld [vmem:[#allocation23_spill] sm:$0xff]  ;;  %v19833_v37 = vpack.c.bf16 %v19831_v7, %v19832_v26 }
 0x1b2   : > { %2849 = vmatprep.mubr.bf16.mxu0 %v19589_v56  ;;  %19814 = vst [vmem:[#allocation34_spill] sm:$0xff] %v12206_v54  ;;  %v12208_v31 = vpop.f32.mrf.mxu1  ;;  %9328 = vtanh.bf16 %v19051_v21  ;;  %v12253_v29 = vadd.bf16 %v19818_v4, %v1513_v52  ;;  %v19827_v55 = vld [vmem:[#allocation15_spill] sm:$0xff] }
 0x1b3   : > { %19815 = vst [vmem:[#allocation33_spill] sm:$0xff] %v12208_v31  ;;  %9330 = vtanh.bf16 %v19819_v20  ;;  %v12233_v9 = vpop.f32.mrf.mxu0  ;;  %v19822_v20 = vpack.c.bf16 %v11658_v57, %v11615_v35  ;;  %v19853_v54 = vmul.bf16 1056980736, %v12225_v8 }
 0x1b4   : > { %2953 = vmatmul.mubr.bf16.gmra.mxu1 %v19809_v41  ;;  %v12222_v41 = vpop.eup %9306  ;;  %19820 = vst [vmem:[#allocation17_spill] sm:$0xff] %v12233_v9  ;;  %v12235_v40 = vpop.f32.mrf.mxu1  ;;  %9332 = vtanh.bf16 %v19052_v18  ;;  %v19823_v18 = vmul.bf16 1056980736, %v12152_v27  ;;  %v19829_v9 = vld [vmem:[#allocation37_spill] sm:$0xff] }
 0x1b5   : > { %2962 = vmatprep.mubr.bf16.mxu1 %v19589_v56  ;;  %19821 = vst [vmem:[#allocation20_spill] sm:$0xff] %v12235_v40  ;;  %v12244_v47 = vpop.eup %9308  ;;  %v12250_v46 = vadd.bf16 %v11079_v10, %v19822_v20  ;;  %v12258_v51 = vpop.f32.mrf.mxu0  ;;  %v19828_v40 = vpack.c.bf16 %v19826_v34, %v19827_v55  ;;  %v12269_v35 = vadd.bf16 %v19829_v9, %v1498_v32  ;;  %v19830_v20 = vmul.bf16 1056980736, %v12167_v22 }
 0x1b6   : > { %9334 = vtanh.bf16 %v19823_v18  ;;  %19824 = vst [vmem:[#allocation18_spill] sm:$0xff] %v12258_v51  ;;  %v12260_v11 = vpop.f32.mrf.mxu1  ;;  %v12274_v21 = vpop.eup %9310  ;;  %v12277_v18 = vadd.bf16 %v19829_v9, %v1500_v45  ;;  %v12283_v55 = vadd.bf16 %v19818_v4, %v19833_v37  ;;  %v19834_v32 = vmul.bf16 1056980736, %v12175_v43  ;;  %v19838_v45 = vld [vmem:[#allocation21_spill] sm:$0xff] }
 0x1b7   : > { %19825 = vst [vmem:[#allocation24_spill] sm:$0xff] %v12260_v11  ;;  %v12266_v57 = vadd.bf16 %v19829_v9, %v19828_v40  ;;  %9336 = vtanh.bf16 %v19830_v20  ;;  %v12288_v34 = vpop.f32.mrf.mxu0  ;;  %v19837_v20 = vld [vmem:[#allocation12_spill] sm:$0xff]  ;;  %v19839_v11 = vld [vmem:[#allocation9_spill] sm:$0xff]  ;;  %v19841_v37 = vpack.c.bf16 %v19791_v42, %v11617_v36  ;;  %v19842_v40 = vmul.bf16 1056980736, %v12191_v2 }
 0x1b8   : > { %9338 = vtanh.bf16 %v19834_v32  ;;  %19835 = vst [vmem:[#allocation11_spill] sm:$0xff] %v12288_v34  ;;  %v12290_v52 = vpop.f32.mrf.mxu1  ;;  %v9313_v25 = vpop.eup %9312  ;;  %v19840_v31 = vpack.c.bf16 %v19838_v45, %v19839_v11  ;;  %v19843_v11 = vld [vmem:[#allocation22_spill] sm:$0xff]  ;;  %v19844_v45 = vld [vmem:[#allocation25_spill] sm:$0xff]  ;;  %v19846_v42 = vmul.bf16 1056980736, %v12200_v13 }
 0x1b9   : > { %19836 = vst [vmem:[#allocation7_spill] sm:$0xff] %v12290_v52  ;;  %2850 = vmatmul.mubr.bf16.gmra.mxu0 %v19837_v20  ;;  %v12303_v26 = vadd.bf16 %v11079_v10, %v19841_v37  ;;  %9340 = vtanh.bf16 %v19842_v40  ;;  %v9315_v38 = vpop.eup %9314  ;;  %v12320_v37 = vpop.f32.mrf.mxu0  ;;  %v19850_v36 = vmul.bf16 1056980736, %v12228_v48 }
 0x1ba   : > { %v12297_v7 = vadd.bf16 %v11079_v10, %v19840_v31  ;;  %2859 = vmatprep.mubr.bf16.mxu0 %v19589_v56  ;;  %v19845_v31 = vpack.c.bf16 %v19843_v11, %v19844_v45  ;;  %9342 = vtanh.bf16 %v19846_v42  ;;  %19847 = vst [vmem:[#allocation16_spill] sm:$0xff] %v12320_v37  ;;  %v12322_v40 = vpop.f32.mrf.mxu1  ;;  %v9317_v32 = vpop.eup %9316  ;;  %v19849_v11 = vmul.bf16 1056980736, %v12216_v12 }
 0x1bb   : > { %19848 = vst [vmem:[#allocation23_spill] sm:$0xff] %v12322_v40  ;;  %v2361_v45 = vadd.bf16 1065369472, %v9313_v25  ;;  %v2362_v0 = vadd.bf16 1065369472, %v9317_v32 }
 0x1bc   : > { %v12314_v4 = vadd.bf16 %v19829_v9, %v19845_v31  ;;  %2963 = vmatmul.mubr.bf16.gmra.mxu1 %v19837_v20  ;;  %9344 = vtanh.bf16 %v19849_v11  ;;  %v9319_v31 = vpop.eup %9318  ;;  %v12333_v9 = vpop.f32.mrf.mxu0  ;;  %v2363_v25 = vadd.bf16 1065369472, %v9315_v38  ;;  %v2346_v42 = vadd.bf16 1065369472, %v12244_v47 }
 0x1bd   : > { %2972 = vmatprep.mubr.bf16.mxu1 %v19589_v56  ;;  %9346 = vtanh.bf16 %v19850_v36  ;;  %19851 = vst [vmem:[#allocation15_spill] sm:$0xff] %v12333_v9  ;;  %v12335_v51 = vpop.f32.mrf.mxu1  ;;  %v9321_v10 = vpop.eup %9320  ;;  %v19854_v20 = vmul.bf16 1056980736, %v12253_v29  ;;  %v19856_v32 = vmul.bf16 1056980736, %v12102_v28 }
 0x1be   : > { %19852 = vst [vmem:[#allocation14_spill] sm:$0xff] %v12335_v51  ;;  %9348 = vtanh.bf16 %v19853_v54  ;;  %v9323_v34 = vpop.eup %9322  ;;  %v12344_v36 = vpop.f32.mrf.mxu0  ;;  %v2364_v17 = vadd.bf16 1065369472, %v9319_v31  ;;  %v2348_v54 = vadd.bf16 1065369472, %v12274_v21 }
 0x1bf   : > { %9350 = vtanh.bf16 %v19854_v20  ;;  %v12346_v9 = vpop.f32.mrf.mxu1  ;;  %v2490_v40 = vmul.bf16 %v2362_v0, %v19856_v32  ;;  %v9325_v38 = vpop.eup %9324  ;;  %v19857_v11 = vmul.bf16 1056980736, %v12269_v35  ;;  %v2345_v47 = vadd.bf16 1065369472, %v12222_v41 }
 0x1c0   : > { %19855 = vst [vmem:[#allocation8_spill] sm:$0xff] %v12346_v9  ;;  %v19858_v20 = vmul.bf16 1056980736, %v12079_v53  ;;  %v9327_v51 = vpop.eup %9326  ;;  %v19859_v28 = vmul.bf16 1056980736, %v12283_v55  ;;  %v12360_v0 = vpop.f32.mrf.mxu0 }
 0x1c1   : > { %9352 = vtanh.bf16 %v19857_v11  ;;  %v12362_v21 = vpop.f32.mrf.mxu1  ;;  %2860 = vmatmul.mubr.bf16.gmra.mxu0 %v11833_v6  ;;  %3013 = vmatprep.subr.bf16.mxu0 %v2490_v40  ;;  %v19861_v31 = vmul.bf16 1056980736, %v12105_v59  ;;  %v2330_v41 = vadd.bf16 1065369472, %v9321_v10  ;;  %v9329_v32 = vpop.eup %9328  ;;  %v19862_v53 = vmul.bf16 1056980736, %v12277_v18 }
 0x1c2   : > { %v2489_v52 = vmul.bf16 %v2361_v45, %v19858_v20  ;;  %9354 = vtanh.bf16 %v19859_v28  ;;  %19860 = vst [vmem:[#allocation12_spill] sm:$0xff] %v12362_v21  ;;  %v2347_v45 = vadd.bf16 1065369472, %v9323_v34  ;;  %v19863_v20 = vmul.bf16 1056980736, %v12082_v3  ;;  %2869 = vmatprep.mubr.bf16.mxu0 %v19589_v56  ;;  %v9331_v21 = vpop.eup %9330  ;;  %v12378_v10 = vpop.f32.mrf.mxu0 }
 0x1c3   : > { %v2492_v11 = vmul.bf16 %v2364_v17, %v19861_v31  ;;  %9356 = vtanh.bf16 %v19862_v53  ;;  %v19864_v28 = vmul.bf16 1056980736, %v12039_v62  ;;  %v1993_v40 = vmul.bf16 1056980736, %v12036_v33  ;;  %v12380_v17 = vpop.f32.mrf.mxu1  ;;  %v9333_v34 = vpop.eup %9332 }
 0x1c4   : > { %v2491_v37 = vmul.bf16 %v2363_v25, %v19863_v20  ;;  %3014 = vmatpush1.bf16.msra.mxu0 %v2489_v52  ;;  %v19865_v59 = vmul.bf16 1056980736, %v12266_v57  ;;  %2973 = vmatmul.mubr.bf16.gmra.mxu1 %v11833_v6  ;;  %v19866_v3 = vmul.bf16 1056980736, %v12048_v24  ;;  %v2332_v62 = vadd.bf16 1065369472, %v9325_v38  ;;  %v9335_v6 = vpop.eup %9334  ;;  %v12391_v24 = vpop.f32.mrf.mxu0 }
 0x1c5   : > { %v2474_v9 = vmul.bf16 %v2346_v42, %v19864_v28  ;;  %3126 = vmatprep.subr.bf16.mxu1 %v2492_v11  ;;  %v19867_v42 = vmul.bf16 1056980736, %v12250_v46  ;;  %v2329_v25 = vadd.bf16 1065369472, %v9327_v51  ;;  %v19868_v31 = vmul.bf16 1056980736, %v12029_v61  ;;  %2982 = vmatprep.mubr.bf16.mxu1 %v19589_v56  ;;  %v9337_v51 = vpop.eup %9336 }
 0x1c6   : > { %9358 = vtanh.bf16 %v19865_v59  ;;  %v2476_v52 = vmul.bf16 %v2348_v54, %v19866_v3  ;;  %3127 = vmatpush1.bf16.msra.mxu1 %v2491_v37  ;;  %v19068_v11 = vmul.bf16 1056980736, %v12297_v7  ;;  %v19869_v20 = vmul.bf16 1056980736, %v12314_v4  ;;  %v12393_v54 = vpop.f32.mrf.mxu1  ;;  %v9339_v3 = vpop.eup %9338 }
 0x1c7   : > { %9360 = vtanh.bf16 %v19867_v42  ;;  %v2473_v53 = vmul.bf16 %v2345_v47, %v19868_v31  ;;  %3015 = vmatprep.subr.bf16.mxu0 %v2474_v9  ;;  %v19870_v38 = vmul.bf16 1056980736, %v12073_v60  ;;  %v2314_v61 = vadd.bf16 1065369472, %v9329_v32  ;;  %v9341_v31 = vpop.eup %9340 }
 0x1c8   : > { %9362 = vtanh.bf16 %v19869_v20  ;;  %3128 = vmatprep.subr.bf16.mxu1 %v2476_v52  ;;  %v19871_v9 = vmul.bf16 1056980736, %v12303_v26  ;;  %v2331_v37 = vadd.bf16 1065369472, %v9331_v21  ;;  %v19872_v47 = vmul.bf16 1056980736, %v12090_v16  ;;  %v12404_v52 = vpop.f32.mrf.mxu0  ;;  %v12406_v60 = vpop.f32.mrf.mxu1 }
 0x1c9   : > { %v2458_v28 = vmul.bf16 %v2330_v41, %v19870_v38  ;;  %3016 = vmatpush1.bf16.msra.mxu0 %v2473_v53  ;;  %v19873_v41 = vmul.bf16 1056980736, %v12087_v58  ;;  %v2316_v42 = vadd.bf16 1065369472, %v9333_v34  ;;  %v2313_v20 = vadd.bf16 1065369472, %v9335_v6 }
 0x1ca   : > { %9364 = vtanh.bf16 %v19871_v9  ;;  %v2475_v59 = vmul.bf16 %v2347_v45, %v19872_v47  ;;  %v19874_v21 = vmul.bf16 1056980736, %v12114_v30  ;;  %v9343_v45 = vpop.eup %9342  ;;  %v12414_v53 = vpop.f32.mrf.mxu0  ;;  %v19876_v58 = vmul.bf16 1056980736, %v12111_v14 }
 0x1cb   : > { %9366 = vtanh.bf16 %v1993_v40  ;;  %3017 = vmatprep.subr.bf16.mxu0 %v2458_v28  ;;  %v2460_v32 = vmul.bf16 %v2332_v62, %v19873_v41  ;;  %v12416_v38 = vpop.f32.mrf.mxu1  ;;  %v19875_v28 = vld [vmem:[#allocation6_spill] sm:$0xff]  ;;  %v2298_v34 = vadd.bf16 1065369472, %v9337_v51  ;;  %v9345_v6 = vpop.eup %9344  ;;  %v2315_v9 = vadd.bf16 1065369472, %v9339_v3 }
 0x1cc   : > { %v2457_v16 = vmul.bf16 %v2329_v25, %v19874_v21  ;;  %3129 = vmatpush1.bf16.msra.mxu1 %v2475_v59  ;;  %9368 = vtanh.bf16 %v19068_v11  ;;  %2870 = vmatmul.mubr.bf16.gmra.mxu0 %v19875_v28  ;;  %v2442_v62 = vmul.bf16 %v2314_v61, %v19876_v58  ;;  %v19877_v30 = vmul.bf16 1056980736, %v12133_v1  ;;  %v9347_v47 = vpop.eup %9346  ;;  %v12425_v59 = vpop.f32.mrf.mxu0 }
 0x1cd   : > { %3130 = vmatprep.subr.bf16.mxu1 %v2460_v32  ;;  %2879 = vmatprep.mubr.bf16.mxu0 %v19589_v56  ;;  %v12427_v41 = vpop.f32.mrf.mxu1  ;;  %v19878_v14 = vmul.bf16 1056980736, %v12130_v15  ;;  %v2300_v51 = vadd.bf16 1065369472, %v9341_v31  ;;  %v9349_v32 = vpop.eup %9348  ;;  %v2297_v3 = vadd.bf16 1065369472, %v9343_v45 }
 0x1ce   : > { %v2459_v25 = vmul.bf16 %v2331_v37, %v19877_v30  ;;  %3018 = vmatpush1.bf16.msra.mxu0 %v2457_v16  ;;  %2983 = vmatmul.mubr.bf16.gmra.mxu1 %v19875_v28  ;;  %v19879_v1 = vmul.bf16 1056980736, %v12152_v27  ;;  %v9351_v21 = vpop.eup %9350  ;;  %v12434_v16 = vpop.f32.mrf.mxu0  ;;  %v19880_v58 = vmul.bf16 1056980736, %v12167_v22  ;;  %v2282_v15 = vadd.bf16 1065369472, %v9345_v6 }
 0x1cf   : > { %3019 = vmatprep.subr.bf16.mxu0 %v2442_v62  ;;  %v2444_v61 = vmul.bf16 %v2316_v42, %v19878_v14  ;;  %2992 = vmatprep.mubr.bf16.mxu1 %v19589_v56  ;;  %v12436_v28 = vpop.f32.mrf.mxu1  ;;  %v9353_v42 = vpop.eup %9352  ;;  %v2299_v31 = vadd.bf16 1065369472, %v9347_v47  ;;  %v19881_v45 = vmul.bf16 1056980736, %v12175_v43  ;;  %v19882_v14 = vmul.bf16 1056980736, %v12191_v2 }
 0x1d0   : > { %v2441_v37 = vmul.bf16 %v2313_v20, %v19879_v1  ;;  %3131 = vmatpush1.bf16.msra.mxu1 %v2459_v25  ;;  %v2426_v62 = vmul.bf16 %v2298_v34, %v19880_v58  ;;  %v9355_v27 = vpop.eup %9354  ;;  %v12442_v20 = vpop.f32.mrf.mxu0  ;;  %v2284_v1 = vadd.bf16 1065369472, %v9349_v32  ;;  %v2281_v22 = vadd.bf16 1065369472, %v9351_v21 }
 0x1d1   : > { %3132 = vmatprep.subr.bf16.mxu1 %v2444_v61  ;;  %v2443_v30 = vmul.bf16 %v2315_v9, %v19881_v45  ;;  %v12444_v25 = vpop.f32.mrf.mxu1  ;;  %v2428_v61 = vmul.bf16 %v2300_v51, %v19882_v14  ;;  %v9357_v11 = vpop.eup %9356  ;;  %v19883_v34 = vmul.bf16 1056980736, %v12200_v13  ;;  %v2266_v2 = vadd.bf16 1065369472, %v9353_v42 }
 0x1d2   : > { %3020 = vmatpush1.bf16.msra.mxu0 %v2441_v37  ;;  %v12450_v43 = vpop.f32.mrf.mxu0  ;;  %v19884_v37 = vmul.bf16 1056980736, %v12216_v12  ;;  %v2283_v32 = vadd.bf16 1065369472, %v9355_v27  ;;  %v19885_v21 = vmul.bf16 1056980736, %v12228_v48 }
 0x1d3   : > { %3021 = vmatprep.subr.bf16.mxu0 %v2426_v62  ;;  %v2425_v6 = vmul.bf16 %v2297_v3, %v19883_v34  ;;  %v12452_v9 = vpop.f32.mrf.mxu1  ;;  %v19886_v12 = vmul.bf16 1056980736, %v12225_v8  ;;  %v2268_v42 = vadd.bf16 1065369472, %v9357_v11  ;;  %v19887_v48 = vmul.bf16 1056980736, %v12253_v29 }
 0x1d4   : > { %3133 = vmatpush1.bf16.msra.mxu1 %v2443_v30  ;;  %v9359_v47 = vpop.eup %9358  ;;  %2880 = vmatmul.mubr.bf16.gmra.mxu0 %v11959_v5  ;;  %v2410_v58 = vmul.bf16 %v2282_v15, %v19884_v37  ;;  %v2427_v62 = vmul.bf16 %v2299_v31, %v19885_v21  ;;  %v12461_v3 = vpop.f32.mrf.mxu0  ;;  %v19888_v34 = vmul.bf16 1056980736, %v12269_v35  ;;  %v19889_v11 = vmul.bf16 1056980736, %v12283_v55 }
 0x1d5   : > { %3134 = vmatprep.subr.bf16.mxu1 %v2428_v61  ;;  %v9361_v51 = vpop.eup %9360  ;;  %2889 = vmatprep.mubr.bf16.mxu0 %v19589_v56  ;;  %v12463_v45 = vpop.f32.mrf.mxu1  ;;  %v2412_v15 = vmul.bf16 %v2284_v1, %v19886_v12  ;;  %v2265_v27 = vadd.bf16 1065369472, %v9359_v47  ;;  %v2409_v31 = vmul.bf16 %v2281_v22, %v19887_v48  ;;  %v19891_v35 = vmul.bf16 1056980736, %v12266_v57 }
 0x1d6   : > { %3022 = vmatpush1.bf16.msra.mxu0 %v2425_v6  ;;  %v9363_v13 = vpop.eup %9362  ;;  %2993 = vmatmul.mubr.bf16.gmra.mxu1 %v11959_v5  ;;  %v12470_v5 = vpop.f32.mrf.mxu0  ;;  %v2394_v6 = vmul.bf16 %v2266_v2, %v19888_v34  ;;  %v2250_v8 = vadd.bf16 1065369472, %v9361_v51  ;;  %v2411_v47 = vmul.bf16 %v2283_v32, %v19889_v11  ;;  %v19892_v32 = vmul.bf16 1056980736, %v12250_v46 }
 0x1d7   : > { %3023 = vmatprep.subr.bf16.mxu0 %v2410_v58  ;;  %3002 = vmatprep.mubr.bf16.mxu1 %v19589_v56  ;;  %v12472_v61 = vpop.f32.mrf.mxu1  ;;  %v2267_v1 = vadd.bf16 1065369472, %v9363_v13  ;;  %v19890_v58 = vmul.bf16 1056980736, %v12277_v18  ;;  %v2393_v2 = vmul.bf16 %v2265_v27, %v19891_v35  ;;  %v19893_v48 = vmul.bf16 1056980736, %v12314_v4 }
 0x1d8   : > { %v9365_v30 = vpop.eup %9364  ;;  %3135 = vmatpush1.bf16.msra.mxu1 %v2427_v62  ;;  %v12478_v22 = vpop.f32.mrf.mxu0  ;;  %v2378_v13 = vmul.bf16 %v2250_v8, %v19892_v32  ;;  %v1486_v35 = vpack.c.bf16 %v12157_v19, %v12119_v44 }
 0x1d9   : > { %v9367_v14 = vpop.eup %9366  ;;  %3136 = vmatprep.subr.bf16.mxu1 %v2412_v15  ;;  %v12480_v37 = vpop.f32.mrf.mxu1  ;;  %v2396_v21 = vmul.bf16 %v2268_v42, %v19890_v58  ;;  %v2252_v62 = vadd.bf16 1065369472, %v9365_v30  ;;  %v2395_v18 = vmul.bf16 %v2267_v1, %v19893_v48  ;;  %v19894_v30 = vmul.bf16 1056980736, %v12303_v26 }
 0x1da   : > { %3024 = vmatpush1.bf16.msra.mxu0 %v2409_v31  ;;  %v9369_v29 = vpop.eup %9368  ;;  %v2249_v12 = vadd.bf16 1065369472, %v9367_v14  ;;  %v1341_v51 = vpop.f32.mrf.mxu0  ;;  %v19895_v14 = vmul.bf16 1056980736, %v12297_v7  ;;  %v1552_v48 = vpack.c.bf16 %v12444_v25, %v12427_v41 }
 0x1db   : > { %3025 = vmatprep.subr.bf16.mxu0 %v2394_v6  ;;  %v12486_v55 = vpop.f32.mrf.mxu1  ;;  %v2251_v15 = vadd.bf16 1065369472, %v9369_v29  ;;  %v2380_v27 = vmul.bf16 %v2252_v62, %v19894_v30  ;;  %v1566_v29 = vpack.c.bf16 %v12478_v22, %v12461_v3  ;;  %v1568_v3 = vpack.c.bf16 %v12480_v37, %v12463_v45  ;;  %v12562_v30 = vld [vmem:[%s18931_s3 + $0x8] sm:$0xff]  }
 0x1dc   : > { %3137 = vmatpush1.bf16.msra.mxu1 %v2411_v47  ;;  %2890 = vmatmul.mubr.bf16.gmra.mxu0 %v12000_v63  ;;  %v1343_v57 = vpop.f32.mrf.mxu0  ;;  %v2377_v31 = vmul.bf16 %v2249_v12, %v1993_v40  ;;  %v12508_v47 = vld [vmem:[%s18931_s3] sm:$0xff]  }
 0x1dd   : > { %3138 = vmatprep.subr.bf16.mxu1 %v2396_v21  ;;  %3045 = vmatprep.mubr.bf16.mxu0 %v19589_v56  ;;  %v1456_v42 = vpop.f32.mrf.mxu1  ;;  %v2379_v34 = vmul.bf16 %v2251_v15, %v19895_v14  ;;  %v1550_v15 = vpack.c.bf16 %v12442_v20, %v12425_v59 }
 0x1de   : > { %3026 = vmatpush1.bf16.msra.mxu0 %v2393_v2  ;;  %3003 = vmatmul.mubr.bf16.gmra.mxu1 %v12000_v63  ;;  %v1345_v4 = vpop.f32.mrf.mxu0  ;;  %v1534_v2 = vpack.c.bf16 %v12404_v52, %v12378_v10  ;;  %v1565_v10 = vpack.c.bf16 %v12470_v5, %v12450_v43  ;;  %v12538_v52 = vadd.bf16 %v19793_v50, %v1566_v29 }
 0x1df   : > { %3027 = vmatprep.subr.bf16.mxu0 %v2378_v13  ;;  %3158 = vmatprep.mubr.bf16.mxu1 %v19589_v56  ;;  %v1458_v46 = vpop.f32.mrf.mxu1  ;;  %v1581_v6 = vpack.c.bf16 %v1345_v4, %v1341_v51  ;;  %v1567_v43 = vpack.c.bf16 %v12472_v61, %v12452_v9  ;;  %v12552_v5 = vadd.bf16 %v19793_v50, %v1568_v3 }
 0x1e0   : > { %3139 = vmatpush1.bf16.msra.mxu1 %v2395_v18  ;;  %v1347_v63 = vpop.f32.mrf.mxu0  ;;  %v1583_v22 = vpack.c.bf16 %v1458_v46, %v12486_v55  ;;  %v12577_v4 = vadd.bf16 %v19798_v23, %v1550_v15  ;;  %v12580_v46 = vadd.bf16 %v19793_v50, %v1565_v10  ;;  %v19079_v14 = vmul.bf16 1056980736, %v12538_v52 }
 0x1e1   : > { %3140 = vmatprep.subr.bf16.mxu1 %v2380_v27  ;;  %v1460_v8 = vpop.f32.mrf.mxu1  ;;  %v12503_v1 = vadd.bf16 %v11029_v49, %v1581_v6  ;;  %v1582_v26 = vpack.c.bf16 %v1347_v63, %v1343_v57  ;;  %v1536_v63 = vpack.c.bf16 %v12406_v60, %v12380_v17  ;;  %v19896_v17 = vld [vmem:[#allocation16_spill] sm:$0xff] }
 0x1e2   : > { %3028 = vmatpush1.bf16.msra.mxu0 %v2377_v31  ;;  %v1584_v33 = vpack.c.bf16 %v1460_v8, %v1456_v42  ;;  %v1351_v40 = vpop.f32.mrf.mxu0  ;;  %v12555_v42 = vadd.bf16 %v11029_v49, %v1583_v22  ;;  %v1549_v31 = vpack.c.bf16 %v12434_v16, %v12414_v53  ;;  %v1551_v16 = vpack.c.bf16 %v12436_v28, %v12416_v38  ;;  %v19901_v22 = vld [vmem:[#allocation11_spill] sm:$0xff] }
 0x1e3   : > { %v1464_v11 = vpop.f32.mrf.mxu1  ;;  %v12512_v7 = vadd.bf16 %v11029_v49, %v1582_v26  ;;  %v19081_v58 = vmul.bf16 1056980736, %v12503_v1  ;;  %v12602_v8 = vadd.bf16 %v19798_v23, %v1552_v48  ;;  %v19077_v26 = vmul.bf16 1056980736, %v12552_v5 }
 0x1e4   : > { %3141 = vmatpush1.bf16.msra.mxu1 %v2379_v34  ;;  %v12519_v21 = vadd.bf16 %v11029_v49, %v1584_v33  ;;  %v1353_v62 = vpop.f32.mrf.mxu0  ;;  %v12594_v34 = vadd.bf16 %v19793_v50, %v1567_v43  ;;  %v19078_v6 = vmul.bf16 1056980736, %v12555_v42  ;;  %v1533_v50 = vpack.c.bf16 %v12391_v24, %v12360_v0  ;;  %v19897_v33 = vld [vmem:[#allocation30_spill] sm:$0xff]  ;;  %v19898_v0 = vld [vmem:[#allocation12_spill] sm:$0xff] }
 0x1e5   : > { %3046 = vmatmul.mubr.bf16.vlgmr.msra.gmra.mxu0 %v12508_v47  ;;  %v1466_v12 = vpop.f32.mrf.mxu1  ;;  %v2094_v51 = vmul.bf16 1056980736, %v12512_v7  ;;  %9370 = vtanh.bf16 %v19081_v58  ;;  %v12610_v38 = vadd.bf16 %v19798_v23, %v1549_v31  ;;  %v19075_v28 = vmul.bf16 1056980736, %v12580_v46  ;;  %v19906_v43 = vld [vmem:[#allocation10_spill] sm:$0xff]  ;;  %v19907_v31 = vld [vmem:[#allocation13_spill] sm:$0xff] }
 0x1e6   : > { %3055 = vmatprep.mubr.bf16.mxu0 %v19589_v56  ;;  %v1355_v32 = vpop.f32.mrf.mxu0  ;;  %v2096_v45 = vmul.bf16 1056980736, %v12519_v21  ;;  %v1518_v60 = vpack.c.bf16 %v12344_v36, %v19896_v17  ;;  %v1535_v24 = vpack.c.bf16 %v12393_v54, %v19898_v0  ;;  %v12626_v29 = vadd.bf16 %v19798_v23, %v1551_v16  ;;  %v12634_v36 = vld [vmem:[%s18931_s3 + $0x10] sm:$0xff]   ;;  %v19908_v17 = vld [vmem:[#allocation33_spill] sm:$0xff] }
 0x1e7   : > { %3159 = vmatmul.mubr.bf16.vlgmr.msra.gmra.mxu1 %v12508_v47  ;;  %v1468_v13 = vpop.f32.mrf.mxu1  ;;  %v1597_v18 = vpack.c.bf16 %v1355_v32, %v1351_v40  ;;  %9372 = vtanh.bf16 %v2094_v51  ;;  %v12618_v40 = vadd.bf16 %v19897_v33, %v1534_v2  ;;  %v19900_v2 = vld [vmem:[#allocation8_spill] sm:$0xff]  ;;  %v12640_v54 = vadd.bf16 %v19897_v33, %v1536_v63  ;;  %v19902_v32 = vld [vmem:[#allocation15_spill] sm:$0xff] }
 0x1e8   : > { %3168 = vmatprep.mubr.bf16.mxu1 %v19589_v56  ;;  %v1599_v57 = vpack.c.bf16 %v1468_v13, %v1464_v11  ;;  %v1357_v37 = vpop.f32.mrf.mxu0  ;;  %9374 = vtanh.bf16 %v2096_v45  ;;  %v19074_v11 = vmul.bf16 1056980736, %v12577_v4  ;;  %v19069_v23 = vmul.bf16 1056980736, %v12602_v8 }
 0x1e9   : > { %v1470_v55 = vpop.f32.mrf.mxu1  ;;  %v12544_v59 = vadd.bf16 %v19794_v39, %v1597_v18  ;;  %v1598_v20 = vpack.c.bf16 %v1357_v37, %v1353_v62  ;;  %v19071_v62 = vmul.bf16 1056980736, %v12594_v34  ;;  %v1517_v13 = vpack.c.bf16 %v19902_v32, %v19901_v22  ;;  %v19903_v18 = vld [vmem:[#allocation34_spill] sm:$0xff]  ;;  %v19905_v37 = vld [vmem:[#allocation31_spill] sm:$0xff] }
 0x1ea   : > { %v12547_v41 = vadd.bf16 %v19794_v39, %v1599_v57  ;;  %v1600_v25 = vpack.c.bf16 %v1470_v55, %v1466_v12  ;;  %v19899_v12 = vld [vmem:[#allocation23_spill] sm:$0xff]  ;;  %v12649_v15 = vadd.bf16 %v19897_v33, %v1533_v50  ;;  %v19070_v48 = vmul.bf16 1056980736, %v12610_v38  ;;  %v19904_v57 = vld [vmem:[#allocation18_spill] sm:$0xff] }
 0x1eb   : > { %v2109_v27 = vmul.bf16 1056980736, %v12544_v59  ;;  %v12568_v61 = vadd.bf16 %v19794_v39, %v1598_v20  ;;  %v1520_v3 = vpack.c.bf16 %v19900_v2, %v19899_v12  ;;  %v1502_v10 = vpack.c.bf16 %v19904_v57, %v19903_v18  ;;  %v19912_v57 = vld [vmem:[#allocation36_spill] sm:$0xff] }
 0x1ec   : > { %v2111_v9 = vmul.bf16 1056980736, %v12547_v41  ;;  %v12571_v49 = vadd.bf16 %v19794_v39, %v1600_v25  ;;  %v12658_v55 = vadd.bf16 %v19905_v37, %v1518_v60  ;;  %v19072_v20 = vmul.bf16 1056980736, %v12618_v40  ;;  %v19909_v60 = vld [vmem:[#allocation24_spill] sm:$0xff] }
 0x1ed   : > { %3056 = vmatmul.mubr.bf16.gmra.mxu0 %v12562_v30  ;;  %9376 = vtanh.bf16 %v2109_v27  ;;  %v2110_v39 = vmul.bf16 1056980736, %v12568_v61  ;;  %v1488_v16 = vpack.c.bf16 %v19907_v31, %v19906_v43  ;;  %v12669_v63 = vadd.bf16 %v19897_v33, %v1535_v24  ;;  %v19910_v33 = vld [vmem:[#allocation32_spill] sm:$0xff]  ;;  %v12785_v61 = vld [vmem:[%s18931_s3 + $0x20] sm:$0xff]  }
 0x1ee   : > { %3065 = vmatprep.mubr.bf16.mxu0 %v19589_v56  ;;  %v2112_v53 = vmul.bf16 1056980736, %v12571_v49  ;;  %9378 = vtanh.bf16 %v2111_v9  ;;  %v19073_v50 = vmul.bf16 1056980736, %v12626_v29  ;;  %v1504_v0 = vpack.c.bf16 %v19909_v60, %v19908_v17  ;;  %v19914_v17 = vld [vmem:[#allocation37_spill] sm:$0xff] }
 0x1ef   : > { %3169 = vmatmul.mubr.bf16.gmra.mxu1 %v12562_v30  ;;  %9380 = vtanh.bf16 %v2110_v39  ;;  %v12677_v12 = vadd.bf16 %v19905_v37, %v1520_v3  ;;  %v19076_v2 = vmul.bf16 1056980736, %v12640_v54  ;;  %v12686_v24 = vadd.bf16 %v19910_v33, %v1486_v35  ;;  %v19911_v3 = vld [vmem:[#allocation28_spill] sm:$0xff]  ;;  %v19915_v35 = vld [vmem:[#allocation27_spill] sm:$0xff] }
 0x1f0   : > { %3178 = vmatprep.mubr.bf16.mxu1 %v19589_v56  ;;  %9382 = vtanh.bf16 %v2112_v53  ;;  %v12689_v32 = vadd.bf16 %v19905_v37, %v1517_v13  ;;  %v19080_v18 = vmul.bf16 1056980736, %v12649_v15  ;;  %v19913_v43 = vpack.c.bf16 %v19911_v3, %v19912_v57  ;;  %v19916_v13 = vld [vmem:[#allocation19_spill] sm:$0xff]  ;;  %v19918_v3 = vld [vmem:[#allocation14_spill] sm:$0xff] }
 0x1f1   : > { %9384 = vtanh.bf16 %v19079_v14  ;;  %v12701_v60 = vadd.bf16 %v19914_v17, %v1502_v10  ;;  %v19082_v19 = vmul.bf16 1056980736, %v12658_v55  ;;  %v19919_v57 = vld [vmem:[#allocation7_spill] sm:$0xff]  ;;  %v19083_v10 = vmul.bf16 1056980736, %v12669_v63 }
 0x1f2   : > { %9386 = vtanh.bf16 %v19078_v6  ;;  %v12698_v31 = vadd.bf16 %v19910_v33, %v19913_v43  ;;  %v19920_v43 = vpack.c.bf16 %v19918_v3, %v19919_v57  ;;  %v19929_v21 = vmul.bf16 1056980736, %v12538_v52 }
 0x1f3   : > { %9388 = vtanh.bf16 %v19077_v26  ;;  %v12664_v25 = vpop.eup %9370  ;;  %v2014_v14 = vmul.bf16 1056980736, %v12701_v60  ;;  %v19931_v52 = vmul.bf16 1056980736, %v12552_v5  ;;  %v19933_v5 = vmul.bf16 1056980736, %v12577_v4 }
 0x1f4   : > { %9390 = vtanh.bf16 %v19075_v28 }
 0x1f5   : > { %3066 = vmatmul.mubr.bf16.gmra.mxu0 %v12634_v36  ;;  %9392 = vtanh.bf16 %v19074_v11  ;;  %v9373_v22 = vpop.eup %9372 }
 0x1f6   : > { %3075 = vmatprep.mubr.bf16.mxu0 %v19589_v56  ;;  %9394 = vtanh.bf16 %v19071_v62  ;;  %v12706_v44 = vpop.eup %9374  ;;  %v12718_v62 = vadd.bf16 %v19905_v37, %v19920_v43  ;;  %v19084_v37 = vmul.bf16 1056980736, %v12677_v12  ;;  %v19921_v43 = vld [vmem:[#allocation17_spill] sm:$0xff]  ;;  %v2350_v58 = vadd.bf16 1065369472, %v9373_v22 }
 0x1f7   : > { %3179 = vmatmul.mubr.bf16.gmra.mxu1 %v12634_v36  ;;  %9396 = vtanh.bf16 %v19069_v23  ;;  %v19917_v23 = vpack.c.bf16 %v19915_v35, %v19916_v13  ;;  %v12730_v35 = vadd.bf16 %v19910_v33, %v1488_v16  ;;  %v12733_v13 = vadd.bf16 %v19914_v17, %v1504_v0 }
 0x1f8   : > { %3188 = vmatprep.mubr.bf16.mxu1 %v19589_v56  ;;  %9398 = vtanh.bf16 %v19070_v48  ;;  %v19085_v16 = vmul.bf16 1056980736, %v12689_v32  ;;  %v2478_v59 = vmul.bf16 %v2350_v58, %v2094_v51 }
 0x1f9   : > { %9400 = vtanh.bf16 %v19072_v20  ;;  %v12712_v48 = vadd.bf16 %v19910_v33, %v19917_v23  ;;  %v12726_v20 = vld [vmem:[%s18931_s3 + $0x18] sm:$0xff]   ;;  %v19924_v33 = vld [vmem:[#allocation20_spill] sm:$0xff] }
 0x1fa   : > { %9402 = vtanh.bf16 %v19073_v50  ;;  %v19922_v50 = vld [vmem:[#allocation29_spill] sm:$0xff] }
 0x1fb   : > { %v9377_v23 = vpop.eup %9376  ;;  %9404 = vtanh.bf16 %v19076_v2  ;;  %v19923_v11 = vpack.c.bf16 %v19921_v43, %v19922_v50  ;;  %v19925_v2 = vld [vmem:[#allocation35_spill] sm:$0xff]  ;;  %v2031_v43 = vmul.bf16 1056980736, %v12718_v62  ;;  %v19945_v62 = vmul.bf16 1056980736, %v12686_v24 }
 0x1fc   : > { %v9379_v3 = vpop.eup %9378  ;;  %9406 = vtanh.bf16 %v19080_v18  ;;  %v19926_v26 = vpack.c.bf16 %v19924_v33, %v19925_v2 }
 0x1fd   : > { %3076 = vmatmul.mubr.bf16.gmra.mxu0 %v12726_v20  ;;  %v12744_v28 = vadd.bf16 %v19914_v17, %v19923_v11  ;;  %v9381_v0 = vpop.eup %9380  ;;  %9408 = vtanh.bf16 %v19082_v19  ;;  %v2365_v11 = vadd.bf16 1065369472, %v9377_v23 }
 0x1fe   : > { %3085 = vmatprep.mubr.bf16.mxu0 %v19589_v56  ;;  %v12754_v6 = vadd.bf16 %v19914_v17, %v19926_v26  ;;  %v9383_v50 = vpop.eup %9382  ;;  %9410 = vtanh.bf16 %v19083_v10  ;;  %v2366_v18 = vadd.bf16 1065369472, %v9381_v0  ;;  %v2016_v26 = vmul.bf16 1056980736, %v12733_v13 }
 0x1ff   : > { %3189 = vmatmul.mubr.bf16.gmra.mxu1 %v12726_v20  ;;  %v9385_v2 = vpop.eup %9384  ;;  %9412 = vtanh.bf16 %v19084_v37  ;;  %v2367_v17 = vadd.bf16 1065369472, %v9379_v3  ;;  %v2368_v33 = vadd.bf16 1065369472, %v9383_v50  ;;  %v2013_v23 = vmul.bf16 1056980736, %v12744_v28 }
 0x200   : > { %3198 = vmatprep.mubr.bf16.mxu1 %v19589_v56  ;;  %v9387_v19 = vpop.eup %9386  ;;  %9414 = vtanh.bf16 %v19085_v16  ;;  %v2494_v57 = vmul.bf16 %v2366_v18, %v2110_v39  ;;  %v2352_v0 = vadd.bf16 1065369472, %v12706_v44  ;;  %v2349_v10 = vadd.bf16 1065369472, %v12664_v25 }
 0x201   : > { %v9389_v22 = vpop.eup %9388  ;;  %9416 = vtanh.bf16 %v2014_v14  ;;  %v2493_v3 = vmul.bf16 %v2365_v11, %v2109_v27  ;;  %v2496_v50 = vmul.bf16 %v2368_v33, %v2112_v53  ;;  %v2015_v16 = vmul.bf16 1056980736, %v12754_v6 }
 0x202   : > { %v9391_v37 = vpop.eup %9390  ;;  %9418 = vtanh.bf16 %v2031_v43  ;;  %3239 = vmatprep.subr.bf16.mxu0 %v2494_v57  ;;  %v2334_v27 = vadd.bf16 1065369472, %v9385_v2  ;;  %v2000_v39 = vmul.bf16 1056980736, %v12730_v35  ;;  %v2351_v53 = vadd.bf16 1065369472, %v9387_v19 }
 0x203   : > { %v9393_v49 = vpop.eup %9392  ;;  %9420 = vtanh.bf16 %v2016_v26  ;;  %v2495_v25 = vmul.bf16 %v2367_v17, %v2111_v9  ;;  %3352 = vmatprep.subr.bf16.mxu1 %v2496_v50  ;;  %3240 = vmatpush1.bf16.msra.mxu0 %v2493_v3  ;;  %v1997_v44 = vmul.bf16 1056980736, %v12698_v31  ;;  %v2480_v7 = vmul.bf16 %v2352_v0, %v2096_v45 }
 0x204   : > { %v9395_v18 = vpop.eup %9394  ;;  %9422 = vtanh.bf16 %v2013_v23  ;;  %3241 = vmatprep.subr.bf16.mxu0 %v2478_v59  ;;  %v2336_v58 = vadd.bf16 1065369472, %v9389_v22  ;;  %v19927_v19 = vmul.bf16 1056980736, %v12686_v24  ;;  %v2333_v41 = vadd.bf16 1065369472, %v9391_v37  ;;  %v12893_v24 = vpop.permute.xlu0 %3779 }
 0x205   : > { %3086 = vmatmul.mubr.bf16.gmra.mxu0 %v12785_v61  ;;  %v9397_v51 = vpop.eup %9396  ;;  %v19928_v9 = vmul.bf16 1056980736, %v12503_v1  ;;  %3353 = vmatpush1.bf16.msra.mxu1 %v2495_v25  ;;  %v1999_v2 = vmul.bf16 1056980736, %v12712_v48  ;;  %v2462_v45 = vmul.bf16 %v2334_v27, %v19929_v21  ;;  %v2318_v17 = vadd.bf16 1065369472, %v9393_v49 }
 0x206   : > { %9424 = vtanh.bf16 %v19927_v19  ;;  %3095 = vmatprep.mubr.bf16.mxu0 %v19589_v56  ;;  %v9399_v11 = vpop.eup %9398  ;;  %3354 = vmatprep.subr.bf16.mxu1 %v2480_v7  ;;  %v2335_v1 = vadd.bf16 1065369472, %v9395_v18  ;;  %v2464_v22 = vmul.bf16 %v2336_v58, %v19931_v52  ;;  %v2320_v3 = vadd.bf16 1065369472, %v9397_v51 }
 0x207   : > { %3199 = vmatmul.mubr.bf16.gmra.mxu1 %v12785_v61  ;;  %v2477_v57 = vmul.bf16 %v2349_v10, %v19928_v9  ;;  %9426 = vtanh.bf16 %v2015_v16  ;;  %v9401_v37 = vpop.eup %9400  ;;  %v19930_v10 = vmul.bf16 1056980736, %v12555_v42  ;;  %v2317_v59 = vadd.bf16 1065369472, %v9399_v11  ;;  %v12827_v42 = vld [vmem:[%s18931_s3 + $0x28] sm:$0xff]  }
 0x208   : > { %3208 = vmatprep.mubr.bf16.mxu1 %v19589_v56  ;;  %9428 = vtanh.bf16 %v2000_v39  ;;  %v9403_v0 = vpop.eup %9402  ;;  %v19932_v27 = vmul.bf16 1056980736, %v12580_v46  ;;  %v2302_v18 = vadd.bf16 1065369472, %v9401_v37  ;;  %v19934_v58 = vmul.bf16 1056980736, %v12594_v34 }
 0x209   : > { %v2479_v33 = vmul.bf16 %v2351_v53, %v19930_v10  ;;  %3242 = vmatpush1.bf16.msra.mxu0 %v2477_v57  ;;  %9430 = vtanh.bf16 %v1997_v44  ;;  %v9405_v50 = vpop.eup %9404  ;;  %v2446_v53 = vmul.bf16 %v2318_v17, %v19933_v5  ;;  %v2319_v46 = vadd.bf16 1065369472, %v9403_v0 }
 0x20a   : > { %3243 = vmatprep.subr.bf16.mxu0 %v2462_v45  ;;  %v2461_v49 = vmul.bf16 %v2333_v41, %v19932_v27  ;;  %v9407_v25 = vpop.eup %9406  ;;  %9432 = vtanh.bf16 %v1999_v2  ;;  %v2463_v51 = vmul.bf16 %v2335_v1, %v19934_v58  ;;  %v19935_v41 = vmul.bf16 1056980736, %v12602_v8 }
 0x20b   : > { %3355 = vmatpush1.bf16.msra.mxu1 %v2479_v33  ;;  %v9409_v7 = vpop.eup %9408  ;;  %v2304_v57 = vadd.bf16 1065369472, %v9405_v50  ;;  %v2301_v4 = vadd.bf16 1065369472, %v9407_v25  ;;  %v19936_v21 = vmul.bf16 1056980736, %v12610_v38 }
 0x20c   : > { %3356 = vmatprep.subr.bf16.mxu1 %v2464_v22  ;;  %v9411_v19 = vpop.eup %9410  ;;  %v2448_v9 = vmul.bf16 %v2320_v3, %v19935_v41  ;;  %v19937_v17 = vmul.bf16 1056980736, %v12618_v40  ;;  %v2286_v1 = vadd.bf16 1065369472, %v9409_v7  ;;  %v19938_v8 = vmul.bf16 1056980736, %v12626_v29 }
 0x20d   : > { %3096 = vmatmul.mubr.bf16.gmra.mxu0 %v12827_v42  ;;  %v9413_v11 = vpop.eup %9412  ;;  %v2445_v45 = vmul.bf16 %v2317_v59, %v19936_v21  ;;  %v2303_v33 = vadd.bf16 1065369472, %v9411_v19  ;;  %v19939_v38 = vmul.bf16 1056980736, %v12640_v54  ;;  %v19940_v27 = vmul.bf16 1056980736, %v12649_v15 }
 0x20e   : > { %3244 = vmatpush1.bf16.msra.mxu0 %v2461_v49  ;;  %3105 = vmatprep.mubr.bf16.mxu0 %v19589_v56  ;;  %v9415_v34 = vpop.eup %9414  ;;  %v2430_v37 = vmul.bf16 %v2302_v18, %v19937_v17  ;;  %v2447_v0 = vmul.bf16 %v2319_v46, %v19938_v8  ;;  %v2288_v3 = vadd.bf16 1065369472, %v9413_v11  ;;  %v12852_v29 = vld [vmem:[%s18931_s3 + $0x30] sm:$0xff]   ;;  %v19941_v25 = vmul.bf16 1056980736, %v12658_v55 }
 0x20f   : > { %3209 = vmatmul.mubr.bf16.gmra.mxu1 %v12827_v42  ;;  %3245 = vmatprep.subr.bf16.mxu0 %v2446_v53  ;;  %v9417_v10 = vpop.eup %9416  ;;  %v2432_v22 = vmul.bf16 %v2304_v57, %v19939_v38  ;;  %v2285_v59 = vadd.bf16 1065369472, %v9415_v34  ;;  %v2429_v49 = vmul.bf16 %v2301_v4, %v19940_v27  ;;  %v19942_v7 = vmul.bf16 1056980736, %v12669_v63 }
 0x210   : > { %3357 = vmatpush1.bf16.msra.mxu1 %v2463_v51  ;;  %3218 = vmatprep.mubr.bf16.mxu1 %v19589_v56  ;;  %v9419_v52 = vpop.eup %9418  ;;  %v2414_v54 = vmul.bf16 %v2286_v1, %v19941_v25  ;;  %v2270_v5 = vadd.bf16 1065369472, %v9417_v10  ;;  %v19943_v58 = vmul.bf16 1056980736, %v12677_v12 }
 0x211   : > { %3358 = vmatprep.subr.bf16.mxu1 %v2448_v9  ;;  %v9421_v50 = vpop.eup %9420  ;;  %v2287_v18 = vadd.bf16 1065369472, %v9419_v52  ;;  %v2431_v15 = vmul.bf16 %v2303_v33, %v19942_v7  ;;  %v19944_v9 = vmul.bf16 1056980736, %v12689_v32 }
 0x212   : > { %3246 = vmatpush1.bf16.msra.mxu0 %v2445_v45  ;;  %v9423_v40 = vpop.eup %9422  ;;  %v2416_v51 = vmul.bf16 %v2288_v3, %v19943_v58  ;;  %v2272_v19 = vadd.bf16 1065369472, %v9421_v50  ;;  %v2398_v11 = vmul.bf16 %v2270_v5, %v2014_v14  ;;  %v12877_v14 = vld [vmem:[%s18931_s3 + $0x38] sm:$0xff]   ;;  %v19956_v5 = vld [vmem:[#allocation26_spill] sm:$0xff] }
 0x213   : > { %3247 = vmatprep.subr.bf16.mxu0 %v2430_v37  ;;  %v2269_v55 = vadd.bf16 1065369472, %v9423_v40  ;;  %v2413_v57 = vmul.bf16 %v2285_v59, %v19944_v9  ;;  %v2415_v12 = vmul.bf16 %v2287_v18, %v2031_v43 }
 0x214   : > { %3359 = vmatpush1.bf16.msra.mxu1 %v2447_v0  ;;  %v9425_v53 = vpop.eup %9424  ;;  %v2400_v32 = vmul.bf16 %v2272_v19, %v2016_v26 }
 0x215   : > { %3360 = vmatprep.subr.bf16.mxu1 %v2432_v22  ;;  %3106 = vmatmul.mubr.bf16.gmra.mxu0 %v12852_v29  ;;  %v9427_v46 = vpop.eup %9426  ;;  %v2254_v4 = vadd.bf16 1065369472, %v9425_v53  ;;  %v2397_v37 = vmul.bf16 %v2269_v55, %v2013_v23 }
 0x216   : > { %3248 = vmatpush1.bf16.msra.mxu0 %v2429_v49  ;;  %3115 = vmatprep.mubr.bf16.mxu0 %v19589_v56  ;;  %v9429_v41 = vpop.eup %9428  ;;  %v2271_v21 = vadd.bf16 1065369472, %v9427_v46 }
 0x217   : > { %3219 = vmatmul.mubr.bf16.gmra.mxu1 %v12852_v29  ;;  %3249 = vmatprep.subr.bf16.mxu0 %v2414_v54  ;;  %v9431_v63 = vpop.eup %9430  ;;  %v2256_v34 = vadd.bf16 1065369472, %v9429_v41  ;;  %v2382_v60 = vmul.bf16 %v2254_v4, %v19945_v62 }
 0x218   : > { %3361 = vmatpush1.bf16.msra.mxu1 %v2431_v15  ;;  %3228 = vmatprep.mubr.bf16.mxu1 %v19589_v56  ;;  %v9433_v45 = vpop.eup %9432  ;;  %v2253_v17 = vadd.bf16 1065369472, %v9431_v63  ;;  %v2399_v13 = vmul.bf16 %v2271_v21, %v2015_v16  ;;  %v12895_v16 = vpop.permute.xlu1 %3791 }
 0x219   : > { %3362 = vmatprep.subr.bf16.mxu1 %v2416_v51  ;;  %v2255_v43 = vadd.bf16 1065369472, %v9433_v45  ;;  %v2384_v28 = vmul.bf16 %v2256_v34, %v2000_v39 }
 0x21a   : > { %3250 = vmatpush1.bf16.msra.mxu0 %v2413_v57  ;;  %v2381_v26 = vmul.bf16 %v2253_v17, %v1997_v44  ;;  %v12911_v44 = vpop.permute.xlu0 %3755 }
 0x21b   : > { %3251 = vmatprep.subr.bf16.mxu0 %v2398_v11  ;;  %v2383_v6 = vmul.bf16 %v2255_v43, %v1999_v2 }
 0x21c   : > { %3363 = vmatpush1.bf16.msra.mxu1 %v2415_v12  ;;  %v12913_v2 = vpop.permute.xlu1 %3767 }
 0x21d   : > { %3364 = vmatprep.subr.bf16.mxu1 %v2400_v32  ;;  %3116 = vmatmul.mubr.bf16.gmra.mxu0 %v12877_v14 }
 0x21e   : > { %3252 = vmatpush1.bf16.msra.mxu0 %v2397_v37  ;;  %3271 = vmatprep.mubr.bf16.mxu0 %v19589_v56  ;;  %v12897_v23 = vpop.f32.mrf.mxu0  ;;  %v12938_v50 = vpop.permute.xlu0 %3731 }
 0x21f   : > { %3229 = vmatmul.mubr.bf16.gmra.mxu1 %v12877_v14  ;;  %3253 = vmatprep.subr.bf16.mxu0 %v2382_v60  ;;  %19946 = vst [vmem:[#allocation21_spill] sm:$0xff] %v12897_v23 }
 0x220   : > { %3365 = vmatpush1.bf16.msra.mxu1 %v2399_v13  ;;  %3384 = vmatprep.mubr.bf16.mxu1 %v19589_v56  ;;  %v12901_v31 = vpop.f32.mrf.mxu1  ;;  %v12904_v35 = vpop.f32.mrf.mxu0 }
 0x221   : > { %3366 = vmatprep.subr.bf16.mxu1 %v2384_v28  ;;  %19947 = vst [vmem:[#allocation9_spill] sm:$0xff] %v12901_v31  ;;  %v12940_v59 = vpop.permute.xlu1 %3743 }
 0x222   : > { %3254 = vmatpush1.bf16.msra.mxu0 %v2381_v26  ;;  %v12907_v48 = vpop.f32.mrf.mxu1  ;;  %v12909_v39 = vpop.f32.mrf.mxu0 }
 0x223   : > { %19948 = vst [vmem:[#allocation22_spill] sm:$0xff] %v12909_v39  ;;  %v12962_v7 = vpop.permute.xlu0 %3707 }
 0x224   : > { %3367 = vmatpush1.bf16.msra.mxu1 %v2383_v6  ;;  %v12917_v10 = vpop.f32.mrf.mxu1  ;;  %v12919_v33 = vpop.f32.mrf.mxu0 }
 0x225   : > { %3272 = vmatmul.mubr.bf16.vlgmr.msra.gmra.mxu0 %v12508_v47  ;;  %19949 = vst [vmem:[#allocation25_spill] sm:$0xff] %v12917_v10  ;;  %v12964_v15 = vpop.permute.xlu1 %3719 }
 0x226   : > { %3281 = vmatprep.mubr.bf16.mxu0 %v19589_v56  ;;  %v12925_v0 = vpop.f32.mrf.mxu1  ;;  %v12927_v52 = vpop.f32.mrf.mxu0 }
 0x227   : > { %3385 = vmatmul.mubr.bf16.vlgmr.msra.gmra.mxu1 %v12508_v47  ;;  %19950 = vst [vmem:[#allocation6_spill] sm:$0xff] %v12927_v52  ;;  %v12985_v63 = vpop.permute.xlu0 %3683 }
 0x228   : > { %3394 = vmatprep.mubr.bf16.mxu1 %v19589_v56  ;;  %v12933_v22 = vpop.f32.mrf.mxu1  ;;  %v12936_v3 = vpop.f32.mrf.mxu0 }
 0x229   : > { %19951 = vst [vmem:[#allocation16_spill] sm:$0xff] %v12933_v22  ;;  %v12987_v11 = vpop.permute.xlu1 %3695 }
 0x22a   : > { %v12943_v27 = vpop.f32.mrf.mxu1  ;;  %v12945_v49 = vpop.f32.mrf.mxu0 }
 0x22b   : > { %19952 = vst [vmem:[#allocation30_spill] sm:$0xff] %v12945_v49  ;;  %v3660_v34 = vpop.permute.xlu0 %3659 }
 0x22c   : > { %v12949_v25 = vpop.f32.mrf.mxu1  ;;  %v12951_v54 = vpop.f32.mrf.mxu0  ;;  %v3668_v52 = vrot.slane %v3660_v34, %v19956_v5  ;;  %v19959_v34 = vpack.c.bf16 %v12919_v33, %v12904_v35 }
 0x22d   : > { %3282 = vmatmul.mubr.bf16.gmra.mxu0 %v12562_v30  ;;  %19953 = vst [vmem:[#allocation12_spill] sm:$0xff] %v12949_v25  ;;  %v3672_v17 = vpop.permute.xlu1 %3671  ;;  %v19964_v33 = vpack.c.bf16 %v12951_v54, %v12936_v3 }
 0x22e   : > { %3291 = vmatprep.mubr.bf16.mxu0 %v19589_v56  ;;  %v12957_v53 = vpop.f32.mrf.mxu1  ;;  %v12959_v18 = vpop.f32.mrf.mxu0 }
 0x22f   : > { %3395 = vmatmul.mubr.bf16.gmra.mxu1 %v12562_v30  ;;  %19954 = vst [vmem:[#allocation23_spill] sm:$0xff] %v12959_v18  ;;  %v3636_v28 = vpop.permute.xlu0 %3635 }
 0x230   : > { %3404 = vmatprep.mubr.bf16.mxu1 %v19589_v56  ;;  %v12969_v58 = vpop.f32.mrf.mxu1  ;;  %v12972_v51 = vpop.f32.mrf.mxu0  ;;  %v3644_v22 = vrot.slane %v3636_v28, %v19956_v5  ;;  %v3740_v28 = vrot.slane %v12938_v50, %v19956_v5  ;;  %v3776_v50 = vrot.slane %v12913_v2, %v19956_v5 }
 0x231   : > { %v3648_v26 = vpop.permute.xlu1 %3647 }
 0x232   : > { %v12975_v19 = vpop.f32.mrf.mxu1  ;;  %v12977_v41 = vpop.f32.mrf.mxu0  ;;  %v3656_v25 = vrot.slane %v3648_v26, %v19956_v5  ;;  %v3752_v26 = vrot.slane %v12940_v59, %v19956_v5 }
 0x233   : > { %19955 = vst [vmem:[#allocation8_spill] sm:$0xff] %v12977_v41 }
 0x234   : > { %v12981_v9 = vpop.f32.mrf.mxu1  ;;  %v12983_v57 = vpop.f32.mrf.mxu0  ;;  %v13059_v41 = vcombine.low %v3644_v22, %v3656_v25  ;;  %v19962_v22 = vpack.c.bf16 %v12925_v0, %v12907_v48  ;;  %v3788_v48 = vrot.slane %v12893_v24, %v19956_v5  ;;  %v13098_v0 = vcombine.low %v3740_v28, %v3752_v26 }
 0x235   : > { %3292 = vmatmul.mubr.bf16.gmra.mxu0 %v12634_v36  ;;  %v3624_v46 = vpop.permute.xlu1 %3623  ;;  %v3498_v18 = vpack.c.bf16 %v12983_v57, %v12972_v51  ;;  %v3764_v51 = vrot.slane %v12911_v44, %v19956_v5  ;;  %v3728_v24 = vrot.slane %v12964_v15, %v19956_v5 }
 0x236   : > { %3301 = vmatprep.mubr.bf16.mxu0 %v19589_v56  ;;  %v12991_v4 = vpop.f32.mrf.mxu0  ;;  %v3632_v8 = vrot.slane %v3624_v46, %v19956_v5  ;;  %19958 = vst [vmem:[#allocation15_spill] sm:$0xff] %v13059_v41  ;;  %v13087_v25 = vadd.bf16 %v13059_v41, %v19964_v33  ;;  %19965 = vst [vmem:[#allocation10_spill] sm:$0xff] %v13098_v0 }
 0x237   : > { %3405 = vmatmul.mubr.bf16.gmra.mxu1 %v12634_v36  ;;  %v12989_v36 = vpop.f32.mrf.mxu1 }
 0x238   : > { %3414 = vmatprep.mubr.bf16.mxu1 %v19589_v56  ;;  %v12998_v12 = vpop.f32.mrf.mxu0  ;;  %v19098_v28 = vmul.bf16 1056980736, %v13087_v25 }
 0x239   : > { %v12995_v21 = vpop.f32.mrf.mxu1 }
 0x23a   : > { %v13003_v32 = vpop.f32.mrf.mxu0 }
 0x23b   : > { %v13001_v45 = vpop.f32.mrf.mxu1 }
 0x23c   : > { %v13007_v62 = vpop.f32.mrf.mxu0 }
 0x23d   : > { %3302 = vmatmul.mubr.bf16.gmra.mxu0 %v12726_v20  ;;  %v13005_v37 = vpop.f32.mrf.mxu1 }
 0x23e   : > { %3311 = vmatprep.mubr.bf16.mxu0 %v19589_v56  ;;  %v13011_v43 = vpop.f32.mrf.mxu0 }
 0x23f   : > { %3415 = vmatmul.mubr.bf16.gmra.mxu1 %v12726_v20  ;;  %v13009_v60 = vpop.f32.mrf.mxu1 }
 0x240   : > { %3424 = vmatprep.mubr.bf16.mxu1 %v19589_v56  ;;  %v13018_v13 = vpop.f32.mrf.mxu0 }
 0x241   : > { %v13015_v20 = vpop.f32.mrf.mxu1 }
 0x242   : > { %v13023_v47 = vpop.f32.mrf.mxu0 }
 0x243   : > { %v13021_v6 = vpop.f32.mrf.mxu1 }
 0x244   : > { %v13027_v1 = vpop.f32.mrf.mxu0 }
 0x245   : > { %3312 = vmatmul.mubr.bf16.gmra.mxu0 %v12785_v61  ;;  %v13025_v30 = vpop.f32.mrf.mxu1 }
 0x246   : > { %3321 = vmatprep.mubr.bf16.mxu0 %v19589_v56 }
 0x247   : > { %3425 = vmatmul.mubr.bf16.gmra.mxu1 %v12785_v61  ;;  %v13029_v40 = vpop.f32.mrf.mxu1  ;;  %v13031_v55 = vpop.f32.mrf.mxu0 }
 0x248   : > { %3434 = vmatprep.mubr.bf16.mxu1 %v19589_v56  ;;  %v3612_v61 = vpop.permute.xlu0 %3611 }
 0x249   : > { %v3620_v38 = vrot.slane %v3612_v61, %v19956_v5  ;;  %v13037_v31 = vpop.f32.mrf.mxu1  ;;  %v2647_v10 = vpop.f32.mrf.mxu0  ;;  %v3680_v61 = vrot.slane %v3672_v17, %v19956_v5 }
 0x24b   : > { %v13043_v23 = vpop.f32.mrf.mxu1  ;;  %v13045_v39 = vpop.f32.mrf.mxu0  ;;  %v13049_v46 = vcombine.low %v3620_v38, %v3632_v8  ;;  %v13074_v59 = vcombine.low %v3668_v52, %v3680_v61 }
 0x24d   : > { %3322 = vmatmul.mubr.bf16.gmra.mxu0 %v12827_v42  ;;  %19957 = vst [vmem:[#allocation11_spill] sm:$0xff] %v13049_v46  ;;  %v13051_v49 = vpop.f32.mrf.mxu1  ;;  %v13065_v8 = vadd.bf16 %v13049_v46, %v19959_v34  ;;  %19961 = vst [vmem:[#allocation18_spill] sm:$0xff] %v13074_v59  ;;  %v13080_v35 = vadd.bf16 %v13049_v46, %v19962_v22  ;;  %v13093_v52 = vadd.bf16 %v13074_v59, %v3498_v18 }
 0x24e   : > { %3331 = vmatprep.mubr.bf16.mxu0 %v19589_v56  ;;  %v3716_v34 = vrot.slane %v12962_v7, %v19956_v5 }
 0x24f   : > { %3435 = vmatmul.mubr.bf16.gmra.mxu1 %v12827_v42  ;;  %v2651_v42 = vpop.f32.mrf.mxu0  ;;  %19960 = vst [vmem:[#allocation34_spill] sm:$0xff] %v13065_v8  ;;  %v13067_v38 = vpop.f32.mrf.mxu1  ;;  %19963 = vst [vmem:[#allocation31_spill] sm:$0xff] %v13080_v35  ;;  %v19097_v3 = vmul.bf16 1056980736, %v13065_v8  ;;  %v20010_v8 = vld [vmem:[#allocation25_spill] sm:$0xff] }
 0x250   : > { %3444 = vmatprep.mubr.bf16.mxu1 %v19589_v56  ;;  %v3546_v44 = vpack.c.bf16 %v2651_v42, %v2647_v10  ;;  %v3800_v10 = vrot.slane %v12895_v16, %v19956_v5  ;;  %v13103_v42 = vcombine.low %v3764_v51, %v3776_v50  ;;  %v3692_v16 = vrot.slane %v12985_v63, %v19956_v5 }
 0x251   : > { %v2655_v17 = vpop.f32.mrf.mxu0  ;;  %v13089_v57 = vpop.f32.mrf.mxu1  ;;  %v3704_v51 = vrot.slane %v12987_v11, %v19956_v5  ;;  %9434 = vtanh.bf16 %v19097_v3  ;;  %v13130_v11 = vcombine.low %v3716_v34, %v3728_v24  ;;  %v3514_v24 = vpack.c.bf16 %v13007_v62, %v12998_v12 }
 0x252   : > { %19966 = vst [vmem:[#allocation13_spill] sm:$0xff] %v13103_v42  ;;  %v13112_v26 = vadd.bf16 %v13098_v0, %v3546_v44  ;;  %v3530_v3 = vpack.c.bf16 %v13027_v1, %v13018_v13  ;;  %v3532_v12 = vpack.c.bf16 %v13029_v40, %v13021_v6  ;;  %v3547_v40 = vpack.c.bf16 %v13051_v49, %v13037_v31 }
 0x253   : > { %v2657_v2 = vpop.f32.mrf.mxu0  ;;  %v2770_v54 = vpop.f32.mrf.mxu1  ;;  %19968 = vst [vmem:[#allocation24_spill] sm:$0xff] %v13130_v11  ;;  %v3531_v49 = vpack.c.bf16 %v13025_v30, %v13015_v20 }
 0x255   : > { %3332 = vmatmul.mubr.bf16.gmra.mxu0 %v12852_v29  ;;  %v2659_v61 = vpop.f32.mrf.mxu0  ;;  %v2772_v22 = vpop.f32.mrf.mxu1 }
 0x256   : > { %3341 = vmatprep.mubr.bf16.mxu0 %v19589_v56  ;;  %v3561_v18 = vpack.c.bf16 %v2659_v61, %v2655_v17  ;;  %v19099_v17 = vmul.bf16 1056980736, %v13093_v52  ;;  %v13125_v61 = vcombine.low %v3788_v48, %v3800_v10  ;;  %v13139_v10 = vcombine.low %v3692_v16, %v3704_v51 }
 0x257   : > { %3445 = vmatmul.mubr.bf16.gmra.mxu1 %v12852_v29  ;;  %v19096_v29 = vmul.bf16 1056980736, %v13080_v35  ;;  %v2661_v33 = vpop.f32.mrf.mxu0  ;;  %v2774_v15 = vpop.f32.mrf.mxu1  ;;  %v3563_v51 = vpack.c.bf16 %v2772_v22, %v13089_v57 }
 0x258   : > { %3454 = vmatprep.mubr.bf16.mxu1 %v19589_v56  ;;  %v3562_v50 = vpack.c.bf16 %v2661_v33, %v2657_v2  ;;  %v13122_v7 = vadd.bf16 %v13103_v42, %v3561_v18  ;;  %19967 = vst [vmem:[#allocation33_spill] sm:$0xff] %v13125_v61  ;;  %v3564_v63 = vpack.c.bf16 %v2774_v15, %v2770_v54  ;;  %v19100_v2 = vmul.bf16 1056980736, %v13112_v26 }
 0x259   : > { %v2665_v44 = vpop.f32.mrf.mxu0  ;;  %9436 = vtanh.bf16 %v19096_v29  ;;  %v2778_v33 = vpop.f32.mrf.mxu1  ;;  %19969 = vst [vmem:[#allocation32_spill] sm:$0xff] %v13139_v10  ;;  %v3500_v54 = vpack.c.bf16 %v12989_v36, %v12975_v19  ;;  %v3516_v29 = vpack.c.bf16 %v13009_v60, %v13001_v45  ;;  %v3499_v36 = vpack.c.bf16 %v12981_v9, %v12969_v58 }
 0x25a   : > { %9438 = vtanh.bf16 %v19098_v28  ;;  %v13136_v18 = vadd.bf16 %v13103_v42, %v3562_v50  ;;  %v13146_v34 = vadd.bf16 %v13103_v42, %v3564_v63  ;;  %v19101_v16 = vmul.bf16 1056980736, %v13122_v7 }
 0x25b   : > { %v2667_v48 = vpop.f32.mrf.mxu0  ;;  %9440 = vtanh.bf16 %v19099_v17  ;;  %v2780_v50 = vpop.f32.mrf.mxu1  ;;  %v3529_v63 = vpack.c.bf16 %v13023_v47, %v13011_v43  ;;  %v13236_v17 = vadd.bf16 %v13139_v10, %v3514_v24  ;;  %v3515_v24 = vpack.c.bf16 %v13005_v37, %v12995_v21 }
 0x25c   : > { %9442 = vtanh.bf16 %v19100_v2  ;;  %v19103_v62 = vmul.bf16 1056980736, %v13136_v18  ;;  %v19102_v22 = vmul.bf16 1056980736, %v13146_v34  ;;  %v13284_v37 = vadd.bf16 %v13074_v59, %v3500_v54 }
 0x25d   : > { %3342 = vmatmul.mubr.bf16.gmra.mxu0 %v12877_v14  ;;  %v2669_v15 = vpop.f32.mrf.mxu0  ;;  %9444 = vtanh.bf16 %v19101_v16  ;;  %v13304_v54 = vadd.bf16 %v13139_v10, %v3515_v24 }
 0x25e   : > { %4585 = vmatprep.mubr.bf16.mxu0 %v19589_v56  ;;  %v3577_v28 = vpack.c.bf16 %v2669_v15, %v2665_v44  ;;  %9446 = vtanh.bf16 %v19103_v62 }
 0x25f   : > { %3455 = vmatmul.mubr.bf16.gmra.mxu1 %v12877_v14  ;;  %v3548_v14 = vpack.c.bf16 %v13067_v38, %v13043_v23  ;;  %v3545_v23 = vpack.c.bf16 %v13045_v39, %v13031_v55  ;;  %v2782_v38 = vpop.f32.mrf.mxu1  ;;  %v2671_v57 = vpop.f32.mrf.mxu0  ;;  %v13180_v39 = vadd.bf16 %v13103_v42, %v3563_v51  ;;  %9448 = vtanh.bf16 %v19102_v22 }
 0x260   : > { %4698 = vmatprep.mubr.bf16.mxu1 %v19589_v56  ;;  %v13170_v47 = vadd.bf16 %v13125_v61, %v3577_v28  ;;  %v3579_v1 = vpack.c.bf16 %v2782_v38, %v2778_v33  ;;  %v3578_v43 = vpack.c.bf16 %v2671_v57, %v2667_v48  ;;  %v13194_v48 = vadd.bf16 %v13130_v11, %v3530_v3 }
 0x261   : > { %v13175_v13 = vadd.bf16 %v13098_v0, %v3548_v14  ;;  %v2784_v55 = vpop.f32.mrf.mxu1  ;;  %v13182_v6 = vpop.f32.mrf.mxu0  ;;  %v13197_v14 = vadd.bf16 %v13098_v0, %v3545_v23  ;;  %v13213_v3 = vadd.bf16 %v13130_v11, %v3532_v12  ;;  %v13216_v23 = vadd.bf16 %v13098_v0, %v3547_v40 }
 0x262   : > { %19970 = vst [vmem:[#allocation28_spill] sm:$0xff] %v13182_v6  ;;  %v19105_v28 = vmul.bf16 1056980736, %v13170_v47  ;;  %v13186_v44 = vadd.bf16 %v13125_v61, %v3579_v1  ;;  %v13189_v33 = vadd.bf16 %v13125_v61, %v3578_v43  ;;  %v3580_v31 = vpack.c.bf16 %v2784_v55, %v2780_v50  ;;  %v13231_v55 = vpop.eup %9434  ;;  %v19995_v6 = vld [vmem:[#allocation6_spill] sm:$0xff] }
 0x263   : > { %v13203_v15 = vpop.f32.mrf.mxu0  ;;  %v19109_v38 = vmul.bf16 1056980736, %v13180_v39  ;;  %v19108_v43 = vmul.bf16 1056980736, %v13175_v13  ;;  %v19110_v2 = vmul.bf16 1056980736, %v13194_v48  ;;  %v13248_v40 = vadd.bf16 %v13130_v11, %v3529_v63 }
 0x264   : > { %v13201_v51 = vpop.f32.mrf.mxu1  ;;  %v19104_v50 = vmul.bf16 1056980736, %v13186_v44  ;;  %v19106_v30 = vmul.bf16 1056980736, %v13189_v33  ;;  %v13210_v20 = vadd.bf16 %v13125_v61, %v3580_v31  ;;  %9450 = vtanh.bf16 %v19105_v28  ;;  %v20001_v61 = vld [vmem:[#allocation12_spill] sm:$0xff] }
 0x265   : > { %19971 = vst [vmem:[#allocation36_spill] sm:$0xff] %v13201_v51  ;;  %v13223_v1 = vpop.f32.mrf.mxu0  ;;  %v3513_v31 = vpack.c.bf16 %v13003_v32, %v12991_v4  ;;  %v13260_v28 = vadd.bf16 %v13130_v11, %v3531_v49  ;;  %v13275_v4 = vadd.bf16 %v13139_v10, %v3516_v29  ;;  %v19113_v21 = vmul.bf16 1056980736, %v13213_v3  ;;  %v19984_v51 = vld [vmem:[#allocation23_spill] sm:$0xff] }
 0x266   : > { %v13221_v57 = vpop.f32.mrf.mxu1  ;;  %19972 = vst [vmem:[#allocation37_spill] sm:$0xff] %v13223_v1  ;;  %9452 = vtanh.bf16 %v19104_v50  ;;  %v19107_v12 = vmul.bf16 1056980736, %v13210_v20 }
 0x267   : > { %9454 = vtanh.bf16 %v19106_v30  ;;  %v13243_v22 = vpop.f32.mrf.mxu0  ;;  %v13245_v62 = vpop.eup %9436  ;;  %v19111_v30 = vmul.bf16 1056980736, %v13216_v23  ;;  %v13294_v29 = vadd.bf16 %v13139_v10, %v3513_v31  ;;  %v19999_v10 = vld [vmem:[#allocation21_spill] sm:$0xff] }
 0x268   : > { %v13241_v16 = vpop.f32.mrf.mxu1  ;;  %9456 = vtanh.bf16 %v19107_v12  ;;  %v13255_v32 = vpop.eup %9438 }
 0x269   : > { %19973 = vst [vmem:[#allocation27_spill] sm:$0xff] %v13241_v16  ;;  %9458 = vtanh.bf16 %v19109_v38  ;;  %v13267_v50 = vpop.f32.mrf.mxu0  ;;  %v13269_v12 = vpop.eup %9440  ;;  %v19976_v38 = vmul.bf16 1056980736, %v13197_v14 }
 0x26a   : > { %v13265_v63 = vpop.f32.mrf.mxu1  ;;  %19974 = vst [vmem:[#allocation19_spill] sm:$0xff] %v13267_v50  ;;  %9460 = vtanh.bf16 %v19108_v43  ;;  %v13299_v19 = vpop.eup %9442 }
 0x26b   : > { %9462 = vtanh.bf16 %v19110_v2  ;;  %v13291_v60 = vpop.f32.mrf.mxu0  ;;  %v13318_v9 = vpop.eup %9444  ;;  %v19980_v2 = vmul.bf16 1056980736, %v13236_v17 }
 0x26c   : > { %v13289_v45 = vpop.f32.mrf.mxu1  ;;  %9464 = vtanh.bf16 %v19976_v38  ;;  %v19979_v38 = vpack.c.bf16 %v12957_v53, %v12943_v27  ;;  %v19986_v53 = vmul.bf16 1056980736, %v13248_v40  ;;  %v19990_v27 = vmul.bf16 1056980736, %v13275_v4 }
 0x26d   : > { %19975 = vst [vmem:[#allocation14_spill] sm:$0xff] %v13289_v45  ;;  %9466 = vtanh.bf16 %v19111_v30  ;;  %v13311_v49 = vpop.f32.mrf.mxu0  ;;  %v9447_v30 = vpop.eup %9446  ;;  %v19991_v45 = vmul.bf16 1056980736, %v13284_v37 }
 0x26e   : > { %v13309_v31 = vpop.f32.mrf.mxu1  ;;  %19978 = vst [vmem:[#allocation17_spill] sm:$0xff] %v13311_v49  ;;  %9468 = vtanh.bf16 %v19113_v21  ;;  %v13324_v24 = vadd.bf16 %v13059_v41, %v19979_v38  ;;  %v19983_v21 = vld [vmem:[#allocation8_spill] sm:$0xff]  ;;  %v19987_v49 = vmul.bf16 1056980736, %v13260_v28 }
 0x26f   : > { %19977 = vst [vmem:[#allocation7_spill] sm:$0xff] %v13309_v31  ;;  %9470 = vtanh.bf16 %v19980_v2  ;;  %v13331_v5 = vpop.f32.mrf.mxu0  ;;  %v19985_v58 = vpack.c.bf16 %v19983_v21, %v19984_v51  ;;  %v13345_v2 = vadd.bf16 %v13074_v59, %v3499_v36  ;;  %v19998_v31 = vld [vmem:[#allocation22_spill] sm:$0xff] }
 0x270   : > { %v13329_v43 = vpop.f32.mrf.mxu1  ;;  %19982 = vst [vmem:[#allocation20_spill] sm:$0xff] %v13331_v5  ;;  %9472 = vtanh.bf16 %v19986_v53  ;;  %v20011_v5 = vld [vmem:[#allocation9_spill] sm:$0xff] }
 0x271   : > { %19981 = vst [vmem:[#allocation29_spill] sm:$0xff] %v13329_v43  ;;  %v13337_v16 = vadd.bf16 %v13074_v59, %v19985_v58  ;;  %9474 = vtanh.bf16 %v19987_v49  ;;  %v13352_v21 = vpop.f32.mrf.mxu0  ;;  %v9449_v58 = vpop.eup %9448  ;;  %v19994_v49 = vld [vmem:[#allocation30_spill] sm:$0xff] }
 0x272   : > { %v13350_v51 = vpop.f32.mrf.mxu1  ;;  %19989 = vst [vmem:[#allocation8_spill] sm:$0xff] %v13352_v21  ;;  %9476 = vtanh.bf16 %v19990_v27  ;;  %v9451_v53 = vpop.eup %9450  ;;  %v19996_v1 = vpack.c.bf16 %v19994_v49, %v19995_v6  ;;  %v19997_v27 = vmul.bf16 1056980736, %v13294_v29  ;;  %v20004_v49 = vmul.bf16 1056980736, %v13304_v54 }
 0x273   : > { %19988 = vst [vmem:[#allocation35_spill] sm:$0xff] %v13350_v51  ;;  %9478 = vtanh.bf16 %v19991_v45  ;;  %v13361_v50 = vpop.f32.mrf.mxu0  ;;  %v20000_v45 = vpack.c.bf16 %v19998_v31, %v19999_v10  ;;  %v4345_v10 = vadd.bf16 1065369472, %v9451_v53  ;;  %v20012_v53 = vpack.c.bf16 %v20010_v8, %v20011_v5 }
 0x274   : > { %v13359_v36 = vpop.f32.mrf.mxu1  ;;  %19993 = vst [vmem:[#allocation38_spill] sm:$0xff] %v13361_v50  ;;  %v9453_v43 = vpop.eup %9452  ;;  %v13367_v59 = vadd.bf16 %v13059_v41, %v19996_v1  ;;  %9480 = vtanh.bf16 %v19997_v27  ;;  %v20002_v50 = vld [vmem:[#allocation16_spill] sm:$0xff]  ;;  %v20016_v8 = vmul.bf16 1056980736, %v13189_v33 }
 0x275   : > { %19992 = vst [vmem:[#allocation23_spill] sm:$0xff] %v13359_v36  ;;  %v9455_v38 = vpop.eup %9454  ;;  %v13376_v11 = vadd.bf16 %v13049_v46, %v20000_v45  ;;  %v20003_v56 = vpack.c.bf16 %v20001_v61, %v20002_v50  ;;  %9482 = vtanh.bf16 %v20004_v49  ;;  %v13389_v27 = vpop.f32.mrf.mxu0  ;;  %v4347_v31 = vadd.bf16 1065369472, %v9453_v43 }
 0x276   : > { %v13387_v51 = vpop.f32.mrf.mxu1  ;;  %20006 = vst [vmem:[#allocation6_spill] sm:$0xff] %v13389_v27  ;;  %v9457_v42 = vpop.eup %9456  ;;  %v4346_v0 = vadd.bf16 1065369472, %v9455_v38  ;;  %v13403_v43 = vadd.bf16 %v13049_v46, %v20012_v53  ;;  %v20013_v45 = vmul.bf16 1056980736, %v13337_v16 }
 0x277   : > { %v13382_v6 = vadd.bf16 %v13059_v41, %v20003_v56  ;;  %20005 = vst [vmem:[#allocation30_spill] sm:$0xff] %v13387_v51  ;;  %v9459_v61 = vpop.eup %9458  ;;  %v20007_v56 = vmul.bf16 1056980736, %v13324_v24  ;;  %v13397_v1 = vpop.f32.mrf.mxu0  ;;  %v4348_v49 = vadd.bf16 1065369472, %v9457_v42 }
 0x278   : > { %v13395_v50 = vpop.f32.mrf.mxu1  ;;  %20009 = vst [vmem:[#allocation21_spill] sm:$0xff] %v13397_v1  ;;  %v4330_v41 = vadd.bf16 1065369472, %v9447_v30  ;;  %v4332_v51 = vadd.bf16 1065369472, %v9449_v58  ;;  %v9461_v35 = vpop.eup %9460  ;;  %v4474_v53 = vmul.bf16 %v4346_v0, %v20016_v8 }
 0x279   : > { %9484 = vtanh.bf16 %v20007_v56  ;;  %20008 = vst [vmem:[#allocation22_spill] sm:$0xff] %v13395_v50  ;;  %v13410_v21 = vpop.eup %9462  ;;  %v20014_v30 = vmul.bf16 1056980736, %v13345_v2  ;;  %v13417_v5 = vpop.f32.mrf.mxu0  ;;  %v20017_v38 = vmul.bf16 1056980736, %v13210_v20 }
 0x27a   : > { %9486 = vtanh.bf16 %v20013_v45  ;;  %v13415_v58 = vpop.f32.mrf.mxu1  ;;  %v9465_v27 = vpop.eup %9464  ;;  %v4329_v56 = vadd.bf16 1065369472, %v13318_v9  ;;  %v4331_v36 = vadd.bf16 1065369472, %v9459_v61  ;;  %v20018_v50 = vmul.bf16 1056980736, %v13170_v47  ;;  %4553 = vmatprep.subr.bf16.mxu0 %v4474_v53 }
 0x27b   : > { %9488 = vtanh.bf16 %v20014_v30  ;;  %20015 = vst [vmem:[#allocation12_spill] sm:$0xff] %v13415_v58  ;;  %v4476_v45 = vmul.bf16 %v4348_v49, %v20017_v38  ;;  %v20019_v1 = vmul.bf16 1056980736, %v13186_v44  ;;  %v9467_v46 = vpop.eup %9466  ;;  %v13430_v33 = vpop.f32.mrf.mxu0  ;;  %v20020_v0 = vmul.bf16 1056980736, %v13136_v18 }
 0x27c   : > { %v4473_v42 = vmul.bf16 %v4345_v10, %v20018_v50  ;;  %v13428_v58 = vpop.f32.mrf.mxu1  ;;  %v20021_v49 = vmul.bf16 1056980736, %v13146_v34  ;;  %v4314_v61 = vadd.bf16 1065369472, %v13299_v19  ;;  %v4316_v47 = vadd.bf16 1065369472, %v9461_v35  ;;  %v9469_v10 = vpop.eup %9468 }
 0x27d   : > { %v4475_v30 = vmul.bf16 %v4347_v31, %v20019_v1  ;;  %4666 = vmatprep.subr.bf16.mxu1 %v4476_v45  ;;  %v4458_v20 = vmul.bf16 %v4330_v41, %v20020_v0  ;;  %v3977_v44 = vmul.bf16 1056980736, %v13376_v11  ;;  %v20022_v1 = vmul.bf16 1056980736, %v13367_v59  ;;  %v9471_v31 = vpop.eup %9470  ;;  %v13445_v34 = vpop.f32.mrf.mxu0 }
 0x27e   : > { %v4460_v9 = vmul.bf16 %v4332_v51, %v20021_v49  ;;  %4554 = vmatpush1.bf16.msra.mxu0 %v4473_v42  ;;  %v3979_v50 = vmul.bf16 1056980736, %v13403_v43  ;;  %v20023_v18 = vmul.bf16 1056980736, %v13382_v6  ;;  %v13443_v41 = vpop.f32.mrf.mxu1  ;;  %v9473_v35 = vpop.eup %9472  ;;  %v4313_v19 = vadd.bf16 1065369472, %v9465_v27 }
 0x27f   : > { %9490 = vtanh.bf16 %v20022_v1  ;;  %4667 = vmatpush1.bf16.msra.mxu1 %v4475_v30  ;;  %4555 = vmatprep.subr.bf16.mxu0 %v4458_v20  ;;  %v4315_v51 = vadd.bf16 1065369472, %v9467_v46  ;;  %v20024_v38 = vmul.bf16 1056980736, %v13122_v7  ;;  %v20025_v42 = vmul.bf16 1056980736, %v13180_v39  ;;  %v9475_v45 = vpop.eup %9474  ;;  %v13453_v0 = vpop.f32.mrf.mxu0 }
 0x280   : > { %9492 = vtanh.bf16 %v20023_v18  ;;  %4668 = vmatprep.subr.bf16.mxu1 %v4460_v9  ;;  %v13451_v30 = vpop.f32.mrf.mxu1  ;;  %v20026_v49 = vmul.bf16 1056980736, %v13112_v26  ;;  %v20027_v9 = vmul.bf16 1056980736, %v13175_v13  ;;  %v4298_v27 = vadd.bf16 1065369472, %v13410_v21  ;;  %v9477_v18 = vpop.eup %9476 }
 0x281   : > { %v4457_v8 = vmul.bf16 %v4329_v56, %v20024_v38  ;;  %v4459_v53 = vmul.bf16 %v4331_v36, %v20025_v42  ;;  %v4300_v46 = vadd.bf16 1065369472, %v9469_v10  ;;  %9494 = vtanh.bf16 %v3977_v44  ;;  %v9479_v7 = vpop.eup %9478  ;;  %v13466_v26 = vpop.f32.mrf.mxu0 }
 0x282   : > { %v4442_v20 = vmul.bf16 %v4314_v61, %v20026_v49  ;;  %v4444_v1 = vmul.bf16 %v4316_v47, %v20027_v9  ;;  %9496 = vtanh.bf16 %v3979_v50  ;;  %v13464_v39 = vpop.f32.mrf.mxu1  ;;  %v9481_v13 = vpop.eup %9480  ;;  %v4297_v36 = vadd.bf16 1065369472, %v9473_v35 }
 0x283   : > { %4556 = vmatpush1.bf16.msra.mxu0 %v4457_v8  ;;  %4669 = vmatpush1.bf16.msra.mxu1 %v4459_v53  ;;  %v4299_v21 = vadd.bf16 1065369472, %v9475_v45  ;;  %v20028_v56 = vmul.bf16 1056980736, %v13197_v14  ;;  %v20029_v47 = vmul.bf16 1056980736, %v13216_v23  ;;  %v9483_v38 = vpop.eup %9482  ;;  %v13474_v42 = vpop.f32.mrf.mxu0 }
 0x284   : > { %4557 = vmatprep.subr.bf16.mxu0 %v4442_v20  ;;  %4670 = vmatprep.subr.bf16.mxu1 %v4444_v1  ;;  %v13472_v8 = vpop.f32.mrf.mxu1  ;;  %v20030_v53 = vmul.bf16 1056980736, %v13194_v48  ;;  %v20031_v20 = vmul.bf16 1056980736, %v13213_v3  ;;  %v4282_v1 = vadd.bf16 1065369472, %v9471_v31 }
 0x285   : > { %v4441_v61 = vmul.bf16 %v4313_v19, %v20028_v56  ;;  %v4443_v10 = vmul.bf16 %v4315_v51, %v20029_v47  ;;  %v4284_v35 = vadd.bf16 1065369472, %v9477_v18  ;;  %v13482_v23 = vpop.f32.mrf.mxu0  ;;  %v4281_v45 = vadd.bf16 1065369472, %v9481_v13 }
 0x286   : > { %v4426_v49 = vmul.bf16 %v4298_v27, %v20030_v53  ;;  %v4428_v9 = vmul.bf16 %v4300_v46, %v20031_v20  ;;  %v13480_v19 = vpop.f32.mrf.mxu1  ;;  %v4283_v56 = vadd.bf16 1065369472, %v9483_v38  ;;  %v20032_v48 = vmul.bf16 1056980736, %v13248_v40 }
 0x287   : > { %4558 = vmatpush1.bf16.msra.mxu0 %v4441_v61  ;;  %4671 = vmatpush1.bf16.msra.mxu1 %v4443_v10  ;;  %v9485_v14 = vpop.eup %9484  ;;  %v20033_v3 = vmul.bf16 1056980736, %v13260_v28  ;;  %v13490_v61 = vpop.f32.mrf.mxu0  ;;  %v20034_v47 = vmul.bf16 1056980736, %v13236_v17  ;;  %v20035_v53 = vmul.bf16 1056980736, %v13275_v4 }
 0x288   : > { %4559 = vmatprep.subr.bf16.mxu0 %v4426_v49  ;;  %4672 = vmatprep.subr.bf16.mxu1 %v4428_v9  ;;  %v9487_v51 = vpop.eup %9486  ;;  %v4425_v27 = vmul.bf16 %v4297_v36, %v20032_v48  ;;  %v13488_v18 = vpop.f32.mrf.mxu1  ;;  %v4266_v13 = vadd.bf16 1065369472, %v13269_v12  ;;  %v4268_v38 = vadd.bf16 1065369472, %v9479_v7  ;;  %v20036_v17 = vmul.bf16 1056980736, %v13294_v29 }
 0x289   : > { %v4427_v46 = vmul.bf16 %v4299_v21, %v20033_v3  ;;  %v9489_v31 = vpop.eup %9488  ;;  %v4410_v10 = vmul.bf16 %v4282_v1, %v20034_v47  ;;  %v4412_v49 = vmul.bf16 %v4284_v35, %v20035_v53  ;;  %v4265_v21 = vadd.bf16 1065369472, %v9487_v51 }
 0x28a   : > { %v13497_v40 = vpop.f32.mrf.mxu1  ;;  %v4267_v20 = vadd.bf16 1065369472, %v9489_v31  ;;  %v4409_v9 = vmul.bf16 %v4281_v45, %v20036_v17  ;;  %v20037_v4 = vmul.bf16 1056980736, %v13304_v54  ;;  %v20038_v48 = vmul.bf16 1056980736, %v13093_v52 }
 0x28b   : > { %4560 = vmatpush1.bf16.msra.mxu0 %v4425_v27  ;;  %4673 = vmatpush1.bf16.msra.mxu1 %v4427_v46  ;;  %v20039_v3 = vmul.bf16 1056980736, %v13284_v37  ;;  %v4250_v47 = vadd.bf16 1065369472, %v13255_v32  ;;  %v4252_v51 = vadd.bf16 1065369472, %v9485_v14  ;;  %v3470_v14 = vpack.c.bf16 %v13243_v22, %v13203_v15 }
 0x28c   : > { %4561 = vmatprep.subr.bf16.mxu0 %v4410_v10  ;;  %4674 = vmatprep.subr.bf16.mxu1 %v4412_v49  ;;  %v13499_v28 = vpop.f32.mrf.mxu0  ;;  %v4411_v1 = vmul.bf16 %v4283_v56, %v20037_v4  ;;  %v4394_v27 = vmul.bf16 %v4266_v13, %v20038_v48  ;;  %v4234_v56 = vadd.bf16 1065369472, %v13231_v55  ;;  %v20040_v10 = vmul.bf16 1056980736, %v13337_v16 }
 0x28d   : > { %v9491_v36 = vpop.eup %9490  ;;  %v4396_v46 = vmul.bf16 %v4268_v38, %v20039_v3  ;;  %v20041_v53 = vmul.bf16 1056980736, %v13345_v2  ;;  %v3472_v13 = vpack.c.bf16 %v13265_v63, %v13221_v57  ;;  %v20042_v55 = vmul.bf16 1056980736, %v13087_v25  ;;  %v20044_v2 = vld [vmem:[#allocation20_spill] sm:$0xff]  ;;  %v20050_v3 = vld [vmem:[#allocation34_spill] sm:$0xff] }
 0x28e   : > { %v9493_v35 = vpop.eup %9492  ;;  %v13505_v12 = vpop.f32.mrf.mxu1  ;;  %v4249_v29 = vadd.bf16 1065369472, %v9491_v36  ;;  %v4393_v37 = vmul.bf16 %v4265_v21, %v20040_v10  ;;  %v4236_v21 = vadd.bf16 1065369472, %v13245_v62  ;;  %v20045_v25 = vmul.bf16 1056980736, %v13367_v59 }
 0x28f   : > { %v2873_v7 = vpop.f32.mrf.mxu0  ;;  %4562 = vmatpush1.bf16.msra.mxu0 %v4409_v9  ;;  %4675 = vmatpush1.bf16.msra.mxu1 %v4411_v1  ;;  %v9495_v31 = vpop.eup %9494  ;;  %v4251_v52 = vadd.bf16 1065369472, %v9493_v35  ;;  %v4395_v32 = vmul.bf16 %v4267_v20, %v20041_v53  ;;  %v4378_v17 = vmul.bf16 %v4250_v47, %v20042_v55  ;;  %v20043_v9 = vmul.bf16 1056980736, %v13324_v24  ;;  %v20047_v62 = vld [vmem:[#allocation11_spill] sm:$0xff] }
 0x290   : > { %v13512_v45 = vpop.f32.mrf.mxu1  ;;  %4563 = vmatprep.subr.bf16.mxu0 %v4394_v27  ;;  %4676 = vmatprep.subr.bf16.mxu1 %v4396_v46  ;;  %v9497_v49 = vpop.eup %9496  ;;  %v3486_v20 = vpack.c.bf16 %v20044_v2, %v13291_v60  ;;  %v4233_v22 = vadd.bf16 1065369472, %v9495_v31  ;;  %v4377_v4 = vmul.bf16 %v4249_v29, %v20045_v25  ;;  %v20046_v24 = vmul.bf16 1056980736, %v13382_v6  ;;  %v20054_v59 = vld [vmem:[#allocation15_spill] sm:$0xff]  ;;  %v20060_v25 = vld [vmem:[#allocation21_spill] sm:$0xff] }
 0x291   : > { %v13514_v54 = vpop.f32.mrf.mxu0  ;;  %v4380_v16 = vmul.bf16 %v4252_v51, %v20043_v9  ;;  %v4235_v63 = vadd.bf16 1065369472, %v9497_v49  ;;  %v13543_v35 = vadd.bf16 %v20047_v62, %v3470_v14  ;;  %v13546_v60 = vadd.bf16 %v20047_v62, %v3472_v13  ;;  %v20052_v51 = vld [vmem:[#allocation31_spill] sm:$0xff]  ;;  %v20057_v9 = vld [vmem:[#allocation13_spill] sm:$0xff] }
 0x292   : > { %v13525_v38 = vpop.f32.mrf.mxu1  ;;  %v4379_v1 = vmul.bf16 %v4251_v52, %v20046_v24  ;;  %v20051_v46 = vmul.bf16 1056980736, %v20050_v3  ;;  %v20053_v31 = vmul.bf16 1056980736, %v20052_v51  ;;  %v13555_v29 = vadd.bf16 %v20054_v59, %v3486_v20 }
 0x293   : > { %v2877_v36 = vpop.f32.mrf.mxu0  ;;  %4564 = vmatpush1.bf16.msra.mxu0 %v4393_v37  ;;  %4677 = vmatpush1.bf16.msra.mxu1 %v4395_v32  ;;  %20048 = vst [vmem:[#allocation16_spill] sm:$0xff] %v13543_v35  ;;  %20049 = vst [vmem:[#allocation25_spill] sm:$0xff] %v13546_v60  ;;  %v4361_v53 = vmul.bf16 %v4233_v22, %v3977_v44  ;;  %v4363_v32 = vmul.bf16 %v4235_v63, %v3979_v50  ;;  %v19147_v14 = vmul.bf16 1056980736, %v13546_v60  ;;  %v20056_v44 = vld [vmem:[#allocation10_spill] sm:$0xff]  ;;  %v20058_v22 = vmov 0  }
 0x294   : > { %v13534_v15 = vpop.f32.mrf.mxu1  ;;  %4565 = vmatprep.subr.bf16.mxu0 %v4378_v17  ;;  %4678 = vmatprep.subr.bf16.mxu1 %v4380_v16  ;;  %v4362_v47 = vmul.bf16 %v4234_v56, %v20051_v46  ;;  %v4364_v10 = vmul.bf16 %v4236_v21, %v20053_v31  ;;  %v3550_v6 = vpack.c.bf16 %v2877_v36, %v2873_v7  ;;  %v19148_v56 = vmul.bf16 1056980736, %v13543_v35  ;;  %v13566_v7 = vld [vmem:[%s18933_s5] sm:$0xff]  }
 0x295   : > { %v13536_v57 = vpop.f32.mrf.mxu0  ;;  %20055 = vst [vmem:[#allocation9_spill] sm:$0xff] %v13566_v7  ;;  %v19149_v36 = vmul.bf16 1056980736, %v13555_v29  ;;  %v20059_v63 = vld [vmem:[#allocation38_spill] sm:$0xff]  ;;  %v3533_v51 = vpack.c.bf16 %v13482_v23, %v13466_v26  ;;  %v3535_v31 = vpack.c.bf16 %v13488_v18, %v13472_v8  ;;  %v20062_v23 = vld [vmem:[#allocation33_spill] sm:$0xff]  ;;  %v20074_v8 = vld [vmem:[#allocation7_spill] sm:$0xff] }
 0x296   : > { %v13548_v48 = vpop.f32.mrf.mxu1  ;;  %v13570_v55 = vadd.bf16 %v20056_v44, %v3550_v6  ;;  %9498 = vtanh.bf16 %v19148_v56  ;;  %v3534_v6 = vpack.c.bf16 %v13490_v61, %v13474_v42  ;;  %v20075_v18 = vld [vmem:[#allocation35_spill] sm:$0xff] }
 0x297   : > { %v2883_v27 = vpop.f32.mrf.mxu0  ;;  %4566 = vmatpush1.bf16.msra.mxu0 %v4377_v4  ;;  %4679 = vmatpush1.bf16.msra.mxu1 %v4379_v1  ;;  %9500 = vtanh.bf16 %v19147_v14  ;;  %v3502_v4 = vpack.c.bf16 %v20060_v25, %v20059_v63  ;;  %v3519_v14 = vpack.c.bf16 %v13451_v30, %v13428_v58 }
 0x298   : > { %v2996_v52 = vpop.f32.mrf.mxu1  ;;  %4567 = vmatprep.subr.bf16.mxu0 %v4362_v47  ;;  %4680 = vmatprep.subr.bf16.mxu1 %v4364_v10  ;;  %9502 = vtanh.bf16 %v19149_v36  ;;  %v19150_v24 = vmul.bf16 1056980736, %v13570_v55  ;;  %v3518_v47 = vpack.c.bf16 %v13453_v0, %v13430_v33  ;;  %v13609_v0 = vld [vmem:[%s18933_s5 + $0x8] sm:$0xff]   ;;  %v3517_v36 = vpack.c.bf16 %v13445_v34, %v13417_v5 }
 0x299   : > { %v2885_v37 = vpop.f32.mrf.mxu0  ;;  %20061 = vst [vmem:[#allocation20_spill] sm:$0xff] %v13609_v0 }
 0x29a   : > { %v2998_v49 = vpop.f32.mrf.mxu1  ;;  %v3565_v1 = vpack.c.bf16 %v2885_v37, %v13536_v57  ;;  %v3549_v57 = vpack.c.bf16 %v13514_v54, %v13499_v28  ;;  %v3551_v28 = vpack.c.bf16 %v13525_v38, %v13505_v12  ;;  %9504 = vtanh.bf16 %v19150_v24  ;;  %v20064_v38 = vld [vmem:[#allocation24_spill] sm:$0xff] }
 0x29b   : > { %v2887_v13 = vpop.f32.mrf.mxu0  ;;  %4568 = vmatpush1.bf16.msra.mxu0 %v4361_v53  ;;  %4681 = vmatpush1.bf16.msra.mxu1 %v4363_v32  ;;  %v13710_v24 = vadd.bf16 %v20064_v38, %v3533_v51  ;;  %v13727_v5 = vadd.bf16 %v20064_v38, %v3535_v31  ;;  %v20071_v51 = vld [vmem:[#allocation30_spill] sm:$0xff]  ;;  %v3488_v31 = vpack.c.bf16 %v20075_v18, %v20074_v8 }
 0x29c   : > { %v3566_v11 = vpack.c.bf16 %v2887_v13, %v2883_v27  ;;  %v3000_v43 = vpop.f32.mrf.mxu1  ;;  %v3567_v27 = vpack.c.bf16 %v2998_v49, %v13548_v48  ;;  %v3552_v48 = vpack.c.bf16 %v13534_v15, %v13512_v45  ;;  %v13620_v45 = vadd.bf16 %v20057_v9, %v3565_v1  ;;  %v20081_v18 = vld [vmem:[#allocation6_spill] sm:$0xff] }
 0x29d   : > { %v2891_v50 = vpop.f32.mrf.mxu0  ;;  %v3568_v17 = vpack.c.bf16 %v3000_v43, %v2996_v52  ;;  %v13635_v43 = vadd.bf16 %v20064_v38, %v3534_v6 }
 0x29e   : > { %v13577_v16 = vadd.bf16 %v20057_v9, %v3566_v11  ;;  %v3004_v21 = vpop.f32.mrf.mxu1  ;;  %4586 = vmatmul.mubr.bf16.vlgmr.msra.gmra.mxu0 %v13566_v7  ;;  %4699 = vmatmul.mubr.bf16.vlgmr.msra.gmra.mxu1 %v13566_v7  ;;  %v13623_v54 = vadd.bf16 %v20057_v9, %v3567_v27  ;;  %v13660_v27 = vadd.bf16 %v20056_v44, %v3549_v57 }
 0x29f   : > { %v2893_v2 = vpop.f32.mrf.mxu0  ;;  %v13584_v20 = vadd.bf16 %v20057_v9, %v3568_v17  ;;  %4595 = vmatprep.mubr.bf16.mxu0 %v20058_v22  ;;  %4708 = vmatprep.mubr.bf16.mxu1 %v20058_v22  ;;  %v13640_v17 = vadd.bf16 %v20056_v44, %v3552_v48 }
 0x2a0   : > { %v3006_v3 = vpop.f32.mrf.mxu1  ;;  %v19152_v52 = vmul.bf16 1056980736, %v13577_v16  ;;  %v19160_v48 = vmul.bf16 1056980736, %v13623_v54 }
 0x2a1   : > { %v2895_v46 = vpop.f32.mrf.mxu0  ;;  %v19151_v26 = vmul.bf16 1056980736, %v13584_v20 }
 0x2a2   : > { %v3581_v10 = vpack.c.bf16 %v2895_v46, %v2891_v50  ;;  %v3008_v37 = vpop.f32.mrf.mxu1  ;;  %v3536_v50 = vpack.c.bf16 %v13497_v40, %v13480_v19  ;;  %9506 = vtanh.bf16 %v19152_v52  ;;  %v19154_v46 = vmul.bf16 1056980736, %v13620_v45 }
 0x2a3   : > { %v2897_v33 = vpop.f32.mrf.mxu0  ;;  %v3583_v42 = vpack.c.bf16 %v3008_v37, %v3004_v21  ;;  %9508 = vtanh.bf16 %v19151_v26  ;;  %v19161_v26 = vmul.bf16 1056980736, %v13660_v27 }
 0x2a4   : > { %v13613_v53 = vadd.bf16 %v20062_v23, %v3581_v10  ;;  %v3582_v61 = vpack.c.bf16 %v2897_v33, %v2893_v2  ;;  %v3010_v15 = vpop.f32.mrf.mxu1  ;;  %v3520_v33 = vpack.c.bf16 %v13464_v39, %v13443_v41  ;;  %v13695_v37 = vpop.eup %9498  ;;  %v20069_v41 = vld [vmem:[#allocation32_spill] sm:$0xff] }
 0x2a5   : > { %v13625_v32 = vpop.f32.mrf.mxu0  ;;  %v13629_v13 = vadd.bf16 %v20062_v23, %v3583_v42  ;;  %v3584_v12 = vpack.c.bf16 %v3010_v15, %v3006_v3  ;;  %v13663_v3 = vadd.bf16 %v20056_v44, %v3551_v28  ;;  %v13681_v42 = vadd.bf16 %v20064_v38, %v3536_v50  ;;  %v13705_v56 = vpop.eup %9500 }
 0x2a6   : > { %20063 = vst [vmem:[#allocation11_spill] sm:$0xff] %v13625_v32  ;;  %v19155_v49 = vmul.bf16 1056980736, %v13613_v53  ;;  %v13632_v11 = vadd.bf16 %v20062_v23, %v3582_v61  ;;  %4596 = vmatmul.mubr.bf16.gmra.mxu0 %v13609_v0  ;;  %4709 = vmatmul.mubr.bf16.gmra.mxu1 %v13609_v0  ;;  %v19158_v61 = vmul.bf16 1056980736, %v13640_v17  ;;  %v13698_v39 = vadd.bf16 %v20069_v41, %v3518_v47 }
 0x2a7   : > { %v13644_v21 = vpop.f32.mrf.mxu1  ;;  %v13648_v2 = vpop.f32.mrf.mxu0  ;;  %v19153_v1 = vmul.bf16 1056980736, %v13629_v13  ;;  %v13655_v40 = vadd.bf16 %v20062_v23, %v3584_v12  ;;  %4605 = vmatprep.mubr.bf16.mxu0 %v20058_v22  ;;  %4718 = vmatprep.mubr.bf16.mxu1 %v20058_v22  ;;  %v13693_v12 = vld [vmem:[%s18933_s5 + $0x10] sm:$0xff]   ;;  %v19159_v50 = vmul.bf16 1056980736, %v13635_v43 }
 0x2a8   : > { %20065 = vst [vmem:[#allocation34_spill] sm:$0xff] %v13644_v21  ;;  %v19157_v19 = vmul.bf16 1056980736, %v13632_v11  ;;  %9510 = vtanh.bf16 %v19155_v49  ;;  %20068 = vst [vmem:[#allocation21_spill] sm:$0xff] %v13693_v12  ;;  %v19162_v34 = vmul.bf16 1056980736, %v13663_v3 }
 0x2a9   : > { %v13668_v10 = vpop.f32.mrf.mxu1  ;;  %v13670_v6 = vpop.f32.mrf.mxu0  ;;  %9512 = vtanh.bf16 %v19153_v1  ;;  %v19156_v57 = vmul.bf16 1056980736, %v13655_v40  ;;  %v20082_v21 = vld [vmem:[#allocation8_spill] sm:$0xff]  ;;  %v20116_v35 = vmul.bf16 1056980736, %v13655_v40 }
 0x2aa   : > { %20066 = vst [vmem:[#allocation31_spill] sm:$0xff] %v13670_v6  ;;  %9514 = vtanh.bf16 %v19157_v19  ;;  %v13719_v1 = vpop.eup %9502  ;;  %v19163_v19 = vmul.bf16 1056980736, %v13681_v42 }
 0x2ab   : > { %v13686_v28 = vpop.f32.mrf.mxu1  ;;  %v13688_v15 = vpop.f32.mrf.mxu0  ;;  %9516 = vtanh.bf16 %v19156_v57  ;;  %v13735_v57 = vadd.bf16 %v20069_v41, %v3520_v33 }
 0x2ac   : > { %20067 = vst [vmem:[#allocation38_spill] sm:$0xff] %v13686_v28  ;;  %9518 = vtanh.bf16 %v19154_v46  ;;  %v20072_v46 = vld [vmem:[#allocation12_spill] sm:$0xff]  ;;  %v20083_v28 = vpack.c.bf16 %v20081_v18, %v20082_v21 }
 0x2ad   : > { %v13715_v47 = vpop.f32.mrf.mxu1  ;;  %v13717_v52 = vpop.f32.mrf.mxu0  ;;  %9520 = vtanh.bf16 %v19160_v48  ;;  %v3504_v49 = vpack.c.bf16 %v20072_v46, %v20071_v51  ;;  %v20076_v46 = vld [vmem:[#allocation18_spill] sm:$0xff]  ;;  %v19169_v51 = vmul.bf16 1056980736, %v13698_v39  ;;  %v20095_v21 = vld [vmem:[#allocation28_spill] sm:$0xff] }
 0x2ae   : > { %20070 = vst [vmem:[#allocation39_spill] sm:$0xff] %v13717_v52  ;;  %9522 = vtanh.bf16 %v19158_v61  ;;  %4606 = vmatmul.mubr.bf16.gmra.mxu0 %v13693_v12  ;;  %4719 = vmatmul.mubr.bf16.gmra.mxu1 %v13693_v12  ;;  %v13752_v33 = vadd.bf16 %v20076_v46, %v3502_v4  ;;  %v13760_v61 = vadd.bf16 %v20069_v41, %v3517_v36 }
 0x2af   : > { %v13740_v58 = vpop.f32.mrf.mxu1  ;;  %v13744_v30 = vpop.f32.mrf.mxu0  ;;  %9524 = vtanh.bf16 %v19159_v50  ;;  %4615 = vmatprep.mubr.bf16.mxu0 %v20058_v22  ;;  %4728 = vmatprep.mubr.bf16.mxu1 %v20058_v22  ;;  %v13770_v4 = vadd.bf16 %v20069_v41, %v3519_v14  ;;  %v13780_v48 = vadd.bf16 %v20076_v46, %v3504_v49  ;;  %v13795_v36 = vadd.bf16 %v20054_v59, %v3488_v31 }
 0x2b0   : > { %20073 = vst [vmem:[#allocation30_spill] sm:$0xff] %v13740_v58  ;;  %9526 = vtanh.bf16 %v19161_v26  ;;  %v13777_v50 = vpop.eup %9504  ;;  %v13808_v52 = vadd.bf16 %v20076_v46, %v20083_v28  ;;  %v20084_v31 = vmul.bf16 1056980736, %v13710_v24  ;;  %v20088_v58 = vld [vmem:[#allocation23_spill] sm:$0xff]  ;;  %v20090_v28 = vmul.bf16 1056980736, %v13727_v5 }
 0x2b1   : > { %v13765_v63 = vpop.f32.mrf.mxu1  ;;  %v13767_v25 = vpop.f32.mrf.mxu0  ;;  %9528 = vtanh.bf16 %v19162_v34  ;;  %v13792_v34 = vld [vmem:[%s18933_s5 + $0x18] sm:$0xff]  }
 0x2b2   : > { %20077 = vst [vmem:[#allocation12_spill] sm:$0xff] %v13765_v63  ;;  %20078 = vst [vmem:[#allocation7_spill] sm:$0xff] %v13767_v25  ;;  %9530 = vtanh.bf16 %v19163_v19  ;;  %v13802_v26 = vpop.eup %9506  ;;  %v20087_v19 = vld [vmem:[#allocation22_spill] sm:$0xff]  ;;  %v20091_v25 = vmul.bf16 1056980736, %v13735_v57  ;;  %v20099_v63 = vld [vmem:[#allocation19_spill] sm:$0xff] }
 0x2b3   : > { %v13785_v14 = vpop.f32.mrf.mxu1  ;;  %v13787_v8 = vpop.f32.mrf.mxu0  ;;  %20080 = vst [vmem:[#allocation40_spill] sm:$0xff] %v13792_v34  ;;  %9532 = vtanh.bf16 %v19169_v51 }
 0x2b4   : > { %20079 = vst [vmem:[#allocation35_spill] sm:$0xff] %v13785_v14  ;;  %9534 = vtanh.bf16 %v20084_v31  ;;  %v13817_v51 = vpop.eup %9508  ;;  %v20089_v14 = vpack.c.bf16 %v20087_v19, %v20088_v58 }
 0x2b5   : > { %v13813_v49 = vpop.f32.mrf.mxu1  ;;  %v13815_v32 = vpop.f32.mrf.mxu0  ;;  %9536 = vtanh.bf16 %v20090_v28 }
 0x2b6   : > { %20085 = vst [vmem:[#allocation6_spill] sm:$0xff] %v13813_v49  ;;  %20086 = vst [vmem:[#allocation8_spill] sm:$0xff] %v13815_v32  ;;  %v13823_v6 = vadd.bf16 %v20076_v46, %v20089_v14  ;;  %v9511_v18 = vpop.eup %9510  ;;  %9538 = vtanh.bf16 %v20091_v25  ;;  %4616 = vmatmul.mubr.bf16.gmra.mxu0 %v13792_v34  ;;  %4729 = vmatmul.mubr.bf16.gmra.mxu1 %v13792_v34  ;;  %v20094_v14 = vld [vmem:[#allocation37_spill] sm:$0xff]  ;;  %v20097_v49 = vmul.bf16 1056980736, %v13752_v33 }
 0x2b7   : > { %v13831_v12 = vpop.f32.mrf.mxu1  ;;  %v13835_v19 = vpop.f32.mrf.mxu0  ;;  %v20096_v46 = vpack.c.bf16 %v20094_v14, %v20095_v21  ;;  %4625 = vmatprep.mubr.bf16.mxu0 %v20058_v22  ;;  %4738 = vmatprep.mubr.bf16.mxu1 %v20058_v22  ;;  %v20098_v34 = vld [vmem:[#allocation17_spill] sm:$0xff]  ;;  %v20102_v14 = vld [vmem:[#allocation14_spill] sm:$0xff]  ;;  %v4349_v31 = vadd.bf16 1065369472, %v9511_v18 }
 0x2b8   : > { %20092 = vst [vmem:[#allocation22_spill] sm:$0xff] %v13831_v12  ;;  %20093 = vst [vmem:[#allocation23_spill] sm:$0xff] %v13835_v19  ;;  %v9513_v58 = vpop.eup %9512  ;;  %9540 = vtanh.bf16 %v20097_v49  ;;  %v20100_v41 = vpack.c.bf16 %v20098_v34, %v20099_v63  ;;  %v20101_v21 = vld [vmem:[#allocation29_spill] sm:$0xff]  ;;  %v20104_v49 = vmul.bf16 1056980736, %v13760_v61 }
 0x2b9   : > { %v13841_v28 = vadd.bf16 %v20047_v62, %v20096_v46  ;;  %v9515_v25 = vpop.eup %9514  ;;  %v20103_v46 = vpack.c.bf16 %v20101_v21, %v20102_v14  ;;  %v13863_v23 = vpop.f32.mrf.mxu1  ;;  %v13875_v21 = vld [vmem:[%s18933_s5 + $0x20] sm:$0xff]   ;;  %v20111_v63 = vmul.bf16 1056980736, %v13795_v36 }
 0x2ba   : > { %v13852_v0 = vadd.bf16 %v20054_v59, %v20100_v41  ;;  %9542 = vtanh.bf16 %v20104_v49  ;;  %20105 = vst [vmem:[#allocation37_spill] sm:$0xff] %v13863_v23  ;;  %v13865_v19 = vpop.f32.mrf.mxu0  ;;  %v9517_v7 = vpop.eup %9516  ;;  %v20107_v41 = vmul.bf16 1056980736, %v13770_v4  ;;  %v4350_v14 = vadd.bf16 1065369472, %v9515_v25 }
 0x2bb   : > { %v13858_v38 = vadd.bf16 %v20054_v59, %v20103_v46  ;;  %20106 = vst [vmem:[#allocation28_spill] sm:$0xff] %v13865_v19  ;;  %v9519_v46 = vpop.eup %9518  ;;  %v20108_v49 = vmul.bf16 1056980736, %v13780_v48  ;;  %v4351_v23 = vadd.bf16 1065369472, %v9513_v58  ;;  %v13879_v9 = vpop.f32.mrf.mxu1 }
 0x2bc   : > { %9544 = vtanh.bf16 %v20107_v41  ;;  %20109 = vst [vmem:[#allocation17_spill] sm:$0xff] %v13879_v9  ;;  %v13881_v34 = vpop.f32.mrf.mxu0  ;;  %v4352_v41 = vadd.bf16 1065369472, %v9517_v7  ;;  %v9521_v44 = vpop.eup %9520  ;;  %v4334_v25 = vadd.bf16 1065369472, %v13802_v26  ;;  %v20117_v26 = vld [vmem:[#allocation27_spill] sm:$0xff] }
 0x2bd   : > { %9546 = vtanh.bf16 %v20108_v49  ;;  %20110 = vst [vmem:[#allocation19_spill] sm:$0xff] %v13881_v34  ;;  %v4336_v19 = vadd.bf16 1065369472, %v13817_v51  ;;  %v9523_v60 = vpop.eup %9522  ;;  %v20112_v58 = vmul.bf16 1056980736, %v13808_v52  ;;  %v13892_v49 = vpop.f32.mrf.mxu1  ;;  %v20118_v51 = vld [vmem:[#allocation36_spill] sm:$0xff] }
 0x2be   : > { %9548 = vtanh.bf16 %v20111_v63  ;;  %20113 = vst [vmem:[#allocation29_spill] sm:$0xff] %v13892_v49  ;;  %v13894_v7 = vpop.f32.mrf.mxu0  ;;  %v20115_v34 = vmul.bf16 1056980736, %v13632_v11  ;;  %v4480_v32 = vmul.bf16 %v4352_v41, %v20116_v35  ;;  %v13900_v12 = vpop.eup %9524  ;;  %v20119_v9 = vpack.c.bf16 %v20117_v26, %v20118_v51  ;;  %4626 = vmatmul.mubr.bf16.gmra.mxu0 %v13875_v21  ;;  %4739 = vmatmul.mubr.bf16.gmra.mxu1 %v13875_v21 }
 0x2bf   : > { %9550 = vtanh.bf16 %v20112_v58  ;;  %20114 = vst [vmem:[#allocation14_spill] sm:$0xff] %v13894_v7  ;;  %v19196_v58 = vmul.bf16 1056980736, %v13858_v38  ;;  %v20120_v49 = vmul.bf16 1056980736, %v13823_v6  ;;  %v9527_v7 = vpop.eup %9526  ;;  %v13915_v41 = vpop.f32.mrf.mxu1  ;;  %4635 = vmatprep.mubr.bf16.mxu0 %v20058_v22  ;;  %4748 = vmatprep.mubr.bf16.mxu1 %v20058_v22 }
 0x2c0   : > { %v4478_v63 = vmul.bf16 %v4350_v14, %v20115_v34  ;;  %v13906_v18 = vadd.bf16 %v20047_v62, %v20119_v9  ;;  %v4333_v59 = vadd.bf16 1065369472, %v9519_v46  ;;  %v4335_v11 = vadd.bf16 1065369472, %v9521_v44  ;;  %v13919_v9 = vpop.f32.mrf.mxu0  ;;  %v9529_v26 = vpop.eup %9528  ;;  %4892 = vmatprep.subr.bf16.mxu1 %v4480_v32 }
 0x2c1   : > { %9552 = vtanh.bf16 %v20120_v49  ;;  %v20121_v34 = vmul.bf16 1056980736, %v13613_v53  ;;  %v20122_v35 = vmul.bf16 1056980736, %v13629_v13  ;;  %v20123_v46 = vmul.bf16 1056980736, %v13577_v16  ;;  %v9531_v49 = vpop.eup %9530 }
 0x2c2   : > { %4779 = vmatprep.subr.bf16.mxu0 %v4478_v63  ;;  %v20124_v53 = vmul.bf16 1056980736, %v13584_v20  ;;  %v4318_v13 = vadd.bf16 1065369472, %v13777_v50  ;;  %v19198_v51 = vmul.bf16 1056980736, %v13841_v28  ;;  %v13931_v32 = vpop.f32.mrf.mxu0  ;;  %v13933_v16 = vpop.eup %9532 }
 0x2c3   : > { %v4477_v40 = vmul.bf16 %v4349_v31, %v20121_v34  ;;  %v4479_v14 = vmul.bf16 %v4351_v23, %v20122_v35  ;;  %v4462_v44 = vmul.bf16 %v4334_v25, %v20123_v46  ;;  %v4320_v23 = vadd.bf16 1065369472, %v9523_v60  ;;  %v13929_v35 = vpop.f32.mrf.mxu1  ;;  %v9535_v60 = vpop.eup %9534 }
 0x2c4   : > { %v4464_v31 = vmul.bf16 %v4336_v19, %v20124_v53  ;;  %v20125_v34 = vmul.bf16 1056980736, %v13852_v0  ;;  %v19197_v20 = vmul.bf16 1056980736, %v13906_v18  ;;  %v4317_v50 = vadd.bf16 1065369472, %v9527_v7  ;;  %v13944_v53 = vpop.f32.mrf.mxu0  ;;  %v9537_v7 = vpop.eup %9536 }
 0x2c5   : > { %4780 = vmatpush1.bf16.msra.mxu0 %v4477_v40  ;;  %4893 = vmatpush1.bf16.msra.mxu1 %v4479_v14  ;;  %v4319_v19 = vadd.bf16 1065369472, %v9529_v26  ;;  %v20126_v25 = vmul.bf16 1056980736, %v13620_v45  ;;  %v20127_v40 = vmul.bf16 1056980736, %v13623_v54  ;;  %v13942_v46 = vpop.f32.mrf.mxu1 }
 0x2c6   : > { %9554 = vtanh.bf16 %v20125_v34  ;;  %4781 = vmatprep.subr.bf16.mxu0 %v4462_v44  ;;  %4894 = vmatprep.subr.bf16.mxu1 %v4464_v31  ;;  %v13951_v44 = vld [vmem:[%s18933_s5 + $0x28] sm:$0xff]   ;;  %v20129_v45 = vmul.bf16 1056980736, %v13570_v55  ;;  %v20130_v54 = vmul.bf16 1056980736, %v13640_v17  ;;  %v9539_v34 = vpop.eup %9538 }
 0x2c7   : > { %9556 = vtanh.bf16 %v19196_v58  ;;  %v4461_v63 = vmul.bf16 %v4333_v59, %v20126_v25  ;;  %v4463_v14 = vmul.bf16 %v4335_v11, %v20127_v40  ;;  %20128 = vst [vmem:[#allocation27_spill] sm:$0xff] %v13951_v44  ;;  %v4302_v26 = vadd.bf16 1065369472, %v13900_v12  ;;  %v13960_v25 = vpop.f32.mrf.mxu1  ;;  %v13962_v40 = vpop.f32.mrf.mxu0  ;;  %4636 = vmatmul.mubr.bf16.gmra.mxu0 %v13951_v44  ;;  %4749 = vmatmul.mubr.bf16.gmra.mxu1 %v13951_v44 }
 0x2c8   : > { %v4446_v59 = vmul.bf16 %v4318_v13, %v20129_v45  ;;  %v4448_v11 = vmul.bf16 %v4320_v23, %v20130_v54  ;;  %v4304_v31 = vadd.bf16 1065369472, %v9531_v49  ;;  %9558 = vtanh.bf16 %v19198_v51  ;;  %v9541_v58 = vpop.eup %9540  ;;  %4645 = vmatprep.mubr.bf16.mxu0 %v20058_v22  ;;  %4758 = vmatprep.mubr.bf16.mxu1 %v20058_v22 }
 0x2c9   : > { %4782 = vmatpush1.bf16.msra.mxu0 %v4461_v63  ;;  %4895 = vmatpush1.bf16.msra.mxu1 %v4463_v14  ;;  %9560 = vtanh.bf16 %v19197_v20  ;;  %v9543_v55 = vpop.eup %9542  ;;  %v4301_v17 = vadd.bf16 1065369472, %v9535_v60  ;;  %v4303_v12 = vadd.bf16 1065369472, %v9537_v7  ;;  %v20131_v13 = vmul.bf16 1056980736, %v13660_v27  ;;  %v13970_v14 = vpop.f32.mrf.mxu1 }
 0x2ca   : > { %4783 = vmatprep.subr.bf16.mxu0 %v4446_v59  ;;  %4896 = vmatprep.subr.bf16.mxu1 %v4448_v11  ;;  %v20132_v49 = vmul.bf16 1056980736, %v13663_v3  ;;  %v13974_v45 = vpop.f32.mrf.mxu0  ;;  %v9545_v54 = vpop.eup %9544  ;;  %v20133_v59 = vmul.bf16 1056980736, %v13635_v43  ;;  %v20134_v60 = vmul.bf16 1056980736, %v13681_v42 }
 0x2cb   : > { %v4445_v23 = vmul.bf16 %v4317_v50, %v20131_v13  ;;  %v4286_v27 = vadd.bf16 1065369472, %v13933_v16  ;;  %v4288_v50 = vadd.bf16 1065369472, %v9539_v34  ;;  %v9547_v3 = vpop.eup %9546  ;;  %v4285_v42 = vadd.bf16 1065369472, %v9543_v55 }
 0x2cc   : > { %v4447_v63 = vmul.bf16 %v4319_v19, %v20132_v49  ;;  %v4430_v11 = vmul.bf16 %v4302_v26, %v20133_v59  ;;  %v4432_v7 = vmul.bf16 %v4304_v31, %v20134_v60  ;;  %v13983_v19 = vpop.f32.mrf.mxu1  ;;  %v13985_v13 = vpop.f32.mrf.mxu0  ;;  %v4287_v26 = vadd.bf16 1065369472, %v9545_v54 }
 0x2cd   : > { %4784 = vmatpush1.bf16.msra.mxu0 %v4445_v23  ;;  %v9549_v49 = vpop.eup %9548  ;;  %v20135_v16 = vmul.bf16 1056980736, %v13710_v24  ;;  %v20136_v34 = vmul.bf16 1056980736, %v13727_v5  ;;  %v20138_v54 = vmul.bf16 1056980736, %v13735_v57 }
 0x2ce   : > { %4897 = vmatpush1.bf16.msra.mxu1 %v4447_v63  ;;  %4785 = vmatprep.subr.bf16.mxu0 %v4430_v11  ;;  %v9551_v43 = vpop.eup %9550  ;;  %v13991_v60 = vpop.f32.mrf.mxu1  ;;  %v13998_v63 = vld [vmem:[%s18933_s5 + $0x30] sm:$0xff]   ;;  %v20139_v44 = vmul.bf16 1056980736, %v13760_v61  ;;  %v4254_v61 = vadd.bf16 1065369472, %v13719_v1 }
 0x2cf   : > { %4898 = vmatprep.subr.bf16.mxu1 %v4432_v7  ;;  %v4429_v31 = vmul.bf16 %v4301_v17, %v20135_v16  ;;  %v4431_v59 = vmul.bf16 %v4303_v12, %v20136_v34  ;;  %v13993_v23 = vpop.f32.mrf.mxu0  ;;  %v9553_v11 = vpop.eup %9552  ;;  %v20137_v7 = vmul.bf16 1056980736, %v13698_v39  ;;  %v4416_v24 = vmul.bf16 %v4288_v50, %v20138_v54  ;;  %4646 = vmatmul.mubr.bf16.gmra.mxu0 %v13998_v63 }
 0x2d0   : > { %v4270_v17 = vadd.bf16 1065369472, %v9541_v58  ;;  %v4272_v16 = vadd.bf16 1065369472, %v9547_v3  ;;  %v14004_v5 = vpop.f32.mrf.mxu1  ;;  %v4269_v20 = vadd.bf16 1065369472, %v9551_v43  ;;  %v4413_v39 = vmul.bf16 %v4285_v42, %v20139_v44  ;;  %4759 = vmatmul.mubr.bf16.gmra.mxu1 %v13998_v63  ;;  %4655 = vmatprep.mubr.bf16.mxu0 %v20058_v22 }
 0x2d1   : > { %v4414_v55 = vmul.bf16 %v4286_v27, %v20137_v7  ;;  %4786 = vmatpush1.bf16.msra.mxu0 %v4429_v31  ;;  %v14006_v12 = vpop.f32.mrf.mxu0  ;;  %v4271_v51 = vadd.bf16 1065369472, %v9553_v11  ;;  %v20140_v27 = vmul.bf16 1056980736, %v13770_v4  ;;  %v20141_v31 = vmul.bf16 1056980736, %v13752_v33  ;;  %4768 = vmatprep.mubr.bf16.mxu1 %v20058_v22 }
 0x2d2   : > { %4899 = vmatpush1.bf16.msra.mxu1 %v4431_v59  ;;  %v14012_v50 = vpop.f32.mrf.mxu1  ;;  %v20142_v43 = vmul.bf16 1056980736, %v13780_v48  ;;  %v4256_v44 = vadd.bf16 1065369472, %v9549_v49  ;;  %v3474_v33 = vpack.c.bf16 %v13688_v15, %v13648_v2  ;;  %v4238_v48 = vadd.bf16 1065369472, %v13695_v37 }
 0x2d3   : > { %4787 = vmatprep.subr.bf16.mxu0 %v4414_v55  ;;  %4900 = vmatprep.subr.bf16.mxu1 %v4416_v24  ;;  %v4415_v57 = vmul.bf16 %v4287_v26, %v20140_v27  ;;  %v14016_v58 = vpop.f32.mrf.mxu0  ;;  %v4398_v59 = vmul.bf16 %v4270_v17, %v20141_v31  ;;  %v20143_v7 = vmul.bf16 1056980736, %v13808_v52  ;;  %v20144_v54 = vmul.bf16 1056980736, %v13823_v6  ;;  %v14043_v2 = vld [vmem:[%s18933_s5 + $0x38] sm:$0xff]  }
 0x2d4   : > { %v9555_v34 = vpop.eup %9554  ;;  %v4400_v11 = vmul.bf16 %v4272_v16, %v20142_v43  ;;  %v14025_v4 = vpop.f32.mrf.mxu1  ;;  %v3476_v17 = vpack.c.bf16 %v13715_v47, %v13668_v10  ;;  %v3490_v15 = vpack.c.bf16 %v13787_v8, %v13744_v30  ;;  %v20145_v52 = vmul.bf16 1056980736, %v13555_v29  ;;  %v20149_v43 = vld [vmem:[#allocation15_spill] sm:$0xff] }
 0x2d5   : > { %v9557_v3 = vpop.eup %9556  ;;  %4788 = vmatpush1.bf16.msra.mxu0 %v4413_v39  ;;  %v14027_v42 = vpop.f32.mrf.mxu0  ;;  %v4253_v26 = vadd.bf16 1065369472, %v9555_v34  ;;  %v4397_v55 = vmul.bf16 %v4269_v20, %v20143_v7  ;;  %v4399_v24 = vmul.bf16 %v4271_v51, %v20144_v54  ;;  %v20146_v6 = vmul.bf16 1056980736, %v13795_v36 }
 0x2d6   : > { %4901 = vmatpush1.bf16.msra.mxu1 %v4415_v57  ;;  %4789 = vmatprep.subr.bf16.mxu0 %v4398_v59  ;;  %v9559_v1 = vpop.eup %9558  ;;  %v4255_v49 = vadd.bf16 1065369472, %v9557_v3  ;;  %v14038_v16 = vpop.f32.mrf.mxu1  ;;  %v4382_v20 = vmul.bf16 %v4254_v61, %v20145_v52  ;;  %v4240_v10 = vadd.bf16 1065369472, %v13705_v56  ;;  %v14057_v57 = vadd.bf16 %v20047_v62, %v3474_v33  ;;  %v20150_v61 = vld [vmem:[#allocation16_spill] sm:$0xff] }
 0x2d7   : > { %4902 = vmatprep.subr.bf16.mxu1 %v4400_v11  ;;  %v3103_v34 = vpop.f32.mrf.mxu0  ;;  %v9561_v37 = vpop.eup %9560  ;;  %v4384_v51 = vmul.bf16 %v4256_v44, %v20146_v6  ;;  %v4237_v27 = vadd.bf16 1065369472, %v9559_v1  ;;  %v20147_v29 = vmul.bf16 1056980736, %v13852_v0  ;;  %v20148_v36 = vmul.bf16 1056980736, %v13858_v38  ;;  %4656 = vmatmul.mubr.bf16.gmra.mxu0 %v14043_v2 }
 0x2d8   : > { %v14052_v47 = vpop.f32.mrf.mxu1  ;;  %v4239_v30 = vadd.bf16 1065369472, %v9561_v37  ;;  %v14064_v56 = vadd.bf16 %v20047_v62, %v3476_v17  ;;  %4769 = vmatmul.mubr.bf16.gmra.mxu1 %v14043_v2  ;;  %v14071_v11 = vadd.bf16 %v20149_v43, %v3490_v15  ;;  %v20151_v44 = vmul.bf16 1056980736, %v20150_v61  ;;  %4811 = vmatprep.mubr.bf16.mxu0 %v20058_v22 }
 0x2d9   : > { %4790 = vmatpush1.bf16.msra.mxu0 %v4397_v55  ;;  %v14054_v39 = vpop.f32.mrf.mxu0  ;;  %v4381_v8 = vmul.bf16 %v4253_v26, %v20147_v29  ;;  %v4383_v3 = vmul.bf16 %v4255_v49, %v20148_v36  ;;  %v20152_v26 = vld [vmem:[#allocation25_spill] sm:$0xff]  ;;  %4924 = vmatprep.mubr.bf16.mxu1 %v20058_v22  ;;  %v3554_v1 = vpack.c.bf16 %v3103_v34, %v14016_v58  ;;  %v19202_v55 = vmul.bf16 1056980736, %v14057_v57 }
 0x2da   : > { %4903 = vmatpush1.bf16.msra.mxu1 %v4399_v24  ;;  %4791 = vmatprep.subr.bf16.mxu0 %v4382_v20  ;;  %v14066_v31 = vpop.f32.mrf.mxu1  ;;  %v4366_v0 = vmul.bf16 %v4238_v48, %v20151_v44  ;;  %v20153_v33 = vmul.bf16 1056980736, %v20152_v26  ;;  %v20154_v54 = vmul.bf16 1056980736, %v13841_v28  ;;  %v20155_v24 = vmul.bf16 1056980736, %v13906_v18 }
 0x2db   : > { %4904 = vmatprep.subr.bf16.mxu1 %v4384_v51  ;;  %v3109_v59 = vpop.f32.mrf.mxu0  ;;  %v19201_v37 = vmul.bf16 1056980736, %v14064_v56  ;;  %v19203_v58 = vmul.bf16 1056980736, %v14071_v11  ;;  %v20156_v20 = vld [vmem:[#allocation10_spill] sm:$0xff]  ;;  %9562 = vtanh.bf16 %v19202_v55  ;;  %v20157_v18 = vld [vmem:[#allocation13_spill] sm:$0xff] }
 0x2dc   : > { %v4368_v38 = vmul.bf16 %v4240_v10, %v20153_v33  ;;  %v3222_v49 = vpop.f32.mrf.mxu1  ;;  %v4365_v48 = vmul.bf16 %v4237_v27, %v20154_v54  ;;  %v4367_v17 = vmul.bf16 %v4239_v30, %v20155_v24  ;;  %v14088_v6 = vadd.bf16 %v20156_v20, %v3554_v1  ;;  %v20158_v36 = vld [vmem:[#allocation9_spill] sm:$0xff] }
 0x2dd   : > { %4792 = vmatpush1.bf16.msra.mxu0 %v4381_v8  ;;  %v3111_v7 = vpop.f32.mrf.mxu0  ;;  %9564 = vtanh.bf16 %v19201_v37  ;;  %v3522_v1 = vpack.c.bf16 %v13944_v53, %v13919_v9  ;;  %v3539_v54 = vpack.c.bf16 %v13991_v60, %v13970_v14  ;;  %v20170_v37 = vld [vmem:[#allocation32_spill] sm:$0xff]  ;;  %v20179_v60 = vld [vmem:[#allocation6_spill] sm:$0xff] }
 0x2de   : > { %4905 = vmatpush1.bf16.msra.mxu1 %v4383_v3  ;;  %4793 = vmatprep.subr.bf16.mxu0 %v4366_v0  ;;  %v3224_v15 = vpop.f32.mrf.mxu1  ;;  %9566 = vtanh.bf16 %v19203_v58  ;;  %v20159_v3 = vld [vmem:[#allocation23_spill] sm:$0xff]  ;;  %v19204_v44 = vmul.bf16 1056980736, %v14088_v6  ;;  %v3569_v0 = vpack.c.bf16 %v3111_v7, %v14054_v39  ;;  %v3538_v39 = vpack.c.bf16 %v13993_v23, %v13974_v45  ;;  %v20178_v14 = vld [vmem:[#allocation12_spill] sm:$0xff] }
 0x2df   : > { %4906 = vmatprep.subr.bf16.mxu1 %v4368_v38  ;;  %v3113_v52 = vpop.f32.mrf.mxu0  ;;  %v3571_v26 = vpack.c.bf16 %v3224_v15, %v14066_v31  ;;  %v3553_v31 = vpack.c.bf16 %v14027_v42, %v14006_v12  ;;  %v3556_v7 = vpack.c.bf16 %v14052_v47, %v14025_v4  ;;  %v3555_v45 = vpack.c.bf16 %v14038_v16, %v14012_v50  ;;  %v20163_v16 = vld [vmem:[#allocation24_spill] sm:$0xff] }
 0x2e0   : > { %v3570_v34 = vpack.c.bf16 %v3113_v52, %v3109_v59  ;;  %v3226_v51 = vpop.f32.mrf.mxu1  ;;  %v20160_v59 = vld [vmem:[#allocation19_spill] sm:$0xff]  ;;  %9568 = vtanh.bf16 %v19204_v44  ;;  %v14133_v23 = vadd.bf16 %v20157_v18, %v3569_v0  ;;  %v14206_v55 = vadd.bf16 %v20170_v37, %v3522_v1 }
 0x2e1   : > { %4794 = vmatpush1.bf16.msra.mxu0 %v4365_v48  ;;  %v3117_v10 = vpop.f32.mrf.mxu0  ;;  %v3572_v28 = vpack.c.bf16 %v3226_v51, %v3222_v49  ;;  %v3506_v61 = vpack.c.bf16 %v20160_v59, %v20159_v3  ;;  %v3537_v49 = vpack.c.bf16 %v13985_v13, %v13962_v40  ;;  %v20161_v40 = vld [vmem:[#allocation33_spill] sm:$0xff]  ;;  %v14136_v12 = vadd.bf16 %v20157_v18, %v3571_v26 }
 0x2e2   : > { %4907 = vmatpush1.bf16.msra.mxu1 %v4367_v17  ;;  %v14095_v27 = vadd.bf16 %v20157_v18, %v3570_v34  ;;  %v3230_v30 = vpop.f32.mrf.mxu1 }
 0x2e3   : > { %v3119_v29 = vpop.f32.mrf.mxu0  ;;  %v14100_v8 = vadd.bf16 %v20157_v18, %v3572_v28  ;;  %v3540_v28 = vpack.c.bf16 %v14004_v5, %v13983_v19  ;;  %v20165_v19 = vld [vmem:[#allocation20_spill] sm:$0xff]  ;;  %v14171_v5 = vadd.bf16 %v20156_v20, %v3553_v31  ;;  %v14218_v44 = vadd.bf16 %v20163_v16, %v3537_v49 }
 0x2e4   : > { %4812 = vmatmul.mubr.bf16.vlgmr.msra.gmra.mxu0 %v20158_v36  ;;  %v3232_v33 = vpop.f32.mrf.mxu1  ;;  %v19206_v24 = vmul.bf16 1056980736, %v14095_v27 }
 0x2e5   : > { %4925 = vmatmul.mubr.bf16.vlgmr.msra.gmra.mxu1 %v20158_v36  ;;  %v3121_v38 = vpop.f32.mrf.mxu0  ;;  %4821 = vmatprep.mubr.bf16.mxu0 %v20058_v22  ;;  %v19205_v53 = vmul.bf16 1056980736, %v14100_v8 }
 0x2e6   : > { %4934 = vmatprep.mubr.bf16.mxu1 %v20058_v22  ;;  %v3585_v48 = vpack.c.bf16 %v3121_v38, %v3117_v10  ;;  %v3234_v17 = vpop.f32.mrf.mxu1  ;;  %v14148_v10 = vadd.bf16 %v20163_v16, %v3538_v39  ;;  %9570 = vtanh.bf16 %v19206_v24  ;;  %v14174_v38 = vadd.bf16 %v20156_v20, %v3555_v45 }
 0x2e7   : > { %v3123_v9 = vpop.f32.mrf.mxu0  ;;  %v3587_v15 = vpack.c.bf16 %v3234_v17, %v3230_v30  ;;  %v14153_v30 = vadd.bf16 %v20156_v20, %v3556_v7  ;;  %9572 = vtanh.bf16 %v19205_v53  ;;  %v19212_v17 = vmul.bf16 1056980736, %v14136_v12 }
 0x2e8   : > { %v14126_v13 = vadd.bf16 %v20161_v40, %v3585_v48  ;;  %v3586_v52 = vpack.c.bf16 %v3123_v9, %v3119_v29  ;;  %v3236_v4 = vpop.f32.mrf.mxu1  ;;  %v19208_v48 = vmul.bf16 1056980736, %v14133_v23  ;;  %v19214_v9 = vmul.bf16 1056980736, %v14148_v10 }
 0x2e9   : > { %v14138_v42 = vpop.f32.mrf.mxu0  ;;  %v14142_v34 = vadd.bf16 %v20161_v40, %v3587_v15  ;;  %v3588_v50 = vpack.c.bf16 %v3236_v4, %v3232_v33  ;;  %v3524_v15 = vpack.c.bf16 %v13960_v25, %v13929_v35  ;;  %v19213_v45 = vmul.bf16 1056980736, %v14153_v30 }
 0x2ea   : > { %20162 = vst [vmem:[#allocation36_spill] sm:$0xff] %v14138_v42  ;;  %v19209_v47 = vmul.bf16 1056980736, %v14126_v13  ;;  %v14145_v51 = vadd.bf16 %v20161_v40, %v3586_v52  ;;  %v14157_v29 = vpop.f32.mrf.mxu1  ;;  %v14194_v52 = vadd.bf16 %v20163_v16, %v3540_v28  ;;  %v20171_v28 = vld [vmem:[#allocation14_spill] sm:$0xff]  ;;  %v19215_v53 = vmul.bf16 1056980736, %v14171_v5 }
 0x2eb   : > { %20164 = vst [vmem:[#allocation16_spill] sm:$0xff] %v14157_v29  ;;  %v14159_v36 = vpop.f32.mrf.mxu0  ;;  %v19207_v0 = vmul.bf16 1056980736, %v14142_v34  ;;  %v14166_v33 = vadd.bf16 %v20161_v40, %v3588_v50  ;;  %v3521_v58 = vpack.c.bf16 %v13931_v32, %v20171_v28  ;;  %v3523_v35 = vpack.c.bf16 %v13942_v46, %v13915_v41  ;;  %v20174_v28 = vld [vmem:[#allocation37_spill] sm:$0xff] }
 0x2ec   : > { %v19211_v26 = vmul.bf16 1056980736, %v14145_v51  ;;  %4822 = vmatmul.mubr.bf16.gmra.mxu0 %v20165_v19  ;;  %9574 = vtanh.bf16 %v19209_v47  ;;  %v14179_v39 = vpop.f32.mrf.mxu1  ;;  %v14235_v32 = vadd.bf16 %v20163_v16, %v3539_v54  ;;  %v19216_v49 = vmul.bf16 1056980736, %v14174_v38 }
 0x2ed   : > { %4935 = vmatmul.mubr.bf16.gmra.mxu1 %v20165_v19  ;;  %20166 = vst [vmem:[#allocation25_spill] sm:$0xff] %v14179_v39  ;;  %v14181_v7 = vpop.f32.mrf.mxu0  ;;  %4831 = vmatprep.mubr.bf16.mxu0 %v20058_v22  ;;  %9576 = vtanh.bf16 %v19207_v0  ;;  %v19210_v31 = vmul.bf16 1056980736, %v14166_v33  ;;  %v14203_v19 = vpop.eup %9562  ;;  %v3492_v54 = vpack.c.bf16 %v20179_v60, %v20178_v14  ;;  %v20222_v40 = vmul.bf16 1056980736, %v14166_v33 }
 0x2ee   : > { %20167 = vst [vmem:[#allocation13_spill] sm:$0xff] %v14181_v7  ;;  %4944 = vmatprep.mubr.bf16.mxu1 %v20058_v22  ;;  %9578 = vtanh.bf16 %v19211_v26  ;;  %v14199_v4 = vpop.f32.mrf.mxu1  ;;  %v14213_v25 = vpop.eup %9564  ;;  %v19218_v26 = vmul.bf16 1056980736, %v14194_v52 }
 0x2ef   : > { %20168 = vst [vmem:[#allocation9_spill] sm:$0xff] %v14199_v4  ;;  %v14201_v50 = vpop.f32.mrf.mxu0  ;;  %9580 = vtanh.bf16 %v19210_v31  ;;  %v14227_v0 = vpop.eup %9566  ;;  %v14243_v31 = vadd.bf16 %v20170_v37, %v3524_v15  ;;  %v19222_v15 = vmul.bf16 1056980736, %v14206_v55  ;;  %v14298_v60 = vadd.bf16 %v20149_v43, %v3492_v54 }
 0x2f0   : > { %20169 = vst [vmem:[#allocation23_spill] sm:$0xff] %v14201_v50  ;;  %9582 = vtanh.bf16 %v19208_v48  ;;  %v14223_v1 = vpop.f32.mrf.mxu1  ;;  %v20175_v48 = vld [vmem:[#allocation29_spill] sm:$0xff]  ;;  %v20189_v54 = vmul.bf16 1056980736, %v14218_v44 }
 0x2f1   : > { %20172 = vst [vmem:[#allocation19_spill] sm:$0xff] %v14223_v1  ;;  %v14225_v24 = vpop.f32.mrf.mxu0  ;;  %9584 = vtanh.bf16 %v19212_v17  ;;  %v3508_v47 = vpack.c.bf16 %v20175_v48, %v20174_v28  ;;  %v20180_v17 = vld [vmem:[#allocation18_spill] sm:$0xff]  ;;  %v20181_v28 = vld [vmem:[#allocation21_spill] sm:$0xff]  ;;  %v20196_v29 = vmul.bf16 1056980736, %v14243_v31 }
 0x2f2   : > { %20173 = vst [vmem:[#allocation20_spill] sm:$0xff] %v14225_v24  ;;  %9586 = vtanh.bf16 %v19213_v45  ;;  %v14248_v41 = vpop.f32.mrf.mxu1  ;;  %v14258_v48 = vadd.bf16 %v20180_v17, %v3506_v61  ;;  %v14266_v45 = vadd.bf16 %v20170_v37, %v3521_v58  ;;  %v14278_v61 = vadd.bf16 %v20170_v37, %v3523_v35  ;;  %v20187_v24 = vld [vmem:[#allocation8_spill] sm:$0xff] }
 0x2f3   : > { %20176 = vst [vmem:[#allocation14_spill] sm:$0xff] %v14248_v41  ;;  %v14250_v46 = vpop.f32.mrf.mxu0  ;;  %9588 = vtanh.bf16 %v19214_v9  ;;  %v14288_v9 = vadd.bf16 %v20180_v17, %v3508_v47  ;;  %v20192_v47 = vld [vmem:[#allocation17_spill] sm:$0xff]  ;;  %v20193_v41 = vld [vmem:[#allocation22_spill] sm:$0xff] }
 0x2f4   : > { %20177 = vst [vmem:[#allocation37_spill] sm:$0xff] %v14250_v46  ;;  %4832 = vmatmul.mubr.bf16.gmra.mxu0 %v20181_v28  ;;  %9590 = vtanh.bf16 %v19215_v53  ;;  %v14271_v3 = vpop.f32.mrf.mxu1  ;;  %v20186_v53 = vld [vmem:[#allocation28_spill] sm:$0xff] }
 0x2f5   : > { %4945 = vmatmul.mubr.bf16.gmra.mxu1 %v20181_v28  ;;  %20182 = vst [vmem:[#allocation29_spill] sm:$0xff] %v14271_v3  ;;  %v14273_v59 = vpop.f32.mrf.mxu0  ;;  %4841 = vmatprep.mubr.bf16.mxu0 %v20058_v22  ;;  %9592 = vtanh.bf16 %v19216_v49  ;;  %v14285_v28 = vpop.eup %9568  ;;  %v20204_v3 = vld [vmem:[#allocation7_spill] sm:$0xff] }
 0x2f6   : > { %20183 = vst [vmem:[#allocation12_spill] sm:$0xff] %v14273_v59  ;;  %4954 = vmatprep.mubr.bf16.mxu1 %v20058_v22  ;;  %9594 = vtanh.bf16 %v19218_v26  ;;  %v14293_v35 = vpop.f32.mrf.mxu1  ;;  %v14305_v58 = vpop.eup %9570  ;;  %v20188_v26 = vpack.c.bf16 %v20186_v53, %v20187_v24  ;;  %v20195_v53 = vmul.bf16 1056980736, %v14235_v32  ;;  %v20201_v24 = vld [vmem:[#allocation31_spill] sm:$0xff] }
 0x2f7   : > { %20184 = vst [vmem:[#allocation6_spill] sm:$0xff] %v14293_v35  ;;  %v14295_v14 = vpop.f32.mrf.mxu0  ;;  %9596 = vtanh.bf16 %v19222_v15  ;;  %v14320_v15 = vpop.eup %9572  ;;  %v20194_v35 = vpack.c.bf16 %v20192_v47, %v20193_v41  ;;  %v20200_v47 = vld [vmem:[#allocation40_spill] sm:$0xff]  ;;  %v20213_v41 = vmul.bf16 1056980736, %v14278_v61 }
 0x2f8   : > { %20185 = vst [vmem:[#allocation21_spill] sm:$0xff] %v14295_v14  ;;  %v14311_v59 = vadd.bf16 %v20180_v17, %v20188_v26  ;;  %9598 = vtanh.bf16 %v20189_v54  ;;  %v14316_v49 = vpop.f32.mrf.mxu1  ;;  %v20202_v54 = vld [vmem:[#allocation11_spill] sm:$0xff] }
 0x2f9   : > { %20190 = vst [vmem:[#allocation28_spill] sm:$0xff] %v14316_v49  ;;  %v14318_v4 = vpop.f32.mrf.mxu0  ;;  %v14326_v42 = vadd.bf16 %v20180_v17, %v20194_v35  ;;  %9600 = vtanh.bf16 %v20195_v53  ;;  %v20199_v35 = vmul.bf16 1056980736, %v14258_v48  ;;  %v20203_v49 = vpack.c.bf16 %v20201_v24, %v20202_v54  ;;  %v20205_v17 = vld [vmem:[#allocation39_spill] sm:$0xff]  ;;  %v20211_v54 = vld [vmem:[#allocation30_spill] sm:$0xff] }
 0x2fa   : > { %20191 = vst [vmem:[#allocation8_spill] sm:$0xff] %v14318_v4  ;;  %v9575_v26 = vpop.eup %9574  ;;  %9602 = vtanh.bf16 %v20196_v29  ;;  %v14334_v7 = vpop.f32.mrf.mxu1  ;;  %v20206_v14 = vpack.c.bf16 %v20204_v3, %v20205_v17  ;;  %v20210_v24 = vld [vmem:[#allocation35_spill] sm:$0xff] }
 0x2fb   : > { %20197 = vst [vmem:[#allocation17_spill] sm:$0xff] %v14334_v7  ;;  %v14336_v1 = vpop.f32.mrf.mxu0  ;;  %v9577_v39 = vpop.eup %9576  ;;  %9604 = vtanh.bf16 %v20199_v35  ;;  %v14347_v29 = vadd.bf16 %v20047_v62, %v20203_v49  ;;  %v20207_v35 = vmul.bf16 1056980736, %v14266_v45  ;;  %v20212_v17 = vpack.c.bf16 %v20210_v24, %v20211_v54 }
 0x2fc   : > { %20198 = vst [vmem:[#allocation22_spill] sm:$0xff] %v14336_v1  ;;  %4842 = vmatmul.mubr.bf16.gmra.mxu0 %v20200_v47  ;;  %v9579_v53 = vpop.eup %9578  ;;  %v14353_v46 = vadd.bf16 %v20149_v43, %v20206_v14  ;;  %v14358_v4 = vpop.f32.mrf.mxu1  ;;  %v4353_v37 = vadd.bf16 1065369472, %v9575_v26  ;;  %v4355_v1 = vadd.bf16 1065369472, %v9577_v39 }
 0x2fd   : > { %4955 = vmatmul.mubr.bf16.gmra.mxu1 %v20200_v47  ;;  %9606 = vtanh.bf16 %v20207_v35  ;;  %20208 = vst [vmem:[#allocation40_spill] sm:$0xff] %v14358_v4  ;;  %v14360_v47 = vpop.f32.mrf.mxu0  ;;  %4851 = vmatprep.mubr.bf16.mxu0 %v20058_v22  ;;  %v9581_v49 = vpop.eup %9580  ;;  %v14368_v14 = vadd.bf16 %v20149_v43, %v20212_v17  ;;  %v4354_v35 = vadd.bf16 1065369472, %v9579_v53  ;;  %v20217_v17 = vmul.bf16 1056980736, %v14298_v60 }
 0x2fe   : > { %20209 = vst [vmem:[#allocation31_spill] sm:$0xff] %v14360_v47  ;;  %4964 = vmatprep.mubr.bf16.mxu1 %v20058_v22  ;;  %9608 = vtanh.bf16 %v20213_v41  ;;  %v9583_v4 = vpop.eup %9582  ;;  %v20214_v47 = vmul.bf16 1056980736, %v14288_v9  ;;  %v14375_v16 = vpop.f32.mrf.mxu1  ;;  %v4356_v24 = vadd.bf16 1065369472, %v9581_v49 }
 0x2ff   : > { %20215 = vst [vmem:[#allocation11_spill] sm:$0xff] %v14375_v16  ;;  %v14377_v20 = vpop.f32.mrf.mxu0  ;;  %v9585_v54 = vpop.eup %9584  ;;  %v4338_v41 = vadd.bf16 1065369472, %v14305_v58  ;;  %v4340_v53 = vadd.bf16 1065369472, %v14320_v15  ;;  %v20223_v58 = vld [vmem:[#allocation38_spill] sm:$0xff] }
 0x300   : > { %9610 = vtanh.bf16 %v20214_v47  ;;  %20216 = vst [vmem:[#allocation7_spill] sm:$0xff] %v14377_v20  ;;  %v9587_v43 = vpop.eup %9586  ;;  %v20218_v39 = vmul.bf16 1056980736, %v14311_v59  ;;  %v14388_v47 = vpop.f32.mrf.mxu1  ;;  %v20221_v20 = vmul.bf16 1056980736, %v14145_v51  ;;  %v4484_v3 = vmul.bf16 %v4356_v24, %v20222_v40  ;;  %v20224_v15 = vld [vmem:[#allocation34_spill] sm:$0xff] }
 0x301   : > { %9612 = vtanh.bf16 %v20217_v17  ;;  %20219 = vst [vmem:[#allocation39_spill] sm:$0xff] %v14388_v47  ;;  %v14390_v49 = vpop.f32.mrf.mxu0  ;;  %v14396_v7 = vpop.eup %9588  ;;  %v20225_v16 = vpack.c.bf16 %v20223_v58, %v20224_v15  ;;  %v20226_v47 = vmul.bf16 1056980736, %v14326_v42  ;;  %v4337_v50 = vadd.bf16 1065369472, %v9583_v4 }
 0x302   : > { %9614 = vtanh.bf16 %v20218_v39  ;;  %20220 = vst [vmem:[#allocation35_spill] sm:$0xff] %v14390_v49  ;;  %v4482_v17 = vmul.bf16 %v4354_v35, %v20221_v20  ;;  %v4003_v39 = vmul.bf16 1056980736, %v14368_v14  ;;  %v9591_v49 = vpop.eup %9590  ;;  %v4339_v51 = vadd.bf16 1065369472, %v9585_v54  ;;  %v14411_v24 = vpop.f32.mrf.mxu1  ;;  %5118 = vmatprep.subr.bf16.mxu1 %v4484_v3 }
 0x303   : > { %v14402_v26 = vadd.bf16 %v20047_v62, %v20225_v16  ;;  %9616 = vtanh.bf16 %v20226_v47  ;;  %v20227_v20 = vmul.bf16 1056980736, %v14126_v13  ;;  %v20228_v40 = vmul.bf16 1056980736, %v14142_v34  ;;  %v14413_v16 = vpop.f32.mrf.mxu0  ;;  %v9593_v58 = vpop.eup %9592 }
 0x304   : > { %5005 = vmatprep.subr.bf16.mxu0 %v4482_v17  ;;  %4852 = vmatmul.mubr.bf16.gmra.mxu0 %v13875_v21  ;;  %v20229_v4 = vmul.bf16 1056980736, %v14095_v27  ;;  %v20230_v13 = vmul.bf16 1056980736, %v14100_v8  ;;  %v4322_v34 = vadd.bf16 1065369472, %v14285_v28  ;;  %v9595_v47 = vpop.eup %9594  ;;  %v14425_v15 = vpop.f32.mrf.mxu1 }
 0x305   : > { %v4481_v33 = vmul.bf16 %v4353_v37, %v20227_v20  ;;  %v4483_v35 = vmul.bf16 %v4355_v1, %v20228_v40  ;;  %4965 = vmatmul.mubr.bf16.gmra.mxu1 %v13875_v21  ;;  %v4324_v1 = vadd.bf16 1065369472, %v9587_v43  ;;  %v19237_v17 = vmul.bf16 1056980736, %v14347_v29  ;;  %v14427_v21 = vpop.f32.mrf.mxu0  ;;  %v9597_v27 = vpop.eup %9596  ;;  %4861 = vmatprep.mubr.bf16.mxu0 %v20058_v22 }
 0x306   : > { %v4466_v54 = vmul.bf16 %v4338_v41, %v20229_v4  ;;  %v4468_v37 = vmul.bf16 %v4340_v53, %v20230_v13  ;;  %v20231_v3 = vmul.bf16 1056980736, %v14353_v46  ;;  %v19236_v41 = vmul.bf16 1056980736, %v14402_v26  ;;  %v9599_v43 = vpop.eup %9598  ;;  %4974 = vmatprep.mubr.bf16.mxu1 %v20058_v22 }
 0x307   : > { %5006 = vmatpush1.bf16.msra.mxu0 %v4481_v33  ;;  %5119 = vmatpush1.bf16.msra.mxu1 %v4483_v35  ;;  %v4321_v8 = vadd.bf16 1065369472, %v9591_v49  ;;  %v4323_v28 = vadd.bf16 1065369472, %v9593_v58  ;;  %v20232_v53 = vmul.bf16 1056980736, %v14133_v23  ;;  %v14436_v35 = vpop.f32.mrf.mxu1  ;;  %v14438_v4 = vpop.f32.mrf.mxu0 }
 0x308   : > { %9618 = vtanh.bf16 %v20231_v3  ;;  %5007 = vmatprep.subr.bf16.mxu0 %v4466_v54  ;;  %5120 = vmatprep.subr.bf16.mxu1 %v4468_v37  ;;  %v20233_v33 = vmul.bf16 1056980736, %v14136_v12  ;;  %v9601_v13 = vpop.eup %9600  ;;  %v20234_v54 = vmul.bf16 1056980736, %v14088_v6  ;;  %v20235_v49 = vmul.bf16 1056980736, %v14153_v30 }
 0x309   : > { %9620 = vtanh.bf16 %v4003_v39  ;;  %v4465_v20 = vmul.bf16 %v4337_v50, %v20232_v53  ;;  %v4306_v23 = vadd.bf16 1065369472, %v14396_v7  ;;  %v4308_v50 = vadd.bf16 1065369472, %v9595_v47  ;;  %v9603_v12 = vpop.eup %9602  ;;  %v14451_v3 = vpop.f32.mrf.mxu0 }
 0x30a   : > { %v4467_v40 = vmul.bf16 %v4339_v51, %v20233_v33  ;;  %v4450_v37 = vmul.bf16 %v4322_v34, %v20234_v54  ;;  %v4452_v58 = vmul.bf16 %v4324_v1, %v20235_v49  ;;  %9622 = vtanh.bf16 %v19237_v17  ;;  %v14449_v51 = vpop.f32.mrf.mxu1  ;;  %v9605_v53 = vpop.eup %9604  ;;  %v20238_v49 = vld [vmem:[#allocation27_spill] sm:$0xff] }
 0x30b   : > { %5008 = vmatpush1.bf16.msra.mxu0 %v4465_v20  ;;  %9624 = vtanh.bf16 %v19236_v41  ;;  %v9607_v6 = vpop.eup %9606  ;;  %v4305_v30 = vadd.bf16 1065369472, %v9599_v43  ;;  %v4307_v7 = vadd.bf16 1065369472, %v9601_v13  ;;  %v20236_v34 = vmul.bf16 1056980736, %v14171_v5 }
 0x30c   : > { %5121 = vmatpush1.bf16.msra.mxu1 %v4467_v40  ;;  %5009 = vmatprep.subr.bf16.mxu0 %v4450_v37  ;;  %v20237_v47 = vmul.bf16 1056980736, %v14174_v38  ;;  %v14459_v33 = vpop.f32.mrf.mxu1  ;;  %v14461_v40 = vpop.f32.mrf.mxu0  ;;  %v20239_v37 = vmul.bf16 1056980736, %v14148_v10  ;;  %v20240_v43 = vmul.bf16 1056980736, %v14194_v52 }
 0x30d   : > { %5122 = vmatprep.subr.bf16.mxu1 %v4452_v58  ;;  %v4449_v1 = vmul.bf16 %v4321_v8, %v20236_v34  ;;  %v9609_v54 = vpop.eup %9608  ;;  %4862 = vmatmul.mubr.bf16.gmra.mxu0 %v20238_v49  ;;  %v4290_v5 = vadd.bf16 1065369472, %v9597_v27  ;;  %v4292_v8 = vadd.bf16 1065369472, %v9603_v12  ;;  %v20241_v10 = vmul.bf16 1056980736, %v14218_v44 }
 0x30e   : > { %v4451_v20 = vmul.bf16 %v4323_v28, %v20237_v47  ;;  %4975 = vmatmul.mubr.bf16.gmra.mxu1 %v20238_v49  ;;  %v4434_v58 = vmul.bf16 %v4306_v23, %v20239_v37  ;;  %v4436_v13 = vmul.bf16 %v4308_v50, %v20240_v43  ;;  %v9611_v34 = vpop.eup %9610  ;;  %v14469_v38 = vpop.f32.mrf.mxu1  ;;  %v4289_v49 = vadd.bf16 1065369472, %v9607_v6  ;;  %4871 = vmatprep.mubr.bf16.mxu0 %v20058_v22 }
 0x30f   : > { %5010 = vmatpush1.bf16.msra.mxu0 %v4449_v1  ;;  %v14471_v28 = vpop.f32.mrf.mxu0  ;;  %v9613_v47 = vpop.eup %9612  ;;  %v4291_v17 = vadd.bf16 1065369472, %v9609_v54  ;;  %v4433_v23 = vmul.bf16 %v4305_v30, %v20241_v10  ;;  %v20242_v52 = vmul.bf16 1056980736, %v14235_v32  ;;  %4984 = vmatprep.mubr.bf16.mxu1 %v20058_v22  ;;  %v20244_v6 = vmul.bf16 1056980736, %v14243_v31 }
 0x310   : > { %5123 = vmatpush1.bf16.msra.mxu1 %v4451_v20  ;;  %5011 = vmatprep.subr.bf16.mxu0 %v4434_v58  ;;  %v9615_v41 = vpop.eup %9614  ;;  %v14477_v50 = vpop.f32.mrf.mxu1  ;;  %v20243_v20 = vmul.bf16 1056980736, %v14206_v55  ;;  %v4274_v44 = vadd.bf16 1065369472, %v9605_v53  ;;  %v4276_v30 = vadd.bf16 1065369472, %v9611_v34 }
 0x311   : > { %5124 = vmatprep.subr.bf16.mxu1 %v4436_v13  ;;  %v4435_v27 = vmul.bf16 %v4307_v7, %v20242_v52  ;;  %v14479_v12 = vpop.f32.mrf.mxu0  ;;  %v9617_v1 = vpop.eup %9616  ;;  %v4420_v54 = vmul.bf16 %v4292_v8, %v20244_v6  ;;  %v4273_v43 = vadd.bf16 1065369472, %v9615_v41  ;;  %v20245_v10 = vmul.bf16 1056980736, %v14266_v45 }
 0x312   : > { %v4418_v37 = vmul.bf16 %v4290_v5, %v20243_v20  ;;  %v14487_v32 = vpop.f32.mrf.mxu1  ;;  %v4275_v13 = vadd.bf16 1065369472, %v9617_v1  ;;  %v20246_v5 = vmul.bf16 1056980736, %v14278_v61  ;;  %v20248_v41 = vmul.bf16 1056980736, %v14288_v9 }
 0x313   : > { %5012 = vmatpush1.bf16.msra.mxu0 %v4433_v23  ;;  %v14489_v7 = vpop.f32.mrf.mxu0  ;;  %v4417_v55 = vmul.bf16 %v4289_v49, %v20245_v10  ;;  %v20247_v23 = vmul.bf16 1056980736, %v14258_v48  ;;  %v4258_v45 = vadd.bf16 1065369472, %v14227_v0  ;;  %v4260_v49 = vadd.bf16 1065369472, %v9613_v47 }
 0x314   : > { %5125 = vmatpush1.bf16.msra.mxu1 %v4435_v27  ;;  %5013 = vmatprep.subr.bf16.mxu0 %v4418_v37  ;;  %v4419_v31 = vmul.bf16 %v4291_v17, %v20246_v5  ;;  %v14495_v8 = vpop.f32.mrf.mxu1  ;;  %v4404_v27 = vmul.bf16 %v4276_v30, %v20248_v41  ;;  %v20249_v48 = vmul.bf16 1056980736, %v14311_v59  ;;  %v20250_v9 = vmul.bf16 1056980736, %v14326_v42 }
 0x315   : > { %5126 = vmatprep.subr.bf16.mxu1 %v4420_v54  ;;  %v14497_v53 = vpop.f32.mrf.mxu0  ;;  %4872 = vmatmul.mubr.bf16.gmra.mxu0 %v13998_v63  ;;  %v4402_v52 = vmul.bf16 %v4274_v44, %v20247_v23  ;;  %v20251_v44 = vmul.bf16 1056980736, %v14071_v11  ;;  %v4242_v59 = vadd.bf16 1065369472, %v14203_v19  ;;  %v4244_v42 = vadd.bf16 1065369472, %v14213_v25 }
 0x316   : > { %v9619_v58 = vpop.eup %9618  ;;  %4985 = vmatmul.mubr.bf16.gmra.mxu1 %v13998_v63  ;;  %v14506_v61 = vpop.f32.mrf.mxu1  ;;  %v4401_v37 = vmul.bf16 %v4273_v43, %v20249_v48  ;;  %v4403_v6 = vmul.bf16 %v4275_v13, %v20250_v9  ;;  %4881 = vmatprep.mubr.bf16.mxu0 %v20058_v22  ;;  %v20254_v19 = vmul.bf16 1056980736, %v14057_v57 }
 0x317   : > { %v9621_v34 = vpop.eup %9620  ;;  %5014 = vmatpush1.bf16.msra.mxu0 %v4417_v55  ;;  %v14508_v17 = vpop.f32.mrf.mxu0  ;;  %v4257_v20 = vadd.bf16 1065369472, %v9619_v58  ;;  %4994 = vmatprep.mubr.bf16.mxu1 %v20058_v22  ;;  %v4386_v30 = vmul.bf16 %v4258_v45, %v20251_v44  ;;  %v20252_v58 = vmul.bf16 1056980736, %v14298_v60 }
 0x318   : > { %5127 = vmatpush1.bf16.msra.mxu1 %v4419_v31  ;;  %5015 = vmatprep.subr.bf16.mxu0 %v4402_v52  ;;  %v9623_v1 = vpop.eup %9622  ;;  %v4259_v63 = vadd.bf16 1065369472, %v9621_v34  ;;  %v14514_v54 = vpop.f32.mrf.mxu1  ;;  %v20253_v31 = vmul.bf16 1056980736, %v14353_v46  ;;  %v4370_v25 = vmul.bf16 %v4242_v59, %v20254_v19  ;;  %v20255_v52 = vmul.bf16 1056980736, %v14064_v56 }
 0x319   : > { %5128 = vmatprep.subr.bf16.mxu1 %v4404_v27  ;;  %v14516_v0 = vpop.f32.mrf.mxu0  ;;  %v9625_v47 = vpop.eup %9624  ;;  %v4388_v10 = vmul.bf16 %v4260_v49, %v20252_v58  ;;  %v4241_v55 = vadd.bf16 1065369472, %v9623_v1  ;;  %v20257_v49 = vmul.bf16 1056980736, %v14402_v26 }
 0x31a   : > { %v14526_v43 = vpop.f32.mrf.mxu1  ;;  %v4243_v5 = vadd.bf16 1065369472, %v9625_v47  ;;  %v4385_v11 = vmul.bf16 %v4257_v20, %v20253_v31  ;;  %v4387_v60 = vmul.bf16 %v4259_v63, %v4003_v39  ;;  %v4372_v41 = vmul.bf16 %v4244_v42, %v20255_v52  ;;  %v20258_v42 = vld [vmem:[#allocation23_spill] sm:$0xff] }
 0x31b   : > { %5016 = vmatpush1.bf16.msra.mxu0 %v4401_v37  ;;  %v3333_v13 = vpop.f32.mrf.mxu0  ;;  %v20256_v39 = vmul.bf16 1056980736, %v14347_v29  ;;  %v3558_v47 = vpack.c.bf16 %v14516_v0, %v14497_v53  ;;  %v3541_v53 = vpack.c.bf16 %v14471_v28, %v14451_v3  ;;  %v3557_v31 = vpack.c.bf16 %v14508_v17, %v14489_v7 }
 0x31c   : > { %5129 = vmatpush1.bf16.msra.mxu1 %v4403_v6  ;;  %5017 = vmatprep.subr.bf16.mxu0 %v4386_v30  ;;  %v3446_v34 = vpop.f32.mrf.mxu1  ;;  %v4371_v1 = vmul.bf16 %v4243_v5, %v20257_v49  ;;  %v14553_v6 = vld [vmem:[%s18933_s5] sm:$0xff]   ;;  %v3542_v5 = vpack.c.bf16 %v14479_v12, %v14461_v40  ;;  %v3544_v52 = vpack.c.bf16 %v14487_v32, %v14469_v38  ;;  %v14619_v38 = vld [vmem:[%s18933_s5 + $0x8] sm:$0xff]  }
 0x31d   : > { %5130 = vmatprep.subr.bf16.mxu1 %v4388_v10  ;;  %v3335_v23 = vpop.f32.mrf.mxu0  ;;  %4882 = vmatmul.mubr.bf16.gmra.mxu0 %v14043_v2  ;;  %v4369_v45 = vmul.bf16 %v4241_v55, %v20256_v39  ;;  %v3526_v55 = vpack.c.bf16 %v14438_v4, %v14413_v16  ;;  %v3559_v16 = vpack.c.bf16 %v14514_v54, %v14495_v8  ;;  %v20259_v4 = vld [vmem:[#allocation33_spill] sm:$0xff]  ;;  %v20261_v39 = vld [vmem:[#allocation24_spill] sm:$0xff] }
 0x31e   : > { %4995 = vmatmul.mubr.bf16.gmra.mxu1 %v14043_v2  ;;  %v3448_v27 = vpop.f32.mrf.mxu1  ;;  %5037 = vmatprep.mubr.bf16.mxu0 %v20058_v22  ;;  %v3543_v32 = vpack.c.bf16 %v14477_v50, %v14459_v33  ;;  %v3528_v50 = vpack.c.bf16 %v14449_v51, %v14425_v15  ;;  %v20263_v15 = vld [vmem:[#allocation22_spill] sm:$0xff]  ;;  %v20264_v51 = vld [vmem:[#allocation7_spill] sm:$0xff] }
 0x31f   : > { %5018 = vmatpush1.bf16.msra.mxu0 %v4385_v11  ;;  %v3337_v46 = vpop.f32.mrf.mxu0  ;;  %5150 = vmatprep.mubr.bf16.mxu1 %v20058_v22  ;;  %v3560_v11 = vpack.c.bf16 %v14526_v43, %v14506_v61 }
 0x320   : > { %5131 = vmatpush1.bf16.msra.mxu1 %v4387_v60  ;;  %5019 = vmatprep.subr.bf16.mxu0 %v4370_v25  ;;  %v3573_v14 = vpack.c.bf16 %v3337_v46, %v3333_v13  ;;  %v3450_v2 = vpop.f32.mrf.mxu1  ;;  %v3478_v13 = vpack.c.bf16 %v20258_v42, %v14159_v36  ;;  %v20260_v25 = vld [vmem:[#allocation10_spill] sm:$0xff]  ;;  %v20277_v42 = vld [vmem:[#allocation13_spill] sm:$0xff] }
 0x321   : > { %5132 = vmatprep.subr.bf16.mxu1 %v4372_v41  ;;  %v3339_v20 = vpop.f32.mrf.mxu0  ;;  %v3575_v30 = vpack.c.bf16 %v3450_v2, %v3446_v34  ;;  %v14584_v40 = vadd.bf16 %v20260_v25, %v3558_v47  ;;  %v14602_v41 = vadd.bf16 %v20260_v25, %v3557_v31  ;;  %v20265_v47 = vld [vmem:[#allocation32_spill] sm:$0xff] }
 0x322   : > { %v3574_v57 = vpack.c.bf16 %v3339_v20, %v3335_v23  ;;  %v14545_v56 = vadd.bf16 %v20157_v18, %v3573_v14  ;;  %v3452_v63 = vpop.f32.mrf.mxu1  ;;  %v14643_v20 = vadd.bf16 %v20261_v39, %v3544_v52  ;;  %v14675_v31 = vadd.bf16 %v20265_v47, %v3528_v50 }
 0x323   : > { %5020 = vmatpush1.bf16.msra.mxu0 %v4369_v45  ;;  %v3343_v48 = vpop.f32.mrf.mxu0  ;;  %v3576_v37 = vpack.c.bf16 %v3452_v63, %v3448_v27  ;;  %v14589_v12 = vadd.bf16 %v20157_v18, %v3575_v30  ;;  %v14626_v45 = vadd.bf16 %v20261_v39, %v3542_v5  ;;  %v19249_v49 = vmul.bf16 1056980736, %v14584_v40  ;;  %v20262_v63 = vld [vmem:[#allocation35_spill] sm:$0xff] }
 0x324   : > { %5133 = vmatpush1.bf16.msra.mxu1 %v4371_v1  ;;  %v14548_v29 = vadd.bf16 %v20157_v18, %v3574_v57  ;;  %v3456_v26 = vpop.f32.mrf.mxu1  ;;  %v19251_v44 = vmul.bf16 1056980736, %v14545_v56  ;;  %v14634_v1 = vadd.bf16 %v20260_v25, %v3559_v16  ;;  %v14659_v30 = vadd.bf16 %v20265_v47, %v3526_v55  ;;  %v20267_v5 = vld [vmem:[#allocation39_spill] sm:$0xff] }
 0x325   : > { %v3345_v9 = vpop.f32.mrf.mxu0  ;;  %v14561_v58 = vadd.bf16 %v20157_v18, %v3576_v37  ;;  %v14605_v18 = vadd.bf16 %v20260_v25, %v3560_v11  ;;  %v19248_v2 = vmul.bf16 1056980736, %v14589_v12  ;;  %v14651_v37 = vadd.bf16 %v20261_v39, %v3541_v53 }
 0x326   : > { %5038 = vmatmul.mubr.bf16.vlgmr.msra.gmra.mxu0 %v14553_v6  ;;  %v3458_v10 = vpop.f32.mrf.mxu1  ;;  %v4086_v60 = vmul.bf16 1056980736, %v14548_v29  ;;  %9626 = vtanh.bf16 %v19251_v44  ;;  %v19241_v53 = vmul.bf16 1056980736, %v14634_v1  ;;  %v19239_v11 = vmul.bf16 1056980736, %v14643_v20 }
 0x327   : > { %5151 = vmatmul.mubr.bf16.vlgmr.msra.gmra.mxu1 %v14553_v6  ;;  %v3347_v59 = vpop.f32.mrf.mxu0  ;;  %5047 = vmatprep.mubr.bf16.mxu0 %v20058_v22  ;;  %v19252_v7 = vmul.bf16 1056980736, %v14561_v58  ;;  %v19245_v57 = vmul.bf16 1056980736, %v14605_v18  ;;  %v19238_v16 = vmul.bf16 1056980736, %v14651_v37 }
 0x328   : > { %5160 = vmatprep.mubr.bf16.mxu1 %v20058_v22  ;;  %v3589_v0 = vpack.c.bf16 %v3347_v59, %v3343_v48  ;;  %v3460_v34 = vpop.f32.mrf.mxu1  ;;  %9628 = vtanh.bf16 %v4086_v60  ;;  %v3525_v48 = vpack.c.bf16 %v14427_v21, %v20262_v63  ;;  %v3527_v21 = vpack.c.bf16 %v14436_v35, %v14411_v24  ;;  %v20268_v24 = vld [vmem:[#allocation8_spill] sm:$0xff]  ;;  %v20269_v35 = vld [vmem:[#allocation31_spill] sm:$0xff] }
 0x329   : > { %v3349_v23 = vpop.f32.mrf.mxu0  ;;  %v3591_v3 = vpack.c.bf16 %v3460_v34, %v3456_v26  ;;  %v19243_v26 = vmul.bf16 1056980736, %v14602_v41  ;;  %v14667_v59 = vadd.bf16 %v20261_v39, %v3543_v32  ;;  %v3509_v34 = vpack.c.bf16 %v20269_v35, %v20268_v24  ;;  %v20273_v32 = vld [vmem:[#allocation29_spill] sm:$0xff]  ;;  %v20274_v39 = vld [vmem:[#allocation28_spill] sm:$0xff] }
 0x32a   : > { %v14581_v19 = vadd.bf16 %v20259_v4, %v3589_v0  ;;  %v3590_v28 = vpack.c.bf16 %v3349_v23, %v3345_v9  ;;  %v3462_v61 = vpop.f32.mrf.mxu1  ;;  %v3510_v9 = vpack.c.bf16 %v20264_v51, %v20263_v15  ;;  %v20266_v0 = vld [vmem:[#allocation40_spill] sm:$0xff]  ;;  %v14683_v23 = vadd.bf16 %v20265_v47, %v3525_v48 }
 0x32b   : > { %v14594_v8 = vadd.bf16 %v20259_v4, %v3591_v3  ;;  %v3592_v43 = vpack.c.bf16 %v3462_v61, %v3458_v10  ;;  %v19240_v10 = vmul.bf16 1056980736, %v14626_v45  ;;  %v3512_v55 = vpack.c.bf16 %v20267_v5, %v20266_v0  ;;  %v20270_v3 = vld [vmem:[#allocation37_spill] sm:$0xff]  ;;  %v20272_v61 = vld [vmem:[#allocation18_spill] sm:$0xff] }
 0x32c   : > { %v4101_v17 = vmul.bf16 1056980736, %v14581_v19  ;;  %v14597_v54 = vadd.bf16 %v20259_v4, %v3590_v28  ;;  %v20271_v28 = vld [vmem:[#allocation21_spill] sm:$0xff]  ;;  %v19242_v52 = vmul.bf16 1056980736, %v14659_v30  ;;  %v3496_v50 = vpack.c.bf16 %v20274_v39, %v20273_v32 }
 0x32d   : > { %v4103_v27 = vmul.bf16 1056980736, %v14594_v8  ;;  %v14614_v14 = vadd.bf16 %v20259_v4, %v3592_v43  ;;  %v14691_v4 = vld [vmem:[%s18933_s5 + $0x10] sm:$0xff]   ;;  %v3494_v25 = vpack.c.bf16 %v20271_v28, %v20270_v3  ;;  %v14698_v43 = vadd.bf16 %v20272_v61, %v3510_v9  ;;  %v20280_v28 = vld [vmem:[#allocation15_spill] sm:$0xff] }
 0x32e   : > { %9630 = vtanh.bf16 %v4101_v17  ;;  %v4102_v46 = vmul.bf16 1056980736, %v14597_v54  ;;  %5048 = vmatmul.mubr.bf16.gmra.mxu0 %v14619_v38  ;;  %v14708_v63 = vadd.bf16 %v20265_v47, %v3527_v21  ;;  %v19244_v48 = vmul.bf16 1056980736, %v14667_v59  ;;  %v20275_v47 = vld [vmem:[#allocation25_spill] sm:$0xff]  ;;  %v20276_v21 = vld [vmem:[#allocation19_spill] sm:$0xff] }
 0x32f   : > { %5161 = vmatmul.mubr.bf16.gmra.mxu1 %v14619_v38  ;;  %9632 = vtanh.bf16 %v19252_v7  ;;  %5057 = vmatprep.mubr.bf16.mxu0 %v20058_v22  ;;  %v4104_v33 = vmul.bf16 1056980736, %v14614_v14  ;;  %v14719_v51 = vadd.bf16 %v20047_v62, %v3478_v13  ;;  %v14722_v9 = vadd.bf16 %v20272_v61, %v3512_v55  ;;  %v20278_v13 = vld [vmem:[#allocation36_spill] sm:$0xff] }
 0x330   : > { %5170 = vmatprep.mubr.bf16.mxu1 %v20058_v22  ;;  %9634 = vtanh.bf16 %v4103_v27  ;;  %v19247_v0 = vmul.bf16 1056980736, %v14675_v31  ;;  %v3480_v5 = vpack.c.bf16 %v20276_v21, %v20275_v47  ;;  %v14730_v24 = vadd.bf16 %v20272_v61, %v3509_v34  ;;  %v20281_v21 = vld [vmem:[#allocation11_spill] sm:$0xff] }
 0x331   : > { %9636 = vtanh.bf16 %v4102_v46  ;;  %v19246_v35 = vmul.bf16 1056980736, %v14683_v23  ;;  %v20279_v55 = vpack.c.bf16 %v20277_v42, %v20278_v13  ;;  %v14744_v32 = vadd.bf16 %v20280_v28, %v3494_v25 }
 0x332   : > { %9638 = vtanh.bf16 %v4104_v33  ;;  %v19250_v39 = vmul.bf16 1056980736, %v14698_v43  ;;  %v14750_v47 = vadd.bf16 %v20280_v28, %v3496_v50  ;;  %v19253_v13 = vmul.bf16 1056980736, %v14708_v63 }
 0x333   : > { %9640 = vtanh.bf16 %v19249_v49  ;;  %v14741_v3 = vadd.bf16 %v20047_v62, %v20279_v55  ;;  %v20284_v55 = vld [vmem:[#allocation9_spill] sm:$0xff]  ;;  %v20293_v8 = vmul.bf16 1056980736, %v14561_v58  ;;  %v20296_v58 = vmul.bf16 1056980736, %v14584_v40 }
 0x334   : > { %9642 = vtanh.bf16 %v19248_v2  ;;  %v14713_v15 = vpop.eup %9626  ;;  %v4008_v2 = vmul.bf16 1056980736, %v14750_v47  ;;  %v20298_v40 = vmul.bf16 1056980736, %v14605_v18  ;;  %v20301_v18 = vmul.bf16 1056980736, %v14626_v45 }
 0x335   : > { %9644 = vtanh.bf16 %v19245_v57  ;;  %v14922_v47 = vld [vmem:[%s18933_s5 + $0x38] sm:$0xff]  }
 0x336   : > { %9646 = vtanh.bf16 %v19243_v26  ;;  %5058 = vmatmul.mubr.bf16.gmra.mxu0 %v14691_v4  ;;  %v14735_v36 = vpop.eup %9628  ;;  %v19254_v26 = vmul.bf16 1056980736, %v14722_v9 }
 0x337   : > { %5171 = vmatmul.mubr.bf16.gmra.mxu1 %v14691_v4  ;;  %9648 = vtanh.bf16 %v19240_v10  ;;  %5067 = vmatprep.mubr.bf16.mxu0 %v20058_v22  ;;  %v20285_v10 = vld [vmem:[#allocation16_spill] sm:$0xff] }
 0x338   : > { %5180 = vmatprep.mubr.bf16.mxu1 %v20058_v22  ;;  %9650 = vtanh.bf16 %v19241_v53  ;;  %v20286_v53 = vpack.c.bf16 %v20284_v55, %v20285_v10  ;;  %v19255_v10 = vmul.bf16 1056980736, %v14730_v24  ;;  %v20291_v55 = vld [vmem:[#allocation14_spill] sm:$0xff] }
 0x339   : > { %9652 = vtanh.bf16 %v19239_v11 }
 0x33a   : > { %9654 = vtanh.bf16 %v19238_v16  ;;  %v20282_v16 = vld [vmem:[#allocation17_spill] sm:$0xff] }
 0x33b   : > { %9656 = vtanh.bf16 %v19242_v52  ;;  %v20283_v11 = vpack.c.bf16 %v20281_v21, %v20282_v16  ;;  %v14765_v52 = vadd.bf16 %v20047_v62, %v20286_v53  ;;  %v14772_v16 = vadd.bf16 %v20047_v62, %v3480_v5  ;;  %v20288_v21 = vld [vmem:[#allocation20_spill] sm:$0xff]  ;;  %v14786_v53 = vld [vmem:[%s18933_s5 + $0x18] sm:$0xff]   ;;  %v20290_v5 = vld [vmem:[#allocation6_spill] sm:$0xff] }
 0x33c   : > { %v9631_v34 = vpop.eup %9630  ;;  %9658 = vtanh.bf16 %v19244_v48 }
 0x33d   : > { %v14756_v42 = vadd.bf16 %v20272_v61, %v20283_v11  ;;  %v9633_v25 = vpop.eup %9632  ;;  %9660 = vtanh.bf16 %v19247_v0  ;;  %v20287_v61 = vld [vmem:[#allocation12_spill] sm:$0xff] }
 0x33e   : > { %v9635_v11 = vpop.eup %9634  ;;  %v20289_v48 = vpack.c.bf16 %v20287_v61, %v20288_v21  ;;  %9662 = vtanh.bf16 %v19246_v35  ;;  %5068 = vmatmul.mubr.bf16.gmra.mxu0 %v14786_v53  ;;  %v20292_v61 = vpack.c.bf16 %v20290_v5, %v20291_v55  ;;  %v4006_v21 = vmul.bf16 1056980736, %v14744_v32 }
 0x33f   : > { %5181 = vmatmul.mubr.bf16.gmra.mxu1 %v14786_v53  ;;  %v9637_v62 = vpop.eup %9636  ;;  %9664 = vtanh.bf16 %v19250_v39  ;;  %v4357_v35 = vadd.bf16 1065369472, %v9631_v34  ;;  %5077 = vmatprep.mubr.bf16.mxu0 %v20058_v22  ;;  %v4023_v49 = vmul.bf16 1056980736, %v14756_v42  ;;  %v4359_v55 = vadd.bf16 1065369472, %v9635_v11 }
 0x340   : > { %v14778_v57 = vadd.bf16 %v20280_v28, %v20289_v48  ;;  %v14794_v48 = vadd.bf16 %v20280_v28, %v20292_v61  ;;  %5190 = vmatprep.mubr.bf16.mxu1 %v20058_v22  ;;  %v9639_v0 = vpop.eup %9638  ;;  %9666 = vtanh.bf16 %v19253_v13  ;;  %v4358_v28 = vadd.bf16 1065369472, %v9637_v62 }
 0x341   : > { %v9641_v5 = vpop.eup %9640  ;;  %9668 = vtanh.bf16 %v19254_v26  ;;  %v4360_v61 = vadd.bf16 1065369472, %v9639_v0  ;;  %v4342_v34 = vadd.bf16 1065369472, %v14735_v36  ;;  %v4344_v7 = vadd.bf16 1065369472, %v9633_v25 }
 0x342   : > { %v9643_v39 = vpop.eup %9642  ;;  %v4005_v44 = vmul.bf16 1056980736, %v14778_v57  ;;  %9670 = vtanh.bf16 %v19255_v10  ;;  %v4486_v50 = vmul.bf16 %v4358_v28, %v4102_v46  ;;  %v4341_v62 = vadd.bf16 1065369472, %v14713_v15 }
 0x343   : > { %v9645_v13 = vpop.eup %9644  ;;  %9672 = vtanh.bf16 %v4006_v21  ;;  %v4485_v0 = vmul.bf16 %v4357_v35, %v4101_v17  ;;  %v4488_v36 = vmul.bf16 %v4360_v61, %v4104_v33  ;;  %v3992_v26 = vmul.bf16 1056980736, %v14772_v16  ;;  %v14836_v35 = vld [vmem:[%s18933_s5 + $0x20] sm:$0xff]  }
 0x344   : > { %v9647_v11 = vpop.eup %9646  ;;  %v4007_v10 = vmul.bf16 1056980736, %v14794_v48  ;;  %9674 = vtanh.bf16 %v4023_v49  ;;  %5231 = vmatprep.subr.bf16.mxu0 %v4486_v50  ;;  %v4326_v54 = vadd.bf16 1065369472, %v9641_v5  ;;  %v4343_v15 = vadd.bf16 1065369472, %v9643_v39 }
 0x345   : > { %v9649_v46 = vpop.eup %9648  ;;  %9676 = vtanh.bf16 %v4008_v2  ;;  %v4487_v19 = vmul.bf16 %v4359_v55, %v4103_v27  ;;  %5344 = vmatprep.subr.bf16.mxu1 %v4488_v36  ;;  %5232 = vmatpush1.bf16.msra.mxu0 %v4485_v0  ;;  %v4470_v17 = vmul.bf16 %v4342_v34, %v4086_v60  ;;  %v3989_v33 = vmul.bf16 1056980736, %v14741_v3  ;;  %v14940_v3 = vpop.permute.xlu1 %5783 }
 0x346   : > { %v9651_v14 = vpop.eup %9650  ;;  %9678 = vtanh.bf16 %v4005_v44  ;;  %5078 = vmatmul.mubr.bf16.gmra.mxu0 %v14836_v35  ;;  %v4472_v27 = vmul.bf16 %v4344_v7, %v20293_v8  ;;  %v4328_v29 = vadd.bf16 1065369472, %v9645_v13  ;;  %v20294_v39 = vmul.bf16 1056980736, %v14719_v51 }
 0x347   : > { %5191 = vmatmul.mubr.bf16.gmra.mxu1 %v14836_v35  ;;  %v9653_v60 = vpop.eup %9652  ;;  %v4325_v25 = vadd.bf16 1065369472, %v9647_v11  ;;  %v20295_v50 = vmul.bf16 1056980736, %v14545_v56  ;;  %5233 = vmatprep.subr.bf16.mxu0 %v4470_v17  ;;  %v3991_v55 = vmul.bf16 1056980736, %v14765_v52  ;;  %v4454_v7 = vmul.bf16 %v4326_v54, %v20296_v58 }
 0x348   : > { %9680 = vtanh.bf16 %v20294_v39  ;;  %5345 = vmatpush1.bf16.msra.mxu1 %v4487_v19  ;;  %v9655_v5 = vpop.eup %9654  ;;  %5087 = vmatprep.mubr.bf16.mxu0 %v20058_v22  ;;  %v4327_v56 = vadd.bf16 1065369472, %v9651_v14  ;;  %v20297_v61 = vmul.bf16 1056980736, %v14589_v12  ;;  %v4456_v36 = vmul.bf16 %v4328_v29, %v20298_v40 }
 0x349   : > { %v4469_v28 = vmul.bf16 %v4341_v62, %v20295_v50  ;;  %9682 = vtanh.bf16 %v4007_v10  ;;  %5346 = vmatprep.subr.bf16.mxu1 %v4472_v27  ;;  %v9657_v13 = vpop.eup %9656  ;;  %5200 = vmatprep.mubr.bf16.mxu1 %v20058_v22  ;;  %v4310_v62 = vadd.bf16 1065369472, %v9649_v46  ;;  %v4312_v11 = vadd.bf16 1065369472, %v9653_v60 }
 0x34a   : > { %9684 = vtanh.bf16 %v3992_v26  ;;  %v4471_v34 = vmul.bf16 %v4343_v15, %v20297_v61  ;;  %v9659_v0 = vpop.eup %9658  ;;  %v4309_v19 = vadd.bf16 1065369472, %v9655_v5  ;;  %v20299_v17 = vmul.bf16 1056980736, %v14602_v41  ;;  %v14872_v41 = vld [vmem:[%s18933_s5 + $0x28] sm:$0xff]  }
 0x34b   : > { %5234 = vmatpush1.bf16.msra.mxu0 %v4469_v28  ;;  %9686 = vtanh.bf16 %v3989_v33  ;;  %v9661_v54 = vpop.eup %9660  ;;  %v4294_v46 = vadd.bf16 1065369472, %v9657_v13  ;;  %v4311_v8 = vadd.bf16 1065369472, %v9659_v0  ;;  %v20300_v27 = vmul.bf16 1056980736, %v14634_v1 }
 0x34c   : > { %5235 = vmatprep.subr.bf16.mxu0 %v4454_v7  ;;  %v4453_v14 = vmul.bf16 %v4325_v25, %v20299_v17  ;;  %5347 = vmatpush1.bf16.msra.mxu1 %v4471_v34  ;;  %v9663_v12 = vpop.eup %9662  ;;  %9688 = vtanh.bf16 %v3991_v55  ;;  %v4438_v29 = vmul.bf16 %v4310_v62, %v20301_v18  ;;  %v20302_v25 = vmul.bf16 1056980736, %v14643_v20  ;;  %v14897_v18 = vld [vmem:[%s18933_s5 + $0x30] sm:$0xff]  }
 0x34d   : > { %5348 = vmatprep.subr.bf16.mxu1 %v4456_v36  ;;  %v9665_v15 = vpop.eup %9664  ;;  %v4455_v39 = vmul.bf16 %v4327_v56, %v20300_v27  ;;  %v4296_v28 = vadd.bf16 1065369472, %v9661_v54  ;;  %v4293_v5 = vadd.bf16 1065369472, %v9663_v12  ;;  %v20303_v58 = vmul.bf16 1056980736, %v14651_v37 }
 0x34e   : > { %v9667_v60 = vpop.eup %9666  ;;  %5088 = vmatmul.mubr.bf16.gmra.mxu0 %v14872_v41  ;;  %v4440_v50 = vmul.bf16 %v4312_v11, %v20302_v25  ;;  %v20304_v13 = vmul.bf16 1056980736, %v14659_v30  ;;  %v20305_v20 = vmul.bf16 1056980736, %v14667_v59  ;;  %v4278_v0 = vadd.bf16 1065369472, %v9665_v15 }
 0x34f   : > { %5236 = vmatpush1.bf16.msra.mxu0 %v4453_v14  ;;  %5201 = vmatmul.mubr.bf16.gmra.mxu1 %v14872_v41  ;;  %v9669_v1 = vpop.eup %9668  ;;  %v4437_v45 = vmul.bf16 %v4309_v19, %v20303_v58  ;;  %v4295_v34 = vadd.bf16 1065369472, %v9667_v60  ;;  %v20306_v40 = vmul.bf16 1056980736, %v14675_v31  ;;  %v20307_v19 = vmul.bf16 1056980736, %v14683_v23 }
 0x350   : > { %5349 = vmatpush1.bf16.msra.mxu1 %v4455_v39  ;;  %5237 = vmatprep.subr.bf16.mxu0 %v4438_v29  ;;  %v9671_v7 = vpop.eup %9670  ;;  %v4422_v56 = vmul.bf16 %v4294_v46, %v20304_v13  ;;  %v4439_v62 = vmul.bf16 %v4311_v8, %v20305_v20  ;;  %v4280_v11 = vadd.bf16 1065369472, %v9669_v1  ;;  %v20308_v8 = vmul.bf16 1056980736, %v14708_v63 }
 0x351   : > { %5350 = vmatprep.subr.bf16.mxu1 %v4440_v50  ;;  %5097 = vmatprep.mubr.bf16.mxu0 %v20058_v22  ;;  %v9673_v61 = vpop.eup %9672  ;;  %v4424_v36 = vmul.bf16 %v4296_v28, %v20306_v40  ;;  %v4277_v30 = vadd.bf16 1065369472, %v9671_v7  ;;  %v4421_v17 = vmul.bf16 %v4293_v5, %v20307_v19  ;;  %v20309_v27 = vmul.bf16 1056980736, %v14698_v43 }
 0x352   : > { %5210 = vmatprep.mubr.bf16.mxu1 %v20058_v22  ;;  %v9675_v37 = vpop.eup %9674  ;;  %v4262_v59 = vadd.bf16 1065369472, %v9673_v61  ;;  %v4423_v15 = vmul.bf16 %v4295_v34, %v20308_v8  ;;  %v20310_v23 = vmul.bf16 1056980736, %v14722_v9  ;;  %v20311_v50 = vmul.bf16 1056980736, %v14730_v24 }
 0x353   : > { %5238 = vmatpush1.bf16.msra.mxu0 %v4437_v45  ;;  %v9677_v54 = vpop.eup %9676  ;;  %v4279_v46 = vadd.bf16 1065369472, %v9675_v37  ;;  %v4406_v31 = vmul.bf16 %v4278_v0, %v20309_v27  ;;  %v20312_v42 = vmul.bf16 1056980736, %v14719_v51 }
 0x354   : > { %5239 = vmatprep.subr.bf16.mxu0 %v4422_v56  ;;  %5351 = vmatpush1.bf16.msra.mxu1 %v4439_v62  ;;  %v9679_v14 = vpop.eup %9678  ;;  %v4408_v29 = vmul.bf16 %v4280_v11, %v20310_v23  ;;  %v4264_v60 = vadd.bf16 1065369472, %v9677_v54  ;;  %v4405_v43 = vmul.bf16 %v4277_v30, %v20311_v50  ;;  %v4390_v1 = vmul.bf16 %v4262_v59, %v4006_v21  ;;  %v14964_v62 = vpop.permute.xlu1 %5759 }
 0x355   : > { %5352 = vmatprep.subr.bf16.mxu1 %v4424_v36  ;;  %v4261_v25 = vadd.bf16 1065369472, %v9679_v14  ;;  %v4407_v9 = vmul.bf16 %v4279_v46, %v4023_v49 }
 0x356   : > { %v9681_v12 = vpop.eup %9680  ;;  %5098 = vmatmul.mubr.bf16.gmra.mxu0 %v14897_v18  ;;  %v4392_v24 = vmul.bf16 %v4264_v60, %v4008_v2 }
 0x357   : > { %5240 = vmatpush1.bf16.msra.mxu0 %v4421_v17  ;;  %v9683_v39 = vpop.eup %9682  ;;  %5211 = vmatmul.mubr.bf16.gmra.mxu1 %v14897_v18  ;;  %v4246_v58 = vadd.bf16 1065369472, %v9681_v12  ;;  %v4389_v32 = vmul.bf16 %v4261_v25, %v4005_v44 }
 0x358   : > { %v9685_v63 = vpop.eup %9684  ;;  %5353 = vmatpush1.bf16.msra.mxu1 %v4423_v15  ;;  %5241 = vmatprep.subr.bf16.mxu0 %v4406_v31  ;;  %v4263_v5 = vadd.bf16 1065369472, %v9683_v39  ;;  %v14988_v14 = vpop.permute.xlu1 %5735 }
 0x359   : > { %v9687_v28 = vpop.eup %9686  ;;  %5354 = vmatprep.subr.bf16.mxu1 %v4408_v29  ;;  %5107 = vmatprep.mubr.bf16.mxu0 %v20058_v22  ;;  %v4248_v7 = vadd.bf16 1065369472, %v9685_v63  ;;  %v4374_v56 = vmul.bf16 %v4246_v58, %v20312_v42 }
 0x35a   : > { %5220 = vmatprep.mubr.bf16.mxu1 %v20058_v22  ;;  %v9689_v45 = vpop.eup %9688  ;;  %v4245_v13 = vadd.bf16 1065369472, %v9687_v28  ;;  %v4391_v49 = vmul.bf16 %v4263_v5, %v4007_v10 }
 0x35b   : > { %5242 = vmatpush1.bf16.msra.mxu0 %v4405_v43  ;;  %v4247_v21 = vadd.bf16 1065369472, %v9689_v45  ;;  %v4376_v44 = vmul.bf16 %v4248_v7, %v3992_v26  ;;  %v14938_v26 = vpop.permute.xlu0 %5771 }
 0x35c   : > { %5243 = vmatprep.subr.bf16.mxu0 %v4390_v1  ;;  %5355 = vmatpush1.bf16.msra.mxu1 %v4407_v9  ;;  %v4373_v2 = vmul.bf16 %v4245_v13, %v3989_v33  ;;  %v15016_v60 = vpop.permute.xlu1 %5711 }
 0x35d   : > { %5356 = vmatprep.subr.bf16.mxu1 %v4392_v24  ;;  %v4375_v57 = vmul.bf16 %v4247_v21, %v3991_v55 }
 0x35e   : > { %5108 = vmatmul.mubr.bf16.gmra.mxu0 %v14922_v47  ;;  %v14934_v51 = vpop.f32.mrf.mxu0  ;;  %v14936_v10 = vpop.f32.mrf.mxu1 }
 0x35f   : > { %5244 = vmatpush1.bf16.msra.mxu0 %v4389_v32  ;;  %5221 = vmatmul.mubr.bf16.gmra.mxu1 %v14922_v47  ;;  %20313 = vst [vmem:[#allocation30_spill] sm:$0xff] %v14934_v51  ;;  %20314 = vst [vmem:[#allocation38_spill] sm:$0xff] %v14936_v10  ;;  %v14962_v20 = vpop.permute.xlu0 %5747 }
 0x360   : > { %5357 = vmatpush1.bf16.msra.mxu1 %v4391_v49  ;;  %5245 = vmatprep.subr.bf16.mxu0 %v4374_v56  ;;  %v14944_v16 = vpop.f32.mrf.mxu0  ;;  %v14946_v52 = vpop.f32.mrf.mxu1 }
 0x361   : > { %5358 = vmatprep.subr.bf16.mxu1 %v4376_v44  ;;  %5263 = vmatprep.mubr.bf16.mxu0 %v20058_v22  ;;  %20315 = vst [vmem:[#allocation34_spill] sm:$0xff] %v14946_v52  ;;  %v15032_v5 = vpop.permute.xlu1 %5687 }
 0x362   : > { %5376 = vmatprep.mubr.bf16.mxu1 %v20058_v22  ;;  %v14950_v48 = vpop.f32.mrf.mxu0  ;;  %v14952_v33 = vpop.f32.mrf.mxu1 }
 0x363   : > { %5246 = vmatpush1.bf16.msra.mxu0 %v4373_v2  ;;  %20316 = vst [vmem:[#allocation27_spill] sm:$0xff] %v14950_v48  ;;  %20317 = vst [vmem:[#allocation23_spill] sm:$0xff] %v14952_v33  ;;  %v14986_v17 = vpop.permute.xlu0 %5723 }
 0x364   : > { %5359 = vmatpush1.bf16.msra.mxu1 %v4375_v57  ;;  %v14958_v34 = vpop.f32.mrf.mxu0 }
 0x365   : > { %v15052_v21 = vpop.permute.xlu1 %5663 }
 0x366   : > { %5264 = vmatmul.mubr.bf16.vlgmr.msra.gmra.mxu0 %v14553_v6  ;;  %v14970_v40 = vpop.f32.mrf.mxu0 }
 0x367   : > { %5377 = vmatmul.mubr.bf16.vlgmr.msra.gmra.mxu1 %v14553_v6  ;;  %5273 = vmatprep.mubr.bf16.mxu0 %v20058_v22  ;;  %v14960_v6 = vpop.f32.mrf.mxu1  ;;  %20319 = vst [vmem:[#allocation10_spill] sm:$0xff] %v14970_v40  ;;  %v15014_v29 = vpop.permute.xlu0 %5699 }
 0x368   : > { %5386 = vmatprep.mubr.bf16.mxu1 %v20058_v22  ;;  %20318 = vst [vmem:[#allocation33_spill] sm:$0xff] %v14960_v6  ;;  %v14976_v11 = vpop.f32.mrf.mxu0 }
 0x369   : > { %v14972_v36 = vpop.f32.mrf.mxu1 }
 0x36a   : > { %20320 = vst [vmem:[#allocation24_spill] sm:$0xff] %v14972_v36  ;;  %v14982_v30 = vpop.f32.mrf.mxu0  ;;  %v20326_v36 = vld [vmem:[#allocation26_spill] sm:$0xff] }
 0x36b   : > { %v14978_v54 = vpop.f32.mrf.mxu1  ;;  %20322 = vst [vmem:[#allocation22_spill] sm:$0xff] %v14982_v30  ;;  %v15030_v1 = vpop.permute.xlu0 %5675  ;;  %v5756_v52 = vrot.slane %v14962_v20, %v20326_v36  ;;  %v5768_v6 = vrot.slane %v14964_v62, %v20326_v36  ;;  %v5780_v20 = vrot.slane %v14938_v26, %v20326_v36  ;;  %v20329_v62 = vpack.c.bf16 %v14958_v34, %v14944_v16 }
 0x36c   : > { %20321 = vst [vmem:[#allocation35_spill] sm:$0xff] %v14978_v54  ;;  %v14994_v12 = vpop.f32.mrf.mxu0  ;;  %v5708_v34 = vrot.slane %v15014_v29, %v20326_v36 }
 0x36d   : > { %v14984_v19 = vpop.f32.mrf.mxu1  ;;  %v20331_v26 = vpack.c.bf16 %v14994_v12, %v14976_v11  ;;  %v5672_v12 = vrot.slane %v15052_v21, %v20326_v36 }
 0x36e   : > { %5274 = vmatmul.mubr.bf16.gmra.mxu0 %v14619_v38  ;;  %20323 = vst [vmem:[#allocation7_spill] sm:$0xff] %v14984_v19  ;;  %v15002_v27 = vpop.f32.mrf.mxu0 }
 0x36f   : > { %5387 = vmatmul.mubr.bf16.gmra.mxu1 %v14619_v38  ;;  %5283 = vmatprep.mubr.bf16.mxu0 %v20058_v22  ;;  %v14996_v46 = vpop.f32.mrf.mxu1  ;;  %v15050_v32 = vpop.permute.xlu0 %5651 }
 0x370   : > { %5396 = vmatprep.mubr.bf16.mxu1 %v20058_v22  ;;  %20324 = vst [vmem:[#allocation32_spill] sm:$0xff] %v14996_v46  ;;  %v15008_v39 = vpop.f32.mrf.mxu0  ;;  %v5640_v38 = vpop.permute.xlu1 %5639  ;;  %v5660_v11 = vrot.slane %v15050_v32, %v20326_v36 }
 0x371   : > { %v15004_v31 = vpop.f32.mrf.mxu1 }
 0x372   : > { %v15018_v63 = vpop.f32.mrf.mxu0 }
 0x373   : > { %v15010_v23 = vpop.f32.mrf.mxu1  ;;  %v5628_v57 = vpop.permute.xlu0 %5627 }
 0x374   : > { %v15022_v50 = vpop.f32.mrf.mxu0  ;;  %v5616_v0 = vpop.permute.xlu1 %5615  ;;  %v5636_v30 = vrot.slane %v5628_v57, %v20326_v36 }
 0x375   : > { %v15020_v25 = vpop.f32.mrf.mxu1  ;;  %v5624_v10 = vrot.slane %v5616_v0, %v20326_v36  ;;  %v5732_v0 = vrot.slane %v14986_v17, %v20326_v36 }
 0x376   : > { %5284 = vmatmul.mubr.bf16.gmra.mxu0 %v14691_v4  ;;  %20325 = vst [vmem:[#allocation40_spill] sm:$0xff] %v15020_v25 }
 0x377   : > { %5397 = vmatmul.mubr.bf16.gmra.mxu1 %v14691_v4  ;;  %5293 = vmatprep.mubr.bf16.mxu0 %v20058_v22  ;;  %v15024_v43 = vpop.f32.mrf.mxu1  ;;  %v15026_v4 = vpop.f32.mrf.mxu0 }
 0x378   : > { %5406 = vmatprep.mubr.bf16.mxu1 %v20058_v22  ;;  %v5604_v8 = vpop.permute.xlu0 %5603 }
 0x379   : > { %v15028_v28 = vpop.f32.mrf.mxu1  ;;  %v15036_v9 = vpop.f32.mrf.mxu0  ;;  %v5612_v19 = vrot.slane %v5604_v8, %v20326_v36  ;;  %v5744_v8 = vrot.slane %v14988_v14, %v20326_v36  ;;  %v5684_v14 = vrot.slane %v15030_v1, %v20326_v36 }
 0x37b   : > { %v15038_v58 = vpop.f32.mrf.mxu1  ;;  %v15042_v45 = vpop.f32.mrf.mxu0  ;;  %v15102_v54 = vcombine.low %v5612_v19, %v5624_v10 }
 0x37d   : > { %v15044_v24 = vpop.f32.mrf.mxu1  ;;  %v15046_v7 = vpop.f32.mrf.mxu0  ;;  %20327 = vst [vmem:[#allocation39_spill] sm:$0xff] %v15102_v54  ;;  %v15116_v17 = vadd.bf16 %v15102_v54, %v20329_v62 }
 0x37e   : > { %5294 = vmatmul.mubr.bf16.gmra.mxu0 %v14786_v53 }
 0x37f   : > { %5407 = vmatmul.mubr.bf16.gmra.mxu1 %v14786_v53  ;;  %5303 = vmatprep.mubr.bf16.mxu0 %v20058_v22  ;;  %v15048_v13 = vpop.f32.mrf.mxu1  ;;  %v15054_v53 = vpop.f32.mrf.mxu0 }
 0x380   : > { %5416 = vmatprep.mubr.bf16.mxu1 %v20058_v22 }
 0x381   : > { %v15056_v49 = vpop.f32.mrf.mxu1  ;;  %v15060_v42 = vpop.f32.mrf.mxu0 }
 0x383   : > { %v15062_v56 = vpop.f32.mrf.mxu1  ;;  %v15066_v44 = vpop.f32.mrf.mxu0 }
 0x385   : > { %v15068_v2 = vpop.f32.mrf.mxu1  ;;  %v15070_v61 = vpop.f32.mrf.mxu0 }
 0x386   : > { %5304 = vmatmul.mubr.bf16.gmra.mxu0 %v14836_v35 }
 0x387   : > { %5417 = vmatmul.mubr.bf16.gmra.mxu1 %v14836_v35  ;;  %5313 = vmatprep.mubr.bf16.mxu0 %v20058_v22  ;;  %v15072_v59 = vpop.f32.mrf.mxu1  ;;  %v15074_v55 = vpop.f32.mrf.mxu0 }
 0x388   : > { %5426 = vmatprep.mubr.bf16.mxu1 %v20058_v22 }
 0x389   : > { %v15076_v35 = vpop.f32.mrf.mxu1  ;;  %v4639_v37 = vpop.f32.mrf.mxu0 }
 0x38b   : > { %v15080_v15 = vpop.f32.mrf.mxu1  ;;  %v15086_v33 = vpop.f32.mrf.mxu0 }
 0x38d   : > { %v15088_v40 = vpop.f32.mrf.mxu1  ;;  %v4643_v51 = vpop.f32.mrf.mxu0 }
 0x38e   : > { %5314 = vmatmul.mubr.bf16.gmra.mxu0 %v14872_v41  ;;  %v5538_v25 = vpack.c.bf16 %v4643_v51, %v4639_v37  ;;  %v5792_v51 = vrot.slane %v14940_v3, %v20326_v36  ;;  %v15122_v37 = vcombine.low %v5756_v52, %v5768_v6  ;;  %v5696_v3 = vrot.slane %v15032_v5, %v20326_v36 }
 0x38f   : > { %5427 = vmatmul.mubr.bf16.gmra.mxu1 %v14872_v41  ;;  %5323 = vmatprep.mubr.bf16.mxu0 %v20058_v22  ;;  %v5648_v41 = vrot.slane %v5640_v38, %v20326_v36  ;;  %v15092_v48 = vpop.f32.mrf.mxu1  ;;  %v4647_v57 = vpop.f32.mrf.mxu0 }
 0x390   : > { %5436 = vmatprep.mubr.bf16.mxu1 %v20058_v22  ;;  %v15152_v54 = vcombine.low %v5780_v20, %v5792_v51  ;;  %v20336_v20 = vmul.bf16 1056980736, %v15116_v17 }
 0x391   : > { %v15104_v46 = vpop.f32.mrf.mxu1  ;;  %v15106_v38 = vcombine.low %v5636_v30, %v5648_v41  ;;  %v4649_v10 = vpop.f32.mrf.mxu0  ;;  %v5720_v30 = vrot.slane %v15016_v60, %v20326_v36 }
 0x392   : > { %20332 = vst [vmem:[#allocation37_spill] sm:$0xff] %v15152_v54  ;;  %9690 = vtanh.bf16 %v20336_v20 }
 0x393   : > { %20328 = vst [vmem:[#allocation8_spill] sm:$0xff] %v15106_v38  ;;  %v4762_v19 = vpop.f32.mrf.mxu1  ;;  %v15130_v16 = vadd.bf16 %v15106_v38, %v20331_v26  ;;  %v4651_v52 = vpop.f32.mrf.mxu0  ;;  %v15154_v32 = vcombine.low %v5708_v34, %v5720_v30 }
 0x394   : > { %v5553_v29 = vpack.c.bf16 %v4651_v52, %v4647_v57  ;;  %v15158_v57 = vcombine.low %v5660_v11, %v5672_v12  ;;  %v5540_v11 = vpack.c.bf16 %v15092_v48, %v15080_v15 }
 0x395   : > { %v4764_v6 = vpop.f32.mrf.mxu1  ;;  %v19271_v1 = vmul.bf16 1056980736, %v15130_v16  ;;  %20333 = vst [vmem:[#allocation21_spill] sm:$0xff] %v15154_v32 }
 0x396   : > { %5324 = vmatmul.mubr.bf16.gmra.mxu0 %v14897_v18  ;;  %v15150_v5 = vadd.bf16 %v15122_v37, %v5553_v29  ;;  %20335 = vst [vmem:[#allocation29_spill] sm:$0xff] %v15158_v57 }
 0x397   : > { %5437 = vmatmul.mubr.bf16.gmra.mxu1 %v14897_v18  ;;  %5333 = vmatprep.mubr.bf16.mxu0 %v20058_v22  ;;  %v15124_v18 = vcombine.low %v5732_v0, %v5744_v8  ;;  %v4653_v0 = vpop.f32.mrf.mxu0  ;;  %v4766_v8 = vpop.f32.mrf.mxu1  ;;  %9692 = vtanh.bf16 %v19271_v1 }
 0x398   : > { %5446 = vmatprep.mubr.bf16.mxu1 %v20058_v22  ;;  %v5554_v62 = vpack.c.bf16 %v4653_v0, %v4649_v10  ;;  %v5556_v26 = vpack.c.bf16 %v4766_v8, %v4762_v19  ;;  %v19273_v10 = vmul.bf16 1056980736, %v15150_v5  ;;  %v5555_v19 = vpack.c.bf16 %v4764_v6, %v15104_v46 }
 0x399   : > { %20330 = vst [vmem:[#allocation31_spill] sm:$0xff] %v15124_v18  ;;  %v15145_v41 = vadd.bf16 %v15124_v18, %v5538_v25  ;;  %v4657_v21 = vpop.f32.mrf.mxu0  ;;  %v4770_v36 = vpop.f32.mrf.mxu1  ;;  %v15156_v25 = vcombine.low %v5684_v14, %v5696_v3  ;;  %v5505_v14 = vpack.c.bf16 %v15042_v45, %v15026_v4  ;;  %v5506_v46 = vpack.c.bf16 %v15046_v7, %v15036_v9 }
 0x39a   : > { %v15162_v60 = vadd.bf16 %v15122_v37, %v5554_v62  ;;  %v15171_v51 = vadd.bf16 %v15122_v37, %v5556_v26  ;;  %v5521_v3 = vpack.c.bf16 %v15066_v44, %v15054_v53  ;;  %v5522_v6 = vpack.c.bf16 %v15070_v61, %v15060_v42 }
 0x39b   : > { %20334 = vst [vmem:[#allocation18_spill] sm:$0xff] %v15156_v25  ;;  %v19272_v52 = vmul.bf16 1056980736, %v15145_v41  ;;  %v4659_v34 = vpop.f32.mrf.mxu0  ;;  %v4772_v30 = vpop.f32.mrf.mxu1  ;;  %v5537_v8 = vpack.c.bf16 %v15086_v33, %v15074_v55  ;;  %v5539_v53 = vpack.c.bf16 %v15088_v40, %v15076_v35  ;;  %v15199_v48 = vadd.bf16 %v15122_v37, %v5555_v19 }
 0x39c   : > { %v19279_v12 = vmul.bf16 1056980736, %v15162_v60  ;;  %v19274_v61 = vmul.bf16 1056980736, %v15171_v51  ;;  %v15209_v40 = vadd.bf16 %v15154_v32, %v5522_v6  ;;  %v5524_v35 = vpack.c.bf16 %v15072_v59, %v15062_v56 }
 0x39d   : > { %v4661_v29 = vpop.f32.mrf.mxu0  ;;  %v4774_v0 = vpop.f32.mrf.mxu1  ;;  %9694 = vtanh.bf16 %v19272_v52  ;;  %v15214_v62 = vadd.bf16 %v15124_v18, %v5540_v11  ;;  %v5523_v59 = vpack.c.bf16 %v15068_v2, %v15056_v49  ;;  %v15233_v56 = vadd.bf16 %v15124_v18, %v5537_v8 }
 0x39e   : > { %5334 = vmatmul.mubr.bf16.gmra.mxu0 %v14922_v47  ;;  %v5569_v9 = vpack.c.bf16 %v4661_v29, %v4657_v21  ;;  %v5571_v7 = vpack.c.bf16 %v4774_v0, %v4770_v36  ;;  %9696 = vtanh.bf16 %v19273_v10  ;;  %v15236_v6 = vadd.bf16 %v15124_v18, %v5539_v53 }
 0x39f   : > { %5447 = vmatmul.mubr.bf16.gmra.mxu1 %v14922_v47  ;;  %6577 = vmatprep.mubr.bf16.mxu0 %v20058_v22  ;;  %v5490_v47 = vpack.c.bf16 %v15022_v50, %v15008_v39  ;;  %v4663_v15 = vpop.f32.mrf.mxu0  ;;  %v4776_v42 = vpop.f32.mrf.mxu1  ;;  %9698 = vtanh.bf16 %v19279_v12  ;;  %v19275_v11 = vmul.bf16 1056980736, %v15199_v48  ;;  %v5508_v2 = vpack.c.bf16 %v15048_v13, %v15038_v58  ;;  %v20344_v50 = vld [vmem:[#allocation40_spill] sm:$0xff] }
 0x3a0   : > { %6690 = vmatprep.mubr.bf16.mxu1 %v20058_v22  ;;  %v15203_v33 = vadd.bf16 %v15152_v54, %v5569_v9  ;;  %v15206_v55 = vadd.bf16 %v15152_v54, %v5571_v7  ;;  %v5570_v36 = vpack.c.bf16 %v4663_v15, %v4659_v34  ;;  %v5572_v44 = vpack.c.bf16 %v4776_v42, %v4772_v30 }
 0x3a1   : > { %9700 = vtanh.bf16 %v19274_v61  ;;  %v15252_v8 = vadd.bf16 %v15154_v32, %v5524_v35  ;;  %v19277_v7 = vmul.bf16 1056980736, %v15214_v62  ;;  %v15258_v53 = vadd.bf16 %v15156_v25, %v5506_v46  ;;  %v15289_v61 = vpop.eup %9690 }
 0x3a2   : > { %v19283_v26 = vmul.bf16 1056980736, %v15203_v33  ;;  %v19280_v21 = vmul.bf16 1056980736, %v15206_v55  ;;  %v15221_v20 = vadd.bf16 %v15152_v54, %v5570_v36  ;;  %v15224_v19 = vadd.bf16 %v15152_v54, %v5572_v44 }
 0x3a3   : > { %v15261_v15 = vadd.bf16 %v15154_v32, %v5521_v3  ;;  %v19276_v42 = vmul.bf16 1056980736, %v15209_v40  ;;  %v19278_v36 = vmul.bf16 1056980736, %v15233_v56  ;;  %v5507_v44 = vpack.c.bf16 %v15044_v24, %v15028_v28 }
 0x3a4   : > { %v15226_v34 = vpop.f32.mrf.mxu0  ;;  %9702 = vtanh.bf16 %v19283_v26  ;;  %v19284_v29 = vmul.bf16 1056980736, %v15221_v20  ;;  %v19282_v0 = vmul.bf16 1056980736, %v15224_v19  ;;  %v15280_v35 = vadd.bf16 %v15154_v32, %v5523_v59 }
 0x3a5   : > { %v15228_v30 = vpop.f32.mrf.mxu1  ;;  %9704 = vtanh.bf16 %v19280_v21  ;;  %v19281_v1 = vmul.bf16 1056980736, %v15236_v6  ;;  %v5492_v3 = vpack.c.bf16 %v15024_v43, %v15010_v23  ;;  %v15294_v46 = vadd.bf16 %v15156_v25, %v5508_v2  ;;  %v15299_v24 = vpop.eup %9692 }
 0x3a6   : > { %20337 = vst [vmem:[#allocation28_spill] sm:$0xff] %v15228_v30  ;;  %v15245_v9 = vpop.f32.mrf.mxu0  ;;  %9706 = vtanh.bf16 %v19284_v29  ;;  %v19285_v28 = vmul.bf16 1056980736, %v15252_v8  ;;  %v5489_v59 = vpack.c.bf16 %v15018_v63, %v15002_v27  ;;  %v19286_v23 = vmul.bf16 1056980736, %v15258_v53 }
 0x3a7   : > { %v15247_v49 = vpop.f32.mrf.mxu1  ;;  %9708 = vtanh.bf16 %v19282_v0  ;;  %v15320_v27 = vadd.bf16 %v15156_v25, %v5505_v14  ;;  %v19288_v39 = vmul.bf16 1056980736, %v15261_v15  ;;  %v20356_v30 = vmul.bf16 1056980736, %v15280_v35 }
 0x3a8   : > { %20338 = vst [vmem:[#allocation25_spill] sm:$0xff] %v15247_v49  ;;  %v15266_v58 = vpop.f32.mrf.mxu0  ;;  %9710 = vtanh.bf16 %v19275_v11  ;;  %v15307_v11 = vadd.bf16 %v15158_v57, %v5490_v47  ;;  %v5491_v47 = vpack.c.bf16 %v20344_v50, %v15004_v31  ;;  %v20347_v31 = vld [vmem:[#allocation32_spill] sm:$0xff] }
 0x3a9   : > { %v15268_v13 = vpop.f32.mrf.mxu1  ;;  %9712 = vtanh.bf16 %v19277_v7 }
 0x3aa   : > { %20339 = vst [vmem:[#allocation19_spill] sm:$0xff] %v15268_v13  ;;  %v15285_v52 = vpop.f32.mrf.mxu0  ;;  %9714 = vtanh.bf16 %v19276_v42  ;;  %v15330_v42 = vadd.bf16 %v15156_v25, %v5507_v44  ;;  %v20348_v44 = vld [vmem:[#allocation35_spill] sm:$0xff]  ;;  %v15377_v7 = vadd.bf16 %v15158_v57, %v5491_v47 }
 0x3ab   : > { %20340 = vst [vmem:[#allocation13_spill] sm:$0xff] %v15285_v52  ;;  %v15287_v10 = vpop.f32.mrf.mxu1  ;;  %9716 = vtanh.bf16 %v19278_v36  ;;  %v15325_v63 = vpop.eup %9694  ;;  %v15342_v36 = vadd.bf16 %v15158_v57, %v5492_v3  ;;  %v20349_v50 = vpack.c.bf16 %v20347_v31, %v20348_v44  ;;  %v20352_v44 = vld [vmem:[#allocation33_spill] sm:$0xff] }
 0x3ac   : > { %20341 = vst [vmem:[#allocation36_spill] sm:$0xff] %v15287_v10  ;;  %v15312_v43 = vpop.f32.mrf.mxu0  ;;  %9718 = vtanh.bf16 %v19281_v1  ;;  %v15339_v14 = vpop.eup %9696  ;;  %v15354_v1 = vadd.bf16 %v15158_v57, %v5489_v59  ;;  %v20366_v59 = vmul.bf16 1056980736, %v15307_v11 }
 0x3ad   : > { %20342 = vst [vmem:[#allocation15_spill] sm:$0xff] %v15312_v43  ;;  %v15314_v2 = vpop.f32.mrf.mxu1  ;;  %9720 = vtanh.bf16 %v19285_v28  ;;  %v15351_v21 = vadd.bf16 %v15106_v38, %v20349_v50  ;;  %v9699_v29 = vpop.eup %9698  ;;  %v20353_v50 = vld [vmem:[#allocation34_spill] sm:$0xff] }
 0x3ae   : > { %20343 = vst [vmem:[#allocation11_spill] sm:$0xff] %v15314_v2  ;;  %v15335_v4 = vpop.f32.mrf.mxu0  ;;  %9722 = vtanh.bf16 %v19286_v23  ;;  %v20354_v0 = vpack.c.bf16 %v20352_v44, %v20353_v50  ;;  %v20355_v23 = vld [vmem:[#allocation39_spill] sm:$0xff]  ;;  %v20359_v44 = vmul.bf16 1056980736, %v15294_v46  ;;  %v20361_v2 = vld [vmem:[#allocation30_spill] sm:$0xff] }
 0x3af   : > { %20345 = vst [vmem:[#allocation17_spill] sm:$0xff] %v15335_v4  ;;  %v15337_v45 = vpop.f32.mrf.mxu1  ;;  %9724 = vtanh.bf16 %v19288_v39  ;;  %v9701_v13 = vpop.eup %9700  ;;  %v20360_v50 = vld [vmem:[#allocation27_spill] sm:$0xff]  ;;  %v20363_v28 = vld [vmem:[#allocation22_spill] sm:$0xff]  ;;  %v20380_v32 = vmul.bf16 1056980736, %v15351_v21 }
 0x3b0   : > { %20346 = vst [vmem:[#allocation9_spill] sm:$0xff] %v15337_v45  ;;  %v15359_v3 = vpop.f32.mrf.mxu0  ;;  %v15374_v12 = vadd.bf16 %v20355_v23, %v20354_v0  ;;  %9726 = vtanh.bf16 %v20356_v30  ;;  %v20362_v47 = vpack.c.bf16 %v20360_v50, %v20361_v2  ;;  %v20364_v43 = vld [vmem:[#allocation10_spill] sm:$0xff]  ;;  %v20369_v2 = vld [vmem:[#allocation23_spill] sm:$0xff] }
 0x3b1   : > { %20350 = vst [vmem:[#allocation16_spill] sm:$0xff] %v15359_v3  ;;  %v15361_v26 = vpop.f32.mrf.mxu1  ;;  %9728 = vtanh.bf16 %v20359_v44  ;;  %v20365_v30 = vpack.c.bf16 %v20363_v28, %v20364_v43  ;;  %v20370_v50 = vld [vmem:[#allocation38_spill] sm:$0xff]  ;;  %v20372_v28 = vld [vmem:[#allocation7_spill] sm:$0xff]  ;;  %v20373_v43 = vld [vmem:[#allocation24_spill] sm:$0xff] }
 0x3b2   : > { %20351 = vst [vmem:[#allocation12_spill] sm:$0xff] %v15361_v26  ;;  %v15382_v39 = vpop.f32.mrf.mxu0  ;;  %v9703_v0 = vpop.eup %9702  ;;  %v15393_v26 = vadd.bf16 %v20355_v23, %v20362_v47  ;;  %9730 = vtanh.bf16 %v20366_v59  ;;  %v20371_v47 = vpack.c.bf16 %v20369_v2, %v20370_v50  ;;  %v20375_v59 = vmul.bf16 1056980736, %v15320_v27 }
 0x3b3   : > { %20357 = vst [vmem:[#allocation20_spill] sm:$0xff] %v15382_v39  ;;  %v15384_v31 = vpop.f32.mrf.mxu1  ;;  %v15399_v3 = vadd.bf16 %v15106_v38, %v20365_v30  ;;  %v9705_v45 = vpop.eup %9704  ;;  %v20374_v30 = vpack.c.bf16 %v20372_v28, %v20373_v43  ;;  %v20376_v2 = vmul.bf16 1056980736, %v15330_v42  ;;  %v6337_v50 = vadd.bf16 1065369472, %v9703_v0 }
 0x3b4   : > { %20358 = vst [vmem:[#allocation6_spill] sm:$0xff] %v15384_v31  ;;  %v15404_v31 = vpop.f32.mrf.mxu0  ;;  %v15412_v39 = vadd.bf16 %v20355_v23, %v20371_v47  ;;  %9732 = vtanh.bf16 %v20375_v59  ;;  %v6339_v57 = vadd.bf16 1065369472, %v9705_v45  ;;  %v6322_v59 = vadd.bf16 1065369472, %v9699_v29 }
 0x3b5   : > { %20367 = vst [vmem:[#allocation14_spill] sm:$0xff] %v15404_v31  ;;  %v15406_v44 = vpop.f32.mrf.mxu1  ;;  %v15418_v4 = vadd.bf16 %v15106_v38, %v20374_v30  ;;  %v9707_v31 = vpop.eup %9706  ;;  %9734 = vtanh.bf16 %v20376_v2  ;;  %v20379_v30 = vmul.bf16 1056980736, %v15342_v36  ;;  %v20384_v45 = vmul.bf16 1056980736, %v15221_v20 }
 0x3b6   : > { %20368 = vst [vmem:[#allocation40_spill] sm:$0xff] %v15406_v44  ;;  %v15427_v47 = vpop.f32.mrf.mxu0  ;;  %v9709_v43 = vpop.eup %9708  ;;  %v6338_v38 = vadd.bf16 1065369472, %v9707_v31 }
 0x3b7   : > { %20377 = vst [vmem:[#allocation32_spill] sm:$0xff] %v15427_v47  ;;  %v15429_v28 = vpop.f32.mrf.mxu1  ;;  %9736 = vtanh.bf16 %v20379_v30  ;;  %v9711_v54 = vpop.eup %9710  ;;  %v6340_v2 = vadd.bf16 1065369472, %v9709_v43  ;;  %v6324_v47 = vadd.bf16 1065369472, %v9701_v13 }
 0x3b8   : > { %20378 = vst [vmem:[#allocation35_spill] sm:$0xff] %v15429_v28  ;;  %9738 = vtanh.bf16 %v20380_v32  ;;  %v15436_v18 = vpop.f32.mrf.mxu0  ;;  %v9713_v28 = vpop.eup %9712  ;;  %v20383_v30 = vmul.bf16 1056980736, %v15354_v1  ;;  %v6466_v31 = vmul.bf16 %v6338_v38, %v20384_v45  ;;  %v20385_v32 = vmul.bf16 1056980736, %v15377_v7 }
 0x3b9   : > { %20381 = vst [vmem:[#allocation33_spill] sm:$0xff] %v15436_v18  ;;  %v15438_v0 = vpop.f32.mrf.mxu1  ;;  %v9715_v25 = vpop.eup %9714  ;;  %v6321_v18 = vadd.bf16 1065369472, %v15339_v14  ;;  %v20386_v13 = vmul.bf16 1056980736, %v15203_v33 }
 0x3ba   : > { %20382 = vst [vmem:[#allocation34_spill] sm:$0xff] %v15438_v0  ;;  %9740 = vtanh.bf16 %v20383_v30  ;;  %v15452_v49 = vpop.f32.mrf.mxu0  ;;  %v20387_v30 = vmul.bf16 1056980736, %v15224_v19  ;;  %v9717_v29 = vpop.eup %9716  ;;  %v6323_v44 = vadd.bf16 1065369472, %v9711_v54  ;;  %6545 = vmatprep.subr.bf16.mxu0 %v6466_v31 }
 0x3bb   : > { %9742 = vtanh.bf16 %v20385_v32  ;;  %v6465_v43 = vmul.bf16 %v6337_v50, %v20386_v13  ;;  %v15454_v10 = vpop.f32.mrf.mxu1  ;;  %v20388_v38 = vmul.bf16 1056980736, %v15206_v55  ;;  %v20389_v45 = vmul.bf16 1056980736, %v15162_v60  ;;  %v9719_v33 = vpop.eup %9718 }
 0x3bc   : > { %v6468_v52 = vmul.bf16 %v6340_v2, %v20387_v30  ;;  %v6306_v14 = vadd.bf16 1065369472, %v15325_v63  ;;  %v20390_v50 = vmul.bf16 1056980736, %v15374_v12  ;;  %v15465_v13 = vpop.f32.mrf.mxu0  ;;  %v20391_v54 = vmul.bf16 1056980736, %v15171_v51  ;;  %v9721_v19 = vpop.eup %9720 }
 0x3bd   : > { %v6467_v20 = vmul.bf16 %v6339_v57, %v20388_v38  ;;  %v6450_v32 = vmul.bf16 %v6322_v59, %v20389_v45  ;;  %v15467_v0 = vpop.f32.mrf.mxu1  ;;  %6546 = vmatpush1.bf16.msra.mxu0 %v6465_v43  ;;  %v6308_v57 = vadd.bf16 1065369472, %v9713_v28  ;;  %v5969_v60 = vmul.bf16 1056980736, %v15393_v26  ;;  %v9723_v63 = vpop.eup %9722 }
 0x3be   : > { %9744 = vtanh.bf16 %v20390_v50  ;;  %6658 = vmatprep.subr.bf16.mxu1 %v6468_v52  ;;  %v6452_v55 = vmul.bf16 %v6324_v47, %v20391_v54  ;;  %v20392_v59 = vmul.bf16 1056980736, %v15399_v3  ;;  %v5971_v2 = vmul.bf16 1056980736, %v15412_v39  ;;  %v15479_v47 = vpop.f32.mrf.mxu0  ;;  %v9725_v30 = vpop.eup %9724 }
 0x3bf   : > { %6659 = vmatpush1.bf16.msra.mxu1 %v6467_v20  ;;  %6547 = vmatprep.subr.bf16.mxu0 %v6450_v32  ;;  %v20393_v31 = vmul.bf16 1056980736, %v15418_v4  ;;  %v6305_v52 = vadd.bf16 1065369472, %v9717_v29  ;;  %v20394_v43 = vmul.bf16 1056980736, %v15150_v5  ;;  %v15481_v28 = vpop.f32.mrf.mxu1 }
 0x3c0   : > { %9746 = vtanh.bf16 %v20392_v59  ;;  %6660 = vmatprep.subr.bf16.mxu1 %v6452_v55  ;;  %v6307_v38 = vadd.bf16 1065369472, %v9719_v33  ;;  %v20395_v20 = vmul.bf16 1056980736, %v15199_v48  ;;  %v20396_v32 = vmul.bf16 1056980736, %v15145_v41  ;;  %v9727_v59 = vpop.eup %9726 }
 0x3c1   : > { %9748 = vtanh.bf16 %v20393_v31  ;;  %v6449_v51 = vmul.bf16 %v6321_v18, %v20394_v43  ;;  %v6290_v54 = vadd.bf16 1065369472, %v9715_v25  ;;  %v15487_v31 = vpop.f32.mrf.mxu0  ;;  %v15489_v29 = vpop.f32.mrf.mxu1  ;;  %v20397_v18 = vmul.bf16 1056980736, %v15214_v62 }
 0x3c2   : > { %v6451_v45 = vmul.bf16 %v6323_v44, %v20395_v20  ;;  %v6434_v50 = vmul.bf16 %v6306_v14, %v20396_v32  ;;  %v6292_v43 = vadd.bf16 1065369472, %v9721_v19  ;;  %v9729_v55 = vpop.eup %9728  ;;  %9750 = vtanh.bf16 %v5969_v60 }
 0x3c3   : > { %6548 = vmatpush1.bf16.msra.mxu0 %v6449_v51  ;;  %v6436_v5 = vmul.bf16 %v6308_v57, %v20397_v18  ;;  %v9731_v48 = vpop.eup %9730  ;;  %9752 = vtanh.bf16 %v5971_v2  ;;  %v6289_v41 = vadd.bf16 1065369472, %v9725_v30  ;;  %v20398_v25 = vmul.bf16 1056980736, %v15233_v56  ;;  %v15499_v14 = vpop.f32.mrf.mxu0 }
 0x3c4   : > { %6661 = vmatpush1.bf16.msra.mxu1 %v6451_v45  ;;  %6549 = vmatprep.subr.bf16.mxu0 %v6434_v50  ;;  %v15501_v33 = vpop.f32.mrf.mxu1  ;;  %v9733_v62 = vpop.eup %9732  ;;  %v6291_v57 = vadd.bf16 1065369472, %v9727_v59  ;;  %v20399_v19 = vmul.bf16 1056980736, %v15236_v6  ;;  %v20400_v20 = vmul.bf16 1056980736, %v15209_v40 }
 0x3c5   : > { %v6433_v44 = vmul.bf16 %v6305_v52, %v20398_v25  ;;  %6662 = vmatprep.subr.bf16.mxu1 %v6436_v5  ;;  %v6274_v32 = vadd.bf16 1065369472, %v9723_v63  ;;  %v9735_v50 = vpop.eup %9734  ;;  %v15507_v18 = vpop.f32.mrf.mxu0  ;;  %v20401_v56 = vmul.bf16 1056980736, %v15252_v8  ;;  %v6276_v25 = vadd.bf16 1065369472, %v9729_v55 }
 0x3c6   : > { %v6435_v51 = vmul.bf16 %v6307_v38, %v20399_v19  ;;  %v6418_v45 = vmul.bf16 %v6290_v54, %v20400_v20  ;;  %v15509_v30 = vpop.f32.mrf.mxu1  ;;  %v9737_v5 = vpop.eup %9736  ;;  %v6273_v6 = vadd.bf16 1065369472, %v9733_v62  ;;  %v20402_v38 = vmul.bf16 1056980736, %v15261_v15 }
 0x3c7   : > { %6550 = vmatpush1.bf16.msra.mxu0 %v6433_v44  ;;  %v6420_v52 = vmul.bf16 %v6292_v43, %v20401_v56  ;;  %v9739_v59 = vpop.eup %9738  ;;  %v15515_v54 = vpop.f32.mrf.mxu0  ;;  %v6275_v20 = vadd.bf16 1065369472, %v9735_v50  ;;  %v20403_v44 = vmul.bf16 1056980736, %v15280_v35  ;;  %v20404_v43 = vmul.bf16 1056980736, %v15258_v53 }
 0x3c8   : > { %6663 = vmatpush1.bf16.msra.mxu1 %v6435_v51  ;;  %6551 = vmatprep.subr.bf16.mxu0 %v6418_v45  ;;  %v6417_v40 = vmul.bf16 %v6289_v41, %v20402_v38  ;;  %v15517_v63 = vpop.f32.mrf.mxu1  ;;  %v9741_v19 = vpop.eup %9740  ;;  %v6258_v51 = vadd.bf16 1065369472, %v9731_v48  ;;  %v20405_v15 = vmul.bf16 1056980736, %v15294_v46  ;;  %v6260_v38 = vadd.bf16 1065369472, %v9737_v5 }
 0x3c9   : > { %6664 = vmatprep.subr.bf16.mxu1 %v6420_v52  ;;  %v6419_v8 = vmul.bf16 %v6291_v57, %v20403_v44  ;;  %v6402_v55 = vmul.bf16 %v6274_v32, %v20404_v43  ;;  %v9743_v45 = vpop.eup %9742  ;;  %v15523_v56 = vpop.f32.mrf.mxu0  ;;  %v6257_v52 = vadd.bf16 1065369472, %v9741_v19  ;;  %v20406_v35 = vmul.bf16 1056980736, %v15320_v27 }
 0x3ca   : > { %v15525_v62 = vpop.f32.mrf.mxu1  ;;  %v6404_v41 = vmul.bf16 %v6276_v25, %v20405_v15  ;;  %v6259_v44 = vadd.bf16 1065369472, %v9743_v45  ;;  %v20408_v46 = vmul.bf16 1056980736, %v15307_v11  ;;  %v6242_v5 = vadd.bf16 1065369472, %v15299_v24 }
 0x3cb   : > { %6552 = vmatpush1.bf16.msra.mxu0 %v6417_v40  ;;  %v6401_v57 = vmul.bf16 %v6273_v6, %v20406_v35  ;;  %v15531_v53 = vpop.f32.mrf.mxu0  ;;  %v20407_v40 = vmul.bf16 1056980736, %v15330_v42  ;;  %v20409_v6 = vmul.bf16 1056980736, %v15342_v36  ;;  %v6244_v15 = vadd.bf16 1065369472, %v9739_v59 }
 0x3cc   : > { %6665 = vmatpush1.bf16.msra.mxu1 %v6419_v8  ;;  %6553 = vmatprep.subr.bf16.mxu0 %v6402_v55  ;;  %v9745_v50 = vpop.eup %9744  ;;  %v15533_v48 = vpop.f32.mrf.mxu1  ;;  %v6386_v25 = vmul.bf16 %v6258_v51, %v20408_v46  ;;  %v20410_v42 = vmul.bf16 1056980736, %v15354_v1  ;;  %v20411_v35 = vmul.bf16 1056980736, %v15377_v7  ;;  %v20412_v36 = vmul.bf16 1056980736, %v15130_v16 }
 0x3cd   : > { %6666 = vmatprep.subr.bf16.mxu1 %v6404_v41  ;;  %v6403_v43 = vmul.bf16 %v6275_v20, %v20407_v40  ;;  %v15540_v19 = vpop.f32.mrf.mxu0  ;;  %v6388_v55 = vmul.bf16 %v6260_v38, %v20409_v6  ;;  %v6226_v59 = vadd.bf16 1065369472, %v15289_v61  ;;  %v6228_v46 = vadd.bf16 1065369472, %v9745_v50 }
 0x3ce   : > { %v9747_v32 = vpop.eup %9746  ;;  %v15542_v27 = vpop.f32.mrf.mxu1  ;;  %v6385_v20 = vmul.bf16 %v6257_v52, %v20410_v42  ;;  %v6370_v38 = vmul.bf16 %v6242_v5, %v20412_v36  ;;  %v20413_v52 = vmul.bf16 1056980736, %v15351_v21  ;;  %v20414_v7 = vmul.bf16 1056980736, %v15399_v3 }
 0x3cf   : > { %v9749_v8 = vpop.eup %9748  ;;  %6554 = vmatpush1.bf16.msra.mxu0 %v6401_v57  ;;  %v6241_v45 = vadd.bf16 1065369472, %v9747_v32  ;;  %v15548_v11 = vpop.f32.mrf.mxu0  ;;  %v6387_v57 = vmul.bf16 %v6259_v44, %v20411_v35  ;;  %v20417_v50 = vmul.bf16 1056980736, %v15374_v12 }
 0x3d0   : > { %6667 = vmatpush1.bf16.msra.mxu1 %v6403_v43  ;;  %6555 = vmatprep.subr.bf16.mxu0 %v6386_v25  ;;  %v15550_v51 = vpop.f32.mrf.mxu1  ;;  %v9751_v24 = vpop.eup %9750  ;;  %v6243_v41 = vadd.bf16 1065369472, %v9749_v8  ;;  %v6372_v43 = vmul.bf16 %v6244_v15, %v20413_v52  ;;  %v20415_v8 = vmul.bf16 1056980736, %v15418_v4 }
 0x3d1   : > { %6668 = vmatprep.subr.bf16.mxu1 %v6388_v55  ;;  %v9753_v40 = vpop.eup %9752  ;;  %v15557_v32 = vpop.f32.mrf.mxu0  ;;  %v6225_v25 = vadd.bf16 1065369472, %v9751_v24  ;;  %v6369_v44 = vmul.bf16 %v6241_v45, %v20414_v7  ;;  %v20416_v55 = vmul.bf16 1056980736, %v15116_v17  ;;  %v15582_v17 = vld [vmem:[%s18935_s7] sm:$0xff]  }
 0x3d2   : > { %v15559_v1 = vpop.f32.mrf.mxu1  ;;  %v6227_v61 = vadd.bf16 1065369472, %v9753_v40  ;;  %v6371_v6 = vmul.bf16 %v6243_v41, %v20415_v8  ;;  %v20421_v8 = vld [vmem:[#allocation36_spill] sm:$0xff] }
 0x3d3   : > { %6556 = vmatpush1.bf16.msra.mxu0 %v6385_v20  ;;  %v4869_v16 = vpop.f32.mrf.mxu0  ;;  %v6354_v42 = vmul.bf16 %v6226_v59, %v20416_v55  ;;  %v6356_v20 = vmul.bf16 %v6228_v46, %v20417_v50  ;;  %v6353_v3 = vmul.bf16 %v6225_v25, %v5969_v60  ;;  %v20418_v59 = vpack.c.bf16 %v15266_v58, %v15226_v34  ;;  %v20420_v58 = vld [vmem:[#allocation25_spill] sm:$0xff]  ;;  %v20422_v55 = vld [vmem:[#allocation32_spill] sm:$0xff] }
 0x3d4   : > { %6669 = vmatpush1.bf16.msra.mxu1 %v6387_v57  ;;  %6557 = vmatprep.subr.bf16.mxu0 %v6370_v38  ;;  %v15565_v5 = vpop.f32.mrf.mxu1  ;;  %v6355_v4 = vmul.bf16 %v6227_v61, %v5971_v2  ;;  %v5542_v25 = vpack.c.bf16 %v4869_v16, %v15548_v11  ;;  %v5512_v50 = vpack.c.bf16 %v15501_v33, %v15481_v28  ;;  %v15618_v11 = vld [vmem:[%s18935_s7 + $0x8] sm:$0xff]  }
 0x3d5   : > { %6670 = vmatprep.subr.bf16.mxu1 %v6372_v43  ;;  %v4873_v21 = vpop.f32.mrf.mxu0  ;;  %v15594_v40 = vadd.bf16 %v20355_v23, %v20418_v59  ;;  %v20419_v43 = vld [vmem:[#allocation13_spill] sm:$0xff]  ;;  %20423 = vst [vmem:[#allocation27_spill] sm:$0xff] %v15618_v11  ;;  %v5525_v16 = vpack.c.bf16 %v15523_v56, %v15507_v18  ;;  %v5541_v18 = vpack.c.bf16 %v15557_v32, %v15540_v19  ;;  %v20424_v56 = vld [vmem:[#allocation31_spill] sm:$0xff] }
 0x3d6   : > { %v15571_v15 = vpop.f32.mrf.mxu1  ;;  %v5543_v19 = vpack.c.bf16 %v15559_v1, %v15542_v27 }
 0x3d7   : > { %6558 = vmatpush1.bf16.msra.mxu0 %v6369_v44  ;;  %v4875_v45 = vpop.f32.mrf.mxu0 }
 0x3d8   : > { %6671 = vmatpush1.bf16.msra.mxu1 %v6371_v6  ;;  %6559 = vmatprep.subr.bf16.mxu0 %v6354_v42  ;;  %v4988_v24 = vpop.f32.mrf.mxu1  ;;  %v5494_v42 = vpack.c.bf16 %v15452_v49, %v20422_v55 }
 0x3d9   : > { %6672 = vmatprep.subr.bf16.mxu1 %v6356_v20  ;;  %v4877_v41 = vpop.f32.mrf.mxu0  ;;  %v5544_v20 = vpack.c.bf16 %v15565_v5, %v15550_v51 }
 0x3da   : > { %v4990_v35 = vpop.f32.mrf.mxu1  ;;  %v5557_v12 = vpack.c.bf16 %v4877_v41, %v4873_v21  ;;  %v5510_v21 = vpack.c.bf16 %v15499_v14, %v15479_v47  ;;  %v5526_v41 = vpack.c.bf16 %v15531_v53, %v15515_v54 }
 0x3db   : > { %6560 = vmatpush1.bf16.msra.mxu0 %v6353_v3  ;;  %v4879_v57 = vpop.f32.mrf.mxu0  ;;  %v5559_v3 = vpack.c.bf16 %v4990_v35, %v15571_v15  ;;  %v20425_v35 = vld [vmem:[#allocation37_spill] sm:$0xff]  ;;  %v15648_v32 = vadd.bf16 %v20424_v56, %v5544_v20 }
 0x3dc   : > { %6673 = vmatpush1.bf16.msra.mxu1 %v6355_v4  ;;  %v4992_v36 = vpop.f32.mrf.mxu1  ;;  %v15585_v26 = vadd.bf16 %v15122_v37, %v5557_v12  ;;  %v5558_v60 = vpack.c.bf16 %v4879_v57, %v4875_v45  ;;  %v5528_v12 = vpack.c.bf16 %v15533_v48, %v15517_v63 }
 0x3dd   : > { %v5560_v38 = vpack.c.bf16 %v4992_v36, %v4988_v24  ;;  %v4883_v39 = vpop.f32.mrf.mxu0 }
 0x3de   : > { %6578 = vmatmul.mubr.bf16.vlgmr.msra.gmra.mxu0 %v15582_v17  ;;  %v4996_v2 = vpop.f32.mrf.mxu1  ;;  %v15597_v52 = vadd.bf16 %v15122_v37, %v5558_v60  ;;  %v19312_v7 = vmul.bf16 1056980736, %v15585_v26  ;;  %v15633_v60 = vadd.bf16 %v20424_v56, %v5542_v25 }
 0x3df   : > { %6691 = vmatmul.mubr.bf16.vlgmr.msra.gmra.mxu1 %v15582_v17  ;;  %6587 = vmatprep.mubr.bf16.mxu0 %v20058_v22  ;;  %v15605_v44 = vadd.bf16 %v15122_v37, %v5560_v38  ;;  %v4885_v61 = vpop.f32.mrf.mxu0  ;;  %v15651_v38 = vadd.bf16 %v15122_v37, %v5559_v3  ;;  %v15676_v3 = vadd.bf16 %v20424_v56, %v5541_v18 }
 0x3e0   : > { %6700 = vmatprep.mubr.bf16.mxu1 %v20058_v22  ;;  %v4998_v34 = vpop.f32.mrf.mxu1  ;;  %v19315_v45 = vmul.bf16 1056980736, %v15597_v52  ;;  %9754 = vtanh.bf16 %v19312_v7  ;;  %v15698_v18 = vadd.bf16 %v20424_v56, %v5543_v19  ;;  %v5509_v7 = vpack.c.bf16 %v15487_v31, %v15465_v13  ;;  %v20432_v19 = vld [vmem:[#allocation18_spill] sm:$0xff] }
 0x3e1   : > { %v4887_v24 = vpop.f32.mrf.mxu0  ;;  %v19313_v51 = vmul.bf16 1056980736, %v15605_v44  ;;  %v15732_v13 = vadd.bf16 %v20432_v19, %v5510_v21  ;;  %v20435_v21 = vld [vmem:[#allocation17_spill] sm:$0xff] }
 0x3e2   : > { %v5000_v4 = vpop.f32.mrf.mxu1  ;;  %v5573_v57 = vpack.c.bf16 %v4887_v24, %v4883_v39  ;;  %9756 = vtanh.bf16 %v19315_v45  ;;  %v15767_v46 = vadd.bf16 %v20432_v19, %v5509_v7 }
 0x3e3   : > { %v5575_v36 = vpack.c.bf16 %v5000_v4, %v4996_v2  ;;  %v4889_v5 = vpop.f32.mrf.mxu0  ;;  %9758 = vtanh.bf16 %v19313_v51 }
 0x3e4   : > { %v5002_v15 = vpop.f32.mrf.mxu1  ;;  %v15639_v54 = vadd.bf16 %v20425_v35, %v5573_v57  ;;  %v5574_v53 = vpack.c.bf16 %v4889_v5, %v4885_v61  ;;  %v5527_v61 = vpack.c.bf16 %v15525_v62, %v15509_v30  ;;  %v15687_v57 = vld [vmem:[%s18935_s7 + $0x10] sm:$0xff]   ;;  %v19319_v30 = vmul.bf16 1056980736, %v15633_v60 }
 0x3e5   : > { %v15642_v63 = vadd.bf16 %v20425_v35, %v5575_v36  ;;  %v5576_v48 = vpack.c.bf16 %v5002_v15, %v4998_v34  ;;  %v20427_v34 = vld [vmem:[#allocation21_spill] sm:$0xff]  ;;  %20428 = vst [vmem:[#allocation22_spill] sm:$0xff] %v15687_v57  ;;  %v19320_v5 = vmul.bf16 1056980736, %v15651_v38 }
 0x3e6   : > { %6588 = vmatmul.mubr.bf16.gmra.mxu0 %v15618_v11  ;;  %v15655_v39 = vpop.f32.mrf.mxu0  ;;  %v19316_v59 = vmul.bf16 1056980736, %v15639_v54  ;;  %v15664_v1 = vadd.bf16 %v20425_v35, %v5574_v53  ;;  %v15673_v20 = vadd.bf16 %v20427_v34, %v5526_v41  ;;  %v15695_v36 = vadd.bf16 %v20427_v34, %v5528_v12 }
 0x3e7   : > { %v15657_v2 = vpop.f32.mrf.mxu1  ;;  %6701 = vmatmul.mubr.bf16.gmra.mxu1 %v15618_v11  ;;  %6597 = vmatprep.mubr.bf16.mxu0 %v20058_v22  ;;  %v19314_v27 = vmul.bf16 1056980736, %v15642_v63  ;;  %v15667_v25 = vadd.bf16 %v20425_v35, %v5576_v48  ;;  %v19321_v48 = vmul.bf16 1056980736, %v15648_v32  ;;  %v15717_v51 = vadd.bf16 %v20427_v34, %v5525_v16 }
 0x3e8   : > { %20426 = vst [vmem:[#allocation30_spill] sm:$0xff] %v15657_v2  ;;  %6710 = vmatprep.mubr.bf16.mxu1 %v20058_v22  ;;  %v15680_v24 = vpop.f32.mrf.mxu0  ;;  %9760 = vtanh.bf16 %v19316_v59  ;;  %v19317_v62 = vmul.bf16 1056980736, %v15664_v1  ;;  %v19323_v31 = vmul.bf16 1056980736, %v15673_v20  ;;  %v5511_v16 = vpack.c.bf16 %v15489_v29, %v15467_v0  ;;  %v20443_v29 = vld [vmem:[#allocation29_spill] sm:$0xff] }
 0x3e9   : > { %v15682_v4 = vpop.f32.mrf.mxu1  ;;  %v19318_v41 = vmul.bf16 1056980736, %v15667_v25  ;;  %9762 = vtanh.bf16 %v19314_v27  ;;  %v19322_v27 = vmul.bf16 1056980736, %v15676_v3  ;;  %v15758_v0 = vadd.bf16 %v20432_v19, %v5512_v50  ;;  %v20441_v50 = vld [vmem:[#allocation9_spill] sm:$0xff] }
 0x3ea   : > { %v15703_v15 = vpop.f32.mrf.mxu0  ;;  %9764 = vtanh.bf16 %v19317_v62  ;;  %v20431_v62 = vld [vmem:[#allocation35_spill] sm:$0xff]  ;;  %v15798_v49 = vadd.bf16 %v20432_v19, %v5511_v16  ;;  %v20447_v7 = vmul.bf16 1056980736, %v15695_v36  ;;  %v20452_v16 = vld [vmem:[#allocation16_spill] sm:$0xff] }
 0x3eb   : > { %v15705_v53 = vpop.f32.mrf.mxu1  ;;  %9766 = vtanh.bf16 %v19318_v41  ;;  %v5496_v12 = vpack.c.bf16 %v15454_v10, %v20431_v62  ;;  %v15741_v41 = vadd.bf16 %v20427_v34, %v5527_v61  ;;  %v19324_v10 = vmul.bf16 1056980736, %v15698_v18  ;;  %v20436_v62 = vld [vmem:[#allocation20_spill] sm:$0xff]  ;;  %v20437_v61 = vld [vmem:[#allocation14_spill] sm:$0xff] }
 0x3ec   : > { %20429 = vst [vmem:[#allocation10_spill] sm:$0xff] %v15705_v53  ;;  %v15722_v45 = vpop.f32.mrf.mxu0  ;;  %9768 = vtanh.bf16 %v19319_v30  ;;  %v5478_v30 = vpack.c.bf16 %v20436_v62, %v20435_v21  ;;  %v20442_v62 = vld [vmem:[#allocation6_spill] sm:$0xff] }
 0x3ed   : > { %v15724_v59 = vpop.f32.mrf.mxu1  ;;  %9770 = vtanh.bf16 %v19320_v5  ;;  %v20438_v5 = vld [vmem:[#allocation33_spill] sm:$0xff] }
 0x3ee   : > { %20430 = vst [vmem:[#allocation23_spill] sm:$0xff] %v15724_v59  ;;  %6598 = vmatmul.mubr.bf16.gmra.mxu0 %v15687_v57  ;;  %v15746_v47 = vpop.f32.mrf.mxu0  ;;  %9772 = vtanh.bf16 %v19321_v48  ;;  %v5493_v6 = vpack.c.bf16 %v20438_v5, %v20437_v61  ;;  %v5480_v48 = vpack.c.bf16 %v20442_v62, %v20441_v50  ;;  %v15782_v5 = vadd.bf16 %v20443_v29, %v5494_v42  ;;  %v15790_v61 = vld [vmem:[%s18935_s7 + $0x18] sm:$0xff]  }
 0x3ef   : > { %20433 = vst [vmem:[#allocation38_spill] sm:$0xff] %v15746_v47  ;;  %v15748_v14 = vpop.f32.mrf.mxu1  ;;  %6711 = vmatmul.mubr.bf16.gmra.mxu1 %v15687_v57  ;;  %6607 = vmatprep.mubr.bf16.mxu0 %v20058_v22  ;;  %9774 = vtanh.bf16 %v19322_v27  ;;  %20444 = vst [vmem:[#allocation25_spill] sm:$0xff] %v15790_v61  ;;  %v15792_v27 = vpop.eup %9754  ;;  %v15795_v50 = vadd.bf16 %v20443_v29, %v5496_v12  ;;  %v20455_v47 = vld [vmem:[#allocation8_spill] sm:$0xff]  ;;  %v20475_v57 = vmul.bf16 1056980736, %v15798_v49 }
 0x3f0   : > { %20434 = vst [vmem:[#allocation7_spill] sm:$0xff] %v15748_v14  ;;  %6720 = vmatprep.mubr.bf16.mxu1 %v20058_v22  ;;  %v15772_v28 = vpop.f32.mrf.mxu0  ;;  %9776 = vtanh.bf16 %v19323_v31  ;;  %v15814_v21 = vpop.eup %9756  ;;  %v15823_v2 = vadd.bf16 %v20443_v29, %v5493_v6  ;;  %v20453_v14 = vld [vmem:[#allocation15_spill] sm:$0xff] }
 0x3f1   : > { %20439 = vst [vmem:[#allocation24_spill] sm:$0xff] %v15772_v28  ;;  %v15774_v33 = vpop.f32.mrf.mxu1  ;;  %9778 = vtanh.bf16 %v19324_v10  ;;  %v20448_v10 = vpack.c.bf16 %v20419_v43, %v15245_v9  ;;  %v15839_v43 = vadd.bf16 %v20455_v47, %v5478_v30  ;;  %v20457_v31 = vld [vmem:[#allocation19_spill] sm:$0xff]  ;;  %v6326_v11 = vadd.bf16 1065369472, %v15814_v21 }
 0x3f2   : > { %20440 = vst [vmem:[#allocation13_spill] sm:$0xff] %v15774_v33  ;;  %v15803_v42 = vpop.f32.mrf.mxu0  ;;  %9780 = vtanh.bf16 %v20447_v7  ;;  %v20449_v7 = vmul.bf16 1056980736, %v15717_v51  ;;  %v20478_v35 = vmul.bf16 1056980736, %v15795_v50 }
 0x3f3   : > { %20445 = vst [vmem:[#allocation36_spill] sm:$0xff] %v15803_v42  ;;  %v15805_v62 = vpop.f32.mrf.mxu1  ;;  %v15820_v55 = vadd.bf16 %v20355_v23, %v20448_v10  ;;  %v20456_v10 = vmul.bf16 1056980736, %v15732_v13  ;;  %v20458_v42 = vld [vmem:[#allocation28_spill] sm:$0xff]  ;;  %v20481_v21 = vmul.bf16 1056980736, %v15664_v1 }
 0x3f4   : > { %20446 = vst [vmem:[#allocation32_spill] sm:$0xff] %v15805_v62  ;;  %9782 = vtanh.bf16 %v20449_v7  ;;  %v15828_v12 = vpop.f32.mrf.mxu0  ;;  %v20454_v62 = vpack.c.bf16 %v20452_v16, %v20453_v14  ;;  %v15845_v7 = vpop.eup %9758  ;;  %v20461_v16 = vld [vmem:[#allocation40_spill] sm:$0xff] }
 0x3f5   : > { %20450 = vst [vmem:[#allocation35_spill] sm:$0xff] %v15828_v12  ;;  %v15830_v53 = vpop.f32.mrf.mxu1  ;;  %9784 = vtanh.bf16 %v20456_v10  ;;  %v20463_v10 = vmul.bf16 1056980736, %v15741_v41 }
 0x3f6   : > { %20451 = vst [vmem:[#allocation17_spill] sm:$0xff] %v15830_v53  ;;  %v15836_v9 = vadd.bf16 %v20455_v47, %v20454_v62  ;;  %6608 = vmatmul.mubr.bf16.gmra.mxu0 %v15790_v61  ;;  %v20459_v53 = vpack.c.bf16 %v20457_v31, %v20458_v42  ;;  %v20460_v62 = vld [vmem:[#allocation34_spill] sm:$0xff]  ;;  %v15862_v12 = vpop.f32.mrf.mxu0  ;;  %v20466_v31 = vpack.c.bf16 %v20421_v8, %v20420_v58 }
 0x3f7   : > { %v20462_v33 = vpack.c.bf16 %v20460_v62, %v20461_v16  ;;  %9786 = vtanh.bf16 %v20463_v10  ;;  %20464 = vst [vmem:[#allocation20_spill] sm:$0xff] %v15862_v12  ;;  %v15864_v28 = vpop.f32.mrf.mxu1  ;;  %6721 = vmatmul.mubr.bf16.gmra.mxu1 %v15790_v61  ;;  %6617 = vmatprep.mubr.bf16.mxu0 %v20058_v22  ;;  %v15875_v42 = vadd.bf16 %v20455_v47, %v5480_v48  ;;  %v20467_v16 = vmul.bf16 1056980736, %v15758_v0  ;;  %v20468_v61 = vld [vmem:[#allocation12_spill] sm:$0xff] }
 0x3f8   : > { %v15851_v14 = vadd.bf16 %v20355_v23, %v20459_v53  ;;  %20465 = vst [vmem:[#allocation14_spill] sm:$0xff] %v15864_v28  ;;  %v9761_v53 = vpop.eup %9760  ;;  %6730 = vmatprep.mubr.bf16.mxu1 %v20058_v22  ;;  %v20471_v48 = vmul.bf16 1056980736, %v15767_v46 }
 0x3f9   : > { %v15857_v30 = vadd.bf16 %v20443_v29, %v20462_v33  ;;  %v15872_v33 = vadd.bf16 %v20355_v23, %v20466_v31  ;;  %9788 = vtanh.bf16 %v20467_v16  ;;  %v9763_v10 = vpop.eup %9762  ;;  %v20469_v29 = vld [vmem:[#allocation11_spill] sm:$0xff]  ;;  %v15891_v31 = vpop.f32.mrf.mxu0  ;;  %v15898_v16 = vld [vmem:[%s18935_s7 + $0x20] sm:$0xff]   ;;  %v6341_v8 = vadd.bf16 1065369472, %v9761_v53 }
 0x3fa   : > { %v20470_v12 = vpack.c.bf16 %v20468_v61, %v20469_v29  ;;  %9790 = vtanh.bf16 %v20471_v48  ;;  %20472 = vst [vmem:[#allocation33_spill] sm:$0xff] %v15891_v31  ;;  %v15893_v62 = vpop.f32.mrf.mxu1  ;;  %v9765_v6 = vpop.eup %9764  ;;  %v6343_v53 = vadd.bf16 1065369472, %v9763_v10  ;;  %v6328_v61 = vadd.bf16 1065369472, %v15845_v7 }
 0x3fb   : > { %20473 = vst [vmem:[#allocation9_spill] sm:$0xff] %v15893_v62  ;;  %v15907_v19 = vpop.f32.mrf.mxu0  ;;  %v6342_v34 = vadd.bf16 1065369472, %v9765_v6  ;;  %v20482_v10 = vmul.bf16 1056980736, %v15839_v43 }
 0x3fc   : > { %v15886_v58 = vadd.bf16 %v20455_v47, %v20470_v12  ;;  %v20474_v12 = vmul.bf16 1056980736, %v15782_v5  ;;  %v9767_v47 = vpop.eup %9766  ;;  %20476 = vst [vmem:[#allocation6_spill] sm:$0xff] %v15907_v19  ;;  %v15909_v62 = vpop.f32.mrf.mxu1  ;;  %v20484_v1 = vmul.bf16 1056980736, %v15857_v30 }
 0x3fd   : > { %20477 = vst [vmem:[#allocation16_spill] sm:$0xff] %v15909_v62  ;;  %v9769_v29 = vpop.eup %9768  ;;  %v15919_v19 = vpop.f32.mrf.mxu0  ;;  %v6470_v6 = vmul.bf16 %v6342_v34, %v20481_v21  ;;  %v6344_v31 = vadd.bf16 1065369472, %v9767_v47  ;;  %v20486_v7 = vmul.bf16 1056980736, %v15667_v25 }
 0x3fe   : > { %9792 = vtanh.bf16 %v20474_v12  ;;  %v9771_v48 = vpop.eup %9770  ;;  %v15921_v56 = vpop.f32.mrf.mxu1  ;;  %v6325_v12 = vadd.bf16 1065369472, %v15792_v27  ;;  %6618 = vmatmul.mubr.bf16.gmra.mxu0 %v15898_v16  ;;  %v20487_v27 = vmul.bf16 1056980736, %v15597_v52  ;;  %v19349_v25 = vmul.bf16 1056980736, %v15594_v40 }
 0x3ff   : > { %9794 = vtanh.bf16 %v20475_v57  ;;  %v20479_v57 = vmul.bf16 1056980736, %v15823_v2  ;;  %20480 = vst [vmem:[#allocation15_spill] sm:$0xff] %v15921_v56  ;;  %v9773_v59 = vpop.eup %9772  ;;  %v15935_v34 = vpop.f32.mrf.mxu0  ;;  %6731 = vmatmul.mubr.bf16.gmra.mxu1 %v15898_v16  ;;  %6771 = vmatprep.subr.bf16.mxu0 %v6470_v6  ;;  %v6472_v21 = vmul.bf16 %v6344_v31, %v20486_v7  ;;  %v20489_v56 = vmul.bf16 1056980736, %v15642_v63 }
 0x400   : > { %9796 = vtanh.bf16 %v20478_v35  ;;  %v9775_v62 = vpop.eup %9774  ;;  %v15937_v47 = vpop.f32.mrf.mxu1  ;;  %v20488_v35 = vmul.bf16 1056980736, %v15875_v42  ;;  %6627 = vmatprep.mubr.bf16.mxu0 %v20058_v22  ;;  %v20490_v52 = vmul.bf16 1056980736, %v15836_v9  ;;  %v6312_v63 = vadd.bf16 1065369472, %v9773_v59  ;;  %6740 = vmatprep.mubr.bf16.mxu1 %v20058_v22 }
 0x401   : > { %9798 = vtanh.bf16 %v20479_v57  ;;  %v20483_v57 = vmul.bf16 1056980736, %v15639_v54  ;;  %20485 = vst [vmem:[#allocation19_spill] sm:$0xff] %v15937_v47  ;;  %v6454_v54 = vmul.bf16 %v6326_v11, %v20487_v27  ;;  %v6471_v47 = vmul.bf16 %v6343_v53, %v20489_v56  ;;  %6884 = vmatprep.subr.bf16.mxu1 %v6472_v21  ;;  %v15953_v11 = vpop.f32.mrf.mxu0 }
 0x402   : > { %9800 = vtanh.bf16 %v20482_v10  ;;  %v9777_v10 = vpop.eup %9776  ;;  %v15955_v31 = vpop.f32.mrf.mxu1  ;;  %v6309_v53 = vadd.bf16 1065369472, %v9775_v62  ;;  %v19348_v27 = vmul.bf16 1056980736, %v15851_v14 }
 0x403   : > { %v6469_v28 = vmul.bf16 %v6341_v8, %v20483_v57  ;;  %9802 = vtanh.bf16 %v20484_v1  ;;  %v6310_v8 = vadd.bf16 1065369472, %v9769_v29  ;;  %v19347_v57 = vmul.bf16 1056980736, %v15872_v33  ;;  %v9779_v6 = vpop.eup %9778  ;;  %6885 = vmatpush1.bf16.msra.mxu1 %v6471_v47 }
 0x404   : > { %9804 = vtanh.bf16 %v20488_v35  ;;  %v6327_v1 = vadd.bf16 1065369472, %v9771_v48  ;;  %v20491_v29 = vmul.bf16 1056980736, %v15605_v44  ;;  %v9781_v56 = vpop.eup %9780  ;;  %v20493_v35 = vmul.bf16 1056980736, %v15585_v26  ;;  %v15967_v44 = vpop.f32.mrf.mxu0 }
 0x405   : > { %6772 = vmatpush1.bf16.msra.mxu0 %v6469_v28  ;;  %9806 = vtanh.bf16 %v20490_v52  ;;  %v20492_v28 = vmul.bf16 1056980736, %v15820_v55  ;;  %v9783_v21 = vpop.eup %9782  ;;  %v15969_v59 = vpop.f32.mrf.mxu1  ;;  %v15976_v26 = vld [vmem:[%s18935_s7 + $0x28] sm:$0xff]   ;;  %v6311_v52 = vadd.bf16 1065369472, %v9779_v6 }
 0x406   : > { %6773 = vmatprep.subr.bf16.mxu0 %v6454_v54  ;;  %v6456_v48 = vmul.bf16 %v6328_v61, %v20491_v29  ;;  %v6453_v7 = vmul.bf16 %v6325_v12, %v20493_v35  ;;  %v20494_v54 = vmul.bf16 1056980736, %v15886_v58  ;;  %v20495_v61 = vmul.bf16 1056980736, %v15633_v60  ;;  %20496 = vst [vmem:[#allocation28_spill] sm:$0xff] %v15976_v26  ;;  %v9785_v47 = vpop.eup %9784  ;;  %v15984_v60 = vpop.f32.mrf.mxu0  ;;  %6628 = vmatmul.mubr.bf16.gmra.mxu0 %v15976_v26 }
 0x407   : > { %9808 = vtanh.bf16 %v20492_v28  ;;  %v6294_v12 = vadd.bf16 1065369472, %v9777_v10  ;;  %v20497_v29 = vmul.bf16 1056980736, %v15651_v38  ;;  %v9787_v28 = vpop.eup %9786  ;;  %v20498_v10 = vmul.bf16 1056980736, %v15648_v32  ;;  %6741 = vmatmul.mubr.bf16.gmra.mxu1 %v15976_v26  ;;  %6637 = vmatprep.mubr.bf16.mxu0 %v20058_v22 }
 0x408   : > { %9810 = vtanh.bf16 %v20494_v54  ;;  %6886 = vmatprep.subr.bf16.mxu1 %v6456_v48  ;;  %v6438_v62 = vmul.bf16 %v6310_v8, %v20495_v61  ;;  %v15986_v8 = vpop.f32.mrf.mxu1  ;;  %v6296_v54 = vadd.bf16 1065369472, %v9781_v56  ;;  %v9789_v61 = vpop.eup %9788  ;;  %v20499_v6 = vmul.bf16 1056980736, %v15676_v3  ;;  %6750 = vmatprep.mubr.bf16.mxu1 %v20058_v22 }
 0x409   : > { %9812 = vtanh.bf16 %v19347_v57  ;;  %v6455_v48 = vmul.bf16 %v6327_v1, %v20497_v29  ;;  %6774 = vmatpush1.bf16.msra.mxu0 %v6453_v7  ;;  %v6440_v35 = vmul.bf16 %v6312_v63, %v20498_v10  ;;  %v6293_v57 = vadd.bf16 1065369472, %v9783_v21  ;;  %v9791_v1 = vpop.eup %9790  ;;  %v15994_v7 = vpop.f32.mrf.mxu0 }
 0x40a   : > { %9814 = vtanh.bf16 %v19349_v25  ;;  %6775 = vmatprep.subr.bf16.mxu0 %v6438_v62  ;;  %v6437_v38 = vmul.bf16 %v6309_v53, %v20499_v6  ;;  %v15996_v29 = vpop.f32.mrf.mxu1  ;;  %v20500_v32 = vmul.bf16 1056980736, %v15673_v20  ;;  %v6278_v56 = vadd.bf16 1065369472, %v9785_v47 }
 0x40b   : > { %6887 = vmatpush1.bf16.msra.mxu1 %v6455_v48  ;;  %9816 = vtanh.bf16 %v19348_v27  ;;  %v6295_v62 = vadd.bf16 1065369472, %v9787_v28  ;;  %v20501_v3 = vmul.bf16 1056980736, %v15698_v18  ;;  %v16004_v10 = vpop.f32.mrf.mxu0  ;;  %v20502_v6 = vmul.bf16 1056980736, %v15695_v36 }
 0x40c   : > { %6888 = vmatprep.subr.bf16.mxu1 %v6440_v35  ;;  %v6422_v63 = vmul.bf16 %v6294_v12, %v20500_v32  ;;  %v9793_v21 = vpop.eup %9792  ;;  %v16006_v35 = vpop.f32.mrf.mxu1  ;;  %v6280_v20 = vadd.bf16 1065369472, %v9789_v61  ;;  %v6277_v47 = vadd.bf16 1065369472, %v9791_v1  ;;  %v20503_v18 = vmul.bf16 1056980736, %v15717_v51 }
 0x40d   : > { %v6439_v53 = vmul.bf16 %v6311_v52, %v20501_v3  ;;  %6776 = vmatpush1.bf16.msra.mxu0 %v6437_v38  ;;  %v9795_v48 = vpop.eup %9794  ;;  %v6424_v27 = vmul.bf16 %v6296_v54, %v20502_v6  ;;  %v16014_v38 = vpop.f32.mrf.mxu0  ;;  %v20504_v36 = vmul.bf16 1056980736, %v15732_v13  ;;  %v16023_v61 = vld [vmem:[%s18935_s7 + $0x30] sm:$0xff]   ;;  %v6262_v1 = vadd.bf16 1065369472, %v9793_v21 }
 0x40e   : > { %6777 = vmatprep.subr.bf16.mxu0 %v6422_v63  ;;  %v9797_v12 = vpop.eup %9796  ;;  %v6421_v52 = vmul.bf16 %v6293_v57, %v20503_v18  ;;  %v16016_v32 = vpop.f32.mrf.mxu1  ;;  %v6279_v57 = vadd.bf16 1065369472, %v9795_v48  ;;  %v20505_v63 = vmul.bf16 1056980736, %v15741_v41  ;;  %v20506_v13 = vmul.bf16 1056980736, %v15758_v0  ;;  %6638 = vmatmul.mubr.bf16.gmra.mxu0 %v16023_v61 }
 0x40f   : > { %6889 = vmatpush1.bf16.msra.mxu1 %v6439_v53  ;;  %v9799_v28 = vpop.eup %9798  ;;  %v6406_v54 = vmul.bf16 %v6278_v56, %v20504_v36  ;;  %v16027_v53 = vpop.f32.mrf.mxu0  ;;  %v6264_v18 = vadd.bf16 1065369472, %v9797_v12  ;;  %v20507_v21 = vmul.bf16 1056980736, %v15767_v46  ;;  %6647 = vmatprep.mubr.bf16.mxu0 %v20058_v22 }
 0x410   : > { %6890 = vmatprep.subr.bf16.mxu1 %v6424_v27  ;;  %v9801_v51 = vpop.eup %9800  ;;  %v6423_v3 = vmul.bf16 %v6295_v62, %v20505_v63  ;;  %v16029_v6 = vpop.f32.mrf.mxu1  ;;  %v6408_v56 = vmul.bf16 %v6280_v20, %v20506_v13  ;;  %v6261_v25 = vadd.bf16 1065369472, %v9799_v28  ;;  %v20509_v28 = vmul.bf16 1056980736, %v15798_v49  ;;  %6751 = vmatmul.mubr.bf16.gmra.mxu1 %v16023_v61 }
 0x411   : > { %6778 = vmatpush1.bf16.msra.mxu0 %v6421_v52  ;;  %v9803_v27 = vpop.eup %9802  ;;  %v6405_v26 = vmul.bf16 %v6277_v47, %v20507_v21  ;;  %v16035_v41 = vpop.f32.mrf.mxu0  ;;  %v20508_v52 = vmul.bf16 1056980736, %v15782_v5  ;;  %v6246_v0 = vadd.bf16 1065369472, %v9801_v51  ;;  %v20510_v13 = vmul.bf16 1056980736, %v15795_v50  ;;  %6760 = vmatprep.mubr.bf16.mxu1 %v20058_v22 }
 0x412   : > { %6779 = vmatprep.subr.bf16.mxu0 %v6406_v54  ;;  %v9805_v36 = vpop.eup %9804  ;;  %v16037_v62 = vpop.f32.mrf.mxu1  ;;  %v6263_v12 = vadd.bf16 1065369472, %v9803_v27  ;;  %v6407_v63 = vmul.bf16 %v6279_v57, %v20509_v28  ;;  %v20511_v49 = vmul.bf16 1056980736, %v15823_v2  ;;  %v20512_v50 = vmul.bf16 1056980736, %v15839_v43 }
 0x413   : > { %6891 = vmatpush1.bf16.msra.mxu1 %v6423_v3  ;;  %v9807_v48 = vpop.eup %9806  ;;  %v6390_v54 = vmul.bf16 %v6262_v1, %v20508_v52  ;;  %v16045_v47 = vpop.f32.mrf.mxu0  ;;  %v6248_v5 = vadd.bf16 1065369472, %v9805_v36  ;;  %v16064_v36 = vld [vmem:[%s18935_s7 + $0x38] sm:$0xff]   ;;  %v20514_v43 = vmul.bf16 1056980736, %v15875_v42 }
 0x414   : > { %6892 = vmatprep.subr.bf16.mxu1 %v6408_v56  ;;  %v16047_v3 = vpop.f32.mrf.mxu1  ;;  %v6392_v56 = vmul.bf16 %v6264_v18, %v20510_v13  ;;  %v6245_v51 = vadd.bf16 1065369472, %v9807_v48  ;;  %v6389_v57 = vmul.bf16 %v6261_v25, %v20511_v49  ;;  %v6374_v18 = vmul.bf16 %v6246_v0, %v20512_v50 }
 0x415   : > { %v9809_v20 = vpop.eup %9808  ;;  %6780 = vmatpush1.bf16.msra.mxu0 %v6405_v26  ;;  %v16055_v27 = vpop.f32.mrf.mxu0  ;;  %v20513_v25 = vmul.bf16 1056980736, %v15857_v30  ;;  %v6376_v0 = vmul.bf16 %v6248_v5, %v20514_v43  ;;  %v20515_v49 = vmul.bf16 1056980736, %v15836_v9 }
 0x416   : > { %v9811_v46 = vpop.eup %9810  ;;  %6781 = vmatprep.subr.bf16.mxu0 %v6390_v54  ;;  %v16057_v21 = vpop.f32.mrf.mxu1  ;;  %v6230_v48 = vadd.bf16 1065369472, %v9809_v20  ;;  %6648 = vmatmul.mubr.bf16.gmra.mxu0 %v16064_v36 }
 0x417   : > { %v9813_v1 = vpop.eup %9812  ;;  %6893 = vmatpush1.bf16.msra.mxu1 %v6407_v63  ;;  %v6247_v2 = vadd.bf16 1065369472, %v9811_v46  ;;  %v6391_v52 = vmul.bf16 %v6263_v12, %v20513_v25  ;;  %v16068_v28 = vpop.f32.mrf.mxu0  ;;  %v6373_v50 = vmul.bf16 %v6245_v51, %v20515_v49  ;;  %v20516_v12 = vmul.bf16 1056980736, %v15820_v55  ;;  %6803 = vmatprep.mubr.bf16.mxu0 %v20058_v22 }
 0x418   : > { %v9815_v26 = vpop.eup %9814  ;;  %6894 = vmatprep.subr.bf16.mxu1 %v6392_v56  ;;  %v16070_v63 = vpop.f32.mrf.mxu1  ;;  %v6232_v13 = vadd.bf16 1065369472, %v9813_v1  ;;  %6761 = vmatmul.mubr.bf16.gmra.mxu1 %v16064_v36  ;;  %v20518_v1 = vmul.bf16 1056980736, %v15872_v33  ;;  %v20521_v49 = vpack.c.bf16 %v15703_v15, %v15655_v39 }
 0x419   : > { %6782 = vmatpush1.bf16.msra.mxu0 %v6389_v57  ;;  %v9817_v54 = vpop.eup %9816  ;;  %v6229_v56 = vadd.bf16 1065369472, %v9815_v26  ;;  %v5099_v20 = vpop.f32.mrf.mxu0  ;;  %v6358_v46 = vmul.bf16 %v6230_v48, %v20516_v12  ;;  %v20519_v26 = vmul.bf16 1056980736, %v15594_v40  ;;  %6916 = vmatprep.mubr.bf16.mxu1 %v20058_v22  ;;  %v20520_v48 = vmul.bf16 1056980736, %v15851_v14 }
 0x41a   : > { %6783 = vmatprep.subr.bf16.mxu0 %v6374_v18  ;;  %v16076_v30 = vpop.f32.mrf.mxu1  ;;  %v6231_v57 = vadd.bf16 1065369472, %v9817_v54  ;;  %v20517_v18 = vmul.bf16 1056980736, %v15886_v58  ;;  %v6360_v51 = vmul.bf16 %v6232_v13, %v20518_v1  ;;  %v16100_v14 = vadd.bf16 %v20355_v23, %v20521_v49 }
 0x41b   : > { %6895 = vmatpush1.bf16.msra.mxu1 %v6391_v52  ;;  %v5101_v5 = vpop.f32.mrf.mxu0  ;;  %v6357_v25 = vmul.bf16 %v6229_v56, %v20519_v26  ;;  %v5546_v12 = vpack.c.bf16 %v16068_v28, %v16045_v47  ;;  %v5514_v1 = vpack.c.bf16 %v15984_v60, %v15953_v11  ;;  %v5516_v47 = vpack.c.bf16 %v15986_v8, %v15955_v31 }
 0x41c   : > { %6896 = vmatprep.subr.bf16.mxu1 %v6376_v0  ;;  %v6375_v42 = vmul.bf16 %v6247_v2, %v20517_v18  ;;  %v5214_v9 = vpop.f32.mrf.mxu1  ;;  %v6359_v2 = vmul.bf16 %v6231_v57, %v20520_v48  ;;  %v20522_v18 = vld [vmem:[#allocation23_spill] sm:$0xff]  ;;  %v5529_v28 = vpack.c.bf16 %v16014_v38, %v15994_v7  ;;  %v5530_v48 = vpack.c.bf16 %v16027_v53, %v16004_v10 }
 0x41d   : > { %6784 = vmatpush1.bf16.msra.mxu0 %v6373_v50  ;;  %v5103_v55 = vpop.f32.mrf.mxu0  ;;  %v5545_v7 = vpack.c.bf16 %v16055_v27, %v16035_v41  ;;  %v20524_v38 = vld [vmem:[#allocation31_spill] sm:$0xff]  ;;  %v5547_v41 = vpack.c.bf16 %v16057_v21, %v16037_v62 }
 0x41e   : > { %6785 = vmatprep.subr.bf16.mxu0 %v6358_v46  ;;  %v5216_v58 = vpop.f32.mrf.mxu1  ;;  %v5561_v52 = vpack.c.bf16 %v5103_v55, %v5099_v20 }
 0x41f   : > { %6897 = vmatpush1.bf16.msra.mxu1 %v6375_v42  ;;  %v5105_v54 = vpop.f32.mrf.mxu0 }
 0x420   : > { %6898 = vmatprep.subr.bf16.mxu1 %v6360_v51  ;;  %v5218_v43 = vpop.f32.mrf.mxu1  ;;  %v16093_v33 = vadd.bf16 %v15122_v37, %v5561_v52  ;;  %v5562_v0 = vpack.c.bf16 %v5105_v54, %v5101_v5  ;;  %v20523_v5 = vld [vmem:[#allocation33_spill] sm:$0xff]  ;;  %v5563_v51 = vpack.c.bf16 %v5216_v58, %v16076_v30 }
 0x421   : > { %6786 = vmatpush1.bf16.msra.mxu0 %v6357_v25  ;;  %v5564_v40 = vpack.c.bf16 %v5218_v43, %v5214_v9  ;;  %v5109_v13 = vpop.f32.mrf.mxu0  ;;  %v5498_v9 = vpack.c.bf16 %v15919_v19, %v20523_v5  ;;  %v16137_v43 = vadd.bf16 %v20524_v38, %v5546_v12  ;;  %v20525_v58 = vld [vmem:[#allocation37_spill] sm:$0xff] }
 0x422   : > { %v5222_v56 = vpop.f32.mrf.mxu1  ;;  %v16103_v50 = vadd.bf16 %v15122_v37, %v5562_v0  ;;  %v19352_v46 = vmul.bf16 1056980736, %v16093_v33  ;;  %v16154_v0 = vadd.bf16 %v15122_v37, %v5563_v51  ;;  %v16178_v51 = vadd.bf16 %v20524_v38, %v5545_v7 }
 0x423   : > { %6899 = vmatpush1.bf16.msra.mxu1 %v6359_v2  ;;  %v16112_v57 = vadd.bf16 %v15122_v37, %v5564_v40  ;;  %v5111_v39 = vpop.f32.mrf.mxu0  ;;  %v5532_v2 = vpack.c.bf16 %v16029_v6, %v16006_v35 }
 0x424   : > { %6804 = vmatmul.mubr.bf16.vlgmr.msra.gmra.mxu0 %v15582_v17  ;;  %v5224_v15 = vpop.f32.mrf.mxu1  ;;  %v19354_v26 = vmul.bf16 1056980736, %v16103_v50  ;;  %9818 = vtanh.bf16 %v19352_v46  ;;  %v19360_v7 = vmul.bf16 1056980736, %v16154_v0  ;;  %v19362_v46 = vmul.bf16 1056980736, %v16178_v51 }
 0x425   : > { %6813 = vmatprep.mubr.bf16.mxu0 %v20058_v22  ;;  %v5113_v25 = vpop.f32.mrf.mxu0 }
 0x426   : > { %6917 = vmatmul.mubr.bf16.vlgmr.msra.gmra.mxu1 %v15582_v17  ;;  %v5548_v17 = vpack.c.bf16 %v16070_v63, %v16047_v3  ;;  %v5226_v55 = vpop.f32.mrf.mxu1  ;;  %v5577_v52 = vpack.c.bf16 %v5113_v25, %v5109_v13  ;;  %v19353_v3 = vmul.bf16 1056980736, %v16112_v57  ;;  %9820 = vtanh.bf16 %v19354_v26 }
 0x427   : > { %6926 = vmatprep.mubr.bf16.mxu1 %v20058_v22  ;;  %v5579_v54 = vpack.c.bf16 %v5226_v55, %v5222_v56  ;;  %v5115_v63 = vpop.f32.mrf.mxu0  ;;  %v20528_v56 = vld [vmem:[#allocation27_spill] sm:$0xff] }
 0x428   : > { %v5228_v30 = vpop.f32.mrf.mxu1  ;;  %v16143_v10 = vadd.bf16 %v20525_v58, %v5577_v52  ;;  %v5578_v53 = vpack.c.bf16 %v5115_v63, %v5111_v39  ;;  %v16151_v27 = vadd.bf16 %v20524_v38, %v5548_v17  ;;  %v5531_v39 = vpack.c.bf16 %v16016_v32, %v15996_v29 }
 0x429   : > { %v16146_v35 = vadd.bf16 %v20525_v58, %v5579_v54  ;;  %v5580_v6 = vpack.c.bf16 %v5228_v30, %v5224_v15  ;;  %v16158_v40 = vpop.f32.mrf.mxu0  ;;  %v20529_v15 = vld [vmem:[#allocation21_spill] sm:$0xff]  ;;  %9822 = vtanh.bf16 %v19353_v3  ;;  %v19359_v52 = vmul.bf16 1056980736, %v16137_v43 }
 0x42a   : > { %20526 = vst [vmem:[#allocation34_spill] sm:$0xff] %v16158_v40  ;;  %v16160_v13 = vpop.f32.mrf.mxu1  ;;  %v19356_v49 = vmul.bf16 1056980736, %v16143_v10  ;;  %v16166_v62 = vadd.bf16 %v20525_v58, %v5578_v53  ;;  %v16175_v17 = vadd.bf16 %v20529_v15, %v5530_v48  ;;  %v16194_v48 = vadd.bf16 %v20529_v15, %v5532_v2  ;;  %v20535_v2 = vld [vmem:[#allocation15_spill] sm:$0xff] }
 0x42b   : > { %20527 = vst [vmem:[#allocation40_spill] sm:$0xff] %v16160_v13  ;;  %v19355_v12 = vmul.bf16 1056980736, %v16146_v35  ;;  %v16169_v21 = vadd.bf16 %v20525_v58, %v5580_v6  ;;  %v16183_v25 = vpop.f32.mrf.mxu0  ;;  %v16197_v54 = vadd.bf16 %v20524_v38, %v5547_v41  ;;  %v19361_v53 = vmul.bf16 1056980736, %v16151_v27  ;;  %v20536_v6 = vld [vmem:[#allocation18_spill] sm:$0xff] }
 0x42c   : > { %6814 = vmatmul.mubr.bf16.gmra.mxu0 %v20528_v56  ;;  %v16185_v55 = vpop.f32.mrf.mxu1  ;;  %9824 = vtanh.bf16 %v19356_v49  ;;  %v19358_v29 = vmul.bf16 1056980736, %v16166_v62  ;;  %v5513_v41 = vpack.c.bf16 %v15967_v44, %v15935_v34  ;;  %v16231_v34 = vadd.bf16 %v20536_v6, %v5514_v1  ;;  %v20540_v1 = vld [vmem:[#allocation22_spill] sm:$0xff]  ;;  %v20562_v13 = vld [vmem:[#allocation16_spill] sm:$0xff] }
 0x42d   : > { %6823 = vmatprep.mubr.bf16.mxu0 %v20058_v22  ;;  %20530 = vst [vmem:[#allocation12_spill] sm:$0xff] %v16185_v55  ;;  %v19357_v32 = vmul.bf16 1056980736, %v16169_v21  ;;  %9826 = vtanh.bf16 %v19355_v12  ;;  %v16202_v63 = vpop.f32.mrf.mxu0  ;;  %v20534_v12 = vld [vmem:[#allocation9_spill] sm:$0xff]  ;;  %v19363_v44 = vmul.bf16 1056980736, %v16175_v17 }
 0x42e   : > { %6927 = vmatmul.mubr.bf16.gmra.mxu1 %v20528_v56  ;;  %20531 = vst [vmem:[#allocation11_spill] sm:$0xff] %v16202_v63  ;;  %v16204_v30 = vpop.f32.mrf.mxu1  ;;  %9828 = vtanh.bf16 %v19358_v29  ;;  %v16216_v56 = vadd.bf16 %v20529_v15, %v5529_v28  ;;  %v5500_v49 = vpack.c.bf16 %v20535_v2, %v20534_v12  ;;  %v20537_v28 = vld [vmem:[#allocation19_spill] sm:$0xff]  ;;  %v16239_v29 = vadd.bf16 %v20529_v15, %v5531_v39  ;;  %v20541_v12 = vld [vmem:[#allocation24_spill] sm:$0xff] }
 0x42f   : > { %6936 = vmatprep.mubr.bf16.mxu1 %v20058_v22  ;;  %20532 = vst [vmem:[#allocation23_spill] sm:$0xff] %v16204_v30  ;;  %9830 = vtanh.bf16 %v19357_v32  ;;  %v16221_v3 = vpop.f32.mrf.mxu0  ;;  %v5515_v32 = vpack.c.bf16 %v15969_v59, %v20537_v28  ;;  %v20542_v2 = vld [vmem:[#allocation35_spill] sm:$0xff]  ;;  %v16255_v59 = vadd.bf16 %v20536_v6, %v5516_v47  ;;  %v19364_v39 = vmul.bf16 1056980736, %v16194_v48  ;;  %v20543_v28 = vld [vmem:[#allocation20_spill] sm:$0xff]  ;;  %v20547_v47 = vld [vmem:[#allocation13_spill] sm:$0xff] }
 0x430   : > { %v16223_v26 = vpop.f32.mrf.mxu1  ;;  %9832 = vtanh.bf16 %v19359_v52  ;;  %v5482_v52 = vpack.c.bf16 %v20542_v2, %v20541_v12  ;;  %v16264_v42 = vadd.bf16 %v20536_v6, %v5513_v41  ;;  %v20548_v2 = vld [vmem:[#allocation17_spill] sm:$0xff]  ;;  %v20550_v5 = vmul.bf16 1056980736, %v16197_v54  ;;  %v20563_v30 = vld [vmem:[#allocation14_spill] sm:$0xff] }
 0x431   : > { %20533 = vst [vmem:[#allocation33_spill] sm:$0xff] %v16223_v26  ;;  %9834 = vtanh.bf16 %v19360_v7  ;;  %v16244_v11 = vpop.f32.mrf.mxu0  ;;  %v20544_v7 = vld [vmem:[#allocation6_spill] sm:$0xff]  ;;  %v20564_v40 = vpack.c.bf16 %v20562_v13, %v20563_v30 }
 0x432   : > { %20538 = vst [vmem:[#allocation31_spill] sm:$0xff] %v16244_v11  ;;  %v16246_v60 = vpop.f32.mrf.mxu1  ;;  %9836 = vtanh.bf16 %v19361_v53  ;;  %v5497_v20 = vpack.c.bf16 %v20544_v7, %v20543_v28  ;;  %v5484_v53 = vpack.c.bf16 %v20548_v2, %v20547_v47  ;;  %v20549_v7 = vld [vmem:[#allocation29_spill] sm:$0xff]  ;;  %v16292_v47 = vadd.bf16 %v20536_v6, %v5515_v32  ;;  %v20557_v32 = vld [vmem:[#allocation36_spill] sm:$0xff] }
 0x433   : > { %20539 = vst [vmem:[#allocation37_spill] sm:$0xff] %v16246_v60  ;;  %9838 = vtanh.bf16 %v19362_v46  ;;  %v16270_v31 = vpop.f32.mrf.mxu0  ;;  %v16280_v41 = vadd.bf16 %v20549_v7, %v5498_v9  ;;  %v16289_v46 = vadd.bf16 %v20549_v7, %v5500_v49  ;;  %v20558_v60 = vld [vmem:[#allocation38_spill] sm:$0xff] }
 0x434   : > { %6824 = vmatmul.mubr.bf16.gmra.mxu0 %v20540_v1  ;;  %20545 = vst [vmem:[#allocation27_spill] sm:$0xff] %v16270_v31  ;;  %v16272_v8 = vpop.f32.mrf.mxu1  ;;  %9840 = vtanh.bf16 %v19363_v44  ;;  %v16317_v12 = vadd.bf16 %v20549_v7, %v5497_v20 }
 0x435   : > { %6833 = vmatprep.mubr.bf16.mxu0 %v20058_v22  ;;  %20546 = vst [vmem:[#allocation21_spill] sm:$0xff] %v16272_v8  ;;  %9842 = vtanh.bf16 %v20550_v5  ;;  %v16297_v9 = vpop.f32.mrf.mxu0  ;;  %v20553_v5 = vpack.c.bf16 %v15722_v45, %v15680_v24  ;;  %v20584_v31 = vmul.bf16 1056980736, %v16289_v46 }
 0x436   : > { %6937 = vmatmul.mubr.bf16.gmra.mxu1 %v20540_v1  ;;  %v16286_v1 = vpop.eup %9818  ;;  %20551 = vst [vmem:[#allocation9_spill] sm:$0xff] %v16297_v9  ;;  %v16299_v2 = vpop.f32.mrf.mxu1  ;;  %9844 = vtanh.bf16 %v19364_v39  ;;  %v20554_v39 = vmul.bf16 1056980736, %v16216_v56  ;;  %v20560_v9 = vld [vmem:[#allocation8_spill] sm:$0xff] }
 0x437   : > { %6946 = vmatprep.mubr.bf16.mxu1 %v20058_v22  ;;  %20552 = vst [vmem:[#allocation15_spill] sm:$0xff] %v16299_v2  ;;  %v16308_v28 = vpop.eup %9820  ;;  %v16314_v19 = vadd.bf16 %v20355_v23, %v20553_v5  ;;  %v16322_v49 = vpop.f32.mrf.mxu0  ;;  %v20559_v2 = vpack.c.bf16 %v20557_v32, %v20558_v60  ;;  %v16333_v24 = vadd.bf16 %v20560_v9, %v5482_v52  ;;  %v20561_v5 = vmul.bf16 1056980736, %v16231_v34 }
 0x438   : > { %9846 = vtanh.bf16 %v20554_v39  ;;  %20555 = vst [vmem:[#allocation19_spill] sm:$0xff] %v16322_v49  ;;  %v16324_v11 = vpop.f32.mrf.mxu1  ;;  %v16338_v44 = vpop.eup %9822  ;;  %v16341_v39 = vadd.bf16 %v20560_v9, %v5484_v53  ;;  %v16347_v60 = vadd.bf16 %v20549_v7, %v20564_v40  ;;  %v20565_v52 = vmul.bf16 1056980736, %v16239_v29  ;;  %v20569_v53 = vld [vmem:[#allocation10_spill] sm:$0xff] }
 0x439   : > { %20556 = vst [vmem:[#allocation22_spill] sm:$0xff] %v16324_v11  ;;  %v16330_v45 = vadd.bf16 %v20560_v9, %v20559_v2  ;;  %9848 = vtanh.bf16 %v20561_v5  ;;  %v16352_v32 = vpop.f32.mrf.mxu0  ;;  %v20568_v5 = vld [vmem:[#allocation25_spill] sm:$0xff]  ;;  %v20570_v11 = vld [vmem:[#allocation30_spill] sm:$0xff]  ;;  %v20572_v40 = vpack.c.bf16 %v20522_v18, %v15682_v4  ;;  %v20573_v2 = vmul.bf16 1056980736, %v16255_v59 }
 0x43a   : > { %9850 = vtanh.bf16 %v20565_v52  ;;  %20566 = vst [vmem:[#allocation24_spill] sm:$0xff] %v16352_v32  ;;  %v16354_v20 = vpop.f32.mrf.mxu1  ;;  %v9825_v63 = vpop.eup %9824  ;;  %v20571_v8 = vpack.c.bf16 %v20569_v53, %v20570_v11  ;;  %v20574_v11 = vld [vmem:[#allocation32_spill] sm:$0xff]  ;;  %v20575_v53 = vld [vmem:[#allocation7_spill] sm:$0xff]  ;;  %v20577_v18 = vmul.bf16 1056980736, %v16264_v42 }
 0x43b   : > { %20567 = vst [vmem:[#allocation35_spill] sm:$0xff] %v16354_v20  ;;  %v16367_v30 = vadd.bf16 %v20355_v23, %v20572_v40  ;;  %9852 = vtanh.bf16 %v20573_v2  ;;  %v9827_v26 = vpop.eup %9826  ;;  %v16384_v40 = vpop.f32.mrf.mxu0  ;;  %v20581_v4 = vmul.bf16 1056980736, %v16292_v47 }
 0x43c   : > { %6834 = vmatmul.mubr.bf16.gmra.mxu0 %v20568_v5  ;;  %v16361_v13 = vadd.bf16 %v20355_v23, %v20571_v8  ;;  %v20576_v8 = vpack.c.bf16 %v20574_v11, %v20575_v53  ;;  %9854 = vtanh.bf16 %v20577_v18  ;;  %20578 = vst [vmem:[#allocation20_spill] sm:$0xff] %v16384_v40  ;;  %v16386_v2 = vpop.f32.mrf.mxu1  ;;  %v9829_v52 = vpop.eup %9828  ;;  %v20580_v11 = vmul.bf16 1056980736, %v16280_v41 }
 0x43d   : > { %6843 = vmatprep.mubr.bf16.mxu0 %v20058_v22  ;;  %20579 = vst [vmem:[#allocation6_spill] sm:$0xff] %v16386_v2  ;;  %v6345_v53 = vadd.bf16 1065369472, %v9825_v63  ;;  %v6346_v55 = vadd.bf16 1065369472, %v9829_v52 }
 0x43e   : > { %v16378_v7 = vadd.bf16 %v20560_v9, %v20576_v8  ;;  %6947 = vmatmul.mubr.bf16.gmra.mxu1 %v20568_v5  ;;  %9856 = vtanh.bf16 %v20580_v11  ;;  %v9831_v8 = vpop.eup %9830  ;;  %v16397_v9 = vpop.f32.mrf.mxu0  ;;  %v6347_v63 = vadd.bf16 1065369472, %v9827_v26  ;;  %v6330_v18 = vadd.bf16 1065369472, %v16308_v28 }
 0x43f   : > { %6956 = vmatprep.mubr.bf16.mxu1 %v20058_v22  ;;  %9858 = vtanh.bf16 %v20581_v4  ;;  %20582 = vst [vmem:[#allocation13_spill] sm:$0xff] %v16397_v9  ;;  %v16399_v49 = vpop.f32.mrf.mxu1  ;;  %v9833_v23 = vpop.eup %9832  ;;  %v20585_v5 = vmul.bf16 1056980736, %v16317_v12  ;;  %v20587_v52 = vmul.bf16 1056980736, %v16166_v62 }
 0x440   : > { %20583 = vst [vmem:[#allocation17_spill] sm:$0xff] %v16399_v49  ;;  %9860 = vtanh.bf16 %v20584_v31  ;;  %v9835_v32 = vpop.eup %9834  ;;  %v16408_v4 = vpop.f32.mrf.mxu0  ;;  %v6348_v6 = vadd.bf16 1065369472, %v9831_v8  ;;  %v6332_v31 = vadd.bf16 1065369472, %v16338_v44 }
 0x441   : > { %9862 = vtanh.bf16 %v20585_v5  ;;  %v16410_v9 = vpop.f32.mrf.mxu1  ;;  %v6474_v2 = vmul.bf16 %v6346_v55, %v20587_v52  ;;  %v9837_v26 = vpop.eup %9836  ;;  %v20588_v11 = vmul.bf16 1056980736, %v16333_v24  ;;  %v6329_v28 = vadd.bf16 1065369472, %v16286_v1 }
 0x442   : > { %20586 = vst [vmem:[#allocation36_spill] sm:$0xff] %v16410_v9  ;;  %v20589_v5 = vmul.bf16 1056980736, %v16143_v10  ;;  %v9839_v49 = vpop.eup %9838  ;;  %v20590_v62 = vmul.bf16 1056980736, %v16347_v60  ;;  %v16424_v55 = vpop.f32.mrf.mxu0 }
 0x443   : > { %9864 = vtanh.bf16 %v20588_v11  ;;  %v16426_v44 = vpop.f32.mrf.mxu1  ;;  %6997 = vmatprep.subr.bf16.mxu0 %v6474_v2  ;;  %v20592_v8 = vmul.bf16 1056980736, %v16169_v21  ;;  %v6314_v1 = vadd.bf16 1065369472, %v9833_v23  ;;  %v9841_v52 = vpop.eup %9840  ;;  %v20593_v10 = vmul.bf16 1056980736, %v16341_v39 }
 0x444   : > { %v6473_v20 = vmul.bf16 %v6345_v53, %v20589_v5  ;;  %9866 = vtanh.bf16 %v20590_v62  ;;  %20591 = vst [vmem:[#allocation38_spill] sm:$0xff] %v16426_v44  ;;  %6844 = vmatmul.mubr.bf16.gmra.mxu0 %v15898_v16  ;;  %v6331_v53 = vadd.bf16 1065369472, %v9835_v32  ;;  %v20594_v5 = vmul.bf16 1056980736, %v16146_v35  ;;  %v9843_v44 = vpop.eup %9842  ;;  %v16442_v23 = vpop.f32.mrf.mxu0 }
 0x445   : > { %v6476_v11 = vmul.bf16 %v6348_v6, %v20592_v8  ;;  %9868 = vtanh.bf16 %v20593_v10  ;;  %v20595_v62 = vmul.bf16 1056980736, %v16103_v50  ;;  %6853 = vmatprep.mubr.bf16.mxu0 %v20058_v22  ;;  %v5977_v2 = vmul.bf16 1056980736, %v16100_v14  ;;  %v16444_v6 = vpop.f32.mrf.mxu1  ;;  %v9845_v32 = vpop.eup %9844 }
 0x446   : > { %v6475_v40 = vmul.bf16 %v6347_v63, %v20594_v5  ;;  %6998 = vmatpush1.bf16.msra.mxu0 %v6473_v20  ;;  %v20596_v21 = vmul.bf16 1056980736, %v16330_v45  ;;  %6957 = vmatmul.mubr.bf16.gmra.mxu1 %v15898_v16  ;;  %v20597_v35 = vmul.bf16 1056980736, %v16112_v57  ;;  %v6316_v50 = vadd.bf16 1065369472, %v9837_v26  ;;  %v9847_v16 = vpop.eup %9846  ;;  %v16455_v57 = vpop.f32.mrf.mxu0 }
 0x447   : > { %v6458_v9 = vmul.bf16 %v6330_v18, %v20595_v62  ;;  %7110 = vmatprep.subr.bf16.mxu1 %v6476_v11  ;;  %v20598_v18 = vmul.bf16 1056980736, %v16314_v19  ;;  %v6313_v63 = vadd.bf16 1065369472, %v9839_v49  ;;  %v20599_v8 = vmul.bf16 1056980736, %v16093_v33  ;;  %6966 = vmatprep.mubr.bf16.mxu1 %v20058_v22  ;;  %v9849_v49 = vpop.eup %9848 }
 0x448   : > { %9870 = vtanh.bf16 %v20596_v21  ;;  %v6460_v20 = vmul.bf16 %v6332_v31, %v20597_v35  ;;  %7111 = vmatpush1.bf16.msra.mxu1 %v6475_v40  ;;  %v19379_v11 = vmul.bf16 1056980736, %v16361_v13  ;;  %v20600_v5 = vmul.bf16 1056980736, %v16378_v7  ;;  %v16457_v31 = vpop.f32.mrf.mxu1  ;;  %v9851_v35 = vpop.eup %9850 }
 0x449   : > { %9872 = vtanh.bf16 %v20598_v18  ;;  %v6457_v10 = vmul.bf16 %v6329_v28, %v20599_v8  ;;  %6999 = vmatprep.subr.bf16.mxu0 %v6458_v9  ;;  %v20601_v26 = vmul.bf16 1056980736, %v16137_v43  ;;  %v6298_v33 = vadd.bf16 1065369472, %v9841_v52  ;;  %v9853_v8 = vpop.eup %9852 }
 0x44a   : > { %9874 = vtanh.bf16 %v20600_v5  ;;  %7112 = vmatprep.subr.bf16.mxu1 %v6460_v20  ;;  %v20602_v9 = vmul.bf16 1056980736, %v16367_v30  ;;  %v6315_v40 = vadd.bf16 1065369472, %v9843_v44  ;;  %v20603_v28 = vmul.bf16 1056980736, %v16154_v0  ;;  %v16468_v20 = vpop.f32.mrf.mxu0  ;;  %v16470_v43 = vpop.f32.mrf.mxu1 }
 0x44b   : > { %v6442_v62 = vmul.bf16 %v6314_v1, %v20601_v26  ;;  %7000 = vmatpush1.bf16.msra.mxu0 %v6457_v10  ;;  %v20604_v1 = vmul.bf16 1056980736, %v16151_v27  ;;  %v6300_v18 = vadd.bf16 1065369472, %v9845_v32  ;;  %v6297_v5 = vadd.bf16 1065369472, %v9847_v16 }
 0x44c   : > { %9876 = vtanh.bf16 %v20602_v9  ;;  %v6459_v21 = vmul.bf16 %v6331_v53, %v20603_v28  ;;  %v20605_v44 = vmul.bf16 1056980736, %v16178_v51  ;;  %v9855_v53 = vpop.eup %9854  ;;  %v16478_v10 = vpop.f32.mrf.mxu0  ;;  %v20607_v27 = vmul.bf16 1056980736, %v16175_v17 }
 0x44d   : > { %9878 = vtanh.bf16 %v5977_v2  ;;  %7001 = vmatprep.subr.bf16.mxu0 %v6442_v62  ;;  %v6444_v52 = vmul.bf16 %v6316_v50, %v20604_v1  ;;  %v16480_v26 = vpop.f32.mrf.mxu1  ;;  %v20606_v62 = vld [vmem:[#allocation28_spill] sm:$0xff]  ;;  %v6282_v32 = vadd.bf16 1065369472, %v9849_v49  ;;  %v9857_v16 = vpop.eup %9856  ;;  %v6299_v9 = vadd.bf16 1065369472, %v9851_v35 }
 0x44e   : > { %v6441_v0 = vmul.bf16 %v6313_v63, %v20605_v44  ;;  %7113 = vmatpush1.bf16.msra.mxu1 %v6459_v21  ;;  %9880 = vtanh.bf16 %v19379_v11  ;;  %6854 = vmatmul.mubr.bf16.gmra.mxu0 %v20606_v62  ;;  %v6426_v50 = vmul.bf16 %v6298_v33, %v20607_v27  ;;  %v20608_v51 = vmul.bf16 1056980736, %v16197_v54  ;;  %v9859_v28 = vpop.eup %9858  ;;  %v16489_v21 = vpop.f32.mrf.mxu0 }
 0x44f   : > { %7114 = vmatprep.subr.bf16.mxu1 %v6444_v52  ;;  %6863 = vmatprep.mubr.bf16.mxu0 %v20058_v22  ;;  %v16491_v1 = vpop.f32.mrf.mxu1  ;;  %v20609_v17 = vmul.bf16 1056980736, %v16194_v48  ;;  %v6284_v49 = vadd.bf16 1065369472, %v9853_v8  ;;  %v9861_v52 = vpop.eup %9860  ;;  %v6281_v35 = vadd.bf16 1065369472, %v9855_v53 }
 0x450   : > { %v6443_v63 = vmul.bf16 %v6315_v40, %v20608_v51  ;;  %7002 = vmatpush1.bf16.msra.mxu0 %v6441_v0  ;;  %6967 = vmatmul.mubr.bf16.gmra.mxu1 %v20606_v62  ;;  %v20610_v54 = vmul.bf16 1056980736, %v16216_v56  ;;  %v9863_v44 = vpop.eup %9862  ;;  %v16498_v0 = vpop.f32.mrf.mxu0  ;;  %v20611_v27 = vmul.bf16 1056980736, %v16231_v34  ;;  %v6266_v48 = vadd.bf16 1065369472, %v9857_v16 }
 0x451   : > { %7003 = vmatprep.subr.bf16.mxu0 %v6426_v50  ;;  %v6428_v33 = vmul.bf16 %v6300_v18, %v20609_v17  ;;  %6976 = vmatprep.mubr.bf16.mxu1 %v20058_v22  ;;  %v16500_v62 = vpop.f32.mrf.mxu1  ;;  %v9865_v18 = vpop.eup %9864  ;;  %v6283_v8 = vadd.bf16 1065369472, %v9859_v28  ;;  %v20612_v53 = vmul.bf16 1056980736, %v16239_v29  ;;  %v20613_v17 = vmul.bf16 1056980736, %v16255_v59 }
 0x452   : > { %v6425_v40 = vmul.bf16 %v6297_v5, %v20610_v54  ;;  %7115 = vmatpush1.bf16.msra.mxu1 %v6443_v63  ;;  %v6410_v50 = vmul.bf16 %v6282_v32, %v20611_v27  ;;  %v9867_v56 = vpop.eup %9866  ;;  %v16506_v5 = vpop.f32.mrf.mxu0  ;;  %v6268_v54 = vadd.bf16 1065369472, %v9861_v52  ;;  %v6265_v34 = vadd.bf16 1065369472, %v9863_v44 }
 0x453   : > { %7116 = vmatprep.subr.bf16.mxu1 %v6428_v33  ;;  %v6427_v51 = vmul.bf16 %v6299_v9, %v20612_v53  ;;  %v16508_v63 = vpop.f32.mrf.mxu1  ;;  %v6412_v33 = vmul.bf16 %v6284_v49, %v20613_v17  ;;  %v9869_v11 = vpop.eup %9868  ;;  %v20614_v32 = vmul.bf16 1056980736, %v16264_v42  ;;  %v6250_v59 = vadd.bf16 1065369472, %v9865_v18 }
 0x454   : > { %7004 = vmatpush1.bf16.msra.mxu0 %v6425_v40  ;;  %v16514_v29 = vpop.f32.mrf.mxu0  ;;  %v20615_v40 = vmul.bf16 1056980736, %v16280_v41  ;;  %v6267_v52 = vadd.bf16 1065369472, %v9867_v56  ;;  %v20616_v44 = vmul.bf16 1056980736, %v16292_v47 }
 0x455   : > { %7005 = vmatprep.subr.bf16.mxu0 %v6410_v50  ;;  %v6409_v16 = vmul.bf16 %v6281_v35, %v20614_v32  ;;  %v16516_v9 = vpop.f32.mrf.mxu1  ;;  %v20617_v41 = vmul.bf16 1056980736, %v16289_v46  ;;  %v6252_v18 = vadd.bf16 1065369472, %v9869_v11  ;;  %v20618_v47 = vmul.bf16 1056980736, %v16317_v12 }
 0x456   : > { %7117 = vmatpush1.bf16.msra.mxu1 %v6427_v51  ;;  %v9871_v28 = vpop.eup %9870  ;;  %6864 = vmatmul.mubr.bf16.gmra.mxu0 %v16023_v61  ;;  %v6394_v27 = vmul.bf16 %v6266_v48, %v20615_v40  ;;  %v6411_v50 = vmul.bf16 %v6283_v8, %v20616_v44  ;;  %v16525_v35 = vpop.f32.mrf.mxu0  ;;  %v20619_v32 = vmul.bf16 1056980736, %v16333_v24  ;;  %v20620_v11 = vmul.bf16 1056980736, %v16347_v60 }
 0x457   : > { %7118 = vmatprep.subr.bf16.mxu1 %v6412_v33  ;;  %v9873_v49 = vpop.eup %9872  ;;  %6873 = vmatprep.mubr.bf16.mxu0 %v20058_v22  ;;  %v16527_v53 = vpop.f32.mrf.mxu1  ;;  %v6396_v48 = vmul.bf16 %v6268_v54, %v20617_v41  ;;  %v6249_v56 = vadd.bf16 1065369472, %v9871_v28  ;;  %v6393_v8 = vmul.bf16 %v6265_v34, %v20618_v47  ;;  %v20622_v24 = vmul.bf16 1056980736, %v16330_v45 }
 0x458   : > { %7006 = vmatpush1.bf16.msra.mxu0 %v6409_v16  ;;  %v9875_v42 = vpop.eup %9874  ;;  %6977 = vmatmul.mubr.bf16.gmra.mxu1 %v16023_v61  ;;  %v16534_v61 = vpop.f32.mrf.mxu0  ;;  %v6378_v16 = vmul.bf16 %v6250_v59, %v20619_v32  ;;  %v6234_v46 = vadd.bf16 1065369472, %v9873_v49  ;;  %v6395_v28 = vmul.bf16 %v6267_v52, %v20620_v11  ;;  %v20623_v52 = vmul.bf16 1056980736, %v16314_v19 }
 0x459   : > { %7007 = vmatprep.subr.bf16.mxu0 %v6394_v27  ;;  %6986 = vmatprep.mubr.bf16.mxu1 %v20058_v22  ;;  %v16536_v33 = vpop.f32.mrf.mxu1  ;;  %v6251_v54 = vadd.bf16 1065369472, %v9875_v42  ;;  %v20621_v27 = vmul.bf16 1056980736, %v16341_v39  ;;  %v6377_v59 = vmul.bf16 %v6249_v56, %v20622_v24  ;;  %v20624_v47 = vmul.bf16 1056980736, %v16378_v7 }
 0x45a   : > { %v9877_v51 = vpop.eup %9876  ;;  %7119 = vmatpush1.bf16.msra.mxu1 %v6411_v50  ;;  %v16542_v34 = vpop.f32.mrf.mxu0  ;;  %v6362_v42 = vmul.bf16 %v6234_v46, %v20623_v52  ;;  %v5470_v24 = vpack.c.bf16 %v16221_v3, %v16183_v25 }
 0x45b   : > { %v9879_v17 = vpop.eup %9878  ;;  %7120 = vmatprep.subr.bf16.mxu1 %v6396_v48  ;;  %v16544_v40 = vpop.f32.mrf.mxu1  ;;  %v6380_v44 = vmul.bf16 %v6252_v18, %v20621_v27  ;;  %v6236_v50 = vadd.bf16 1065369472, %v9877_v51  ;;  %v6379_v39 = vmul.bf16 %v6251_v54, %v20624_v47  ;;  %v20625_v51 = vmul.bf16 1056980736, %v16367_v30 }
 0x45c   : > { %7008 = vmatpush1.bf16.msra.mxu0 %v6393_v8  ;;  %v9881_v12 = vpop.eup %9880  ;;  %v6233_v41 = vadd.bf16 1065369472, %v9879_v17  ;;  %v5325_v49 = vpop.f32.mrf.mxu0  ;;  %v20626_v17 = vmul.bf16 1056980736, %v16361_v13  ;;  %v5536_v47 = vpack.c.bf16 %v16508_v63, %v16491_v1 }
 0x45d   : > { %7009 = vmatprep.subr.bf16.mxu0 %v6378_v16  ;;  %v16550_v60 = vpop.f32.mrf.mxu1  ;;  %v6235_v48 = vadd.bf16 1065369472, %v9881_v12  ;;  %v6364_v56 = vmul.bf16 %v6236_v50, %v20625_v51  ;;  %v5550_v12 = vpack.c.bf16 %v16542_v34, %v16525_v35  ;;  %v5552_v35 = vpack.c.bf16 %v16544_v40, %v16527_v53  ;;  %v16626_v51 = vld [vmem:[%s18935_s7 + $0x8] sm:$0xff]  }
 0x45e   : > { %7121 = vmatpush1.bf16.msra.mxu1 %v6395_v28  ;;  %6874 = vmatmul.mubr.bf16.gmra.mxu0 %v16064_v36  ;;  %v5327_v45 = vpop.f32.mrf.mxu0  ;;  %v6361_v8 = vmul.bf16 %v6233_v41, %v5977_v2  ;;  %v16572_v28 = vld [vmem:[%s18935_s7] sm:$0xff]  }
 0x45f   : > { %7122 = vmatprep.subr.bf16.mxu1 %v6380_v44  ;;  %7029 = vmatprep.mubr.bf16.mxu0 %v20058_v22  ;;  %v5440_v18 = vpop.f32.mrf.mxu1  ;;  %v6363_v32 = vmul.bf16 %v6235_v48, %v20626_v17  ;;  %v5534_v48 = vpack.c.bf16 %v16506_v5, %v16489_v21 }
 0x460   : > { %7010 = vmatpush1.bf16.msra.mxu0 %v6377_v59  ;;  %6987 = vmatmul.mubr.bf16.gmra.mxu1 %v16064_v36  ;;  %v5329_v7 = vpop.f32.mrf.mxu0  ;;  %v5518_v59 = vpack.c.bf16 %v16468_v20, %v16442_v23  ;;  %v5549_v23 = vpack.c.bf16 %v16534_v61, %v16514_v29  ;;  %v16602_v20 = vadd.bf16 %v20524_v38, %v5550_v12 }
 0x461   : > { %7011 = vmatprep.subr.bf16.mxu0 %v6362_v42  ;;  %7142 = vmatprep.mubr.bf16.mxu1 %v20058_v22  ;;  %v5442_v19 = vpop.f32.mrf.mxu1  ;;  %v5565_v16 = vpack.c.bf16 %v5329_v7, %v5325_v49  ;;  %v5551_v29 = vpack.c.bf16 %v16536_v33, %v16516_v9  ;;  %v16616_v61 = vadd.bf16 %v20524_v38, %v5552_v35 }
 0x462   : > { %7123 = vmatpush1.bf16.msra.mxu1 %v6379_v39  ;;  %v5331_v36 = vpop.f32.mrf.mxu0  ;;  %v5567_v34 = vpack.c.bf16 %v5442_v19, %v16550_v60  ;;  %v16641_v7 = vadd.bf16 %v20529_v15, %v5534_v48  ;;  %v16644_v19 = vadd.bf16 %v20524_v38, %v5549_v23  ;;  %v19390_v17 = vmul.bf16 1056980736, %v16602_v20 }
 0x463   : > { %7124 = vmatprep.subr.bf16.mxu1 %v6364_v56  ;;  %v5444_v46 = vpop.f32.mrf.mxu1  ;;  %v16567_v54 = vadd.bf16 %v15122_v37, %v5565_v16  ;;  %v5566_v30 = vpack.c.bf16 %v5331_v36, %v5327_v45  ;;  %v5520_v36 = vpack.c.bf16 %v16470_v43, %v16444_v6  ;;  %v20627_v6 = vld [vmem:[#allocation20_spill] sm:$0xff] }
 0x464   : > { %7012 = vmatpush1.bf16.msra.mxu0 %v6361_v8  ;;  %v5568_v14 = vpack.c.bf16 %v5444_v46, %v5440_v18  ;;  %v5335_v2 = vpop.f32.mrf.mxu0  ;;  %v16619_v18 = vadd.bf16 %v15122_v37, %v5567_v34  ;;  %v5533_v8 = vpack.c.bf16 %v16498_v0, %v16478_v10  ;;  %v5535_v0 = vpack.c.bf16 %v16500_v62, %v16480_v26  ;;  %v20632_v34 = vld [vmem:[#allocation24_spill] sm:$0xff] }
 0x465   : > { %v5448_v11 = vpop.f32.mrf.mxu1  ;;  %v16576_v13 = vadd.bf16 %v15122_v37, %v5566_v30  ;;  %v19392_v27 = vmul.bf16 1056980736, %v16567_v54  ;;  %v16666_v46 = vadd.bf16 %v20529_v15, %v5536_v47  ;;  %v19388_v30 = vmul.bf16 1056980736, %v16616_v61 }
 0x466   : > { %7125 = vmatpush1.bf16.msra.mxu1 %v6363_v32  ;;  %v16583_v44 = vadd.bf16 %v15122_v37, %v5568_v14  ;;  %v5337_v50 = vpop.f32.mrf.mxu0  ;;  %v16658_v32 = vadd.bf16 %v20524_v38, %v5551_v29  ;;  %v19389_v16 = vmul.bf16 1056980736, %v16619_v18  ;;  %v5517_v38 = vpack.c.bf16 %v16455_v57, %v16424_v55  ;;  %v20628_v14 = vld [vmem:[#allocation18_spill] sm:$0xff]  ;;  %v20637_v29 = vld [vmem:[#allocation12_spill] sm:$0xff] }
 0x467   : > { %7030 = vmatmul.mubr.bf16.vlgmr.msra.gmra.mxu0 %v16572_v28  ;;  %v5450_v41 = vpop.f32.mrf.mxu1  ;;  %v6078_v49 = vmul.bf16 1056980736, %v16576_v13  ;;  %9882 = vtanh.bf16 %v19392_v27  ;;  %v16674_v26 = vadd.bf16 %v20529_v15, %v5533_v8  ;;  %v19386_v62 = vmul.bf16 1056980736, %v16644_v19  ;;  %v20629_v55 = vld [vmem:[#allocation38_spill] sm:$0xff]  ;;  %v20638_v8 = vld [vmem:[#allocation33_spill] sm:$0xff] }
 0x468   : > { %7039 = vmatprep.mubr.bf16.mxu0 %v20058_v22  ;;  %v5339_v52 = vpop.f32.mrf.mxu0  ;;  %v6080_v53 = vmul.bf16 1056980736, %v16583_v44  ;;  %v5502_v43 = vpack.c.bf16 %v16408_v4, %v20627_v6  ;;  %v5519_v57 = vpack.c.bf16 %v16457_v31, %v20629_v55  ;;  %v16690_v12 = vadd.bf16 %v20529_v15, %v5535_v0  ;;  %v16698_v4 = vld [vmem:[%s18935_s7 + $0x10] sm:$0xff]   ;;  %v20639_v6 = vld [vmem:[#allocation21_spill] sm:$0xff] }
 0x469   : > { %7143 = vmatmul.mubr.bf16.vlgmr.msra.gmra.mxu1 %v16572_v28  ;;  %v5452_v42 = vpop.f32.mrf.mxu1  ;;  %v5581_v39 = vpack.c.bf16 %v5339_v52, %v5335_v2  ;;  %9884 = vtanh.bf16 %v6078_v49  ;;  %v16682_v2 = vadd.bf16 %v20628_v14, %v5518_v59  ;;  %v20631_v59 = vld [vmem:[#allocation36_spill] sm:$0xff]  ;;  %v16704_v31 = vadd.bf16 %v20628_v14, %v5520_v36  ;;  %v20633_v52 = vld [vmem:[#allocation13_spill] sm:$0xff] }
 0x46a   : > { %7152 = vmatprep.mubr.bf16.mxu1 %v20058_v22  ;;  %v5583_v45 = vpack.c.bf16 %v5452_v42, %v5448_v11  ;;  %v5341_v40 = vpop.f32.mrf.mxu0  ;;  %9886 = vtanh.bf16 %v6080_v53  ;;  %v19385_v11 = vmul.bf16 1056980736, %v16641_v7  ;;  %v19380_v15 = vmul.bf16 1056980736, %v16666_v46 }
 0x46b   : > { %v5454_v60 = vpop.f32.mrf.mxu1  ;;  %v16608_v21 = vadd.bf16 %v20525_v58, %v5581_v39  ;;  %v5582_v5 = vpack.c.bf16 %v5341_v40, %v5337_v50  ;;  %v19382_v50 = vmul.bf16 1056980736, %v16658_v32  ;;  %v5501_v42 = vpack.c.bf16 %v20633_v52, %v20632_v34  ;;  %v20634_v39 = vld [vmem:[#allocation27_spill] sm:$0xff]  ;;  %v20636_v40 = vld [vmem:[#allocation29_spill] sm:$0xff] }
 0x46c   : > { %v16611_v1 = vadd.bf16 %v20525_v58, %v5583_v45  ;;  %v5584_v63 = vpack.c.bf16 %v5454_v60, %v5450_v41  ;;  %v20630_v41 = vld [vmem:[#allocation6_spill] sm:$0xff]  ;;  %v16713_v48 = vadd.bf16 %v20628_v14, %v5517_v38  ;;  %v19381_v47 = vmul.bf16 1056980736, %v16674_v26  ;;  %v20635_v45 = vld [vmem:[#allocation19_spill] sm:$0xff] }
 0x46d   : > { %v6093_v56 = vmul.bf16 1056980736, %v16608_v21  ;;  %v16632_v33 = vadd.bf16 %v20525_v58, %v5582_v5  ;;  %v5504_v35 = vpack.c.bf16 %v20631_v59, %v20630_v41  ;;  %v5486_v23 = vpack.c.bf16 %v20635_v45, %v20634_v39  ;;  %v20643_v45 = vld [vmem:[#allocation34_spill] sm:$0xff] }
 0x46e   : > { %v6095_v9 = vmul.bf16 1056980736, %v16611_v1  ;;  %v16635_v37 = vadd.bf16 %v20525_v58, %v5584_v63  ;;  %v16722_v60 = vadd.bf16 %v20636_v40, %v5502_v43  ;;  %v19383_v5 = vmul.bf16 1056980736, %v16682_v2  ;;  %v20640_v43 = vld [vmem:[#allocation22_spill] sm:$0xff] }
 0x46f   : > { %7040 = vmatmul.mubr.bf16.gmra.mxu0 %v16626_v51  ;;  %9888 = vtanh.bf16 %v6093_v56  ;;  %v6094_v58 = vmul.bf16 1056980736, %v16632_v33  ;;  %v5472_v0 = vpack.c.bf16 %v20638_v8, %v20637_v29  ;;  %v16733_v36 = vadd.bf16 %v20628_v14, %v5519_v57  ;;  %v20641_v14 = vld [vmem:[#allocation39_spill] sm:$0xff]  ;;  %v16849_v33 = vld [vmem:[%s18935_s7 + $0x20] sm:$0xff]  }
 0x470   : > { %7049 = vmatprep.mubr.bf16.mxu0 %v20058_v22  ;;  %v6096_v10 = vmul.bf16 1056980736, %v16635_v37  ;;  %9890 = vtanh.bf16 %v6095_v9  ;;  %v19384_v38 = vmul.bf16 1056980736, %v16690_v12  ;;  %v5488_v55 = vpack.c.bf16 %v20640_v43, %v20639_v6  ;;  %v20645_v6 = vld [vmem:[#allocation8_spill] sm:$0xff] }
 0x471   : > { %7153 = vmatmul.mubr.bf16.gmra.mxu1 %v16626_v51  ;;  %9892 = vtanh.bf16 %v6094_v58  ;;  %v16741_v41 = vadd.bf16 %v20636_v40, %v5504_v35  ;;  %v19387_v59 = vmul.bf16 1056980736, %v16704_v31  ;;  %v16750_v57 = vadd.bf16 %v20641_v14, %v5470_v24  ;;  %v20642_v35 = vld [vmem:[#allocation11_spill] sm:$0xff] }
 0x472   : > { %7162 = vmatprep.mubr.bf16.mxu1 %v20058_v22  ;;  %9894 = vtanh.bf16 %v6096_v10  ;;  %v16753_v52 = vadd.bf16 %v20636_v40, %v5501_v42  ;;  %v19391_v39 = vmul.bf16 1056980736, %v16713_v48  ;;  %v20644_v29 = vpack.c.bf16 %v20642_v35, %v20643_v45  ;;  %v20646_v24 = vld [vmem:[#allocation23_spill] sm:$0xff]  ;;  %v20647_v42 = vld [vmem:[#allocation40_spill] sm:$0xff]  ;;  %v20649_v35 = vld [vmem:[#allocation17_spill] sm:$0xff] }
 0x473   : > { %9896 = vtanh.bf16 %v19390_v17  ;;  %v16765_v43 = vadd.bf16 %v20645_v6, %v5486_v23  ;;  %v19393_v3 = vmul.bf16 1056980736, %v16722_v60  ;;  %v20650_v45 = vld [vmem:[#allocation35_spill] sm:$0xff]  ;;  %v19394_v23 = vmul.bf16 1056980736, %v16733_v36 }
 0x474   : > { %9898 = vtanh.bf16 %v19389_v16  ;;  %v16762_v8 = vadd.bf16 %v20641_v14, %v20644_v29  ;;  %v20651_v29 = vpack.c.bf16 %v20649_v35, %v20650_v45  ;;  %v20660_v44 = vmul.bf16 1056980736, %v16602_v20 }
 0x475   : > { %9900 = vtanh.bf16 %v19388_v30  ;;  %v16728_v63 = vpop.eup %9882  ;;  %v5998_v17 = vmul.bf16 1056980736, %v16765_v43  ;;  %v20662_v20 = vmul.bf16 1056980736, %v16616_v61  ;;  %v20664_v61 = vmul.bf16 1056980736, %v16641_v7 }
 0x476   : > { %9902 = vtanh.bf16 %v19386_v62 }
 0x477   : > { %7050 = vmatmul.mubr.bf16.gmra.mxu0 %v16698_v4  ;;  %9904 = vtanh.bf16 %v19385_v11  ;;  %v9885_v34 = vpop.eup %9884 }
 0x478   : > { %7059 = vmatprep.mubr.bf16.mxu0 %v20058_v22  ;;  %9906 = vtanh.bf16 %v19382_v50  ;;  %v16770_v25 = vpop.eup %9886  ;;  %v16782_v50 = vadd.bf16 %v20636_v40, %v20651_v29  ;;  %v19395_v40 = vmul.bf16 1056980736, %v16741_v41  ;;  %v20652_v29 = vld [vmem:[#allocation9_spill] sm:$0xff]  ;;  %v6334_v27 = vadd.bf16 1065369472, %v9885_v34 }
 0x479   : > { %7163 = vmatmul.mubr.bf16.gmra.mxu1 %v16698_v4  ;;  %9908 = vtanh.bf16 %v19380_v15  ;;  %v20648_v15 = vpack.c.bf16 %v20646_v24, %v20647_v42  ;;  %v16794_v24 = vadd.bf16 %v20641_v14, %v5472_v0  ;;  %v16797_v42 = vadd.bf16 %v20645_v6, %v5488_v55 }
 0x47a   : > { %7172 = vmatprep.mubr.bf16.mxu1 %v20058_v22  ;;  %9910 = vtanh.bf16 %v19381_v47  ;;  %v19396_v0 = vmul.bf16 1056980736, %v16753_v52  ;;  %v6462_v21 = vmul.bf16 %v6334_v27, %v6078_v49 }
 0x47b   : > { %9912 = vtanh.bf16 %v19383_v5  ;;  %v16776_v47 = vadd.bf16 %v20641_v14, %v20648_v15  ;;  %v16790_v5 = vld [vmem:[%s18935_s7 + $0x18] sm:$0xff]   ;;  %v20655_v14 = vld [vmem:[#allocation15_spill] sm:$0xff] }
 0x47c   : > { %9914 = vtanh.bf16 %v19384_v38  ;;  %v20653_v38 = vld [vmem:[#allocation31_spill] sm:$0xff] }
 0x47d   : > { %v9889_v15 = vpop.eup %9888  ;;  %9916 = vtanh.bf16 %v19387_v59  ;;  %v20654_v11 = vpack.c.bf16 %v20652_v29, %v20653_v38  ;;  %v20656_v59 = vld [vmem:[#allocation37_spill] sm:$0xff]  ;;  %v6015_v29 = vmul.bf16 1056980736, %v16782_v50  ;;  %v20676_v50 = vmul.bf16 1056980736, %v16750_v57 }
 0x47e   : > { %v9891_v35 = vpop.eup %9890  ;;  %9918 = vtanh.bf16 %v19391_v39  ;;  %v20657_v30 = vpack.c.bf16 %v20655_v14, %v20656_v59 }
 0x47f   : > { %7060 = vmatmul.mubr.bf16.gmra.mxu0 %v16790_v5  ;;  %v16808_v62 = vadd.bf16 %v20645_v6, %v20654_v11  ;;  %v9893_v55 = vpop.eup %9892  ;;  %9920 = vtanh.bf16 %v19393_v3  ;;  %v6349_v11 = vadd.bf16 1065369472, %v9889_v15 }
 0x480   : > { %7069 = vmatprep.mubr.bf16.mxu0 %v20058_v22  ;;  %v16818_v16 = vadd.bf16 %v20645_v6, %v20657_v30  ;;  %v9895_v38 = vpop.eup %9894  ;;  %9922 = vtanh.bf16 %v19394_v23  ;;  %v6350_v39 = vadd.bf16 1065369472, %v9893_v55  ;;  %v6000_v30 = vmul.bf16 1056980736, %v16797_v42 }
 0x481   : > { %7173 = vmatmul.mubr.bf16.gmra.mxu1 %v16790_v5  ;;  %v9897_v59 = vpop.eup %9896  ;;  %9924 = vtanh.bf16 %v19395_v40  ;;  %v6351_v6 = vadd.bf16 1065369472, %v9891_v35  ;;  %v6352_v14 = vadd.bf16 1065369472, %v9895_v38  ;;  %v5997_v15 = vmul.bf16 1056980736, %v16808_v62 }
 0x482   : > { %7182 = vmatprep.mubr.bf16.mxu1 %v20058_v22  ;;  %v9899_v3 = vpop.eup %9898  ;;  %9926 = vtanh.bf16 %v19396_v0  ;;  %v6478_v45 = vmul.bf16 %v6350_v39, %v6094_v58  ;;  %v6336_v55 = vadd.bf16 1065369472, %v16770_v25  ;;  %v6333_v23 = vadd.bf16 1065369472, %v16728_v63 }
 0x483   : > { %v9901_v34 = vpop.eup %9900  ;;  %9928 = vtanh.bf16 %v5998_v17  ;;  %v6477_v35 = vmul.bf16 %v6349_v11, %v6093_v56  ;;  %v6480_v38 = vmul.bf16 %v6352_v14, %v6096_v10  ;;  %v5999_v0 = vmul.bf16 1056980736, %v16818_v16 }
 0x484   : > { %v9903_v40 = vpop.eup %9902  ;;  %9930 = vtanh.bf16 %v6015_v29  ;;  %7223 = vmatprep.subr.bf16.mxu0 %v6478_v45  ;;  %v6318_v56 = vadd.bf16 1065369472, %v9897_v59  ;;  %v5984_v58 = vmul.bf16 1056980736, %v16794_v24  ;;  %v6335_v10 = vadd.bf16 1065369472, %v9899_v3 }
 0x485   : > { %v9905_v37 = vpop.eup %9904  ;;  %9932 = vtanh.bf16 %v6000_v30  ;;  %v6479_v63 = vmul.bf16 %v6351_v6, %v6095_v9  ;;  %7336 = vmatprep.subr.bf16.mxu1 %v6480_v38  ;;  %7224 = vmatpush1.bf16.msra.mxu0 %v6477_v35  ;;  %v5981_v25 = vmul.bf16 1056980736, %v16762_v8  ;;  %v6464_v13 = vmul.bf16 %v6336_v55, %v6080_v53 }
 0x486   : > { %v9907_v39 = vpop.eup %9906  ;;  %9934 = vtanh.bf16 %v5997_v15  ;;  %7225 = vmatprep.subr.bf16.mxu0 %v6462_v21  ;;  %v6320_v27 = vadd.bf16 1065369472, %v9901_v34  ;;  %v20658_v3 = vmul.bf16 1056980736, %v16750_v57  ;;  %v6317_v1 = vadd.bf16 1065369472, %v9903_v40  ;;  %v16955_v57 = vpop.permute.xlu1 %7775 }
 0x487   : > { %7070 = vmatmul.mubr.bf16.gmra.mxu0 %v16849_v33  ;;  %v9909_v49 = vpop.eup %9908  ;;  %v20659_v9 = vmul.bf16 1056980736, %v16567_v54  ;;  %7337 = vmatpush1.bf16.msra.mxu1 %v6479_v63  ;;  %v5983_v59 = vmul.bf16 1056980736, %v16776_v47  ;;  %v6446_v53 = vmul.bf16 %v6318_v56, %v20660_v44  ;;  %v6302_v6 = vadd.bf16 1065369472, %v9905_v37 }
 0x488   : > { %9936 = vtanh.bf16 %v20658_v3  ;;  %7079 = vmatprep.mubr.bf16.mxu0 %v20058_v22  ;;  %v9911_v11 = vpop.eup %9910  ;;  %7338 = vmatprep.subr.bf16.mxu1 %v6464_v13  ;;  %v6319_v54 = vadd.bf16 1065369472, %v9907_v39  ;;  %v6448_v34 = vmul.bf16 %v6320_v27, %v20662_v20  ;;  %v6304_v35 = vadd.bf16 1065369472, %v9909_v49 }
 0x489   : > { %7183 = vmatmul.mubr.bf16.gmra.mxu1 %v16849_v33  ;;  %v6461_v45 = vmul.bf16 %v6333_v23, %v20659_v9  ;;  %9938 = vtanh.bf16 %v5999_v0  ;;  %v9913_v40 = vpop.eup %9912  ;;  %v20661_v23 = vmul.bf16 1056980736, %v16619_v18  ;;  %v6301_v21 = vadd.bf16 1065369472, %v9911_v11  ;;  %v16891_v18 = vld [vmem:[%s18935_s7 + $0x28] sm:$0xff]  }
 0x48a   : > { %7192 = vmatprep.mubr.bf16.mxu1 %v20058_v22  ;;  %9940 = vtanh.bf16 %v5984_v58  ;;  %v9915_v55 = vpop.eup %9914  ;;  %v20663_v56 = vmul.bf16 1056980736, %v16644_v19  ;;  %v6286_v39 = vadd.bf16 1065369472, %v9913_v40  ;;  %v20665_v27 = vmul.bf16 1056980736, %v16658_v32  ;;  %v16972_v47 = vpop.permute.xlu1 %7751 }
 0x48b   : > { %v6463_v14 = vmul.bf16 %v6335_v10, %v20661_v23  ;;  %7226 = vmatpush1.bf16.msra.mxu0 %v6461_v45  ;;  %9942 = vtanh.bf16 %v5981_v25  ;;  %v9917_v38 = vpop.eup %9916  ;;  %v6430_v10 = vmul.bf16 %v6302_v6, %v20664_v61  ;;  %v6303_v19 = vadd.bf16 1065369472, %v9915_v55 }
 0x48c   : > { %7227 = vmatprep.subr.bf16.mxu0 %v6446_v53  ;;  %v6445_v37 = vmul.bf16 %v6317_v1, %v20663_v56  ;;  %v9919_v63 = vpop.eup %9918  ;;  %9944 = vtanh.bf16 %v5983_v59  ;;  %v6447_v49 = vmul.bf16 %v6319_v54, %v20665_v27  ;;  %v20666_v1 = vmul.bf16 1056980736, %v16666_v46 }
 0x48d   : > { %7339 = vmatpush1.bf16.msra.mxu1 %v6463_v14  ;;  %v9921_v13 = vpop.eup %9920  ;;  %v6288_v45 = vadd.bf16 1065369472, %v9917_v38  ;;  %v6285_v7 = vadd.bf16 1065369472, %v9919_v63  ;;  %v20667_v44 = vmul.bf16 1056980736, %v16674_v26 }
 0x48e   : > { %7340 = vmatprep.subr.bf16.mxu1 %v6448_v34  ;;  %v9923_v3 = vpop.eup %9922  ;;  %v6432_v9 = vmul.bf16 %v6304_v35, %v20666_v1  ;;  %v20668_v6 = vmul.bf16 1056980736, %v16682_v2  ;;  %v6270_v54 = vadd.bf16 1065369472, %v9921_v13  ;;  %v20669_v46 = vmul.bf16 1056980736, %v16690_v12 }
 0x48f   : > { %7080 = vmatmul.mubr.bf16.gmra.mxu0 %v16891_v18  ;;  %v9925_v11 = vpop.eup %9924  ;;  %v6429_v53 = vmul.bf16 %v6301_v21, %v20667_v44  ;;  %v6287_v14 = vadd.bf16 1065369472, %v9923_v3  ;;  %v20670_v26 = vmul.bf16 1056980736, %v16704_v31  ;;  %v20671_v56 = vmul.bf16 1056980736, %v16713_v48 }
 0x490   : > { %7228 = vmatpush1.bf16.msra.mxu0 %v6445_v37  ;;  %7089 = vmatprep.mubr.bf16.mxu0 %v20058_v22  ;;  %v9927_v32 = vpop.eup %9926  ;;  %v6414_v40 = vmul.bf16 %v6286_v39, %v20668_v6  ;;  %v6431_v55 = vmul.bf16 %v6303_v19, %v20669_v46  ;;  %v6272_v35 = vadd.bf16 1065369472, %v9925_v11  ;;  %v16916_v12 = vld [vmem:[%s18935_s7 + $0x30] sm:$0xff]   ;;  %v20672_v63 = vmul.bf16 1056980736, %v16722_v60 }
 0x491   : > { %7193 = vmatmul.mubr.bf16.gmra.mxu1 %v16891_v18  ;;  %7229 = vmatprep.subr.bf16.mxu0 %v6430_v10  ;;  %v9929_v23 = vpop.eup %9928  ;;  %v6416_v34 = vmul.bf16 %v6288_v45, %v20670_v26  ;;  %v6269_v21 = vadd.bf16 1065369472, %v9927_v32  ;;  %v6413_v37 = vmul.bf16 %v6285_v7, %v20671_v56  ;;  %v20673_v13 = vmul.bf16 1056980736, %v16733_v36 }
 0x492   : > { %7341 = vmatpush1.bf16.msra.mxu1 %v6447_v49  ;;  %7202 = vmatprep.mubr.bf16.mxu1 %v20058_v22  ;;  %v9931_v20 = vpop.eup %9930  ;;  %v6398_v31 = vmul.bf16 %v6270_v54, %v20672_v63  ;;  %v6254_v61 = vadd.bf16 1065369472, %v9929_v23  ;;  %v20674_v27 = vmul.bf16 1056980736, %v16741_v41 }
 0x493   : > { %7342 = vmatprep.subr.bf16.mxu1 %v6432_v9  ;;  %v9933_v38 = vpop.eup %9932  ;;  %v6271_v39 = vadd.bf16 1065369472, %v9931_v20  ;;  %v6415_v48 = vmul.bf16 %v6287_v14, %v20673_v13  ;;  %v20675_v9 = vmul.bf16 1056980736, %v16753_v52 }
 0x494   : > { %7230 = vmatpush1.bf16.msra.mxu0 %v6429_v53  ;;  %v9935_v2 = vpop.eup %9934  ;;  %v6400_v49 = vmul.bf16 %v6272_v35, %v20674_v27  ;;  %v6256_v3 = vadd.bf16 1065369472, %v9933_v38  ;;  %v6382_v11 = vmul.bf16 %v6254_v61, %v5998_v17  ;;  %v16941_v17 = vld [vmem:[%s18935_s7 + $0x38] sm:$0xff]   ;;  %v16998_v35 = vpop.permute.xlu1 %7727 }
 0x495   : > { %7231 = vmatprep.subr.bf16.mxu0 %v6414_v40  ;;  %v6253_v60 = vadd.bf16 1065369472, %v9935_v2  ;;  %v6397_v45 = vmul.bf16 %v6269_v21, %v20675_v9  ;;  %v6399_v41 = vmul.bf16 %v6271_v39, %v6015_v29 }
 0x496   : > { %7343 = vmatpush1.bf16.msra.mxu1 %v6431_v55  ;;  %v9937_v10 = vpop.eup %9936  ;;  %v6384_v52 = vmul.bf16 %v6256_v3, %v6000_v30 }
 0x497   : > { %7344 = vmatprep.subr.bf16.mxu1 %v6416_v34  ;;  %7090 = vmatmul.mubr.bf16.gmra.mxu0 %v16916_v12  ;;  %v9939_v19 = vpop.eup %9938  ;;  %v6238_v7 = vadd.bf16 1065369472, %v9937_v10  ;;  %v6381_v40 = vmul.bf16 %v6253_v60, %v5997_v15 }
 0x498   : > { %7232 = vmatpush1.bf16.msra.mxu0 %v6413_v37  ;;  %7099 = vmatprep.mubr.bf16.mxu0 %v20058_v22  ;;  %v9941_v1 = vpop.eup %9940  ;;  %v6255_v44 = vadd.bf16 1065369472, %v9939_v19  ;;  %v17023_v39 = vpop.permute.xlu1 %7703 }
 0x499   : > { %7203 = vmatmul.mubr.bf16.gmra.mxu1 %v16916_v12  ;;  %7233 = vmatprep.subr.bf16.mxu0 %v6398_v31  ;;  %v9943_v36 = vpop.eup %9942  ;;  %v6240_v32 = vadd.bf16 1065369472, %v9941_v1  ;;  %v6366_v43 = vmul.bf16 %v6238_v7, %v20676_v50 }
 0x49a   : > { %7345 = vmatpush1.bf16.msra.mxu1 %v6415_v48  ;;  %7212 = vmatprep.mubr.bf16.mxu1 %v20058_v22  ;;  %v9945_v53 = vpop.eup %9944  ;;  %v6237_v6 = vadd.bf16 1065369472, %v9943_v36  ;;  %v6383_v42 = vmul.bf16 %v6255_v44, %v5999_v0  ;;  %v16959_v0 = vpop.permute.xlu0 %7763 }
 0x49b   : > { %7346 = vmatprep.subr.bf16.mxu1 %v6400_v49  ;;  %v6239_v29 = vadd.bf16 1065369472, %v9945_v53  ;;  %v6368_v62 = vmul.bf16 %v6240_v32, %v5984_v58 }
 0x49c   : > { %7234 = vmatpush1.bf16.msra.mxu0 %v6397_v45  ;;  %v6365_v30 = vmul.bf16 %v6237_v6, %v5981_v25  ;;  %v17045_v9 = vpop.permute.xlu1 %7679 }
 0x49d   : > { %7235 = vmatprep.subr.bf16.mxu0 %v6382_v11  ;;  %v6367_v16 = vmul.bf16 %v6239_v29, %v5983_v59 }
 0x49e   : > { %7347 = vmatpush1.bf16.msra.mxu1 %v6399_v41  ;;  %v16961_v15 = vpop.f32.mrf.mxu0  ;;  %v16981_v23 = vpop.permute.xlu0 %7739 }
 0x49f   : > { %7348 = vmatprep.subr.bf16.mxu1 %v6384_v52  ;;  %7100 = vmatmul.mubr.bf16.gmra.mxu0 %v16941_v17  ;;  %20677 = vst [vmem:[#allocation16_spill] sm:$0xff] %v16961_v15  ;;  %v16963_v24 = vpop.f32.mrf.mxu1 }
 0x4a0   : > { %7236 = vmatpush1.bf16.msra.mxu0 %v6381_v40  ;;  %7255 = vmatprep.mubr.bf16.mxu0 %v20058_v22  ;;  %20678 = vst [vmem:[#allocation14_spill] sm:$0xff] %v16963_v24  ;;  %v16966_v8 = vpop.f32.mrf.mxu0  ;;  %v17064_v53 = vpop.permute.xlu1 %7655 }
 0x4a1   : > { %7213 = vmatmul.mubr.bf16.gmra.mxu1 %v16941_v17  ;;  %7237 = vmatprep.subr.bf16.mxu0 %v6366_v43  ;;  %v16970_v58 = vpop.f32.mrf.mxu1 }
 0x4a2   : > { %7349 = vmatpush1.bf16.msra.mxu1 %v6383_v42  ;;  %7368 = vmatprep.mubr.bf16.mxu1 %v20058_v22  ;;  %20679 = vst [vmem:[#allocation25_spill] sm:$0xff] %v16970_v58  ;;  %v16974_v25 = vpop.f32.mrf.mxu0  ;;  %v17006_v56 = vpop.permute.xlu0 %7715 }
 0x4a3   : > { %7350 = vmatprep.subr.bf16.mxu1 %v6368_v62  ;;  %20680 = vst [vmem:[#allocation10_spill] sm:$0xff] %v16974_v25  ;;  %v16979_v54 = vpop.f32.mrf.mxu1 }
 0x4a4   : > { %7238 = vmatpush1.bf16.msra.mxu0 %v6365_v30  ;;  %20681 = vst [vmem:[#allocation30_spill] sm:$0xff] %v16979_v54  ;;  %v16985_v46 = vpop.f32.mrf.mxu0 }
 0x4a5   : > { %v16989_v55 = vpop.f32.mrf.mxu1 }
 0x4a6   : > { %7351 = vmatpush1.bf16.msra.mxu1 %v6367_v16  ;;  %20682 = vst [vmem:[#allocation32_spill] sm:$0xff] %v16989_v55  ;;  %v16993_v26 = vpop.f32.mrf.mxu0  ;;  %v17032_v27 = vpop.permute.xlu0 %7691 }
 0x4a7   : > { %7256 = vmatmul.mubr.bf16.vlgmr.msra.gmra.mxu0 %v16572_v28  ;;  %20683 = vst [vmem:[#allocation7_spill] sm:$0xff] %v16993_v26  ;;  %v16995_v34 = vpop.f32.mrf.mxu1 }
 0x4a8   : > { %7265 = vmatprep.mubr.bf16.mxu0 %v20058_v22  ;;  %20684 = vst [vmem:[#allocation28_spill] sm:$0xff] %v16995_v34  ;;  %v17000_v38 = vpop.f32.mrf.mxu0 }
 0x4a9   : > { %7369 = vmatmul.mubr.bf16.vlgmr.msra.gmra.mxu1 %v16572_v28  ;;  %v17004_v21 = vpop.f32.mrf.mxu1 }
 0x4aa   : > { %7378 = vmatprep.mubr.bf16.mxu1 %v20058_v22  ;;  %20685 = vst [vmem:[#allocation20_spill] sm:$0xff] %v17004_v21  ;;  %v17008_v37 = vpop.f32.mrf.mxu0  ;;  %v17051_v11 = vpop.permute.xlu0 %7667 }
 0x4ab   : > { %20686 = vst [vmem:[#allocation18_spill] sm:$0xff] %v17008_v37  ;;  %v17013_v63 = vpop.f32.mrf.mxu1 }
 0x4ac   : > { %20687 = vst [vmem:[#allocation38_spill] sm:$0xff] %v17013_v63  ;;  %v17017_v61 = vpop.f32.mrf.mxu0 }
 0x4ad   : > { %v17021_v10 = vpop.f32.mrf.mxu1 }
 0x4ae   : > { %20688 = vst [vmem:[#allocation6_spill] sm:$0xff] %v17021_v10  ;;  %v17027_v48 = vpop.f32.mrf.mxu0  ;;  %v17071_v6 = vpop.permute.xlu0 %7643 }
 0x4af   : > { %7266 = vmatmul.mubr.bf16.gmra.mxu0 %v16626_v51  ;;  %v17029_v19 = vpop.f32.mrf.mxu1 }
 0x4b0   : > { %7275 = vmatprep.mubr.bf16.mxu0 %v20058_v22  ;;  %v17034_v49 = vpop.f32.mrf.mxu0 }
 0x4b1   : > { %7379 = vmatmul.mubr.bf16.gmra.mxu1 %v16626_v51  ;;  %v17038_v3 = vpop.f32.mrf.mxu1  ;;  %v20689_v51 = vld [vmem:[#allocation26_spill] sm:$0xff] }
 0x4b2   : > { %7388 = vmatprep.mubr.bf16.mxu1 %v20058_v22  ;;  %v17040_v1 = vpop.f32.mrf.mxu0  ;;  %v7620_v30 = vpop.permute.xlu0 %7619 }
 0x4b3   : > { %v17043_v60 = vpop.f32.mrf.mxu1  ;;  %v7628_v26 = vrot.slane %v7620_v30, %v20689_v51  ;;  %v20692_v30 = vpack.c.bf16 %v16985_v46, %v16966_v8  ;;  %v7748_v8 = vrot.slane %v16981_v23, %v20689_v51  ;;  %v7760_v46 = vrot.slane %v16972_v47, %v20689_v51 }
 0x4b4   : > { %v17047_v45 = vpop.f32.mrf.mxu0  ;;  %v7676_v47 = vrot.slane %v17051_v11, %v20689_v51 }
 0x4b5   : > { %v17049_v36 = vpop.f32.mrf.mxu1 }
 0x4b6   : > { %v17053_v7 = vpop.f32.mrf.mxu0  ;;  %v7596_v20 = vpop.permute.xlu0 %7595 }
 0x4b7   : > { %7276 = vmatmul.mubr.bf16.gmra.mxu0 %v16698_v4  ;;  %v17055_v44 = vpop.f32.mrf.mxu1  ;;  %v7604_v28 = vrot.slane %v7596_v20, %v20689_v51 }
 0x4b8   : > { %7285 = vmatprep.mubr.bf16.mxu0 %v20058_v22 }
 0x4b9   : > { %7389 = vmatmul.mubr.bf16.gmra.mxu1 %v16698_v4  ;;  %v17058_v4 = vpop.f32.mrf.mxu0  ;;  %v17062_v41 = vpop.f32.mrf.mxu1 }
 0x4ba   : > { %7398 = vmatprep.mubr.bf16.mxu1 %v20058_v22 }
 0x4bb   : > { %v17066_v52 = vpop.f32.mrf.mxu0  ;;  %v17069_v32 = vpop.f32.mrf.mxu1 }
 0x4bd   : > { %v17073_v40 = vpop.f32.mrf.mxu0  ;;  %v17075_v50 = vpop.f32.mrf.mxu1 }
 0x4bf   : > { %7286 = vmatmul.mubr.bf16.gmra.mxu0 %v16790_v5  ;;  %v17077_v43 = vpop.f32.mrf.mxu0  ;;  %v17079_v29 = vpop.f32.mrf.mxu1 }
 0x4c0   : > { %7295 = vmatprep.mubr.bf16.mxu0 %v20058_v22 }
 0x4c1   : > { %7399 = vmatmul.mubr.bf16.gmra.mxu1 %v16790_v5  ;;  %v7632_v5 = vpop.permute.xlu1 %7631  ;;  %v17082_v42 = vpop.f32.mrf.mxu0 }
 0x4c2   : > { %7408 = vmatprep.mubr.bf16.mxu1 %v20058_v22  ;;  %v17086_v62 = vpop.f32.mrf.mxu1  ;;  %v7640_v37 = vrot.slane %v7632_v5, %v20689_v51  ;;  %v7736_v5 = vrot.slane %v16998_v35, %v20689_v51  ;;  %v7772_v35 = vrot.slane %v16959_v0, %v20689_v51 }
 0x4c3   : > { %v17088_v16 = vpop.f32.mrf.mxu0 }
 0x4c4   : > { %v17091_v31 = vpop.f32.mrf.mxu1  ;;  %v17117_v21 = vcombine.low %v7628_v26, %v7640_v37  ;;  %v7700_v37 = vrot.slane %v17032_v27, %v20689_v51  ;;  %v7652_v27 = vrot.slane %v17071_v6, %v20689_v51 }
 0x4c5   : > { %v17093_v2 = vpop.f32.mrf.mxu0  ;;  %v7608_v59 = vpop.permute.xlu1 %7607 }
 0x4c6   : > { %v17095_v14 = vpop.f32.mrf.mxu1  ;;  %v7616_v34 = vrot.slane %v7608_v59, %v20689_v51  ;;  %20691 = vst [vmem:[#allocation24_spill] sm:$0xff] %v17117_v21 }
 0x4c7   : > { %7296 = vmatmul.mubr.bf16.gmra.mxu0 %v16849_v33  ;;  %v17097_v13 = vpop.f32.mrf.mxu0 }
 0x4c8   : > { %7305 = vmatprep.mubr.bf16.mxu0 %v20058_v22  ;;  %v17115_v25 = vcombine.low %v7604_v28, %v7616_v34  ;;  %v20693_v28 = vpack.c.bf16 %v17017_v61, %v17000_v38  ;;  %v7784_v38 = vrot.slane %v16955_v57, %v20689_v51  ;;  %v7712_v61 = vrot.slane %v17023_v39, %v20689_v51 }
 0x4c9   : > { %7409 = vmatmul.mubr.bf16.gmra.mxu1 %v16849_v33  ;;  %v17100_v33 = vpop.f32.mrf.mxu1  ;;  %v6631_v63 = vpop.f32.mrf.mxu0 }
 0x4ca   : > { %7418 = vmatprep.mubr.bf16.mxu1 %v20058_v22  ;;  %20690 = vst [vmem:[#allocation36_spill] sm:$0xff] %v17115_v25  ;;  %v17129_v10 = vadd.bf16 %v17115_v25, %v20692_v30  ;;  %v17136_v26 = vadd.bf16 %v17117_v21, %v20693_v28  ;;  %v17169_v11 = vcombine.low %v7772_v35, %v7784_v38 }
 0x4cb   : > { %v17108_v24 = vpop.f32.mrf.mxu1  ;;  %v17111_v54 = vpop.f32.mrf.mxu0  ;;  %v17171_v25 = vcombine.low %v7700_v37, %v7712_v61  ;;  %v7497_v38 = vpack.c.bf16 %v17066_v52, %v17053_v7  ;;  %v7499_v37 = vpack.c.bf16 %v17069_v32, %v17055_v44  ;;  %v20709_v7 = vld [vmem:[#allocation32_spill] sm:$0xff]  ;;  %v20710_v52 = vld [vmem:[#allocation25_spill] sm:$0xff] }
 0x4cc   : > { %v19413_v39 = vmul.bf16 1056980736, %v17136_v26  ;;  %20696 = vst [vmem:[#allocation19_spill] sm:$0xff] %v17169_v11 }
 0x4cd   : > { %v17113_v15 = vpop.f32.mrf.mxu1  ;;  %v6635_v20 = vpop.f32.mrf.mxu0  ;;  %20697 = vst [vmem:[#allocation29_spill] sm:$0xff] %v17171_v25 }
 0x4ce   : > { %v7530_v30 = vpack.c.bf16 %v6635_v20, %v6631_v63  ;;  %v7664_v63 = vrot.slane %v17064_v53, %v20689_v51 }
 0x4cf   : > { %7306 = vmatmul.mubr.bf16.gmra.mxu0 %v16891_v18  ;;  %v17119_v59 = vpop.f32.mrf.mxu1  ;;  %v6639_v58 = vpop.f32.mrf.mxu0 }
 0x4d0   : > { %7315 = vmatprep.mubr.bf16.mxu0 %v20058_v22  ;;  %v17184_v35 = vcombine.low %v7652_v27, %v7664_v63  ;;  %v7513_v27 = vpack.c.bf16 %v17088_v16, %v17077_v43  ;;  %v7532_v63 = vpack.c.bf16 %v17119_v59, %v17108_v24  ;;  %v7529_v43 = vpack.c.bf16 %v17111_v54, %v17097_v13 }
 0x4d1   : > { %7419 = vmatmul.mubr.bf16.gmra.mxu1 %v16891_v18  ;;  %v7724_v18 = vrot.slane %v17006_v56, %v20689_v51  ;;  %v17138_v34 = vpop.f32.mrf.mxu1  ;;  %v6641_v56 = vpop.f32.mrf.mxu0 }
 0x4d2   : > { %7428 = vmatprep.mubr.bf16.mxu1 %v20058_v22  ;;  %20700 = vst [vmem:[#allocation33_spill] sm:$0xff] %v17184_v35 }
 0x4d3   : > { %v6754_v0 = vpop.f32.mrf.mxu1  ;;  %v17155_v23 = vcombine.low %v7724_v18, %v7736_v5  ;;  %v6643_v28 = vpop.f32.mrf.mxu0  ;;  %v17167_v5 = vcombine.low %v7748_v8, %v7760_v46 }
 0x4d4   : > { %v7545_v20 = vpack.c.bf16 %v6643_v28, %v6639_v58 }
 0x4d5   : > { %20694 = vst [vmem:[#allocation13_spill] sm:$0xff] %v17155_v23  ;;  %v6756_v18 = vpop.f32.mrf.mxu1  ;;  %20695 = vst [vmem:[#allocation27_spill] sm:$0xff] %v17167_v5  ;;  %v6645_v21 = vpop.f32.mrf.mxu0  ;;  %v17237_v54 = vadd.bf16 %v17155_v23, %v7532_v63 }
 0x4d6   : > { %v7546_v57 = vpack.c.bf16 %v6645_v21, %v6641_v56  ;;  %v17181_v58 = vadd.bf16 %v17167_v5, %v7545_v20  ;;  %v7481_v21 = vpack.c.bf16 %v17040_v1, %v17027_v48  ;;  %v7514_v20 = vpack.c.bf16 %v17093_v2, %v17082_v42 }
 0x4d7   : > { %7316 = vmatmul.mubr.bf16.gmra.mxu0 %v16916_v12  ;;  %v6758_v55 = vpop.f32.mrf.mxu1  ;;  %v6649_v8 = vpop.f32.mrf.mxu0 }
 0x4d8   : > { %7325 = vmatprep.mubr.bf16.mxu0 %v20058_v22  ;;  %v7548_v53 = vpack.c.bf16 %v6758_v55, %v6754_v0  ;;  %v17191_v46 = vadd.bf16 %v17167_v5, %v7546_v57  ;;  %v7482_v55 = vpack.c.bf16 %v17047_v45, %v17034_v49  ;;  %v7498_v0 = vpack.c.bf16 %v17073_v40, %v17058_v4 }
 0x4d9   : > { %7429 = vmatmul.mubr.bf16.gmra.mxu1 %v16916_v12  ;;  %v7688_v12 = vrot.slane %v17045_v9, %v20689_v51  ;;  %v17174_v9 = vadd.bf16 %v17155_v23, %v7530_v30  ;;  %v20699_v51 = vmul.bf16 1056980736, %v17129_v10  ;;  %v6762_v56 = vpop.f32.mrf.mxu1  ;;  %v6651_v30 = vpop.f32.mrf.mxu0  ;;  %v7547_v57 = vpack.c.bf16 %v6756_v18, %v17138_v34 }
 0x4da   : > { %7438 = vmatprep.mubr.bf16.mxu1 %v20058_v22  ;;  %v17201_v61 = vadd.bf16 %v17167_v5, %v7548_v53  ;;  %v19415_v4 = vmul.bf16 1056980736, %v17181_v58  ;;  %v7516_v34 = vpack.c.bf16 %v17095_v14, %v17086_v62  ;;  %v19417_v18 = vmul.bf16 1056980736, %v17191_v46 }
 0x4db   : > { %v17176_v6 = vcombine.low %v7676_v47, %v7688_v12  ;;  %9946 = vtanh.bf16 %v20699_v51  ;;  %v7500_v47 = vpack.c.bf16 %v17075_v50, %v17062_v41  ;;  %v19414_v12 = vmul.bf16 1056980736, %v17174_v9  ;;  %v6764_v28 = vpop.f32.mrf.mxu1  ;;  %v6653_v40 = vpop.f32.mrf.mxu0  ;;  %v20712_v41 = vld [vmem:[#allocation36_spill] sm:$0xff] }
 0x4dc   : > { %9948 = vtanh.bf16 %v19413_v39  ;;  %v7561_v51 = vpack.c.bf16 %v6653_v40, %v6649_v8  ;;  %v19416_v24 = vmul.bf16 1056980736, %v17201_v61  ;;  %v17231_v2 = vadd.bf16 %v17167_v5, %v7547_v57 }
 0x4dd   : > { %20698 = vst [vmem:[#allocation12_spill] sm:$0xff] %v17176_v6  ;;  %v6766_v53 = vpop.f32.mrf.mxu1  ;;  %v6655_v16 = vpop.f32.mrf.mxu0  ;;  %9950 = vtanh.bf16 %v19414_v12  ;;  %v17247_v59 = vadd.bf16 %v17171_v25, %v7514_v20  ;;  %v17297_v12 = vadd.bf16 %v17171_v25, %v7513_v27  ;;  %v7483_v50 = vpack.c.bf16 %v17043_v60, %v17029_v19 }
 0x4de   : > { %v17234_v14 = vadd.bf16 %v17169_v11, %v7561_v51  ;;  %v7562_v42 = vpack.c.bf16 %v6655_v16, %v6651_v30  ;;  %9952 = vtanh.bf16 %v19415_v4  ;;  %v17256_v30 = vadd.bf16 %v17155_v23, %v7529_v43 }
 0x4df   : > { %7326 = vmatmul.mubr.bf16.gmra.mxu0 %v16941_v17  ;;  %v6768_v62 = vpop.f32.mrf.mxu1  ;;  %9954 = vtanh.bf16 %v19417_v18  ;;  %v19422_v51 = vmul.bf16 1056980736, %v17231_v2  ;;  %v17276_v43 = vadd.bf16 %v17171_v25, %v7516_v34  ;;  %v19430_v49 = vmul.bf16 1056980736, %v17297_v12 }
 0x4e0   : > { %8512 = vmatprep.mubr.bf16.mxu0 %v20058_v22  ;;  %v7564_v13 = vpack.c.bf16 %v6768_v62, %v6764_v28  ;;  %v19420_v8 = vmul.bf16 1056980736, %v17234_v14  ;;  %9956 = vtanh.bf16 %v19416_v24  ;;  %v17287_v62 = vadd.bf16 %v17176_v6, %v7498_v0 }
 0x4e1   : > { %7439 = vmatmul.mubr.bf16.gmra.mxu1 %v16941_v17  ;;  %v7515_v17 = vpack.c.bf16 %v17091_v31, %v17079_v29  ;;  %v7531_v31 = vpack.c.bf16 %v17113_v15, %v17100_v33  ;;  %v7563_v29 = vpack.c.bf16 %v6766_v53, %v6762_v56  ;;  %v17253_v56 = vadd.bf16 %v17169_v11, %v7562_v42 }
 0x4e2   : > { %8553 = vmatprep.mubr.bf16.mxu1 %v20058_v22  ;;  %v17262_v28 = vadd.bf16 %v17169_v11, %v7564_v13  ;;  %9958 = vtanh.bf16 %v19420_v8  ;;  %v19423_v13 = vmul.bf16 1056980736, %v17247_v59  ;;  %v19424_v24 = vmul.bf16 1056980736, %v17256_v30 }
 0x4e3   : > { %v17242_v15 = vadd.bf16 %v17169_v11, %v7563_v29  ;;  %v17269_v20 = vadd.bf16 %v17155_v23, %v7531_v31  ;;  %v19421_v53 = vmul.bf16 1056980736, %v17253_v56  ;;  %v19426_v29 = vmul.bf16 1056980736, %v17237_v54  ;;  %v20735_v11 = vld [vmem:[#allocation38_spill] sm:$0xff] }
 0x4e4   : > { %v17244_v33 = vpop.f32.mrf.mxu0  ;;  %v19419_v16 = vmul.bf16 1056980736, %v17262_v28  ;;  %v17300_v4 = vadd.bf16 %v17171_v25, %v7515_v17  ;;  %v17324_v8 = vadd.bf16 %v17176_v6, %v7500_v47  ;;  %v17350_v47 = vadd.bf16 %v17176_v6, %v7497_v38 }
 0x4e5   : > { %20701 = vst [vmem:[#allocation21_spill] sm:$0xff] %v17244_v33  ;;  %v19418_v57 = vmul.bf16 1056980736, %v17242_v15  ;;  %v19425_v34 = vmul.bf16 1056980736, %v17269_v20  ;;  %v17363_v19 = vadd.bf16 %v17176_v6, %v7499_v37  ;;  %v20711_v38 = vpack.c.bf16 %v20709_v7, %v20710_v52  ;;  %v20718_v52 = vld [vmem:[#allocation24_spill] sm:$0xff] }
 0x4e6   : > { %v17264_v63 = vpop.f32.mrf.mxu1  ;;  %v17266_v40 = vpop.f32.mrf.mxu0  ;;  %v17403_v60 = vadd.bf16 %v17184_v35, %v7481_v21  ;;  %v20721_v48 = vmul.bf16 1056980736, %v17300_v4  ;;  %v20732_v33 = vld [vmem:[#allocation18_spill] sm:$0xff] }
 0x4e7   : > { %20702 = vst [vmem:[#allocation22_spill] sm:$0xff] %v17264_v63  ;;  %9960 = vtanh.bf16 %v19418_v57  ;;  %v17372_v17 = vadd.bf16 %v20712_v41, %v20711_v38  ;;  %v20723_v63 = vld [vmem:[#allocation16_spill] sm:$0xff] }
 0x4e8   : > { %v17282_v42 = vpop.f32.mrf.mxu1  ;;  %v17284_v31 = vpop.f32.mrf.mxu0  ;;  %9962 = vtanh.bf16 %v19421_v53  ;;  %v19427_v53 = vmul.bf16 1056980736, %v17276_v43 }
 0x4e9   : > { %20703 = vst [vmem:[#allocation39_spill] sm:$0xff] %v17282_v42  ;;  %20704 = vst [vmem:[#allocation11_spill] sm:$0xff] %v17284_v31  ;;  %v17294_v39 = vpop.eup %9946  ;;  %9964 = vtanh.bf16 %v19419_v16  ;;  %v7484_v16 = vpack.c.bf16 %v17049_v36, %v17038_v3  ;;  %v17337_v3 = vadd.bf16 %v17184_v35, %v7482_v55  ;;  %v19428_v36 = vmul.bf16 1056980736, %v17287_v62 }
 0x4ea   : > { %v17305_v0 = vpop.f32.mrf.mxu1  ;;  %v17307_v18 = vpop.f32.mrf.mxu0  ;;  %9966 = vtanh.bf16 %v19422_v51 }
 0x4eb   : > { %20705 = vst [vmem:[#allocation34_spill] sm:$0xff] %v17305_v0  ;;  %v17309_v57 = vpop.eup %9948  ;;  %9968 = vtanh.bf16 %v19426_v29  ;;  %v20716_v29 = vld [vmem:[#allocation20_spill] sm:$0xff] }
 0x4ec   : > { %v17329_v51 = vpop.f32.mrf.mxu1  ;;  %v17331_v27 = vpop.f32.mrf.mxu0  ;;  %9970 = vtanh.bf16 %v19423_v13  ;;  %v17375_v13 = vadd.bf16 %v17184_v35, %v7484_v16  ;;  %v20725_v16 = vmul.bf16 1056980736, %v17324_v8 }
 0x4ed   : > { %20706 = vst [vmem:[#allocation8_spill] sm:$0xff] %v17331_v27  ;;  %9972 = vtanh.bf16 %v19424_v24  ;;  %v17384_v37 = vpop.eup %9950 }
 0x4ee   : > { %v17355_v45 = vpop.f32.mrf.mxu1  ;;  %v17357_v55 = vpop.f32.mrf.mxu0  ;;  %9974 = vtanh.bf16 %v19425_v34  ;;  %v20715_v34 = vld [vmem:[#allocation6_spill] sm:$0xff] }
 0x4ef   : > { %20707 = vst [vmem:[#allocation23_spill] sm:$0xff] %v17355_v45  ;;  %20708 = vst [vmem:[#allocation40_spill] sm:$0xff] %v17357_v55  ;;  %9976 = vtanh.bf16 %v19427_v53  ;;  %v20717_v7 = vpack.c.bf16 %v20715_v34, %v20716_v29  ;;  %v17397_v24 = vpop.eup %9952  ;;  %v17406_v29 = vadd.bf16 %v17184_v35, %v7483_v50  ;;  %v20722_v34 = vld [vmem:[#allocation10_spill] sm:$0xff] }
 0x4f0   : > { %v17380_v44 = vpop.f32.mrf.mxu1  ;;  %v17382_v32 = vpop.f32.mrf.mxu0  ;;  %9978 = vtanh.bf16 %v19428_v36  ;;  %v20728_v45 = vld [vmem:[#allocation30_spill] sm:$0xff] }
 0x4f1   : > { %20713 = vst [vmem:[#allocation17_spill] sm:$0xff] %v17380_v44  ;;  %20714 = vst [vmem:[#allocation35_spill] sm:$0xff] %v17382_v32  ;;  %v17390_v38 = vadd.bf16 %v20718_v52, %v20717_v7  ;;  %9980 = vtanh.bf16 %v19430_v49  ;;  %v9955_v53 = vpop.eup %9954  ;;  %v20724_v49 = vpack.c.bf16 %v20722_v34, %v20723_v63  ;;  %v20733_v32 = vld [vmem:[#allocation7_spill] sm:$0xff] }
 0x4f2   : > { %v17411_v7 = vpop.f32.mrf.mxu1  ;;  %v17413_v36 = vpop.f32.mrf.mxu0  ;;  %9982 = vtanh.bf16 %v20721_v48  ;;  %v20734_v6 = vpack.c.bf16 %v20732_v33, %v20733_v32  ;;  %v20740_v32 = vmul.bf16 1056980736, %v17363_v19  ;;  %v8314_v5 = vadd.bf16 1065369472, %v9955_v53 }
 0x4f3   : > { %20719 = vst [vmem:[#allocation9_spill] sm:$0xff] %v17411_v7  ;;  %20720 = vst [vmem:[#allocation31_spill] sm:$0xff] %v17413_v36  ;;  %v9957_v50 = vpop.eup %9956  ;;  %v17426_v0 = vadd.bf16 %v20712_v41, %v20724_v49  ;;  %9984 = vtanh.bf16 %v20725_v16  ;;  %v20729_v7 = vld [vmem:[#allocation14_spill] sm:$0xff]  ;;  %v20731_v49 = vmul.bf16 1056980736, %v17337_v3 }
 0x4f4   : > { %v17431_v31 = vpop.f32.mrf.mxu1  ;;  %v17433_v48 = vpop.f32.mrf.mxu0  ;;  %v20730_v21 = vpack.c.bf16 %v20728_v45, %v20729_v7  ;;  %v17450_v25 = vadd.bf16 %v20718_v52, %v20734_v6  ;;  %v20736_v45 = vld [vmem:[#allocation28_spill] sm:$0xff]  ;;  %v20744_v33 = vmul.bf16 1056980736, %v17390_v38  ;;  %v20748_v6 = vmul.bf16 1056980736, %v17406_v29 }
 0x4f5   : > { %20726 = vst [vmem:[#allocation15_spill] sm:$0xff] %v17431_v31  ;;  %20727 = vst [vmem:[#allocation37_spill] sm:$0xff] %v17433_v48  ;;  %v9959_v1 = vpop.eup %9958  ;;  %9986 = vtanh.bf16 %v20731_v49  ;;  %v20737_v7 = vpack.c.bf16 %v20735_v11, %v20736_v45  ;;  %v20738_v49 = vmul.bf16 1056980736, %v17350_v47 }
 0x4f6   : > { %v17439_v27 = vadd.bf16 %v20712_v41, %v20730_v21  ;;  %v9961_v16 = vpop.eup %9960  ;;  %v17461_v22 = vpop.f32.mrf.mxu1  ;;  %v8329_v11 = vadd.bf16 1065369472, %v9959_v1  ;;  %v8316_v1 = vadd.bf16 1065369472, %v9957_v50  ;;  %v8313_v50 = vadd.bf16 1065369472, %v17397_v24 }
 0x4f7   : > { %v17456_v21 = vadd.bf16 %v20718_v52, %v20737_v7  ;;  %9988 = vtanh.bf16 %v20738_v49  ;;  %20739 = vst [vmem:[#allocation26_spill] sm:$0xff] %v17461_v22  ;;  %v17463_v34 = vpop.f32.mrf.mxu0  ;;  %v9963_v44 = vpop.eup %9962  ;;  %v20741_v7 = vmul.bf16 1056980736, %v17375_v13  ;;  %v8331_v63 = vadd.bf16 1065369472, %v9961_v16 }
 0x4f8   : > { %9990 = vtanh.bf16 %v20740_v32  ;;  %v9965_v45 = vpop.eup %9964  ;;  %v17471_v31 = vpop.f32.mrf.mxu1  ;;  %v8330_v22 = vadd.bf16 1065369472, %v9963_v44  ;;  %v20747_v44 = vmul.bf16 1056980736, %v17253_v56  ;;  %v20750_v16 = vmul.bf16 1056980736, %v17262_v28 }
 0x4f9   : > { %9992 = vtanh.bf16 %v20741_v7  ;;  %20742 = vst [vmem:[#allocation32_spill] sm:$0xff] %v17471_v31  ;;  %v17473_v49 = vpop.f32.mrf.mxu0  ;;  %v9967_v23 = vpop.eup %9966  ;;  %v8332_v32 = vadd.bf16 1065369472, %v9965_v45  ;;  %v20745_v7 = vmul.bf16 1056980736, %v17403_v60 }
 0x4fa   : > { %20743 = vst [vmem:[#allocation25_spill] sm:$0xff] %v17473_v49  ;;  %9994 = vtanh.bf16 %v20744_v33  ;;  %v9969_v35 = vpop.eup %9968  ;;  %v17483_v31 = vpop.f32.mrf.mxu1  ;;  %v8458_v33 = vmul.bf16 %v8330_v22, %v20747_v44  ;;  %v20749_v45 = vmul.bf16 1056980736, %v17234_v14  ;;  %v8315_v49 = vadd.bf16 1065369472, %v9967_v23 }
 0x4fb   : > { %9996 = vtanh.bf16 %v20745_v7  ;;  %20746 = vst [vmem:[#allocation36_spill] sm:$0xff] %v17483_v31  ;;  %v17485_v53 = vpop.f32.mrf.mxu0  ;;  %v9971_v55 = vpop.eup %9970  ;;  %v8460_v48 = vmul.bf16 %v8332_v32, %v20750_v16  ;;  %v20751_v31 = vmul.bf16 1056980736, %v17242_v15  ;;  %v20752_v56 = vmul.bf16 1056980736, %v17191_v46 }
 0x4fc   : > { %9998 = vtanh.bf16 %v20748_v6  ;;  %v8457_v52 = vmul.bf16 %v8329_v11, %v20749_v45  ;;  %v9973_v7 = vpop.eup %9972  ;;  %v17498_v42 = vpop.f32.mrf.mxu1  ;;  %8480 = vmatprep.subr.bf16.mxu0 %v8458_v33  ;;  %v8298_v24 = vadd.bf16 1065369472, %v17384_v37  ;;  %v20753_v11 = vmul.bf16 1056980736, %v17372_v17 }
 0x4fd   : > { %v8459_v36 = vmul.bf16 %v8331_v63, %v20751_v31  ;;  %v17500_v22 = vpop.f32.mrf.mxu0  ;;  %v8442_v6 = vmul.bf16 %v8314_v5, %v20752_v56  ;;  %v9975_v14 = vpop.eup %9974  ;;  %8521 = vmatprep.subr.bf16.mxu1 %v8460_v48  ;;  %v20754_v23 = vmul.bf16 1056980736, %v17201_v61  ;;  %v8300_v28 = vadd.bf16 1065369472, %v9969_v35 }
 0x4fe   : > { %10000 = vtanh.bf16 %v20753_v11  ;;  %8481 = vmatpush1.bf16.msra.mxu0 %v8457_v52  ;;  %v9977_v31 = vpop.eup %9976  ;;  %v7961_v63 = vmul.bf16 1056980736, %v17426_v0  ;;  %v20755_v32 = vmul.bf16 1056980736, %v17450_v25  ;;  %v17512_v46 = vpop.f32.mrf.mxu1  ;;  %v7963_v48 = vmul.bf16 1056980736, %v17439_v27 }
 0x4ff   : > { %v8444_v15 = vmul.bf16 %v8316_v1, %v20754_v23  ;;  %8522 = vmatpush1.bf16.msra.mxu1 %v8459_v36  ;;  %v17514_v5 = vpop.f32.mrf.mxu0  ;;  %8482 = vmatprep.subr.bf16.mxu0 %v8442_v6  ;;  %v9979_v37 = vpop.eup %9978  ;;  %v20756_v52 = vmul.bf16 1056980736, %v17456_v21  ;;  %v8297_v61 = vadd.bf16 1065369472, %v9973_v7  ;;  %v20757_v35 = vmul.bf16 1056980736, %v17181_v58 }
 0x500   : > { %10002 = vtanh.bf16 %v20755_v32  ;;  %v9981_v16 = vpop.eup %9980  ;;  %v8299_v44 = vadd.bf16 1065369472, %v9975_v14  ;;  %v20758_v33 = vmul.bf16 1056980736, %v17231_v2  ;;  %v17523_v36 = vpop.f32.mrf.mxu1  ;;  %v20759_v6 = vmul.bf16 1056980736, %v17174_v9 }
 0x501   : > { %10004 = vtanh.bf16 %v20756_v52  ;;  %v8441_v1 = vmul.bf16 %v8313_v50, %v20757_v35  ;;  %8523 = vmatprep.subr.bf16.mxu1 %v8444_v15  ;;  %v17525_v56 = vpop.f32.mrf.mxu0  ;;  %v8282_v23 = vadd.bf16 1065369472, %v9971_v55  ;;  %v9983_v32 = vpop.eup %9982  ;;  %v20760_v7 = vmul.bf16 1056980736, %v17237_v54  ;;  %v17645_v0 = vld [vmem:[%s18937_s9] sm:$0x3] }
 0x502   : > { %v8443_v45 = vmul.bf16 %v8315_v49, %v20758_v33  ;;  %v8426_v11 = vmul.bf16 %v8298_v24, %v20759_v6  ;;  %v8284_v50 = vadd.bf16 1065369472, %v9977_v31  ;;  %v9985_v15 = vpop.eup %9984  ;;  %10006 = vtanh.bf16 %v7961_v63  ;;  %v17533_v2 = vpop.f32.mrf.mxu1  ;;  %20791 = vst [vmem:[#allocation10_spill] sm:$0xff] %v17645_v0 }
 0x503   : > { %8483 = vmatpush1.bf16.msra.mxu0 %v8441_v1  ;;  %v8428_v58 = vmul.bf16 %v8300_v28, %v20760_v7  ;;  %v17535_v49 = vpop.f32.mrf.mxu0  ;;  %v9987_v14 = vpop.eup %9986  ;;  %10008 = vtanh.bf16 %v7963_v48  ;;  %v8281_v9 = vadd.bf16 1065369472, %v9981_v16  ;;  %v20761_v55 = vmul.bf16 1056980736, %v17256_v30 }
 0x504   : > { %8524 = vmatpush1.bf16.msra.mxu1 %v8443_v45  ;;  %8484 = vmatprep.subr.bf16.mxu0 %v8426_v11  ;;  %v8283_v28 = vadd.bf16 1065369472, %v9983_v32  ;;  %v20762_v31 = vmul.bf16 1056980736, %v17269_v20  ;;  %v17543_v35 = vpop.f32.mrf.mxu1  ;;  %v20763_v33 = vmul.bf16 1056980736, %v17247_v59 }
 0x505   : > { %v8425_v54 = vmul.bf16 %v8297_v61, %v20761_v55  ;;  %8525 = vmatprep.subr.bf16.mxu1 %v8428_v58  ;;  %v9989_v24 = vpop.eup %9988  ;;  %v17545_v1 = vpop.f32.mrf.mxu0  ;;  %v8266_v6 = vadd.bf16 1065369472, %v9979_v37  ;;  %v20764_v16 = vmul.bf16 1056980736, %v17276_v43  ;;  %v8268_v61 = vadd.bf16 1065369472, %v9985_v15 }
 0x506   : > { %v8427_v52 = vmul.bf16 %v8299_v44, %v20762_v31  ;;  %v8410_v45 = vmul.bf16 %v8282_v23, %v20763_v33  ;;  %v9991_v11 = vpop.eup %9990  ;;  %v17551_v58 = vpop.f32.mrf.mxu1  ;;  %v8265_v32 = vadd.bf16 1065369472, %v9989_v24  ;;  %v20765_v55 = vmul.bf16 1056980736, %v17297_v12 }
 0x507   : > { %8485 = vmatpush1.bf16.msra.mxu0 %v8425_v54  ;;  %v8412_v30 = vmul.bf16 %v8284_v50, %v20764_v16  ;;  %v9993_v7 = vpop.eup %9992  ;;  %v17553_v20 = vpop.f32.mrf.mxu0  ;;  %v8267_v23 = vadd.bf16 1065369472, %v9991_v11  ;;  %v20766_v54 = vmul.bf16 1056980736, %v17300_v4  ;;  %v20767_v31 = vmul.bf16 1056980736, %v17287_v62 }
 0x508   : > { %8526 = vmatpush1.bf16.msra.mxu1 %v8427_v52  ;;  %8486 = vmatprep.subr.bf16.mxu0 %v8410_v45  ;;  %v9995_v44 = vpop.eup %9994  ;;  %v8409_v59 = vmul.bf16 %v8281_v9, %v20765_v55  ;;  %v17559_v50 = vpop.f32.mrf.mxu1  ;;  %v8250_v33 = vadd.bf16 1065369472, %v9987_v14  ;;  %v20768_v24 = vmul.bf16 1056980736, %v17324_v8  ;;  %v8252_v9 = vadd.bf16 1065369472, %v9993_v7 }
 0x509   : > { %8527 = vmatprep.subr.bf16.mxu1 %v8412_v30  ;;  %v9997_v37 = vpop.eup %9996  ;;  %v8411_v43 = vmul.bf16 %v8283_v28, %v20766_v54  ;;  %v17561_v15 = vpop.f32.mrf.mxu0  ;;  %v8394_v52 = vmul.bf16 %v8266_v6, %v20767_v31  ;;  %v20769_v30 = vmul.bf16 1056980736, %v17350_v47  ;;  %v20770_v6 = vmul.bf16 1056980736, %v17363_v19 }
 0x50a   : > { %v9999_v45 = vpop.eup %9998  ;;  %v8396_v12 = vmul.bf16 %v8268_v61, %v20768_v24  ;;  %v17567_v16 = vpop.f32.mrf.mxu1  ;;  %v8249_v28 = vadd.bf16 1065369472, %v9997_v37  ;;  %v20771_v7 = vmul.bf16 1056980736, %v17337_v3  ;;  %v20772_v47 = vmul.bf16 1056980736, %v17375_v13 }
 0x50b   : > { %8487 = vmatpush1.bf16.msra.mxu0 %v8409_v59  ;;  %v17569_v11 = vpop.f32.mrf.mxu0  ;;  %v8393_v55 = vmul.bf16 %v8265_v32, %v20769_v30  ;;  %v8251_v14 = vadd.bf16 1065369472, %v9999_v45  ;;  %v8395_v59 = vmul.bf16 %v8267_v23, %v20770_v6  ;;  %v8236_v37 = vadd.bf16 1065369472, %v9995_v44 }
 0x50c   : > { %8528 = vmatpush1.bf16.msra.mxu1 %v8411_v43  ;;  %8488 = vmatprep.subr.bf16.mxu0 %v8394_v52  ;;  %v10001_v4 = vpop.eup %10000  ;;  %v17575_v8 = vpop.f32.mrf.mxu1  ;;  %v8378_v54 = vmul.bf16 %v8250_v33, %v20771_v7  ;;  %v8234_v43 = vadd.bf16 1065369472, %v17309_v57  ;;  %v8380_v32 = vmul.bf16 %v8252_v9, %v20772_v47  ;;  %v20773_v45 = vmul.bf16 1056980736, %v17403_v60 }
 0x50d   : > { %8529 = vmatprep.subr.bf16.mxu1 %v8396_v12  ;;  %v20774_v57 = vmul.bf16 1056980736, %v17406_v29  ;;  %v20775_v44 = vmul.bf16 1056980736, %v17136_v26  ;;  %v20776_v60 = vmul.bf16 1056980736, %v17390_v38  ;;  %v7486_v26 = vpack.c.bf16 %v17485_v53, %v17463_v34 }
 0x50e   : > { %v10003_v62 = vpop.eup %10002  ;;  %v17577_v61 = vpop.f32.mrf.mxu0  ;;  %v8377_v24 = vmul.bf16 %v8249_v28, %v20773_v45  ;;  %v20777_v7 = vmul.bf16 1056980736, %v17450_v25  ;;  %v20779_v38 = vpack.c.bf16 %v17307_v18, %v17266_v40  ;;  %v20781_v25 = vmul.bf16 1056980736, %v17129_v10  ;;  %v20786_v18 = vld [vmem:[#allocation31_spill] sm:$0xff]  ;;  %v20787_v40 = vld [vmem:[#allocation40_spill] sm:$0xff] }
 0x50f   : > { %v10005_v31 = vpop.eup %10004  ;;  %8489 = vmatpush1.bf16.msra.mxu0 %v8393_v55  ;;  %v8233_v23 = vadd.bf16 1065369472, %v10003_v62  ;;  %v8379_v12 = vmul.bf16 %v8251_v14, %v20774_v57  ;;  %v8362_v9 = vmul.bf16 %v8234_v43, %v20775_v44  ;;  %v8218_v55 = vadd.bf16 1065369472, %v17294_v39  ;;  %v20790_v44 = vld [vmem:[#allocation33_spill] sm:$0xff] }
 0x510   : > { %v17584_v52 = vpop.f32.mrf.mxu1  ;;  %8530 = vmatpush1.bf16.msra.mxu1 %v8395_v59  ;;  %v6857_v19 = vpop.f32.mrf.mxu0  ;;  %8490 = vmatprep.subr.bf16.mxu0 %v8378_v54  ;;  %v8235_v33 = vadd.bf16 1065369472, %v10005_v31  ;;  %v8364_v28 = vmul.bf16 %v8236_v37, %v20776_v60  ;;  %v8220_v62 = vadd.bf16 1065369472, %v10001_v4  ;;  %v20778_v43 = vmul.bf16 1056980736, %v17456_v21 }
 0x511   : > { %8531 = vmatprep.subr.bf16.mxu1 %v8380_v32  ;;  %v10007_v3 = vpop.eup %10006  ;;  %v8361_v54 = vmul.bf16 %v8233_v23, %v20777_v7  ;;  %v17611_v4 = vadd.bf16 %v20712_v41, %v20779_v38  ;;  %v8346_v37 = vmul.bf16 %v8218_v55, %v20781_v25  ;;  %v20782_v23 = vld [vmem:[#allocation39_spill] sm:$0xff]  ;;  %v20785_v21 = vmul.bf16 1056980736, %v17372_v17 }
 0x512   : > { %v17590_v30 = vpop.f32.mrf.mxu1  ;;  %v17592_v13 = vpop.f32.mrf.mxu0  ;;  %v8217_v14 = vadd.bf16 1065369472, %v10007_v3  ;;  %v8363_v31 = vmul.bf16 %v8235_v33, %v20778_v43  ;;  %v20783_v34 = vpack.c.bf16 %v17329_v51, %v20782_v23  ;;  %v20789_v3 = vld [vmem:[#allocation24_spill] sm:$0xff]  ;;  %v20794_v38 = vmov 0  }
 0x513   : > { %v10009_v6 = vpop.eup %10008  ;;  %8491 = vmatpush1.bf16.msra.mxu0 %v8377_v24  ;;  %20780 = vst [vmem:[#allocation6_spill] sm:$0xff] %v17611_v4  ;;  %v8348_v45 = vmul.bf16 %v8220_v62, %v20785_v21  ;;  %v20788_v24 = vpack.c.bf16 %v20786_v18, %v20787_v40  ;;  %v19461_v55 = vmul.bf16 1056980736, %v17611_v4  ;;  %v20792_v62 = vld [vmem:[#allocation13_spill] sm:$0xff]  ;;  %v7502_v40 = vpack.c.bf16 %v17535_v49, %v17514_v5 }
 0x514   : > { %v17599_v59 = vpop.f32.mrf.mxu1  ;;  %8532 = vmatpush1.bf16.msra.mxu1 %v8379_v12  ;;  %v6861_v29 = vpop.f32.mrf.mxu0  ;;  %8492 = vmatprep.subr.bf16.mxu0 %v8362_v9  ;;  %v8219_v39 = vadd.bf16 1065369472, %v10009_v6  ;;  %v17621_v53 = vadd.bf16 %v20712_v41, %v20783_v34  ;;  %v8345_v51 = vmul.bf16 %v8217_v14, %v7961_v63  ;;  %v17636_v9 = vadd.bf16 %v20790_v44, %v7486_v26  ;;  %v20795_v34 = vld [vmem:[#allocation32_spill] sm:$0xff] }
 0x515   : > { %8533 = vmatprep.subr.bf16.mxu1 %v8364_v28  ;;  %v17629_v33 = vadd.bf16 %v20789_v3, %v20788_v24  ;;  %v7534_v57 = vpack.c.bf16 %v6861_v29, %v6857_v19  ;;  %10010 = vtanh.bf16 %v19461_v55  ;;  %v7488_v21 = vpack.c.bf16 %v17498_v42, %v20795_v34 }
 0x516   : > { %v17613_v47 = vpop.f32.mrf.mxu1  ;;  %v6865_v32 = vpop.f32.mrf.mxu0  ;;  %20784 = vst [vmem:[#allocation20_spill] sm:$0xff] %v17621_v53  ;;  %v8347_v17 = vmul.bf16 %v8219_v39, %v7963_v48  ;;  %v19460_v19 = vmul.bf16 1056980736, %v17621_v53  ;;  %v19463_v14 = vmul.bf16 1056980736, %v17636_v9  ;;  %v7520_v5 = vpack.c.bf16 %v17575_v8, %v17559_v50 }
 0x517   : > { %8493 = vmatpush1.bf16.msra.mxu0 %v8361_v54  ;;  %v19462_v63 = vmul.bf16 1056980736, %v17629_v33  ;;  %v17649_v29 = vadd.bf16 %v20792_v62, %v7534_v57  ;;  %v20793_v54 = vld [vmem:[#allocation27_spill] sm:$0xff]  ;;  %v7536_v24 = vpack.c.bf16 %v17613_v47, %v17590_v30  ;;  %v7533_v49 = vpack.c.bf16 %v17592_v13, %v17577_v61 }
 0x518   : > { %v17631_v12 = vpop.f32.mrf.mxu1  ;;  %8534 = vmatpush1.bf16.msra.mxu1 %v8363_v31  ;;  %v6867_v10 = vpop.f32.mrf.mxu0  ;;  %8494 = vmatprep.subr.bf16.mxu0 %v8346_v37  ;;  %10012 = vtanh.bf16 %v19460_v19  ;;  %v7535_v50 = vpack.c.bf16 %v17599_v59, %v17584_v52  ;;  %v7519_v59 = vpack.c.bf16 %v17567_v16, %v17551_v58 }
 0x519   : > { %8535 = vmatprep.subr.bf16.mxu1 %v8348_v45  ;;  %10014 = vtanh.bf16 %v19462_v63  ;;  %v7501_v45 = vpack.c.bf16 %v17525_v56, %v17500_v22  ;;  %v17704_v8 = vadd.bf16 %v20792_v62, %v7536_v24  ;;  %v17726_v24 = vadd.bf16 %v20792_v62, %v7533_v49 }
 0x51a   : > { %v6980_v6 = vpop.f32.mrf.mxu1  ;;  %v6869_v60 = vpop.f32.mrf.mxu0  ;;  %10016 = vtanh.bf16 %v19463_v14 }
 0x51b   : > { %v7549_v28 = vpack.c.bf16 %v6869_v60, %v6865_v32  ;;  %8495 = vmatpush1.bf16.msra.mxu0 %v8345_v51  ;;  %v19464_v32 = vmul.bf16 1056980736, %v17649_v29  ;;  %v7517_v60 = vpack.c.bf16 %v17561_v15, %v17545_v1  ;;  %v20796_v1 = vld [vmem:[#allocation19_spill] sm:$0xff] }
 0x51c   : > { %v6982_v27 = vpop.f32.mrf.mxu1  ;;  %8536 = vmatpush1.bf16.msra.mxu1 %v8347_v17  ;;  %v6871_v48 = vpop.f32.mrf.mxu0 }
 0x51d   : > { %v7550_v7 = vpack.c.bf16 %v6871_v48, %v6867_v10  ;;  %v17655_v26 = vadd.bf16 %v20793_v54, %v7549_v28  ;;  %v7551_v10 = vpack.c.bf16 %v6982_v27, %v17631_v12  ;;  %v7518_v28 = vpack.c.bf16 %v17569_v11, %v17553_v20 }
 0x51e   : > { %v6984_v39 = vpop.f32.mrf.mxu1  ;;  %v6875_v43 = vpop.f32.mrf.mxu0  ;;  %8513 = vmatmul.mubr.bf16.vlgmr.msra.gmra.mxu0 %v17645_v0  ;;  %10018 = vtanh.bf16 %v19464_v32 }
 0x51f   : > { %v7552_v31 = vpack.c.bf16 %v6984_v39, %v6980_v6  ;;  %8554 = vmatmul.mubr.bf16.vlgmr.msra.gmra.mxu1 %v17645_v0  ;;  %8594 = vmatprep.mubr.bf16.mxu0 %v20794_v38  ;;  %v17666_v25 = vadd.bf16 %v20793_v54, %v7550_v7  ;;  %v19465_v57 = vmul.bf16 1056980736, %v17655_v26  ;;  %v7504_v6 = vpack.c.bf16 %v17543_v35, %v17523_v36 }
 0x520   : > { %v6988_v37 = vpop.f32.mrf.mxu1  ;;  %v6877_v23 = vpop.f32.mrf.mxu0  ;;  %8635 = vmatprep.mubr.bf16.mxu1 %v20794_v38  ;;  %v17709_v61 = vadd.bf16 %v20793_v54, %v7551_v10 }
 0x521   : > { %v17676_v18 = vadd.bf16 %v20793_v54, %v7552_v31  ;;  %v19467_v30 = vmul.bf16 1056980736, %v17666_v25  ;;  %10020 = vtanh.bf16 %v19465_v57 }
 0x522   : > { %v6990_v51 = vpop.f32.mrf.mxu1  ;;  %v6879_v17 = vpop.f32.mrf.mxu0  ;;  %v19471_v49 = vmul.bf16 1056980736, %v17709_v61 }
 0x523   : > { %v7565_v48 = vpack.c.bf16 %v6879_v17, %v6875_v43  ;;  %v19466_v27 = vmul.bf16 1056980736, %v17676_v18  ;;  %10022 = vtanh.bf16 %v19467_v30 }
 0x524   : > { %v6992_v47 = vpop.f32.mrf.mxu1  ;;  %v6881_v12 = vpop.f32.mrf.mxu0 }
 0x525   : > { %v17699_v15 = vadd.bf16 %v20796_v1, %v7565_v48  ;;  %v7567_v20 = vpack.c.bf16 %v6992_v47, %v6988_v37  ;;  %v7566_v11 = vpack.c.bf16 %v6881_v12, %v6877_v23  ;;  %v20798_v37 = vld [vmem:[#allocation29_spill] sm:$0xff]  ;;  %10024 = vtanh.bf16 %v19466_v27 }
 0x526   : > { %v6994_v13 = vpop.f32.mrf.mxu1  ;;  %v17723_v23 = vadd.bf16 %v20798_v37, %v7518_v28  ;;  %v17742_v28 = vadd.bf16 %v20798_v37, %v7520_v5  ;;  %v17745_v48 = vadd.bf16 %v20792_v62, %v7535_v50  ;;  %v17760_v50 = vpop.eup %10010  ;;  %v17766_v19 = vadd.bf16 %v20798_v37, %v7517_v60 }
 0x527   : > { %v17711_v7 = vpop.f32.mrf.mxu0  ;;  %v19469_v39 = vmul.bf16 1056980736, %v17699_v15  ;;  %v17715_v43 = vadd.bf16 %v20796_v1, %v7567_v20  ;;  %v17718_v31 = vadd.bf16 %v20796_v1, %v7566_v11  ;;  %v7568_v52 = vpack.c.bf16 %v6994_v13, %v6990_v51  ;;  %v20801_v13 = vld [vmem:[#allocation12_spill] sm:$0xff]  ;;  %v17775_v32 = vpop.eup %10012 }
 0x528   : > { %20797 = vst [vmem:[#allocation16_spill] sm:$0xff] %v17711_v7  ;;  %v19473_v20 = vmul.bf16 1056980736, %v17704_v8  ;;  %v19472_v55 = vmul.bf16 1056980736, %v17723_v23  ;;  %v17784_v57 = vpop.eup %10014  ;;  %v7503_v27 = vpack.c.bf16 %v17533_v2, %v17512_v46  ;;  %v17789_v30 = vadd.bf16 %v20798_v37, %v7519_v59  ;;  %v20807_v2 = vld [vmem:[#allocation36_spill] sm:$0xff] }
 0x529   : > { %v17730_v10 = vpop.f32.mrf.mxu1  ;;  %v17732_v17 = vpop.f32.mrf.mxu0  ;;  %v19468_v51 = vmul.bf16 1056980736, %v17715_v43  ;;  %v19474_v58 = vmul.bf16 1056980736, %v17718_v31  ;;  %v17739_v16 = vadd.bf16 %v20796_v1, %v7568_v52  ;;  %10026 = vtanh.bf16 %v19469_v39 }
 0x52a   : > { %20799 = vst [vmem:[#allocation30_spill] sm:$0xff] %v17730_v10  ;;  %v17763_v52 = vadd.bf16 %v20801_v13, %v7502_v40  ;;  %v19475_v11 = vmul.bf16 1056980736, %v17726_v24  ;;  %v17798_v40 = vpop.eup %10016  ;;  %v17804_v60 = vadd.bf16 %v20801_v13, %v7504_v6  ;;  %v19479_v46 = vmul.bf16 1056980736, %v17742_v28 }
 0x52b   : > { %v17750_v47 = vpop.f32.mrf.mxu1  ;;  %v17752_v12 = vpop.f32.mrf.mxu0  ;;  %10028 = vtanh.bf16 %v19468_v51  ;;  %v19470_v5 = vmul.bf16 1056980736, %v17739_v16  ;;  %v19476_v51 = vmul.bf16 1056980736, %v17745_v48  ;;  %v17815_v59 = vadd.bf16 %v20790_v44, %v7488_v21  ;;  %v20806_v21 = vld [vmem:[#allocation26_spill] sm:$0xff] }
 0x52c   : > { %20800 = vst [vmem:[#allocation14_spill] sm:$0xff] %v17752_v12  ;;  %10030 = vtanh.bf16 %v19474_v58  ;;  %v17828_v6 = vadd.bf16 %v20801_v13, %v7501_v45  ;;  %v17833_v34 = vpop.eup %10018  ;;  %v20820_v45 = vmul.bf16 1056980736, %v17789_v30  ;;  %v20852_v53 = vmul.bf16 1056980736, %v17715_v43 }
 0x52d   : > { %v17771_v63 = vpop.f32.mrf.mxu1  ;;  %v17773_v14 = vpop.f32.mrf.mxu0  ;;  %10032 = vtanh.bf16 %v19470_v5 }
 0x52e   : > { %20802 = vst [vmem:[#allocation18_spill] sm:$0xff] %v17771_v63  ;;  %10034 = vtanh.bf16 %v19471_v49  ;;  %v20814_v49 = vld [vmem:[#allocation37_spill] sm:$0xff] }
 0x52f   : > { %v17794_v39 = vpop.f32.mrf.mxu1  ;;  %v17796_v5 = vpop.f32.mrf.mxu0  ;;  %10036 = vtanh.bf16 %v19473_v20  ;;  %v17838_v20 = vadd.bf16 %v20801_v13, %v7503_v27  ;;  %v20810_v27 = vld [vmem:[#allocation15_spill] sm:$0xff] }
 0x530   : > { %20803 = vst [vmem:[#allocation7_spill] sm:$0xff] %v17796_v5  ;;  %10038 = vtanh.bf16 %v19472_v55  ;;  %v7487_v55 = vpack.c.bf16 %v20807_v2, %v20806_v21  ;;  %v17852_v21 = vpop.eup %10020  ;;  %v20823_v5 = vmul.bf16 1056980736, %v17804_v60 }
 0x531   : > { %v17820_v36 = vpop.f32.mrf.mxu1  ;;  %v17822_v35 = vpop.f32.mrf.mxu0  ;;  %10040 = vtanh.bf16 %v19475_v11  ;;  %v20811_v11 = vld [vmem:[#allocation17_spill] sm:$0xff]  ;;  %v20834_v38 = vmul.bf16 1056980736, %v17838_v20 }
 0x532   : > { %20804 = vst [vmem:[#allocation38_spill] sm:$0xff] %v17820_v36  ;;  %20805 = vst [vmem:[#allocation28_spill] sm:$0xff] %v17822_v35  ;;  %10042 = vtanh.bf16 %v19476_v51  ;;  %v20812_v58 = vpack.c.bf16 %v20810_v27, %v20811_v11  ;;  %v20813_v51 = vld [vmem:[#allocation25_spill] sm:$0xff]  ;;  %v17881_v27 = vadd.bf16 %v20790_v44, %v7487_v55  ;;  %v20824_v36 = vmul.bf16 1056980736, %v17815_v59 }
 0x533   : > { %v17843_v22 = vpop.f32.mrf.mxu1  ;;  %v17845_v56 = vpop.f32.mrf.mxu0  ;;  %10044 = vtanh.bf16 %v19479_v46  ;;  %v20815_v10 = vpack.c.bf16 %v20813_v51, %v20814_v49  ;;  %v20816_v46 = vmul.bf16 1056980736, %v17763_v52  ;;  %v20830_v51 = vmul.bf16 1056980736, %v17828_v6  ;;  %v20841_v35 = vld [vmem:[#allocation21_spill] sm:$0xff] }
 0x534   : > { %20808 = vst [vmem:[#allocation39_spill] sm:$0xff] %v17843_v22  ;;  %20809 = vst [vmem:[#allocation31_spill] sm:$0xff] %v17845_v56  ;;  %v17858_v42 = vadd.bf16 %v20789_v3, %v20812_v58  ;;  %v20819_v58 = vmul.bf16 1056980736, %v17766_v19  ;;  %v10023_v49 = vpop.eup %10022  ;;  %v20827_v56 = vld [vmem:[#allocation35_spill] sm:$0xff]  ;;  %v20831_v22 = vld [vmem:[#allocation9_spill] sm:$0xff] }
 0x535   : > { %v17864_v63 = vadd.bf16 %v20790_v44, %v20815_v10  ;;  %10046 = vtanh.bf16 %v20816_v46  ;;  %v17869_v2 = vpop.f32.mrf.mxu1  ;;  %v17871_v7 = vpop.f32.mrf.mxu0  ;;  %v20828_v44 = vld [vmem:[#allocation8_spill] sm:$0xff]  ;;  %v8318_v54 = vadd.bf16 1065369472, %v10023_v49 }
 0x536   : > { %20817 = vst [vmem:[#allocation40_spill] sm:$0xff] %v17869_v2  ;;  %20818 = vst [vmem:[#allocation32_spill] sm:$0xff] %v17871_v7  ;;  %10048 = vtanh.bf16 %v20819_v58  ;;  %v10025_v58 = vpop.eup %10024  ;;  %v20829_v13 = vpack.c.bf16 %v20827_v56, %v20828_v44  ;;  %v20851_v7 = vmul.bf16 1056980736, %v17699_v15 }
 0x537   : > { %10050 = vtanh.bf16 %v20820_v45  ;;  %v17886_v12 = vpop.f32.mrf.mxu1  ;;  %v17888_v11 = vpop.f32.mrf.mxu0 }
 0x538   : > { %20821 = vst [vmem:[#allocation26_spill] sm:$0xff] %v17886_v12  ;;  %20822 = vst [vmem:[#allocation36_spill] sm:$0xff] %v17888_v11  ;;  %10052 = vtanh.bf16 %v20823_v5  ;;  %v10027_v10 = vpop.eup %10026  ;;  %v17905_v37 = vadd.bf16 %v20789_v3, %v20829_v13  ;;  %v20832_v12 = vld [vmem:[#allocation23_spill] sm:$0xff] }
 0x539   : > { %10054 = vtanh.bf16 %v20824_v36  ;;  %v17897_v46 = vpop.f32.mrf.mxu1  ;;  %v17899_v45 = vpop.f32.mrf.mxu0  ;;  %v20833_v36 = vpack.c.bf16 %v20831_v22, %v20832_v12  ;;  %v8333_v5 = vadd.bf16 1065369472, %v10027_v10  ;;  %v20837_v22 = vmul.bf16 1056980736, %v17858_v42 }
 0x53a   : > { %20825 = vst [vmem:[#allocation15_spill] sm:$0xff] %v17897_v46  ;;  %20826 = vst [vmem:[#allocation17_spill] sm:$0xff] %v17899_v45  ;;  %v10029_v2 = vpop.eup %10028  ;;  %10056 = vtanh.bf16 %v20830_v51  ;;  %v20843_v51 = vld [vmem:[#allocation34_spill] sm:$0xff] }
 0x53b   : > { %v10031_v55 = vpop.eup %10030  ;;  %v17914_v46 = vadd.bf16 %v20789_v3, %v20833_v36  ;;  %10058 = vtanh.bf16 %v20834_v38  ;;  %v17919_v44 = vpop.f32.mrf.mxu1  ;;  %v8335_v0 = vadd.bf16 1065369472, %v10029_v2  ;;  %v20840_v3 = vld [vmem:[#allocation11_spill] sm:$0xff] }
 0x53c   : > { %20835 = vst [vmem:[#allocation25_spill] sm:$0xff] %v17919_v44  ;;  %v17921_v13 = vpop.f32.mrf.mxu0  ;;  %v10033_v56 = vpop.eup %10032  ;;  %v8334_v45 = vadd.bf16 1065369472, %v10031_v55  ;;  %10060 = vtanh.bf16 %v20837_v22  ;;  %v8320_v44 = vadd.bf16 1065369472, %v10025_v58  ;;  %v20842_v10 = vpack.c.bf16 %v20840_v3, %v20841_v35  ;;  %v20844_v55 = vld [vmem:[#allocation22_spill] sm:$0xff] }
 0x53d   : > { %20836 = vst [vmem:[#allocation37_spill] sm:$0xff] %v17921_v13  ;;  %v10035_v12 = vpop.eup %10034  ;;  %v17927_v36 = vpop.f32.mrf.mxu1  ;;  %v8336_v38 = vadd.bf16 1065369472, %v10033_v56  ;;  %v20845_v11 = vpack.c.bf16 %v20843_v51, %v20844_v55  ;;  %v20847_v3 = vmul.bf16 1056980736, %v17881_v27  ;;  %v8461_v58 = vmul.bf16 %v8333_v5, %v20851_v7 }
 0x53e   : > { %20838 = vst [vmem:[#allocation35_spill] sm:$0xff] %v17927_v36  ;;  %v17929_v1 = vpop.f32.mrf.mxu0  ;;  %v10037_v62 = vpop.eup %10036  ;;  %v17935_v2 = vadd.bf16 %v20712_v41, %v20842_v10  ;;  %v20846_v36 = vmul.bf16 1056980736, %v17864_v63  ;;  %v20849_v51 = vmul.bf16 1056980736, %v17718_v31 }
 0x53f   : > { %20839 = vst [vmem:[#allocation8_spill] sm:$0xff] %v17929_v1  ;;  %v17941_v13 = vadd.bf16 %v20712_v41, %v20845_v11  ;;  %v17946_v49 = vpop.eup %10038  ;;  %v17951_v35 = vpop.f32.mrf.mxu1  ;;  %v20850_v10 = vmul.bf16 1056980736, %v17739_v16  ;;  %v8319_v1 = vadd.bf16 1065369472, %v10035_v12 }
 0x540   : > { %10062 = vtanh.bf16 %v20846_v36  ;;  %20848 = vst [vmem:[#allocation9_spill] sm:$0xff] %v17951_v35  ;;  %v17953_v56 = vpop.f32.mrf.mxu0  ;;  %v8462_v11 = vmul.bf16 %v8334_v45, %v20849_v51  ;;  %v10041_v22 = vpop.eup %10040  ;;  %v8317_v36 = vadd.bf16 1065369472, %v17852_v21  ;;  %v20853_v16 = vmul.bf16 1056980736, %v17666_v25 }
 0x541   : > { %10064 = vtanh.bf16 %v20847_v3  ;;  %v8464_v55 = vmul.bf16 %v8336_v38, %v20850_v10  ;;  %v8463_v3 = vmul.bf16 %v8335_v0, %v20852_v53  ;;  %v10043_v4 = vpop.eup %10042  ;;  %v17964_v35 = vpop.f32.mrf.mxu1  ;;  %v20854_v38 = vmul.bf16 1056980736, %v17676_v18 }
 0x542   : > { %8562 = vmatprep.subr.bf16.mxu0 %v8462_v11  ;;  %v17966_v31 = vpop.f32.mrf.mxu0  ;;  %v8446_v45 = vmul.bf16 %v8318_v54, %v20853_v16  ;;  %v8302_v12 = vadd.bf16 1065369472, %v17833_v34  ;;  %v8304_v15 = vadd.bf16 1065369472, %v10037_v62  ;;  %v10045_v7 = vpop.eup %10044  ;;  %v7965_v43 = vmul.bf16 1056980736, %v17935_v2 }
 0x543   : > { %8603 = vmatprep.subr.bf16.mxu1 %v8464_v55  ;;  %v8448_v21 = vmul.bf16 %v8320_v44, %v20854_v38  ;;  %v20855_v53 = vmul.bf16 1056980736, %v17905_v37  ;;  %8563 = vmatpush1.bf16.msra.mxu0 %v8461_v58  ;;  %v10047_v0 = vpop.eup %10046  ;;  %v7967_v5 = vmul.bf16 1056980736, %v17941_v13  ;;  %v20856_v25 = vmul.bf16 1056980736, %v17914_v46  ;;  %v17979_v54 = vpop.f32.mrf.mxu1 }
 0x544   : > { %8604 = vmatpush1.bf16.msra.mxu1 %v8463_v3  ;;  %8564 = vmatprep.subr.bf16.mxu0 %v8446_v45  ;;  %v17981_v18 = vpop.f32.mrf.mxu0  ;;  %v10049_v62 = vpop.eup %10048  ;;  %v8301_v34 = vadd.bf16 1065369472, %v10041_v22  ;;  %v8303_v44 = vadd.bf16 1065369472, %v10043_v4  ;;  %v20857_v51 = vmul.bf16 1056980736, %v17655_v26 }
 0x545   : > { %10066 = vtanh.bf16 %v20855_v53  ;;  %8605 = vmatprep.subr.bf16.mxu1 %v8448_v21  ;;  %v20858_v58 = vmul.bf16 1056980736, %v17709_v61  ;;  %v10051_v55 = vpop.eup %10050  ;;  %v17987_v3 = vpop.f32.mrf.mxu1  ;;  %v20859_v38 = vmul.bf16 1056980736, %v17649_v29  ;;  %v20860_v21 = vmul.bf16 1056980736, %v17704_v8 }
 0x546   : > { %10068 = vtanh.bf16 %v20856_v25  ;;  %v8445_v11 = vmul.bf16 %v8317_v36, %v20857_v51  ;;  %v17989_v16 = vpop.f32.mrf.mxu0  ;;  %v8286_v22 = vadd.bf16 1065369472, %v17946_v49  ;;  %v8288_v4 = vadd.bf16 1065369472, %v10045_v7  ;;  %v10053_v25 = vpop.eup %10052  ;;  %v20890_v2 = vld [vmem:[#allocation27_spill] sm:$0xff] }
 0x547   : > { %v8447_v10 = vmul.bf16 %v8319_v1, %v20858_v58  ;;  %v8430_v45 = vmul.bf16 %v8302_v12, %v20859_v38  ;;  %v8432_v53 = vmul.bf16 %v8304_v15, %v20860_v21  ;;  %10070 = vtanh.bf16 %v7965_v43  ;;  %v10055_v26 = vpop.eup %10054  ;;  %v18000_v1 = vpop.f32.mrf.mxu1 }
 0x548   : > { %8565 = vmatpush1.bf16.msra.mxu0 %v8445_v11  ;;  %10072 = vtanh.bf16 %v7967_v5  ;;  %v18002_v29 = vpop.f32.mrf.mxu0  ;;  %v10057_v8 = vpop.eup %10056  ;;  %v8285_v61 = vadd.bf16 1065369472, %v10049_v62  ;;  %v8287_v49 = vadd.bf16 1065369472, %v10051_v55  ;;  %v20861_v36 = vmul.bf16 1056980736, %v17726_v24 }
 0x549   : > { %8606 = vmatpush1.bf16.msra.mxu1 %v8447_v10  ;;  %8566 = vmatprep.subr.bf16.mxu0 %v8430_v45  ;;  %v20862_v15 = vmul.bf16 1056980736, %v17745_v48  ;;  %v10059_v51 = vpop.eup %10058  ;;  %v18008_v11 = vpop.f32.mrf.mxu1  ;;  %v20863_v10 = vmul.bf16 1056980736, %v17723_v23  ;;  %v20864_v45 = vmul.bf16 1056980736, %v17742_v28 }
 0x54a   : > { %8607 = vmatprep.subr.bf16.mxu1 %v8432_v53  ;;  %v8429_v12 = vmul.bf16 %v8301_v34, %v20861_v36  ;;  %v18010_v58 = vpop.f32.mrf.mxu0  ;;  %v8270_v53 = vadd.bf16 1065369472, %v10047_v0  ;;  %v8272_v62 = vadd.bf16 1065369472, %v10053_v25  ;;  %v10061_v24 = vpop.eup %10060  ;;  %v8269_v55 = vadd.bf16 1065369472, %v10057_v8 }
 0x54b   : > { %v8431_v7 = vmul.bf16 %v8303_v44, %v20862_v15  ;;  %v8414_v38 = vmul.bf16 %v8286_v22, %v20863_v10  ;;  %v8416_v21 = vmul.bf16 %v8288_v4, %v20864_v45  ;;  %v18016_v34 = vpop.f32.mrf.mxu1  ;;  %v8271_v36 = vadd.bf16 1065369472, %v10059_v51 }
 0x54c   : > { %8567 = vmatpush1.bf16.msra.mxu0 %v8429_v12  ;;  %v18018_v48 = vpop.f32.mrf.mxu0  ;;  %v20865_v23 = vmul.bf16 1056980736, %v17766_v19  ;;  %v20866_v28 = vmul.bf16 1056980736, %v17789_v30  ;;  %v20867_v15 = vmul.bf16 1056980736, %v17763_v52 }
 0x54d   : > { %8608 = vmatpush1.bf16.msra.mxu1 %v8431_v7  ;;  %8568 = vmatprep.subr.bf16.mxu0 %v8414_v38  ;;  %v18024_v25 = vpop.f32.mrf.mxu1  ;;  %v20868_v10 = vmul.bf16 1056980736, %v17804_v60  ;;  %v8254_v8 = vadd.bf16 1065369472, %v17798_v40  ;;  %v8256_v51 = vadd.bf16 1065369472, %v10055_v26 }
 0x54e   : > { %8609 = vmatprep.subr.bf16.mxu1 %v8416_v21  ;;  %v10063_v44 = vpop.eup %10062  ;;  %v8413_v22 = vmul.bf16 %v8285_v61, %v20865_v23  ;;  %v8415_v4 = vmul.bf16 %v8287_v49, %v20866_v28  ;;  %v18026_v12 = vpop.f32.mrf.mxu0  ;;  %v8398_v7 = vmul.bf16 %v8270_v53, %v20867_v15  ;;  %v20869_v52 = vmul.bf16 1056980736, %v17828_v6 }
 0x54f   : > { %v10065_v0 = vpop.eup %10064  ;;  %v8400_v38 = vmul.bf16 %v8272_v62, %v20868_v10  ;;  %v18033_v19 = vpop.f32.mrf.mxu1  ;;  %v8253_v49 = vadd.bf16 1065369472, %v10063_v44  ;;  %v20870_v60 = vmul.bf16 1056980736, %v17838_v20  ;;  %v20871_v23 = vmul.bf16 1056980736, %v17636_v9 }
 0x550   : > { %8569 = vmatpush1.bf16.msra.mxu0 %v8413_v22  ;;  %v18035_v30 = vpop.f32.mrf.mxu0  ;;  %v8255_v45 = vadd.bf16 1065369472, %v10065_v0  ;;  %v8397_v21 = vmul.bf16 %v8269_v55, %v20869_v52  ;;  %v20872_v28 = vmul.bf16 1056980736, %v17815_v59  ;;  %v8238_v15 = vadd.bf16 1065369472, %v17784_v57 }
 0x551   : > { %8610 = vmatpush1.bf16.msra.mxu1 %v8415_v4  ;;  %8570 = vmatprep.subr.bf16.mxu0 %v8398_v7  ;;  %v8399_v53 = vmul.bf16 %v8271_v36, %v20870_v60  ;;  %v18041_v40 = vpop.f32.mrf.mxu1  ;;  %v8382_v22 = vmul.bf16 %v8254_v8, %v20871_v23  ;;  %v8240_v44 = vadd.bf16 1065369472, %v10061_v24  ;;  %v20873_v9 = vmul.bf16 1056980736, %v17864_v63 }
 0x552   : > { %8611 = vmatprep.subr.bf16.mxu1 %v8400_v38  ;;  %v7083_v26 = vpop.f32.mrf.mxu0  ;;  %v8384_v4 = vmul.bf16 %v8256_v51, %v20872_v28  ;;  %v20874_v59 = vmul.bf16 1056980736, %v17881_v27  ;;  %v20875_v8 = vmul.bf16 1056980736, %v17629_v33  ;;  %v20876_v52 = vmul.bf16 1056980736, %v17858_v42 }
 0x553   : > { %v10067_v61 = vpop.eup %10066  ;;  %v18048_v6 = vpop.f32.mrf.mxu1  ;;  %v8381_v7 = vmul.bf16 %v8253_v49, %v20873_v9  ;;  %v8222_v60 = vadd.bf16 1065369472, %v17760_v50  ;;  %v20879_v50 = vpack.c.bf16 %v17773_v14, %v17732_v17  ;;  %v20880_v23 = vpack.c.bf16 %v17794_v39, %v17750_v47  ;;  %v20885_v14 = vld [vmem:[#allocation32_spill] sm:$0xff] }
 0x554   : > { %v10069_v62 = vpop.eup %10068  ;;  %8571 = vmatpush1.bf16.msra.mxu0 %v8397_v21  ;;  %v18050_v20 = vpop.f32.mrf.mxu0  ;;  %v8237_v36 = vadd.bf16 1065369472, %v10067_v61  ;;  %v8383_v10 = vmul.bf16 %v8255_v45, %v20874_v59  ;;  %v8366_v51 = vmul.bf16 %v8238_v15, %v20875_v8  ;;  %v8368_v21 = vmul.bf16 %v8240_v44, %v20876_v52  ;;  %v20881_v15 = vld [vmem:[#allocation6_spill] sm:$0xff]  ;;  %v20886_v17 = vld [vmem:[#allocation28_spill] sm:$0xff] }
 0x555   : > { %8612 = vmatpush1.bf16.msra.mxu1 %v8399_v53  ;;  %8572 = vmatprep.subr.bf16.mxu0 %v8382_v22  ;;  %v10071_v55 = vpop.eup %10070  ;;  %v8239_v0 = vadd.bf16 1065369472, %v10069_v62  ;;  %v18056_v57 = vpop.f32.mrf.mxu1  ;;  %v8224_v61 = vadd.bf16 1065369472, %v17775_v32  ;;  %v20877_v53 = vmul.bf16 1056980736, %v17905_v37  ;;  %v18074_v32 = vadd.bf16 %v20712_v41, %v20879_v50 }
 0x556   : > { %8613 = vmatprep.subr.bf16.mxu1 %v8384_v4  ;;  %v10073_v38 = vpop.eup %10072  ;;  %v7087_v24 = vpop.f32.mrf.mxu0  ;;  %v8221_v63 = vadd.bf16 1065369472, %v10071_v55  ;;  %v20878_v62 = vmul.bf16 1056980736, %v17914_v46  ;;  %v18080_v22 = vadd.bf16 %v20712_v41, %v20880_v23  ;;  %v20882_v44 = vmul.bf16 1056980736, %v20881_v15 }
 0x557   : > { %v18064_v49 = vpop.f32.mrf.mxu1  ;;  %v8223_v45 = vadd.bf16 1065369472, %v10073_v38  ;;  %v8365_v33 = vmul.bf16 %v8237_v36, %v20877_v53  ;;  %v7538_v28 = vpack.c.bf16 %v7087_v24, %v7083_v26  ;;  %v20883_v55 = vld [vmem:[#allocation20_spill] sm:$0xff]  ;;  %v20887_v9 = vpack.c.bf16 %v20885_v14, %v20886_v17  ;;  %v20893_v23 = vld [vmem:[#allocation10_spill] sm:$0xff]  ;;  %v20895_v15 = vld [vmem:[#allocation9_spill] sm:$0xff] }
 0x558   : > { %8573 = vmatpush1.bf16.msra.mxu0 %v8381_v7  ;;  %v7091_v27 = vpop.f32.mrf.mxu0  ;;  %v8367_v42 = vmul.bf16 %v8239_v0, %v20878_v62  ;;  %v8350_v46 = vmul.bf16 %v8222_v60, %v20882_v44  ;;  %v20884_v36 = vmul.bf16 1056980736, %v20883_v55  ;;  %v20888_v7 = vld [vmem:[#allocation24_spill] sm:$0xff]  ;;  %v8349_v26 = vmul.bf16 %v8221_v63, %v7965_v43 }
 0x559   : > { %8614 = vmatpush1.bf16.msra.mxu1 %v8383_v10  ;;  %8574 = vmatprep.subr.bf16.mxu0 %v8366_v51  ;;  %v18082_v4 = vpop.f32.mrf.mxu1  ;;  %v18092_v59 = vadd.bf16 %v20888_v7, %v20887_v9  ;;  %v8351_v10 = vmul.bf16 %v8223_v45, %v7967_v5  ;;  %v19509_v38 = vmul.bf16 1056980736, %v18074_v32  ;;  %v19508_v8 = vmul.bf16 1056980736, %v18080_v22  ;;  %v20889_v51 = vld [vmem:[#allocation13_spill] sm:$0xff]  ;;  %v20892_v45 = vld [vmem:[#allocation8_spill] sm:$0xff] }
 0x55a   : > { %8615 = vmatprep.subr.bf16.mxu1 %v8368_v21  ;;  %v7093_v37 = vpop.f32.mrf.mxu0  ;;  %v8352_v0 = vmul.bf16 %v8224_v61, %v20884_v36  ;;  %v18101_v52 = vadd.bf16 %v20889_v51, %v7538_v28  ;;  %v20896_v36 = vmov 0   ;;  %v7540_v14 = vpack.c.bf16 %v18064_v49, %v18048_v6 }
 0x55b   : > { %v7206_v39 = vpop.f32.mrf.mxu1  ;;  %v19510_v61 = vmul.bf16 1056980736, %v18092_v59  ;;  %10074 = vtanh.bf16 %v19509_v38 }
 0x55c   : > { %8575 = vmatpush1.bf16.msra.mxu0 %v8365_v33  ;;  %v7095_v47 = vpop.f32.mrf.mxu0  ;;  %10076 = vtanh.bf16 %v19508_v8  ;;  %v19511_v62 = vmul.bf16 1056980736, %v18101_v52 }
 0x55d   : > { %8616 = vmatpush1.bf16.msra.mxu1 %v8367_v42  ;;  %8576 = vmatprep.subr.bf16.mxu0 %v8350_v46  ;;  %v7553_v24 = vpack.c.bf16 %v7095_v47, %v7091_v27  ;;  %v7208_v21 = vpop.f32.mrf.mxu1  ;;  %v20891_v27 = vld [vmem:[#allocation17_spill] sm:$0xff]  ;;  %10078 = vtanh.bf16 %v19510_v61  ;;  %v7505_v46 = vpack.c.bf16 %v17981_v18, %v17953_v56 }
 0x55e   : > { %8617 = vmatprep.subr.bf16.mxu1 %v8352_v0  ;;  %v7097_v60 = vpop.f32.mrf.mxu0  ;;  %v7490_v33 = vpack.c.bf16 %v20892_v45, %v20891_v27  ;;  %v7506_v0 = vpack.c.bf16 %v17989_v16, %v17966_v31  ;;  %v7555_v9 = vpack.c.bf16 %v7208_v21, %v18082_v4  ;;  %v7524_v31 = vpack.c.bf16 %v18033_v19, %v18016_v34 }
 0x55f   : > { %v7554_v53 = vpack.c.bf16 %v7097_v60, %v7093_v37  ;;  %v18105_v43 = vadd.bf16 %v20890_v2, %v7553_v24  ;;  %v7210_v13 = vpop.f32.mrf.mxu1  ;;  %v20894_v37 = vld [vmem:[#allocation25_spill] sm:$0xff]  ;;  %v7522_v24 = vpack.c.bf16 %v18026_v12, %v18010_v58  ;;  %v7537_v16 = vpack.c.bf16 %v18050_v20, %v18035_v30 }
 0x560   : > { %8577 = vmatpush1.bf16.msra.mxu0 %v8349_v26  ;;  %v7101_v5 = vpop.f32.mrf.mxu0  ;;  %v7556_v63 = vpack.c.bf16 %v7210_v13, %v7206_v39  ;;  %v7492_v44 = vpack.c.bf16 %v20895_v15, %v20894_v37  ;;  %v7508_v26 = vpack.c.bf16 %v18000_v1, %v17979_v54  ;;  %10080 = vtanh.bf16 %v19511_v62  ;;  %v20917_v37 = vld [vmem:[#allocation37_spill] sm:$0xff]  ;;  %v20918_v15 = vld [vmem:[#allocation36_spill] sm:$0xff] }
 0x561   : > { %8618 = vmatpush1.bf16.msra.mxu1 %v8351_v10  ;;  %v18115_v42 = vadd.bf16 %v20890_v2, %v7554_v53  ;;  %v7214_v50 = vpop.f32.mrf.mxu1  ;;  %v19512_v17 = vmul.bf16 1056980736, %v18105_v43  ;;  %v7521_v10 = vpack.c.bf16 %v18018_v48, %v18002_v29  ;;  %v20897_v29 = vld [vmem:[#allocation19_spill] sm:$0xff]  ;;  %v7539_v34 = vpack.c.bf16 %v18056_v57, %v18041_v40 }
 0x562   : > { %v7103_v28 = vpop.f32.mrf.mxu0  ;;  %v18126_v55 = vadd.bf16 %v20890_v2, %v7556_v63  ;;  %v18156_v19 = vadd.bf16 %v20889_v51, %v7540_v14  ;;  %v18161_v30 = vadd.bf16 %v20890_v2, %v7555_v9  ;;  %v7523_v57 = vpack.c.bf16 %v18024_v25, %v18008_v11 }
 0x563   : > { %8595 = vmatmul.mubr.bf16.vlgmr.msra.gmra.mxu0 %v20893_v23  ;;  %v7216_v39 = vpop.f32.mrf.mxu1  ;;  %v19514_v6 = vmul.bf16 1056980736, %v18115_v42  ;;  %10082 = vtanh.bf16 %v19512_v17  ;;  %v7507_v17 = vpack.c.bf16 %v17987_v3, %v17964_v35  ;;  %v20911_v3 = vld [vmem:[#allocation35_spill] sm:$0xff] }
 0x564   : > { %8636 = vmatmul.mubr.bf16.vlgmr.msra.gmra.mxu1 %v20893_v23  ;;  %8676 = vmatprep.mubr.bf16.mxu0 %v20896_v36  ;;  %v7105_v47 = vpop.f32.mrf.mxu0  ;;  %v19513_v21 = vmul.bf16 1056980736, %v18126_v55 }
 0x565   : > { %8717 = vmatprep.mubr.bf16.mxu1 %v20896_v36  ;;  %v7569_v60 = vpack.c.bf16 %v7105_v47, %v7101_v5  ;;  %v7218_v49 = vpop.f32.mrf.mxu1  ;;  %10084 = vtanh.bf16 %v19514_v6 }
 0x566   : > { %v7107_v4 = vpop.f32.mrf.mxu0  ;;  %v7571_v58 = vpack.c.bf16 %v7218_v49, %v7214_v50  ;;  %v20899_v50 = vld [vmem:[#allocation29_spill] sm:$0xff]  ;;  %10086 = vtanh.bf16 %v19513_v21 }
 0x567   : > { %v18151_v48 = vadd.bf16 %v20897_v29, %v7569_v60  ;;  %v7570_v12 = vpack.c.bf16 %v7107_v4, %v7103_v28  ;;  %v7220_v20 = vpop.f32.mrf.mxu1  ;;  %v18175_v23 = vadd.bf16 %v20899_v50, %v7522_v24  ;;  %v18178_v28 = vadd.bf16 %v20889_v51, %v7537_v16 }
 0x568   : > { %v18163_v53 = vpop.f32.mrf.mxu0  ;;  %v18167_v5 = vadd.bf16 %v20897_v29, %v7571_v58  ;;  %v7572_v40 = vpack.c.bf16 %v7220_v20, %v7216_v39  ;;  %v18194_v47 = vadd.bf16 %v20899_v50, %v7524_v31  ;;  %v18197_v24 = vadd.bf16 %v20889_v51, %v7539_v34 }
 0x569   : > { %20898 = vst [vmem:[#allocation23_spill] sm:$0xff] %v18163_v53  ;;  %v19516_v13 = vmul.bf16 1056980736, %v18151_v48  ;;  %v18170_v63 = vadd.bf16 %v20897_v29, %v7570_v12  ;;  %v18182_v14 = vpop.f32.mrf.mxu1  ;;  %v19517_v60 = vmul.bf16 1056980736, %v18161_v30  ;;  %v20903_v12 = vld [vmem:[#allocation12_spill] sm:$0xff]  ;;  %v18216_v20 = vadd.bf16 %v20899_v50, %v7521_v10  ;;  %v18225_v61 = vpop.eup %10074 }
 0x56a   : > { %20900 = vst [vmem:[#allocation11_spill] sm:$0xff] %v18182_v14  ;;  %v18184_v9 = vpop.f32.mrf.mxu0  ;;  %v19515_v39 = vmul.bf16 1056980736, %v18167_v5  ;;  %v18191_v25 = vadd.bf16 %v20897_v29, %v7572_v40  ;;  %v19520_v4 = vmul.bf16 1056980736, %v18156_v19  ;;  %v18213_v34 = vadd.bf16 %v20903_v12, %v7506_v0  ;;  %v18234_v58 = vpop.eup %10076  ;;  %v20945_v29 = vld [vmem:[#allocation16_spill] sm:$0xff] }
 0x56b   : > { %v19521_v11 = vmul.bf16 1056980736, %v18170_v63  ;;  %10088 = vtanh.bf16 %v19516_v13  ;;  %v18202_v16 = vpop.f32.mrf.mxu1  ;;  %v19519_v40 = vmul.bf16 1056980736, %v18175_v23  ;;  %v19523_v62 = vmul.bf16 1056980736, %v18178_v28  ;;  %v18248_v0 = vpop.eup %10078 }
 0x56c   : > { %20901 = vst [vmem:[#allocation21_spill] sm:$0xff] %v18202_v16  ;;  %v18204_v49 = vpop.f32.mrf.mxu0  ;;  %10090 = vtanh.bf16 %v19515_v39  ;;  %v19518_v31 = vmul.bf16 1056980736, %v18191_v25  ;;  %v18239_v21 = vadd.bf16 %v20899_v50, %v7523_v57  ;;  %v19522_v6 = vmul.bf16 1056980736, %v18197_v24  ;;  %v20907_v57 = vld [vmem:[#allocation33_spill] sm:$0xff] }
 0x56d   : > { %20902 = vst [vmem:[#allocation34_spill] sm:$0xff] %v18204_v49  ;;  %10092 = vtanh.bf16 %v19521_v11  ;;  %v18221_v8 = vpop.f32.mrf.mxu1  ;;  %v18254_v10 = vadd.bf16 %v20903_v12, %v7508_v26  ;;  %v19524_v35 = vmul.bf16 1056980736, %v18194_v47  ;;  %v18278_v26 = vadd.bf16 %v20903_v12, %v7505_v46  ;;  %v20930_v16 = vld [vmem:[#allocation31_spill] sm:$0xff]  ;;  %v20934_v49 = vld [vmem:[#allocation40_spill] sm:$0xff] }
 0x56e   : > { %20904 = vst [vmem:[#allocation22_spill] sm:$0xff] %v18221_v8  ;;  %v18223_v38 = vpop.f32.mrf.mxu0  ;;  %10094 = vtanh.bf16 %v19518_v31  ;;  %v18283_v45 = vpop.eup %10080  ;;  %v18301_v46 = vadd.bf16 %v20907_v57, %v7492_v44  ;;  %v20919_v44 = vpack.c.bf16 %v20917_v37, %v20918_v15  ;;  %v20955_v51 = vmul.bf16 1056980736, %v18151_v48 }
 0x56f   : > { %10096 = vtanh.bf16 %v19517_v60  ;;  %v18244_v39 = vpop.f32.mrf.mxu1  ;;  %v18265_v60 = vadd.bf16 %v20907_v57, %v7490_v33  ;;  %v20910_v33 = vld [vmem:[#allocation15_spill] sm:$0xff]  ;;  %v20933_v37 = vmul.bf16 1056980736, %v18278_v26 }
 0x570   : > { %20905 = vst [vmem:[#allocation6_spill] sm:$0xff] %v18244_v39  ;;  %v18246_v13 = vpop.f32.mrf.mxu0  ;;  %10098 = vtanh.bf16 %v19520_v4  ;;  %v18288_v4 = vadd.bf16 %v20903_v12, %v7507_v17  ;;  %v18320_v31 = vadd.bf16 %v20907_v57, %v20919_v44  ;;  %v20931_v39 = vld [vmem:[#allocation7_spill] sm:$0xff] }
 0x571   : > { %20906 = vst [vmem:[#allocation20_spill] sm:$0xff] %v18246_v13  ;;  %10100 = vtanh.bf16 %v19519_v40  ;;  %v18270_v54 = vpop.f32.mrf.mxu1  ;;  %v7491_v40 = vpack.c.bf16 %v20911_v3, %v20910_v33  ;;  %v18308_v33 = vpop.eup %10082  ;;  %v20923_v3 = vmul.bf16 1056980736, %v18239_v21  ;;  %v20932_v13 = vpack.c.bf16 %v20930_v16, %v20931_v39 }
 0x572   : > { %20908 = vst [vmem:[#allocation32_spill] sm:$0xff] %v18270_v54  ;;  %v18272_v1 = vpop.f32.mrf.mxu0  ;;  %10102 = vtanh.bf16 %v19523_v62  ;;  %v20915_v62 = vld [vmem:[#allocation39_spill] sm:$0xff] }
 0x573   : > { %20909 = vst [vmem:[#allocation28_spill] sm:$0xff] %v18272_v1  ;;  %10104 = vtanh.bf16 %v19522_v6  ;;  %v18293_v56 = vpop.f32.mrf.mxu1  ;;  %v20914_v6 = vld [vmem:[#allocation26_spill] sm:$0xff]  ;;  %v10085_v15 = vpop.eup %10084  ;;  %v18337_v44 = vadd.bf16 %v20907_v57, %v7491_v40  ;;  %v18362_v53 = vadd.bf16 %v20888_v7, %v20932_v13 }
 0x574   : > { %20912 = vst [vmem:[#allocation17_spill] sm:$0xff] %v18293_v56  ;;  %v18295_v18 = vpop.f32.mrf.mxu0  ;;  %10106 = vtanh.bf16 %v19524_v35  ;;  %v20916_v11 = vpack.c.bf16 %v20914_v6, %v20915_v62  ;;  %v20920_v35 = vmul.bf16 1056980736, %v18213_v34  ;;  %v20922_v6 = vmul.bf16 1056980736, %v18216_v20  ;;  %v20935_v56 = vld [vmem:[#allocation38_spill] sm:$0xff] }
 0x575   : > { %20913 = vst [vmem:[#allocation8_spill] sm:$0xff] %v18295_v18  ;;  %v18325_v17 = vpop.f32.mrf.mxu1 }
 0x576   : > { %v18314_v27 = vadd.bf16 %v20888_v7, %v20916_v11  ;;  %10108 = vtanh.bf16 %v20920_v35  ;;  %20921 = vst [vmem:[#allocation10_spill] sm:$0xff] %v18325_v17  ;;  %v18327_v14 = vpop.f32.mrf.mxu0  ;;  %v20926_v11 = vmul.bf16 1056980736, %v18254_v10  ;;  %v20927_v35 = vmul.bf16 1056980736, %v18265_v60 }
 0x577   : > { %10110 = vtanh.bf16 %v20922_v6  ;;  %v18342_v8 = vpop.f32.mrf.mxu1  ;;  %v10087_v6 = vpop.eup %10086 }
 0x578   : > { %10112 = vtanh.bf16 %v20923_v3  ;;  %20924 = vst [vmem:[#allocation25_spill] sm:$0xff] %v18342_v8  ;;  %v18344_v62 = vpop.f32.mrf.mxu0 }
 0x579   : > { %20925 = vst [vmem:[#allocation9_spill] sm:$0xff] %v18344_v62  ;;  %10114 = vtanh.bf16 %v20926_v11  ;;  %v10089_v40 = vpop.eup %10088  ;;  %v18354_v3 = vpop.f32.mrf.mxu1  ;;  %v20937_v62 = vmul.bf16 1056980736, %v18288_v4  ;;  %v20940_v11 = vmul.bf16 1056980736, %v18301_v46 }
 0x57a   : > { %10116 = vtanh.bf16 %v20927_v35  ;;  %20928 = vst [vmem:[#allocation15_spill] sm:$0xff] %v18354_v3  ;;  %v18356_v17 = vpop.f32.mrf.mxu0  ;;  %v10091_v18 = vpop.eup %10090  ;;  %v20936_v35 = vpack.c.bf16 %v20934_v49, %v20935_v56  ;;  %v20941_v56 = vmul.bf16 1056980736, %v18314_v27 }
 0x57b   : > { %20929 = vst [vmem:[#allocation35_spill] sm:$0xff] %v18356_v17  ;;  %10118 = vtanh.bf16 %v20933_v37  ;;  %v10093_v54 = vpop.eup %10092  ;;  %v18376_v39 = vpop.f32.mrf.mxu1  ;;  %v8337_v37 = vadd.bf16 1065369472, %v10089_v40  ;;  %v8339_v57 = vadd.bf16 1065369472, %v10091_v18  ;;  %v20947_v18 = vld [vmem:[#allocation18_spill] sm:$0xff] }
 0x57c   : > { %v18371_v8 = vadd.bf16 %v20888_v7, %v20936_v35  ;;  %10120 = vtanh.bf16 %v20937_v62  ;;  %20938 = vst [vmem:[#allocation26_spill] sm:$0xff] %v18376_v39  ;;  %v18378_v13 = vpop.f32.mrf.mxu0  ;;  %v10095_v16 = vpop.eup %10094  ;;  %v8338_v12 = vadd.bf16 1065369472, %v10093_v54  ;;  %v8322_v17 = vadd.bf16 1065369472, %v10085_v15  ;;  %v20948_v54 = vld [vmem:[#allocation30_spill] sm:$0xff] }
 0x57d   : > { %20939 = vst [vmem:[#allocation39_spill] sm:$0xff] %v18378_v13  ;;  %10122 = vtanh.bf16 %v20940_v11  ;;  %v10097_v49 = vpop.eup %10096  ;;  %v18384_v35 = vpop.f32.mrf.mxu1  ;;  %v8340_v62 = vadd.bf16 1065369472, %v10095_v16  ;;  %v8324_v39 = vadd.bf16 1065369472, %v10087_v6  ;;  %v20944_v13 = vld [vmem:[#allocation14_spill] sm:$0xff]  ;;  %v20949_v40 = vpack.c.bf16 %v20947_v18, %v20948_v54 }
 0x57e   : > { %10124 = vtanh.bf16 %v20941_v56  ;;  %20942 = vst [vmem:[#allocation37_spill] sm:$0xff] %v18384_v35  ;;  %v18386_v3 = vpop.f32.mrf.mxu0  ;;  %v10099_v50 = vpop.eup %10098  ;;  %v20946_v36 = vpack.c.bf16 %v20944_v13, %v20945_v29  ;;  %v20950_v35 = vmul.bf16 1056980736, %v18320_v31  ;;  %v20951_v29 = vmul.bf16 1056980736, %v18337_v44 }
 0x57f   : > { %20943 = vst [vmem:[#allocation36_spill] sm:$0xff] %v18386_v3  ;;  %v18398_v2 = vadd.bf16 %v20712_v41, %v20949_v40  ;;  %v18403_v15 = vpop.eup %10100  ;;  %v20953_v16 = vmul.bf16 1056980736, %v18170_v63  ;;  %v20954_v54 = vmul.bf16 1056980736, %v18191_v25  ;;  %v8465_v6 = vmul.bf16 %v8337_v37, %v20955_v51 }
 0x580   : > { %v18392_v11 = vadd.bf16 %v20712_v41, %v20946_v36  ;;  %10126 = vtanh.bf16 %v20950_v35  ;;  %v18408_v36 = vpop.f32.mrf.mxu1  ;;  %v18410_v13 = vpop.f32.mrf.mxu0  ;;  %v8321_v35 = vadd.bf16 1065369472, %v18308_v33  ;;  %v8323_v3 = vadd.bf16 1065369472, %v10097_v49 }
 0x581   : > { %10128 = vtanh.bf16 %v20951_v29  ;;  %20952 = vst [vmem:[#allocation31_spill] sm:$0xff] %v18408_v36  ;;  %v8466_v18 = vmul.bf16 %v8338_v12, %v20953_v16  ;;  %v8468_v40 = vmul.bf16 %v8340_v62, %v20954_v54  ;;  %v10103_v56 = vpop.eup %10102  ;;  %v20956_v7 = vmul.bf16 1056980736, %v18167_v5 }
 0x582   : > { %v10105_v1 = vpop.eup %10104  ;;  %v18421_v36 = vpop.f32.mrf.mxu1  ;;  %v20957_v25 = vmul.bf16 1056980736, %v18115_v42  ;;  %v20958_v62 = vmul.bf16 1056980736, %v18126_v55  ;;  %v8306_v49 = vadd.bf16 1065369472, %v18283_v45 }
 0x583   : > { %v8467_v29 = vmul.bf16 %v8339_v57, %v20956_v7  ;;  %8644 = vmatprep.subr.bf16.mxu0 %v8466_v18  ;;  %8685 = vmatprep.subr.bf16.mxu1 %v8468_v40  ;;  %v18423_v63 = vpop.f32.mrf.mxu0  ;;  %v8308_v48 = vadd.bf16 1065369472, %v10099_v50  ;;  %v10107_v51 = vpop.eup %10106  ;;  %v7969_v5 = vmul.bf16 1056980736, %v18392_v11  ;;  %v20959_v7 = vmul.bf16 1056980736, %v18362_v53 }
 0x584   : > { %v8450_v12 = vmul.bf16 %v8322_v17, %v20957_v25  ;;  %v8452_v33 = vmul.bf16 %v8324_v39, %v20958_v62  ;;  %8645 = vmatpush1.bf16.msra.mxu0 %v8465_v6  ;;  %v10109_v57 = vpop.eup %10108  ;;  %v7971_v37 = vmul.bf16 1056980736, %v18398_v2  ;;  %v20960_v42 = vmul.bf16 1056980736, %v18371_v8  ;;  %v18436_v17 = vpop.f32.mrf.mxu1 }
 0x585   : > { %10130 = vtanh.bf16 %v20959_v7  ;;  %8686 = vmatpush1.bf16.msra.mxu1 %v8467_v29  ;;  %v18438_v55 = vpop.f32.mrf.mxu0  ;;  %v10111_v50 = vpop.eup %10110  ;;  %v8305_v45 = vadd.bf16 1065369472, %v10103_v56  ;;  %v8307_v39 = vadd.bf16 1065369472, %v10105_v1  ;;  %v20961_v16 = vmul.bf16 1056980736, %v18105_v43 }
 0x586   : > { %10132 = vtanh.bf16 %v20960_v42  ;;  %8646 = vmatprep.subr.bf16.mxu0 %v8450_v12  ;;  %8687 = vmatprep.subr.bf16.mxu1 %v8452_v33  ;;  %v20962_v6 = vmul.bf16 1056980736, %v18161_v30  ;;  %v10113_v40 = vpop.eup %10112  ;;  %v18444_v29 = vpop.f32.mrf.mxu1  ;;  %v20963_v62 = vmul.bf16 1056980736, %v18101_v52  ;;  %v20964_v33 = vmul.bf16 1056980736, %v18156_v19 }
 0x587   : > { %v8449_v18 = vmul.bf16 %v8321_v35, %v20961_v16  ;;  %v18446_v25 = vpop.f32.mrf.mxu0  ;;  %v8290_v56 = vadd.bf16 1065369472, %v18403_v15  ;;  %v8292_v1 = vadd.bf16 1065369472, %v10107_v51  ;;  %v10115_v42 = vpop.eup %10114  ;;  %10134 = vtanh.bf16 %v7969_v5 }
 0x588   : > { %v8451_v54 = vmul.bf16 %v8323_v3, %v20962_v6  ;;  %v8434_v12 = vmul.bf16 %v8306_v49, %v20963_v62  ;;  %v8436_v7 = vmul.bf16 %v8308_v48, %v20964_v33  ;;  %v10117_v43 = vpop.eup %10116  ;;  %10136 = vtanh.bf16 %v7971_v37  ;;  %v18457_v30 = vpop.f32.mrf.mxu1 }
 0x589   : > { %8647 = vmatpush1.bf16.msra.mxu0 %v8449_v18  ;;  %v18459_v52 = vpop.f32.mrf.mxu0  ;;  %v10119_v19 = vpop.eup %10118  ;;  %v8289_v3 = vadd.bf16 1065369472, %v10111_v50  ;;  %v8291_v15 = vadd.bf16 1065369472, %v10113_v40  ;;  %v20965_v35 = vmul.bf16 1056980736, %v18178_v28 }
 0x58a   : > { %8688 = vmatpush1.bf16.msra.mxu1 %v8451_v54  ;;  %8648 = vmatprep.subr.bf16.mxu0 %v8434_v12  ;;  %v20966_v48 = vmul.bf16 1056980736, %v18197_v24  ;;  %v10121_v16 = vpop.eup %10120  ;;  %v18465_v18 = vpop.f32.mrf.mxu1  ;;  %v20967_v54 = vmul.bf16 1056980736, %v18175_v23  ;;  %v20968_v12 = vmul.bf16 1056980736, %v18194_v47 }
 0x58b   : > { %8689 = vmatprep.subr.bf16.mxu1 %v8436_v7  ;;  %v8433_v49 = vmul.bf16 %v8305_v45, %v20965_v35  ;;  %v18467_v6 = vpop.f32.mrf.mxu0  ;;  %v8274_v7 = vadd.bf16 1065369472, %v10109_v57  ;;  %v8276_v50 = vadd.bf16 1065369472, %v10115_v42  ;;  %v10123_v40 = vpop.eup %10122  ;;  %v8273_v35 = vadd.bf16 1065369472, %v10119_v19 }
 0x58c   : > { %v8435_v51 = vmul.bf16 %v8307_v39, %v20966_v48  ;;  %v8418_v62 = vmul.bf16 %v8290_v56, %v20967_v54  ;;  %v8420_v33 = vmul.bf16 %v8292_v1, %v20968_v12  ;;  %v10125_v28 = vpop.eup %10124  ;;  %v18473_v45 = vpop.f32.mrf.mxu1  ;;  %v8275_v48 = vadd.bf16 1065369472, %v10121_v16 }
 0x58d   : > { %8649 = vmatpush1.bf16.msra.mxu0 %v8433_v49  ;;  %v18475_v24 = vpop.f32.mrf.mxu0  ;;  %v20969_v23 = vmul.bf16 1056980736, %v18216_v20  ;;  %v20970_v47 = vmul.bf16 1056980736, %v18239_v21  ;;  %v8260_v19 = vadd.bf16 1065369472, %v10123_v40 }
 0x58e   : > { %8690 = vmatpush1.bf16.msra.mxu1 %v8435_v51  ;;  %8650 = vmatprep.subr.bf16.mxu0 %v8418_v62  ;;  %v10127_v39 = vpop.eup %10126  ;;  %v18481_v42 = vpop.f32.mrf.mxu1  ;;  %v20971_v51 = vmul.bf16 1056980736, %v18213_v34  ;;  %v20972_v62 = vmul.bf16 1056980736, %v18254_v10 }
 0x58f   : > { %8691 = vmatprep.subr.bf16.mxu1 %v8420_v33  ;;  %v8417_v56 = vmul.bf16 %v8289_v3, %v20969_v23  ;;  %v8419_v57 = vmul.bf16 %v8291_v15, %v20970_v47  ;;  %v10129_v1 = vpop.eup %10128  ;;  %v18483_v49 = vpop.f32.mrf.mxu0  ;;  %v8258_v33 = vadd.bf16 1065369472, %v10117_v43  ;;  %v8257_v15 = vadd.bf16 1065369472, %v10127_v39 }
 0x590   : > { %v8402_v54 = vmul.bf16 %v8274_v7, %v20971_v51  ;;  %v8404_v12 = vmul.bf16 %v8276_v50, %v20972_v62  ;;  %v18489_v20 = vpop.f32.mrf.mxu1  ;;  %v8259_v16 = vadd.bf16 1065369472, %v10129_v1  ;;  %v20973_v23 = vmul.bf16 1056980736, %v18278_v26 }
 0x591   : > { %8651 = vmatpush1.bf16.msra.mxu0 %v8417_v56  ;;  %v18491_v21 = vpop.f32.mrf.mxu0  ;;  %v20974_v7 = vmul.bf16 1056980736, %v18288_v4  ;;  %v20975_v56 = vmul.bf16 1056980736, %v18265_v60  ;;  %v8244_v39 = vadd.bf16 1065369472, %v10125_v28 }
 0x592   : > { %8692 = vmatpush1.bf16.msra.mxu1 %v8419_v57  ;;  %8652 = vmatprep.subr.bf16.mxu0 %v8402_v54  ;;  %v8401_v34 = vmul.bf16 %v8273_v35, %v20973_v23  ;;  %v18497_v43 = vpop.f32.mrf.mxu1  ;;  %v20976_v57 = vmul.bf16 1056980736, %v18301_v46  ;;  %v8242_v54 = vadd.bf16 1065369472, %v18248_v0  ;;  %v20977_v60 = vmul.bf16 1056980736, %v18320_v31 }
 0x593   : > { %8693 = vmatprep.subr.bf16.mxu1 %v8404_v12  ;;  %v10131_v3 = vpop.eup %10130  ;;  %v8403_v10 = vmul.bf16 %v8275_v48, %v20974_v7  ;;  %v7309_v40 = vpop.f32.mrf.mxu0  ;;  %v8386_v47 = vmul.bf16 %v8258_v33, %v20975_v56  ;;  %v20978_v46 = vmul.bf16 1056980736, %v18337_v44  ;;  %v20982_v56 = vmul.bf16 1056980736, %v18371_v8 }
 0x594   : > { %v10133_v50 = vpop.eup %10132  ;;  %v8388_v51 = vmul.bf16 %v8260_v19, %v20976_v57  ;;  %v18504_v26 = vpop.f32.mrf.mxu1  ;;  %v8241_v48 = vadd.bf16 1065369472, %v10131_v3  ;;  %v8385_v62 = vmul.bf16 %v8257_v15, %v20977_v60  ;;  %v20979_v19 = vmul.bf16 1056980736, %v18092_v59  ;;  %v20988_v60 = vld [vmem:[#allocation24_spill] sm:$0xff] }
 0x595   : > { %8653 = vmatpush1.bf16.msra.mxu0 %v8401_v34  ;;  %v18506_v4 = vpop.f32.mrf.mxu0  ;;  %v10135_v35 = vpop.eup %10134  ;;  %v8243_v1 = vadd.bf16 1065369472, %v10133_v50  ;;  %v8387_v12 = vmul.bf16 %v8259_v16, %v20978_v46  ;;  %v20980_v34 = vmul.bf16 1056980736, %v18314_v27  ;;  %v8228_v3 = vadd.bf16 1065369472, %v18234_v58 }
 0x596   : > { %8694 = vmatpush1.bf16.msra.mxu1 %v8403_v10  ;;  %8654 = vmatprep.subr.bf16.mxu0 %v8386_v47  ;;  %v10137_v33 = vpop.eup %10136  ;;  %v18512_v0 = vpop.f32.mrf.mxu1  ;;  %v8370_v23 = vmul.bf16 %v8242_v54, %v20979_v19  ;;  %v8226_v10 = vadd.bf16 1065369472, %v18225_v61  ;;  %v8225_v15 = vadd.bf16 1065369472, %v10135_v35  ;;  %v20981_v50 = vmul.bf16 1056980736, %v18362_v53 }
 0x597   : > { %8695 = vmatprep.subr.bf16.mxu1 %v8388_v51  ;;  %v7313_v28 = vpop.f32.mrf.mxu0  ;;  %v8372_v7 = vmul.bf16 %v8244_v39, %v20980_v34  ;;  %v8227_v16 = vadd.bf16 1065369472, %v10137_v33  ;;  %v8371_v27 = vmul.bf16 %v8243_v1, %v20982_v56  ;;  %v20983_v61 = vpack.c.bf16 %v18223_v38, %v18184_v9  ;;  %v20986_v53 = vld [vmem:[#allocation28_spill] sm:$0xff] }
 0x598   : > { %v18520_v31 = vpop.f32.mrf.mxu1  ;;  %v8369_v59 = vmul.bf16 %v8241_v48, %v20981_v50  ;;  %v20984_v51 = vmul.bf16 1056980736, %v18074_v32  ;;  %v20985_v39 = vmul.bf16 1056980736, %v18080_v22  ;;  %v20987_v48 = vpack.c.bf16 %v18327_v14, %v20986_v53 }
 0x599   : > { %8655 = vmatpush1.bf16.msra.mxu0 %v8385_v62  ;;  %v7317_v44 = vpop.f32.mrf.mxu0  ;;  %v18530_v58 = vadd.bf16 %v20712_v41, %v20983_v61  ;;  %v7542_v1 = vpack.c.bf16 %v7313_v28, %v7309_v40  ;;  %v8353_v32 = vmul.bf16 %v8225_v15, %v7969_v5  ;;  %v8355_v22 = vmul.bf16 %v8227_v16, %v7971_v37  ;;  %v20989_v40 = vld [vmem:[#allocation13_spill] sm:$0xff] }
 0x59a   : > { %8696 = vmatpush1.bf16.msra.mxu1 %v8387_v12  ;;  %8656 = vmatprep.subr.bf16.mxu0 %v8370_v23  ;;  %v7430_v47 = vpop.f32.mrf.mxu1  ;;  %v8354_v54 = vmul.bf16 %v8226_v10, %v20984_v51  ;;  %v8356_v35 = vmul.bf16 %v8228_v3, %v20985_v39  ;;  %v18540_v8 = vadd.bf16 %v20988_v60, %v20987_v48  ;;  %v20990_v23 = vld [vmem:[#allocation27_spill] sm:$0xff]  ;;  %v18562_v10 = vld [vmem:[%s18937_s9] sm:$0x3]  ;;  %v20991_v15 = vmov 0  }
 0x59b   : > { %8697 = vmatprep.subr.bf16.mxu1 %v8372_v7  ;;  %v7319_v57 = vpop.f32.mrf.mxu0  ;;  %v19546_v46 = vmul.bf16 1056980736, %v18530_v58  ;;  %v18549_v28 = vadd.bf16 %v20989_v40, %v7542_v1  ;;  %v7544_v16 = vpack.c.bf16 %v18520_v31, %v18504_v26  ;;  %v7512_v51 = vpack.c.bf16 %v18457_v30, %v18436_v17  ;;  %v20992_v17 = vld [vmem:[#allocation19_spill] sm:$0xff] }
 0x59c   : > { %v7432_v38 = vpop.f32.mrf.mxu1  ;;  %v19547_v33 = vmul.bf16 1056980736, %v18540_v8  ;;  %v7528_v26 = vpack.c.bf16 %v18489_v20, %v18473_v45  ;;  %v7541_v31 = vpack.c.bf16 %v18506_v4, %v18491_v21  ;;  %v7525_v1 = vpack.c.bf16 %v18475_v24, %v18459_v52 }
 0x59d   : > { %8657 = vmatpush1.bf16.msra.mxu0 %v8369_v59  ;;  %v7321_v9 = vpop.f32.mrf.mxu0  ;;  %10138 = vtanh.bf16 %v19546_v46  ;;  %v18596_v45 = vadd.bf16 %v20989_v40, %v7544_v16  ;;  %v7527_v52 = vpack.c.bf16 %v18481_v42, %v18465_v18  ;;  %v20995_v18 = vld [vmem:[#allocation36_spill] sm:$0xff]  ;;  %v21008_v46 = vld [vmem:[#allocation23_spill] sm:$0xff] }
 0x59e   : > { %8698 = vmatpush1.bf16.msra.mxu1 %v8371_v27  ;;  %8658 = vmatprep.subr.bf16.mxu0 %v8354_v54  ;;  %v7557_v62 = vpack.c.bf16 %v7321_v9, %v7317_v44  ;;  %v7434_v14 = vpop.f32.mrf.mxu1  ;;  %10140 = vtanh.bf16 %v19547_v33  ;;  %v19558_v44 = vmul.bf16 1056980736, %v18549_v28  ;;  %v7526_v54 = vpack.c.bf16 %v18483_v49, %v18467_v6 }
 0x59f   : > { %8699 = vmatprep.subr.bf16.mxu1 %v8356_v35  ;;  %v7323_v12 = vpop.f32.mrf.mxu0  ;;  %v7559_v59 = vpack.c.bf16 %v7434_v14, %v7430_v47  ;;  %v7543_v47 = vpack.c.bf16 %v18512_v0, %v18497_v43 }
 0x5a0   : > { %v7558_v19 = vpack.c.bf16 %v7323_v12, %v7319_v57  ;;  %v18552_v34 = vadd.bf16 %v20990_v23, %v7557_v62  ;;  %v7436_v11 = vpop.f32.mrf.mxu1  ;;  %v7510_v57 = vpack.c.bf16 %v18446_v25, %v18423_v63  ;;  %10142 = vtanh.bf16 %v19558_v44  ;;  %v21020_v44 = vld [vmem:[#allocation11_spill] sm:$0xff] }
 0x5a1   : > { %8659 = vmatpush1.bf16.msra.mxu0 %v8353_v32  ;;  %v7327_v5 = vpop.f32.mrf.mxu0  ;;  %v7560_v2 = vpack.c.bf16 %v7436_v11, %v7432_v38  ;;  %v18601_v49 = vadd.bf16 %v20990_v23, %v7559_v59  ;;  %v20993_v38 = vld [vmem:[#allocation29_spill] sm:$0xff]  ;;  %v18617_v32 = vadd.bf16 %v20989_v40, %v7541_v31  ;;  %v18631_v24 = vadd.bf16 %v20989_v40, %v7543_v47  ;;  %v20996_v40 = vld [vmem:[#allocation12_spill] sm:$0xff] }
 0x5a2   : > { %8700 = vmatpush1.bf16.msra.mxu1 %v8355_v22  ;;  %v18557_v37 = vadd.bf16 %v20990_v23, %v7558_v19  ;;  %v7440_v7 = vpop.f32.mrf.mxu1  ;;  %v19561_v50 = vmul.bf16 1056980736, %v18552_v34  ;;  %v18614_v9 = vadd.bf16 %v20993_v38, %v7526_v54  ;;  %v18637_v19 = vadd.bf16 %v20993_v38, %v7528_v26  ;;  %v20998_v54 = vld [vmem:[#allocation31_spill] sm:$0xff] }
 0x5a3   : > { %v7329_v3 = vpop.f32.mrf.mxu0  ;;  %v18575_v56 = vadd.bf16 %v20990_v23, %v7560_v2  ;;  %v19559_v12 = vmul.bf16 1056980736, %v18601_v49  ;;  %v19556_v23 = vmul.bf16 1056980736, %v18596_v45  ;;  %v18646_v2 = vadd.bf16 %v20996_v40, %v7510_v57 }
 0x5a4   : > { %8677 = vmatmul.mubr.bf16.vlgmr.msra.gmra.mxu0 %v18562_v10  ;;  %v7442_v27 = vpop.f32.mrf.mxu1  ;;  %v8070_v35 = vmul.bf16 1056980736, %v18557_v37  ;;  %10144 = vtanh.bf16 %v19561_v50  ;;  %v19555_v16 = vmul.bf16 1056980736, %v18617_v32  ;;  %v19554_v57 = vmul.bf16 1056980736, %v18631_v24 }
 0x5a5   : > { %8718 = vmatmul.mubr.bf16.vlgmr.msra.gmra.mxu1 %v18562_v10  ;;  %8758 = vmatprep.mubr.bf16.mxu0 %v20991_v15  ;;  %v7331_v61 = vpop.f32.mrf.mxu0  ;;  %v8072_v20 = vmul.bf16 1056980736, %v18575_v56  ;;  %v18674_v26 = vadd.bf16 %v20996_v40, %v7512_v51  ;;  %v19550_v31 = vmul.bf16 1056980736, %v18637_v19  ;;  %v19548_v47 = vmul.bf16 1056980736, %v18646_v2 }
 0x5a6   : > { %8799 = vmatprep.mubr.bf16.mxu1 %v20991_v15  ;;  %v7573_v39 = vpack.c.bf16 %v7331_v61, %v7327_v5  ;;  %v7444_v53 = vpop.f32.mrf.mxu1  ;;  %10146 = vtanh.bf16 %v8070_v35  ;;  %v20994_v5 = vld [vmem:[#allocation35_spill] sm:$0xff]  ;;  %v18654_v15 = vadd.bf16 %v20993_v38, %v7525_v1  ;;  %v18664_v61 = vadd.bf16 %v20993_v38, %v7527_v52 }
 0x5a7   : > { %v7333_v63 = vpop.f32.mrf.mxu0  ;;  %v7575_v30 = vpack.c.bf16 %v7444_v53, %v7440_v7  ;;  %v7494_v42 = vpack.c.bf16 %v20995_v18, %v20994_v5  ;;  %v19552_v7 = vmul.bf16 1056980736, %v18614_v9  ;;  %v21000_v53 = vld [vmem:[#allocation9_spill] sm:$0xff]  ;;  %v19553_v18 = vmul.bf16 1056980736, %v18674_v26 }
 0x5a8   : > { %v18593_v25 = vadd.bf16 %v20992_v17, %v7573_v39  ;;  %v7574_v6 = vpack.c.bf16 %v7333_v63, %v7329_v3  ;;  %v7446_v21 = vpop.f32.mrf.mxu1  ;;  %v7509_v3 = vpack.c.bf16 %v18438_v55, %v18410_v13  ;;  %v20997_v55 = vld [vmem:[#allocation26_spill] sm:$0xff]  ;;  %v21001_v63 = vld [vmem:[#allocation39_spill] sm:$0xff]  ;;  %v19549_v51 = vmul.bf16 1056980736, %v18654_v15 }
 0x5a9   : > { %v18606_v4 = vadd.bf16 %v20992_v17, %v7575_v30  ;;  %v7576_v48 = vpack.c.bf16 %v7446_v21, %v7442_v27  ;;  %v7511_v27 = vpack.c.bf16 %v18444_v29, %v18421_v36  ;;  %v7496_v39 = vpack.c.bf16 %v20998_v54, %v20997_v55  ;;  %v20999_v36 = vld [vmem:[#allocation33_spill] sm:$0xff] }
 0x5aa   : > { %v8085_v43 = vmul.bf16 1056980736, %v18593_v25  ;;  %v18609_v0 = vadd.bf16 %v20992_v17, %v7574_v6  ;;  %v18680_v29 = vadd.bf16 %v20999_v36, %v7494_v42  ;;  %v18688_v30 = vadd.bf16 %v20996_v40, %v7509_v3  ;;  %v21002_v6 = vld [vmem:[#allocation15_spill] sm:$0xff]  ;;  %v21003_v21 = vld [vmem:[#allocation37_spill] sm:$0xff] }
 0x5ab   : > { %v8087_v22 = vmul.bf16 1056980736, %v18606_v4  ;;  %v18626_v14 = vadd.bf16 %v20992_v17, %v7576_v48  ;;  %v18659_v59 = vpop.eup %10138  ;;  %v7493_v17 = vpack.c.bf16 %v21001_v63, %v21000_v53  ;;  %v7495_v48 = vpack.c.bf16 %v21003_v21, %v21002_v6  ;;  %v21004_v3 = vld [vmem:[#allocation25_spill] sm:$0xff] }
 0x5ac   : > { %10148 = vtanh.bf16 %v8085_v43  ;;  %v8086_v62 = vmul.bf16 1056980736, %v18609_v0  ;;  %v18669_v13 = vpop.eup %10140  ;;  %v18696_v1 = vadd.bf16 %v20996_v40, %v7511_v27  ;;  %v19551_v38 = vmul.bf16 1056980736, %v18664_v61  ;;  %v21005_v40 = vld [vmem:[#allocation17_spill] sm:$0xff] }
 0x5ad   : > { %10150 = vtanh.bf16 %v8072_v20  ;;  %v8088_v11 = vmul.bf16 1056980736, %v18626_v14  ;;  %v18704_v5 = vadd.bf16 %v20999_v36, %v7496_v39  ;;  %v21006_v27 = vpack.c.bf16 %v21004_v3, %v21005_v40 }
 0x5ae   : > { %10152 = vtanh.bf16 %v8087_v22  ;;  %v18701_v52 = vpop.eup %10142  ;;  %v19557_v54 = vmul.bf16 1056980736, %v18680_v29  ;;  %v18721_v39 = vadd.bf16 %v20999_v36, %v7493_v17  ;;  %v19560_v53 = vmul.bf16 1056980736, %v18688_v30 }
 0x5af   : > { %10154 = vtanh.bf16 %v8086_v62  ;;  %v18715_v55 = vadd.bf16 %v20988_v60, %v21006_v27  ;;  %v18727_v6 = vadd.bf16 %v20999_v36, %v7495_v48  ;;  %v8023_v21 = vmul.bf16 1056980736, %v18696_v1  ;;  %v21007_v27 = vld [vmem:[#allocation34_spill] sm:$0xff]  ;;  %v21011_v48 = vld [vmem:[#allocation21_spill] sm:$0xff] }
 0x5b0   : > { %10156 = vtanh.bf16 %v8088_v11  ;;  %v19563_v40 = vmul.bf16 1056980736, %v18704_v5  ;;  %v21009_v33 = vpack.c.bf16 %v21007_v27, %v21008_v46  ;;  %v21010_v36 = vld [vmem:[#allocation6_spill] sm:$0xff]  ;;  %v21017_v27 = vld [vmem:[#allocation32_spill] sm:$0xff] }
 0x5b1   : > { %10158 = vtanh.bf16 %v19559_v12 }
 0x5b2   : > { %10160 = vtanh.bf16 %v19556_v23  ;;  %v18709_v42 = vpop.eup %10144 }
 0x5b3   : > { %10162 = vtanh.bf16 %v19552_v7 }
 0x5b4   : > { %10164 = vtanh.bf16 %v19555_v16  ;;  %v10147_v63 = vpop.eup %10146 }
 0x5b5   : > { %10166 = vtanh.bf16 %v19554_v57  ;;  %v21014_v57 = vld [vmem:[#allocation20_spill] sm:$0xff] }
 0x5b6   : > { %10168 = vtanh.bf16 %v19550_v31 }
 0x5b7   : > { %10170 = vtanh.bf16 %v19548_v47  ;;  %v18739_v47 = vadd.bf16 %v20712_v41, %v21009_v33  ;;  %v21016_v33 = vld [vmem:[#allocation10_spill] sm:$0xff] }
 0x5b8   : > { %10172 = vtanh.bf16 %v19549_v51  ;;  %v21012_v51 = vpack.c.bf16 %v21010_v36, %v21011_v48  ;;  %v21018_v23 = vpack.c.bf16 %v21016_v33, %v21017_v27  ;;  %v8326_v27 = vadd.bf16 1065369472, %v10147_v63 }
 0x5b9   : > { %10174 = vtanh.bf16 %v19551_v38  ;;  %v19562_v38 = vmul.bf16 1056980736, %v18715_v55  ;;  %v7973_v4 = vmul.bf16 1056980736, %v18739_v47 }
 0x5ba   : > { %v10149_v3 = vpop.eup %10148  ;;  %10176 = vtanh.bf16 %v19553_v18  ;;  %v18745_v31 = vadd.bf16 %v20712_v41, %v21012_v51  ;;  %v21013_v18 = vld [vmem:[#allocation8_spill] sm:$0xff]  ;;  %v18760_v36 = vadd.bf16 %v20988_v60, %v21018_v23  ;;  %v19564_v51 = vmul.bf16 1056980736, %v18721_v39 }
 0x5bb   : > { %v10151_v17 = vpop.eup %10150  ;;  %10178 = vtanh.bf16 %v19557_v54  ;;  %v21015_v16 = vpack.c.bf16 %v21013_v18, %v21014_v57  ;;  %v21019_v54 = vld [vmem:[#allocation22_spill] sm:$0xff]  ;;  %v8341_v18 = vadd.bf16 1065369472, %v10149_v3  ;;  %v8454_v0 = vmul.bf16 %v8326_v27, %v8070_v35 }
 0x5bc   : > { %v10153_v7 = vpop.eup %10152  ;;  %10180 = vtanh.bf16 %v19560_v53  ;;  %v21021_v12 = vpack.c.bf16 %v21019_v54, %v21020_v44  ;;  %v7976_v50 = vmul.bf16 1056980736, %v18745_v31  ;;  %v8328_v44 = vadd.bf16 1065369472, %v10151_v17 }
 0x5bd   : > { %v18754_v46 = vadd.bf16 %v20988_v60, %v21015_v16  ;;  %v10155_v48 = vpop.eup %10154  ;;  %v8007_v16 = vmul.bf16 1056980736, %v18727_v6  ;;  %10182 = vtanh.bf16 %v8023_v21  ;;  %v8343_v23 = vadd.bf16 1065369472, %v10153_v7 }
 0x5be   : > { %v18769_v57 = vadd.bf16 %v20712_v41, %v21021_v12  ;;  %v10157_v60 = vpop.eup %10156  ;;  %10184 = vtanh.bf16 %v19563_v40  ;;  %v8342_v33 = vadd.bf16 1065369472, %v10155_v48  ;;  %v7991_v3 = vmul.bf16 1056980736, %v18760_v36 }
 0x5bf   : > { %v10159_v53 = vpop.eup %10158  ;;  %10186 = vtanh.bf16 %v19562_v38  ;;  %v8344_v41 = vadd.bf16 1065369472, %v10157_v60  ;;  %v7989_v54 = vmul.bf16 1056980736, %v18754_v46  ;;  %v8325_v48 = vadd.bf16 1065369472, %v18709_v42 }
 0x5c0   : > { %v10161_v12 = vpop.eup %10160  ;;  %10188 = vtanh.bf16 %v19564_v51  ;;  %v8470_v7 = vmul.bf16 %v8342_v33, %v8086_v62  ;;  %v8469_v17 = vmul.bf16 %v8341_v18, %v8085_v43  ;;  %v8327_v40 = vadd.bf16 1065369472, %v10159_v53 }
 0x5c1   : > { %v10163_v63 = vpop.eup %10162  ;;  %10190 = vtanh.bf16 %v8007_v16  ;;  %v8472_v60 = vmul.bf16 %v8344_v41, %v8088_v11  ;;  %v8471_v51 = vmul.bf16 %v8343_v23, %v8087_v22  ;;  %v8310_v62 = vadd.bf16 1065369472, %v18701_v52 }
 0x5c2   : > { %v10165_v38 = vpop.eup %10164  ;;  %8726 = vmatprep.subr.bf16.mxu0 %v8470_v7  ;;  %10192 = vtanh.bf16 %v7976_v50  ;;  %v8456_v25 = vmul.bf16 %v8328_v44, %v8072_v20  ;;  %v8312_v43 = vadd.bf16 1065369472, %v10161_v12  ;;  %v7975_v35 = vmul.bf16 1056980736, %v18769_v57 }
 0x5c3   : > { %v10167_v33 = vpop.eup %10166  ;;  %8767 = vmatprep.subr.bf16.mxu1 %v8472_v60  ;;  %8727 = vmatpush1.bf16.msra.mxu0 %v8469_v17  ;;  %10194 = vtanh.bf16 %v7989_v54  ;;  %v8309_v22 = vadd.bf16 1065369472, %v10165_v38  ;;  %v21022_v11 = vmul.bf16 1056980736, %v18552_v34  ;;  %v21023_v42 = vmul.bf16 1056980736, %v18601_v49 }
 0x5c4   : > { %v10169_v14 = vpop.eup %10168  ;;  %8768 = vmatpush1.bf16.msra.mxu1 %v8471_v51  ;;  %8728 = vmatprep.subr.bf16.mxu0 %v8454_v0  ;;  %10196 = vtanh.bf16 %v7991_v3  ;;  %v8311_v52 = vadd.bf16 1065369472, %v10167_v33  ;;  %v21024_v18 = vmul.bf16 1056980736, %v18549_v28  ;;  %v8294_v23 = vadd.bf16 1065369472, %v10163_v63 }
 0x5c5   : > { %v10171_v37 = vpop.eup %10170  ;;  %v8453_v56 = vmul.bf16 %v8325_v48, %v21022_v11  ;;  %8769 = vmatprep.subr.bf16.mxu1 %v8456_v25  ;;  %v8455_v53 = vmul.bf16 %v8327_v40, %v21023_v42  ;;  %v21025_v41 = vmul.bf16 1056980736, %v18596_v45  ;;  %v8296_v12 = vadd.bf16 1065369472, %v10169_v14 }
 0x5c6   : > { %v10173_v20 = vpop.eup %10172  ;;  %v8438_v51 = vmul.bf16 %v8310_v62, %v21024_v18  ;;  %10198 = vtanh.bf16 %v7973_v4  ;;  %v21026_v28 = vmul.bf16 1056980736, %v18617_v32  ;;  %v21027_v45 = vmul.bf16 1056980736, %v18631_v24 }
 0x5c7   : > { %v10175_v27 = vpop.eup %10174  ;;  %8729 = vmatpush1.bf16.msra.mxu0 %v8453_v56  ;;  %v8440_v44 = vmul.bf16 %v8312_v43, %v21025_v41  ;;  %10200 = vtanh.bf16 %v7975_v35  ;;  %v8293_v49 = vadd.bf16 1065369472, %v10173_v20  ;;  %v21028_v17 = vmul.bf16 1056980736, %v18614_v9 }
 0x5c8   : > { %v10177_v38 = vpop.eup %10176  ;;  %8770 = vmatpush1.bf16.msra.mxu1 %v8455_v53  ;;  %8730 = vmatprep.subr.bf16.mxu0 %v8438_v51  ;;  %v8437_v40 = vmul.bf16 %v8309_v22, %v21026_v28  ;;  %v8295_v63 = vadd.bf16 1065369472, %v10175_v27  ;;  %v8439_v48 = vmul.bf16 %v8311_v52, %v21027_v45  ;;  %v8278_v0 = vadd.bf16 1065369472, %v10171_v37 }
 0x5c9   : > { %v10179_v34 = vpop.eup %10178  ;;  %8771 = vmatprep.subr.bf16.mxu1 %v8440_v44  ;;  %v8422_v60 = vmul.bf16 %v8294_v23, %v21028_v17  ;;  %v21029_v33 = vmul.bf16 1056980736, %v18637_v19  ;;  %v8280_v43 = vadd.bf16 1065369472, %v10177_v38  ;;  %v21030_v11 = vmul.bf16 1056980736, %v18654_v15 }
 0x5ca   : > { %v10181_v7 = vpop.eup %10180  ;;  %v21031_v9 = vmul.bf16 1056980736, %v18664_v61  ;;  %v21032_v52 = vmul.bf16 1056980736, %v18646_v2  ;;  %v8262_v19 = vadd.bf16 1065369472, %v10179_v34 }
 0x5cb   : > { %v10183_v62 = vpop.eup %10182  ;;  %8731 = vmatpush1.bf16.msra.mxu0 %v8437_v40  ;;  %v8424_v25 = vmul.bf16 %v8296_v12, %v21029_v33  ;;  %v8277_v22 = vadd.bf16 1065369472, %v10181_v7  ;;  %v8421_v56 = vmul.bf16 %v8293_v49, %v21030_v11  ;;  %v21033_v18 = vmul.bf16 1056980736, %v18674_v26 }
 0x5cc   : > { %v10185_v14 = vpop.eup %10184  ;;  %8772 = vmatpush1.bf16.msra.mxu1 %v8439_v48  ;;  %8732 = vmatprep.subr.bf16.mxu0 %v8422_v60  ;;  %v8279_v20 = vadd.bf16 1065369472, %v10183_v62  ;;  %v8423_v37 = vmul.bf16 %v8295_v63, %v21031_v9  ;;  %v8406_v42 = vmul.bf16 %v8278_v0, %v21032_v52  ;;  %v21034_v41 = vmul.bf16 1056980736, %v18688_v30 }
 0x5cd   : > { %v10187_v32 = vpop.eup %10186  ;;  %8773 = vmatprep.subr.bf16.mxu1 %v8424_v25  ;;  %v8408_v51 = vmul.bf16 %v8280_v43, %v21033_v18  ;;  %v8264_v23 = vadd.bf16 1065369472, %v10185_v14  ;;  %v21035_v38 = vmul.bf16 1056980736, %v18680_v29  ;;  %v8246_v26 = vadd.bf16 1065369472, %v18669_v13 }
 0x5ce   : > { %v10189_v24 = vpop.eup %10188  ;;  %v8405_v44 = vmul.bf16 %v8277_v22, %v21034_v41  ;;  %v8407_v2 = vmul.bf16 %v8279_v20, %v8023_v21  ;;  %v21036_v28 = vmul.bf16 1056980736, %v18704_v5  ;;  %v8248_v7 = vadd.bf16 1065369472, %v10187_v32 }
 0x5cf   : > { %v10191_v53 = vpop.eup %10190  ;;  %8733 = vmatpush1.bf16.msra.mxu0 %v8421_v56  ;;  %v8261_v27 = vadd.bf16 1065369472, %v10189_v24  ;;  %v8390_v34 = vmul.bf16 %v8262_v19, %v21035_v38  ;;  %v21037_v63 = vmul.bf16 1056980736, %v18721_v39  ;;  %v21038_v13 = vmul.bf16 1056980736, %v18540_v8 }
 0x5d0   : > { %8774 = vmatpush1.bf16.msra.mxu1 %v8423_v37  ;;  %8734 = vmatprep.subr.bf16.mxu0 %v8406_v42  ;;  %v10193_v15 = vpop.eup %10192  ;;  %v8263_v12 = vadd.bf16 1065369472, %v10191_v53  ;;  %v8392_v40 = vmul.bf16 %v8264_v23, %v21036_v28  ;;  %v8230_v17 = vadd.bf16 1065369472, %v18659_v59  ;;  %v21039_v60 = vmul.bf16 1056980736, %v18715_v55 }
 0x5d1   : > { %8775 = vmatprep.subr.bf16.mxu1 %v8408_v51  ;;  %v10195_v61 = vpop.eup %10194  ;;  %v8389_v45 = vmul.bf16 %v8261_v27, %v21037_v63  ;;  %v8374_v48 = vmul.bf16 %v8246_v26, %v21038_v13  ;;  %v8232_v62 = vadd.bf16 1065369472, %v10193_v15  ;;  %v21040_v59 = vmul.bf16 1056980736, %v18530_v58  ;;  %v8478_v58 = vpop.permute.xlu0 %8477 }
 0x5d2   : > { %v10197_v49 = vpop.eup %10196  ;;  %v8245_v30 = vadd.bf16 1065369472, %v10195_v61  ;;  %v8391_v29 = vmul.bf16 %v8263_v12, %v8007_v16  ;;  %v8376_v0 = vmul.bf16 %v8248_v7, %v21039_v60 }
 0x5d3   : > { %8735 = vmatpush1.bf16.msra.mxu0 %v8405_v44  ;;  %v8247_v21 = vadd.bf16 1065369472, %v10197_v49  ;;  %v8358_v16 = vmul.bf16 %v8230_v17, %v21040_v59  ;;  %v8360_v55 = vmul.bf16 %v8232_v62, %v7976_v50 }
 0x5d4   : > { %8776 = vmatpush1.bf16.msra.mxu1 %v8407_v2  ;;  %8736 = vmatprep.subr.bf16.mxu0 %v8390_v34  ;;  %v10199_v1 = vpop.eup %10198  ;;  %v8373_v33 = vmul.bf16 %v8245_v30, %v7989_v54 }
 0x5d5   : > { %8777 = vmatprep.subr.bf16.mxu1 %v8392_v40  ;;  %v10201_v5 = vpop.eup %10200  ;;  %v8229_v39 = vadd.bf16 1065369472, %v10199_v1  ;;  %v8375_v8 = vmul.bf16 %v8247_v21, %v7991_v3 }
 0x5d6   : > { %v8231_v6 = vadd.bf16 1065369472, %v10201_v5 }
 0x5d7   : > { %8737 = vmatpush1.bf16.msra.mxu0 %v8389_v45  ;;  %v8357_v25 = vmul.bf16 %v8229_v39, %v7973_v4 }
 0x5d8   : > { %8778 = vmatpush1.bf16.msra.mxu1 %v8391_v29  ;;  %8738 = vmatprep.subr.bf16.mxu0 %v8374_v48  ;;  %v8359_v46 = vmul.bf16 %v8231_v6, %v7975_v35 }
 0x5d9   : > { %8779 = vmatprep.subr.bf16.mxu1 %v8376_v0 }
 0x5db   : > { %8739 = vmatpush1.bf16.msra.mxu0 %v8373_v33 }
 0x5dc   : > { %8780 = vmatpush1.bf16.msra.mxu1 %v8375_v8  ;;  %8740 = vmatprep.subr.bf16.mxu0 %v8358_v16 }
 0x5dd   : > { %8781 = vmatprep.subr.bf16.mxu1 %v8360_v55 }
 0x5de   : > { %v8514_v36 = vpop.f32.mrf.mxu0 }
 0x5df   : > { %8741 = vmatpush1.bf16.msra.mxu0 %v8357_v25  ;;  %v8555_v54 = vpop.f32.mrf.mxu1  ;;  %v8515_v31 = vadd.f32 %v8514_v36, %v8478_v58 }
 0x5e0   : > { %8782 = vmatpush1.bf16.msra.mxu1 %v8359_v46  ;;  %v8516_v50 = vpop.f32.mrf.mxu0  ;;  %v8556_v4 = vadd.f32 %v8555_v54, %v8478_v58 }
 0x5e1   : > { %v8517_v47 = vadd.f32 %v8516_v50, %v8478_v58  ;;  %v8557_v3 = vpop.f32.mrf.mxu1 }
 0x5e2   : > { %8759 = vmatmul.mubr.bf16.vlgmr.msra.gmra.mxu0 %v18562_v10  ;;  %v8558_v43 = vadd.f32 %v8557_v3, %v8478_v58  ;;  %v8518_v57 = vpop.f32.mrf.mxu0 }
 0x5e3   : > { %8800 = vmatmul.mubr.bf16.vlgmr.msra.gmra.mxu1 %v18562_v10  ;;  %v8824_v35 = vcombine.low %v8515_v31, %v8517_v47  ;;  %v8559_v14 = vpop.f32.mrf.mxu1 }
 0x5e4   : > { %v8825_v32 = vcombine.low %v8556_v4, %v8558_v43  ;;  %v8519_v22 = vpop.f32.mrf.mxu0 }
 0x5e5   : > { %8840 = vst [vmem:[%s18870_s24] sm:$0x77] %v8824_v35  ;;  %v8560_v11 = vpop.f32.mrf.mxu1 }
 0x5e6   : > { %8841 = vst [vmem:[%s18870_s24 + $0x8] sm:$0x77] %v8825_v32 }
 0x623   : > { %v8596_v10 = vpop.f32.mrf.mxu0 }
 0x624   : > { %v8637_v56 = vpop.f32.mrf.mxu1  ;;  %v8597_v9 = vadd.f32 %v8596_v10, %v8478_v58 }
 0x625   : > { %v8598_v24 = vpop.f32.mrf.mxu0  ;;  %v8638_v37 = vadd.f32 %v8637_v56, %v8478_v58 }
 0x626   : > { %v8639_v20 = vpop.f32.mrf.mxu1  ;;  %v8599_v52 = vadd.f32 %v8598_v24, %v8478_v58 }
 0x627   : > { %v8640_v42 = vadd.f32 %v8639_v20, %v8478_v58  ;;  %v8600_v19 = vpop.f32.mrf.mxu0 }
 0x628   : > { %v8641_v53 = vpop.f32.mrf.mxu1  ;;  %v8826_v18 = vcombine.low %v8597_v9, %v8599_v52 }
 0x629   : > { %v8827_v51 = vcombine.low %v8638_v37, %v8640_v42  ;;  %v8601_v23 = vpop.f32.mrf.mxu0 }
 0x62a   : > { %v8642_v15 = vpop.f32.mrf.mxu1  ;;  %8842 = vst [vmem:[%s18870_s24 + $0x10] sm:$0x77] %v8826_v18 }
 0x62b   : > { %8843 = vst [vmem:[%s18870_s24 + $0x18] sm:$0x77] %v8827_v51 }
 0x664   : > { %v8678_v27 = vpop.f32.mrf.mxu0 }
 0x665   : > { %v8719_v41 = vpop.f32.mrf.mxu1  ;;  %v8679_v12 = vadd.f32 %v8678_v27, %v8478_v58 }
 0x666   : > { %v8680_v44 = vpop.f32.mrf.mxu0  ;;  %v8720_v2 = vadd.f32 %v8719_v41, %v8478_v58 }
 0x667   : > { %v8721_v61 = vpop.f32.mrf.mxu1  ;;  %v8681_v38 = vadd.f32 %v8680_v44, %v8478_v58 }
 0x668   : > { %v8722_v34 = vadd.f32 %v8721_v61, %v8478_v58  ;;  %v8682_v26 = vpop.f32.mrf.mxu0 }
 0x669   : > { %v8723_v49 = vpop.f32.mrf.mxu1  ;;  %v8828_v28 = vcombine.low %v8679_v12, %v8681_v38 }
 0x66a   : > { %v8829_v40 = vcombine.low %v8720_v2, %v8722_v34  ;;  %v8683_v7 = vpop.f32.mrf.mxu0 }
 0x66b   : > { %v8724_v30 = vpop.f32.mrf.mxu1  ;;  %8844 = vst [vmem:[%s18870_s24 + $0x20] sm:$0x77] %v8828_v28 }
 0x66c   : > { %8845 = vst [vmem:[%s18870_s24 + $0x28] sm:$0x77] %v8829_v40 }
 0x6a2   : > { %v8760_v63 = vpop.f32.mrf.mxu0 }
 0x6a3   : > { %v8801_v45 = vpop.f32.mrf.mxu1  ;;  %v8761_v21 = vadd.f32 %v8760_v63, %v8478_v58 }
 0x6a4   : > { %v8762_v1 = vpop.f32.mrf.mxu0  ;;  %v8802_v48 = vadd.f32 %v8801_v45, %v8478_v58 }
 0x6a5   : > { %v8763_v29 = vadd.f32 %v8762_v1, %v8478_v58  ;;  %v8803_v13 = vpop.f32.mrf.mxu1 }
 0x6a6   : > { %v8804_v17 = vadd.f32 %v8803_v13, %v8478_v58  ;;  %v8764_v5 = vpop.f32.mrf.mxu0 }
 0x6a7   : > { %v8830_v60 = vcombine.low %v8761_v21, %v8763_v29  ;;  %v8805_v0 = vpop.f32.mrf.mxu1 }
 0x6a8   : > { %v8831_v62 = vcombine.low %v8802_v48, %v8804_v17  ;;  %v8765_v39 = vpop.f32.mrf.mxu0 }
 0x6a9   : > { %8846 = vst [vmem:[%s18870_s24 + $0x30] sm:$0x77] %v8830_v60  ;;  %v8806_v33 = vpop.f32.mrf.mxu1 }
 0x6aa   : > { %8847 = vst [vmem:[%s18870_s24 + $0x38] sm:$0x77] %v8831_v62 }
 0x6ab   : > { %10240 = shalt.err (!%p10237_p3)
}
 0x6ac   : > { %s10241_s24 = scalar_lea.hbm %s18883_s29, 1024  ;;  %s10245_s30 = scalar_lea.hbm %s18939_s11, 2048 }
 0x6ad   : > { %p10242_p4 = scmp.ne.s32.totalorder %s18883_s29, %s10241_s24  ;;  %p10246_p9 = scmp.lt.s32.totalorder %s18883_s29, %s18939_s11 }
 0x6ae   : > { %p10247_p10 = scmp.lt.s32.totalorder %s10245_s30, %s10241_s24 }
 0x6af   : > { %p10243_p7 = pnand %p10242_p4, %p10390_p5 }
 0x6b0   : > { %p10248_p11 = por %p10247_p10, %p10246_p9 }
 0x6b1   : > { %p10244_p8 = pneg %p10243_p7 }
 0x6b3   : > { %p10249_p12 = pnand %p10248_p11, %p10244_p8 }
 0x6b5   : > { %10252 = shalt.err (!%p10249_p12)
}
 0x6b6   : > { %9087 = dma.vmem_to_hbm [thread:$0]  (%p10390_p5), %s18885_s26, 1024, %s18883_s29, %s8849_s21  }
 0x6b7 PF: > { %p9093_p13 = scmp.ge.s32.totalorder %s10287_s20, 2  ;;  %s8875_s13 = sand.u32 1, %s10275_s17  }
 0x6b8   : > { %s8876_s15 = scalar_lea.sflag [#allocation3], %s8875_s13 }
 0x6b9   : > { %p9090_p0 = pnand %p9093_p13, %p10394_p6 }
 0x6bb   : > { %p9091_p1 = pneg %p9090_p0 }
 0x6bd   : > { %10270 = dma.done.wait (%p9091_p1), %s8876_s15, 1024  }
 0x6be   : > { %10272 = vsyncadd (%p9091_p1), %s8876_s15, 4294966272  ;;  %s21041_s22 = sld [smem:[#allocation5_spill]]  ;;  %p21_p2 = scmp.ge.s32.totalorder %s10377_s23, 4  }
 0x6bf   : > { %s21042_s17 = smov %s10279_s18  ;;  %s21043_s18 = smov %s10283_s19 }
 0x6c0   : > { %s21045_s20 = smov %s10377_s23  ;;  %23 = sbr.rel (!%p21_p2) target bundleno = 3 (0x3), region = 99 }
 0x6c4   : > { %s21044_s19 = smov %s21041_s22 }
 0x6c5   :  { %8881 = vsyncpa [#allocation3], 1 }
 0x6c6   :  { %8883 = vsyncpa [#allocation3 + $0x1], 1 }

</bundles_post_ra>
